<compile_context>
chip_gen: v6e
topology: v6e:2x2x1
jax: 0.10.0
libtpu: 0.0.40
codegen_flags: <defaults>
</compile_context>

<pallas_src>
from math import sqrt

import jax
import jax.numpy as jnp
from jax.experimental import pallas as pl
from jax.experimental.pallas import tpu as pltpu

# ------------------------------ configuration -------------------------------
DIM = 32                                   # model dim
HEADS = 4
DIM_HEAD = DIM // HEADS                    # timm Attention: head_dim = dim // heads
DEPTH = 2
PATCH = 8
FRAMES = 4
IMG_H, IMG_W = 16, 16
CHANNELS = 3
FF_MULT = 4
BATCH = 2

SCALE = DIM_HEAD ** -0.5
LN_EPS = 1e-5
PATCH_DIM = CHANNELS * PATCH * PATCH                    # 192
N_PATCH = (IMG_H // PATCH) * (IMG_W // PATCH)           # 4 spatial tokens / frame
T = FRAMES * N_PATCH                                    # 16 tokens / batch element
BT = BATCH * T                                          # 32 rows processed at once
HBT = HEADS * BT                                        # 128 head-stacked rows
HD = HEADS * DIM                                        # 128 stacked input columns
FF_INNER = DIM * FF_MULT                                # 128
NEG_INF = -1e30

# rows inside the (VEC_ROWS, DIM) "small vectors" slab
ROW_BPE = 0                                # patch-embedding bias
ROW_ATTN = 1                               # + 3*blk : [ln_g, ln_b, b_out]
ROW_FF = ROW_ATTN + 3 * (2 * DEPTH)        # + 2*l   : [ln_g, ln_b]
VEC_ROWS = ROW_FF + 2 * DEPTH              # 17


# -------------------- in-kernel helpers (traced into the kernel) -------------
def _ln(x, g, b):
    """LayerNorm over last dim, eps=1e-5, affine (matches nn.LayerNorm)."""
    mu = jnp.mean(x, axis=-1, keepdims=True)
    xc = x - mu
    var = jnp.mean(xc * xc, axis=-1, keepdims=True)
    return xc * jax.lax.rsqrt(var + LN_EPS) * g + b


def _attn_block(x, rep, bd01, amask, w_q, w_k, b_q, b_k, w_vp, ln_g, ln_b, b_out):
    """PreNorm + MHSA with batch AND heads stacked along sublanes.

    x: (BT, DIM).  amask already encodes (same head) & (same batch) &
    (same time/space group); SCALE is folded into w_q / b_q on the host.
    """
    xn = _ln(x, ln_g, ln_b)                                            # (BT, D)
    # Head-stacked block-diagonal input: xbd[h*BT + r, h*D + c] = xn[r, c].
    # Built with a matmul against the host replication matrix, a sublane
    # concat and one elementwise multiply (all layout-friendly ops).
    xw = jnp.dot(xn, rep, preferred_element_type=jnp.float32)          # (BT, H*D)
    xbd = jnp.concatenate([xw] * HEADS, axis=0) * bd01                 # (H*BT, H*D)

    q = jnp.dot(xbd, w_q, preferred_element_type=jnp.float32) + b_q    # (H*BT, Dh)
    k = jnp.dot(xbd, w_k, preferred_element_type=jnp.float32) + b_k    # (H*BT, Dh)
    vp = jnp.dot(xbd, w_vp, preferred_element_type=jnp.float32)        # (H*BT, D)

    # q @ k^T for all heads / batch elements at once; mask kills cross blocks.
    s = jax.lax.dot_general(q, k, (((1,), (1,)), ((), ())),
                            preferred_element_type=jnp.float32)        # (H*BT, H*BT)
    s = s + amask
    s = s - jnp.max(s, axis=-1, keepdims=True)                         # stable softmax
    p = jnp.exp(s)
    p = p * pl.reciprocal(jnp.sum(p, axis=-1, keepdims=True), approx=True)

    o = jnp.dot(p, vp, preferred_element_type=jnp.float32)             # (H*BT, D)
    # head merge: concat_h(o_h) @ Wp == sum_h o_h @ Wp_h, and Wp_h is already
    # fused into w_vp, so summing the sublane row blocks finishes the merge.
    merged = o[0:BT]
    for h in range(1, HEADS):
        merged = merged + o[h * BT:(h + 1) * BT]
    return merged + b_out                      # b_out = sum_h bv_h @ Wp_h + b_proj


def _ff_block(x, ln_g, ln_b, w1, b1, w2, b2):
    """PreNorm + Linear(D, 8D) -> GEGLU -> Linear(4D, D)."""
    xn = _ln(x, ln_g, ln_b)
    h = jnp.dot(xn, w1, preferred_element_type=jnp.float32) + b1       # (BT, 2*FF_INNER)
    a = h[:, :FF_INNER]                        # lane slices at multiples of 128
    g = h[:, FF_INNER:]
    gelu = 0.5 * g * (1.0 + jax.lax.erf(g * (1.0 / sqrt(2.0))))        # exact GELU
    return jnp.dot(a * gelu, w2, preferred_element_type=jnp.float32) + b2


def _encoder_kernel(tok_ref, wpe_ref, masks_ref, rep_ref, bd_ref,
                    qk_ref, vp_ref, ff1_ref, ff2_ref, vec_ref, o_ref):
    """Whole encoder, whole batch, single grid step."""
    vec = vec_ref[...]                                                 # (17, 32)
    rep = rep_ref[...]                                                 # (D, H*D)
    bd01 = bd_ref[...]                                                 # (H*BT, H*D)

    # patch embedding for all B*T tokens at once
    b_pe = vec[ROW_BPE:ROW_BPE + 1, :]
    x = jnp.dot(tok_ref[...], wpe_ref[...],
                preferred_element_type=jnp.float32) + b_pe             # (BT, D)

    # TODO(synk): rotary embeddings are constructed in the reference __init__
    # but never applied in its forward(); nothing to apply here.

    for l in range(DEPTH):                                             # static unroll
        for branch in range(2):                       # 0 = time attn, 1 = spatial attn
            blk = 2 * l + branch
            base = ROW_ATTN + 3 * blk
            x = _attn_block(
                x, rep, bd01, masks_ref[branch],
                qk_ref[4 * blk + 0], qk_ref[4 * blk + 1],              # Wq_stk, Wk_stk
                qk_ref[4 * blk + 2], qk_ref[4 * blk + 3],              # bq_stk, bk_stk
                vp_ref[blk],                                           # fused Wv@Wp
                vec[base:base + 1, :], vec[base + 1:base + 2, :],
                vec[base + 2:base + 3, :]) + x
        fb = ROW_FF + 2 * l
        f1 = ff1_ref[l]                                                # (33, 256)
        f2 = ff2_ref[l]                                                # (129, 32)
        x = _ff_block(x, vec[fb:fb + 1, :], vec[fb + 1:fb + 2, :],
                      f1[:DIM, :], f1[DIM:DIM + 1, :],
                      f2[:FF_INNER, :], f2[FF_INNER:FF_INNER + 1, :]) + x
    o_ref[...] = x


# --------------------------- host-side parameter packing ---------------------
def _pack_params(params):
    """Pack all weights into 5 slabs with the stacked-head layout."""
    # The qk slab mixes (H*DIM, Dh) weights and (H*BT, Dh) tiled biases; this
    # packing relies on H*DIM == H*BT (DIM == BATCH*T) for this configuration.
    assert HD == HBT

    layers = params["layers"]
    branches = []
    for layer in layers:
        branches.append(layer["time"])
        branches.append(layer["space"])

    qk_items, vp_items, vec_rows = [], [], []
    vec_rows.append(params["b_pe"].reshape(1, DIM))

    for a in branches:
        w_qkv, b_qkv = a["w_qkv"], a["b_qkv"]
        wq = w_qkv[:, :DIM] * SCALE                      # fold attention scale into Q
        wk = w_qkv[:, DIM:2 * DIM]
        wv = w_qkv[:, 2 * DIM:]
        bq = b_qkv[:DIM] * SCALE
        bk = b_qkv[DIM:2 * DIM]
        bv = b_qkv[2 * DIM:]
        wp, bp = a["w_proj"], a["b_proj"]

        # head-stacked weights: row block h multiplies head h's slice of xbd
        wq_stk = jnp.concatenate(
            [wq[:, h * DIM_HEAD:(h + 1) * DIM_HEAD] for h in range(HEADS)], axis=0)
        wk_stk = jnp.concatenate(
            [wk[:, h * DIM_HEAD:(h + 1) * DIM_HEAD] for h in range(HEADS)], axis=0)
        # biases tiled per row block (same bias for every token of a head)
        bq_stk = jnp.repeat(bq.reshape(HEADS, DIM_HEAD), BT, axis=0)   # (H*BT, Dh)
        bk_stk = jnp.repeat(bk.reshape(HEADS, DIM_HEAD), BT, axis=0)
        # fused value+output projection per head:  Wvp_h = Wv_h @ Wp_h
        wvp_stk = jnp.concatenate(
            [wv[:, h * DIM_HEAD:(h + 1) * DIM_HEAD]
             @ wp[h * DIM_HEAD:(h + 1) * DIM_HEAD, :] for h in range(HEADS)], axis=0)
        # softmax rows sum to 1 -> value bias + proj bias collapse to one vector
        b_out = (bv @ wp + bp).reshape(1, DIM)

        qk_items += [wq_stk, wk_stk, bq_stk, bk_stk]
        vp_items.append(wvp_stk)
        vec_rows += [a["ln_g"].reshape(1, DIM), a["ln_b"].reshape(1, DIM), b_out]

    ff1_items, ff2_items = [], []
    for layer in layers:
        ff = layer["ff"]
        ff1_items.append(jnp.concatenate([ff["w1"], ff["b1"].reshape(1, -1)], axis=0))
        ff2_items.append(jnp.concatenate([ff["w2"], ff["b2"].reshape(1, -1)], axis=0))
        vec_rows += [ff["ln_g"].reshape(1, DIM), ff["ln_b"].reshape(1, DIM)]

    return (jnp.stack(qk_items),                 # (16, 128, 8)
            jnp.stack(vp_items),                 # (4, 128, 32)
            jnp.stack(ff1_items),                # (DEPTH, 33, 256)
            jnp.stack(ff2_items),                # (DEPTH, 129, 32)
            jnp.concatenate(vec_rows, axis=0))   # (17, 32)


def _build_masks(n):
    """Combined additive masks: same head AND same batch AND same group."""
    r = jnp.arange(HBT)
    head = r // BT
    rem = r % BT
    batch = rem // T
    tok = rem % T
    frame = tok // n
    spatial = tok % n
    same = (head[:, None] == head[None, :]) & (batch[:, None] == batch[None, :])
    time_ok = same & (spatial[:, None] == spatial[None, :])   # attend across frames
    space_ok = same & (frame[:, None] == frame[None, :])      # attend within a frame
    mt = jnp.where(time_ok, 0.0, NEG_INF).astype(jnp.float32)
    ms = jnp.where(space_ok, 0.0, NEG_INF).astype(jnp.float32)
    return jnp.stack([mt, ms])                                 # (2, HBT, HBT)


def _full_spec(arr):
    """BlockSpec covering the whole array (single grid step)."""
    zeros = (0,) * arr.ndim
    return pl.BlockSpec(arr.shape, lambda i, _z=zeros: _z)


# ------------------------------- forward pass --------------------------------
def timesformer_forward(video, params):
    """video: (b, f, c, h, w) float32 -> (b, f*hp*wp, DIM)."""
    b, f, c, h, w = video.shape
    p = PATCH
    hp, wp = h // p, w // p
    n = hp * wp
    t = f * n
    assert b * t == BT and p * p * c == PATCH_DIM

    # rearrange 'b f c (h p1) (w p2) -> (b f h w) (p1 p2 c)'  (pure data movement)
    x = video.reshape(b, f, c, hp, p, wp, p)
    x = x.transpose(0, 1, 3, 5, 4, 6, 2)                       # b f hp wp p1 p2 c
    tokens = x.reshape(b * t, PATCH_DIM)                       # (BT, 192)

    masks = _build_masks(n)                                    # (2, 128, 128)
    # replication matrix: xn @ rep puts a copy of xn into every head column block
    rep = jnp.tile(jnp.eye(DIM, dtype=jnp.float32), (1, HEADS))           # (32, 128)
    # 0/1 block-diagonal selector turning the replicated slab into xbd
    bd01 = (jnp.arange(HBT)[:, None] // BT
            == jnp.arange(HD)[None, :] // DIM).astype(jnp.float32)        # (128, 128)

    qk, vp, ff1, ff2, vec = _pack_params(params)
    args = (tokens, params["w_pe"], masks, rep, bd01, qk, vp, ff1, ff2, vec)

    out = pl.pallas_call(
        _encoder_kernel,
        grid=(1,),                                   # whole batch in one grid step
        in_specs=[_full_spec(a) for a in args],
        out_specs=pl.BlockSpec((BT, DIM), lambda i: (0, 0)),
        out_shape=jax.ShapeDtypeStruct((BT, DIM), jnp.float32),
        compiler_params=pltpu.CompilerParams(dimension_semantics=("arbitrary",)),
    )(*args)
    return out.reshape(b, t, DIM)


# ----------------------------- parameter init --------------------------------
def _attn_params(key):
    k1, k2 = jax.random.split(key)
    return {
        "ln_g": jnp.ones((DIM,), jnp.float32),
        "ln_b": jnp.zeros((DIM,), jnp.float32),
        "w_qkv": 0.02 * jax.random.normal(k1, (DIM, 3 * DIM), jnp.float32),
        "b_qkv": jnp.zeros((3 * DIM,), jnp.float32),
        "w_proj": 0.02 * jax.random.normal(k2, (DIM, DIM), jnp.float32),
        "b_proj": jnp.zeros((DIM,), jnp.float32),
    }


def _ff_params(key):
    k1, k2 = jax.random.split(key)
    return {
        "ln_g": jnp.ones((DIM,), jnp.float32),
        "ln_b": jnp.zeros((DIM,), jnp.float32),
        "w1": 0.02 * jax.random.normal(k1, (DIM, DIM * FF_MULT * 2), jnp.float32),
        "b1": jnp.zeros((DIM * FF_MULT * 2,), jnp.float32),
        "w2": 0.02 * jax.random.normal(k2, (DIM * FF_MULT, DIM), jnp.float32),
        "b2": jnp.zeros((DIM,), jnp.float32),
    }


def init_params(key):
    keys = jax.random.split(key, 1 + 3 * DEPTH)
    params = {
        "w_pe": 0.02 * jax.random.normal(keys[0], (PATCH_DIM, DIM), jnp.float32),
        "b_pe": jnp.zeros((DIM,), jnp.float32),
        "layers": [],
    }
    for d in range(DEPTH):
        params["layers"].append({
            "time": _attn_params(keys[1 + 3 * d]),
            "space": _attn_params(keys[2 + 3 * d]),
            "ff": _ff_params(keys[3 + 3 * d]),
        })
    return params


# ------------------------------------ main ------------------------------------
if __name__ == "__main__":
    key = jax.random.PRNGKey(0)
    k_vid, k_par = jax.random.split(key)
    video = jax.random.normal(
        k_vid, (BATCH, FRAMES, CHANNELS, IMG_H, IMG_W), jnp.float32)
    params = init_params(k_par)

    out = timesformer_forward(video, params)
    out = jax.block_until_ready(out)

    expected = (BATCH, T, DIM)
    assert out.shape == expected, (out.shape, expected)
    assert bool(jnp.all(jnp.isfinite(out)))
    print("KERNEL_OK")
</pallas_src>

<mosaic_0001>
module attributes {stable_mosaic.version = 11 : i64} {
  func.func @_encoder_kernel(%arg0: i32, %arg1: memref<32x192xf32, #tpu.memory_space<vmem>>, %arg2: memref<192x32xf32, #tpu.memory_space<vmem>>, %arg3: memref<2x128x128xf32, #tpu.memory_space<vmem>>, %arg4: memref<32x128xf32, #tpu.memory_space<vmem>>, %arg5: memref<128x128xf32, #tpu.memory_space<vmem>>, %arg6: memref<16x128x8xf32, #tpu.memory_space<vmem>>, %arg7: memref<4x128x32xf32, #tpu.memory_space<vmem>>, %arg8: memref<2x33x256xf32, #tpu.memory_space<vmem>>, %arg9: memref<2x129x32xf32, #tpu.memory_space<vmem>>, %arg10: memref<17x32xf32, #tpu.memory_space<vmem>>, %arg11: memref<32x32xf32, #tpu.memory_space<vmem>>) attributes {dimension_semantics = [#tpu.dimension_semantics<arbitrary>], iteration_bounds = array<i64: 1>, scalar_prefetch = 0 : i64, scratch_operands = 0 : i64, tpu.core_type = #tpu.core_type<tc>, window_params = [{pipeline_mode = #tpu.pipeline_mode<synchronous>, transform_indices = @transform_0, window_bounds = array<i64: 32, 192>}, {pipeline_mode = #tpu.pipeline_mode<synchronous>, transform_indices = @transform_1, window_bounds = array<i64: 192, 32>}, {pipeline_mode = #tpu.pipeline_mode<synchronous>, transform_indices = @transform_2, window_bounds = array<i64: 2, 128, 128>}, {pipeline_mode = #tpu.pipeline_mode<synchronous>, transform_indices = @transform_3, window_bounds = array<i64: 32, 128>}, {pipeline_mode = #tpu.pipeline_mode<synchronous>, transform_indices = @transform_4, window_bounds = array<i64: 128, 128>}, {pipeline_mode = #tpu.pipeline_mode<synchronous>, transform_indices = @transform_5, window_bounds = array<i64: 16, 128, 8>}, {pipeline_mode = #tpu.pipeline_mode<synchronous>, transform_indices = @transform_6, window_bounds = array<i64: 4, 128, 32>}, {pipeline_mode = #tpu.pipeline_mode<synchronous>, transform_indices = @transform_7, window_bounds = array<i64: 2, 33, 256>}, {pipeline_mode = #tpu.pipeline_mode<synchronous>, transform_indices = @transform_8, window_bounds = array<i64: 2, 129, 32>}, {pipeline_mode = #tpu.pipeline_mode<synchronous>, transform_indices = @transform_9, window_bounds = array<i64: 17, 32>}, {pipeline_mode = #tpu.pipeline_mode<synchronous>, transform_indices = @transform_10, window_bounds = array<i64: 32, 32>}]} {
    %c0 = arith.constant 0 : index
    %c0_0 = arith.constant 0 : index
    %0 = vector.load %arg10[%c0, %c0_0] : memref<17x32xf32, #tpu.memory_space<vmem>>, vector<17x32xf32>
    %c0_1 = arith.constant 0 : index
    %c0_2 = arith.constant 0 : index
    %1 = vector.load %arg4[%c0_1, %c0_2] : memref<32x128xf32, #tpu.memory_space<vmem>>, vector<32x128xf32>
    %c0_3 = arith.constant 0 : index
    %c0_4 = arith.constant 0 : index
    %2 = vector.load %arg5[%c0_3, %c0_4] : memref<128x128xf32, #tpu.memory_space<vmem>>, vector<128x128xf32>
    %3 = vector.extract_strided_slice %0 {offsets = [0, 0], sizes = [1, 32], strides = [1, 1]} : vector<17x32xf32> to vector<1x32xf32>
    %c0_5 = arith.constant 0 : index
    %c0_6 = arith.constant 0 : index
    %4 = vector.load %arg1[%c0_5, %c0_6] : memref<32x192xf32, #tpu.memory_space<vmem>>, vector<32x192xf32>
    %c0_7 = arith.constant 0 : index
    %c0_8 = arith.constant 0 : index
    %5 = vector.load %arg2[%c0_7, %c0_8] : memref<192x32xf32, #tpu.memory_space<vmem>>, vector<192x32xf32>
    %cst = arith.constant dense<0.000000e+00> : vector<32x32xf32>
    %6 = tpu.matmul %4, %5, %cst {dimension_numbers = #tpu.dot_dimension_numbers<[1], [0], [0], [1], [0, 0, 1, 1], [], []>} : vector<32x192xf32>, vector<192x32xf32>, vector<32x32xf32> -> vector<32x32xf32>
    %7 = vector.broadcast %3 : vector<1x32xf32> to vector<32x32xf32>
    %8 = arith.addf %6, %7 : vector<32x32xf32>
    %c0_9 = arith.constant 0 : index
    %c0_10 = arith.constant 0 : index
    %c0_11 = arith.constant 0 : index
    %9 = vector.load %arg3[%c0_9, %c0_10, %c0_11] : memref<2x128x128xf32, #tpu.memory_space<vmem>>, vector<1x128x128xf32>
    %10 = vector.shape_cast %9 : vector<1x128x128xf32> to vector<128x128xf32>
    %c0_12 = arith.constant 0 : index
    %c0_13 = arith.constant 0 : index
    %c0_14 = arith.constant 0 : index
    %11 = vector.load %arg6[%c0_12, %c0_13, %c0_14] : memref<16x128x8xf32, #tpu.memory_space<vmem>>, vector<1x128x8xf32>
    %12 = vector.shape_cast %11 : vector<1x128x8xf32> to vector<128x8xf32>
    %c1 = arith.constant 1 : index
    %c0_15 = arith.constant 0 : index
    %c0_16 = arith.constant 0 : index
    %13 = vector.load %arg6[%c1, %c0_15, %c0_16] : memref<16x128x8xf32, #tpu.memory_space<vmem>>, vector<1x128x8xf32>
    %14 = vector.shape_cast %13 : vector<1x128x8xf32> to vector<128x8xf32>
    %c2 = arith.constant 2 : index
    %c0_17 = arith.constant 0 : index
    %c0_18 = arith.constant 0 : index
    %15 = vector.load %arg6[%c2, %c0_17, %c0_18] : memref<16x128x8xf32, #tpu.memory_space<vmem>>, vector<1x128x8xf32>
    %16 = vector.shape_cast %15 : vector<1x128x8xf32> to vector<128x8xf32>
    %c3 = arith.constant 3 : index
    %c0_19 = arith.constant 0 : index
    %c0_20 = arith.constant 0 : index
    %17 = vector.load %arg6[%c3, %c0_19, %c0_20] : memref<16x128x8xf32, #tpu.memory_space<vmem>>, vector<1x128x8xf32>
    %18 = vector.shape_cast %17 : vector<1x128x8xf32> to vector<128x8xf32>
    %c0_21 = arith.constant 0 : index
    %c0_22 = arith.constant 0 : index
    %c0_23 = arith.constant 0 : index
    %19 = vector.load %arg7[%c0_21, %c0_22, %c0_23] : memref<4x128x32xf32, #tpu.memory_space<vmem>>, vector<1x128x32xf32>
    %20 = vector.shape_cast %19 : vector<1x128x32xf32> to vector<128x32xf32>
    %21 = vector.extract_strided_slice %0 {offsets = [1, 0], sizes = [1, 32], strides = [1, 1]} : vector<17x32xf32> to vector<1x32xf32>
    %22 = vector.extract_strided_slice %0 {offsets = [2, 0], sizes = [1, 32], strides = [1, 1]} : vector<17x32xf32> to vector<1x32xf32>
    %23 = vector.extract_strided_slice %0 {offsets = [3, 0], sizes = [1, 32], strides = [1, 1]} : vector<17x32xf32> to vector<1x32xf32>
    %cst_24 = arith.constant dense<0.000000e+00> : vector<32xf32>
    %24 = vector.multi_reduction <add>, %8, %cst_24 [1] : vector<32x32xf32> to vector<32xf32>
    %25 = vector.shape_cast %24 : vector<32xf32> to vector<32x1xf32>
    %cst_25 = arith.constant 3.200000e+01 : f32
    %26 = vector.broadcast %cst_25 : f32 to vector<32x1xf32>
    %27 = arith.divf %25, %26 : vector<32x1xf32>
    %28 = vector.broadcast %27 : vector<32x1xf32> to vector<32x32xf32>
    %29 = arith.subf %8, %28 : vector<32x32xf32>
    %30 = arith.mulf %29, %29 : vector<32x32xf32>
    %cst_26 = arith.constant dense<0.000000e+00> : vector<32xf32>
    %31 = vector.multi_reduction <add>, %30, %cst_26 [1] : vector<32x32xf32> to vector<32xf32>
    %32 = vector.shape_cast %31 : vector<32xf32> to vector<32x1xf32>
    %cst_27 = arith.constant 3.200000e+01 : f32
    %33 = vector.broadcast %cst_27 : f32 to vector<32x1xf32>
    %34 = arith.divf %32, %33 : vector<32x1xf32>
    %cst_28 = arith.constant 9.99999974E-6 : f32
    %35 = vector.broadcast %cst_28 : f32 to vector<32x1xf32>
    %36 = arith.addf %34, %35 : vector<32x1xf32>
    %37 = math.rsqrt %36 : vector<32x1xf32>
    %38 = vector.broadcast %37 : vector<32x1xf32> to vector<32x32xf32>
    %39 = arith.mulf %29, %38 : vector<32x32xf32>
    %40 = vector.broadcast %21 : vector<1x32xf32> to vector<32x32xf32>
    %41 = arith.mulf %39, %40 : vector<32x32xf32>
    %42 = vector.broadcast %22 : vector<1x32xf32> to vector<32x32xf32>
    %43 = arith.addf %41, %42 : vector<32x32xf32>
    %cst_29 = arith.constant dense<0.000000e+00> : vector<32x128xf32>
    %44 = tpu.matmul %43, %1, %cst_29 {dimension_numbers = #tpu.dot_dimension_numbers<[1], [0], [0], [1], [0, 0, 1, 1], [], []>} : vector<32x32xf32>, vector<32x128xf32>, vector<32x128xf32> -> vector<32x128xf32>
    %45 = tpu.concatenate %44, %44, %44, %44 in 0 : vector<32x128xf32>, vector<32x128xf32>, vector<32x128xf32>, vector<32x128xf32> -> vector<128x128xf32>
    %46 = arith.mulf %45, %2 : vector<128x128xf32>
    %cst_30 = arith.constant dense<0.000000e+00> : vector<128x8xf32>
    %47 = tpu.matmul %46, %12, %cst_30 {dimension_numbers = #tpu.dot_dimension_numbers<[1], [0], [0], [1], [0, 0, 1, 1], [], []>} : vector<128x128xf32>, vector<128x8xf32>, vector<128x8xf32> -> vector<128x8xf32>
    %48 = arith.addf %47, %16 : vector<128x8xf32>
    %cst_31 = arith.constant dense<0.000000e+00> : vector<128x8xf32>
    %49 = tpu.matmul %46, %14, %cst_31 {dimension_numbers = #tpu.dot_dimension_numbers<[1], [0], [0], [1], [0, 0, 1, 1], [], []>} : vector<128x128xf32>, vector<128x8xf32>, vector<128x8xf32> -> vector<128x8xf32>
    %50 = arith.addf %49, %18 : vector<128x8xf32>
    %cst_32 = arith.constant dense<0.000000e+00> : vector<128x32xf32>
    %51 = tpu.matmul %46, %20, %cst_32 {dimension_numbers = #tpu.dot_dimension_numbers<[1], [0], [0], [1], [0, 0, 1, 1], [], []>} : vector<128x128xf32>, vector<128x32xf32>, vector<128x32xf32> -> vector<128x32xf32>
    %cst_33 = arith.constant dense<0.000000e+00> : vector<128x128xf32>
    %52 = tpu.matmul %48, %50, %cst_33 {dimension_numbers = #tpu.dot_dimension_numbers<[1], [1], [0], [0], [0, 0, 1, 0], [], []>} : vector<128x8xf32>, vector<128x8xf32>, vector<128x128xf32> -> vector<128x128xf32>
    %53 = arith.addf %52, %10 : vector<128x128xf32>
    %cst_34 = arith.constant dense<0xFF800000> : vector<128xf32>
    %54 = vector.multi_reduction <maximumf>, %53, %cst_34 [1] : vector<128x128xf32> to vector<128xf32>
    %55 = vector.shape_cast %54 : vector<128xf32> to vector<128x1xf32>
    %56 = vector.broadcast %55 : vector<128x1xf32> to vector<128x128xf32>
    %57 = arith.subf %53, %56 : vector<128x128xf32>
    %58 = math.exp %57 : vector<128x128xf32>
    %cst_35 = arith.constant dense<0.000000e+00> : vector<128xf32>
    %59 = vector.multi_reduction <add>, %58, %cst_35 [1] : vector<128x128xf32> to vector<128xf32>
    %60 = vector.shape_cast %59 : vector<128xf32> to vector<128x1xf32>
    %61 = tpu.reciprocal %60 {approx = true} : vector<128x1xf32> -> vector<128x1xf32>
    %62 = vector.broadcast %61 : vector<128x1xf32> to vector<128x128xf32>
    %63 = arith.mulf %58, %62 : vector<128x128xf32>
    %cst_36 = arith.constant dense<0.000000e+00> : vector<128x32xf32>
    %64 = tpu.matmul %63, %51, %cst_36 {dimension_numbers = #tpu.dot_dimension_numbers<[1], [0], [0], [1], [0, 0, 1, 1], [], []>} : vector<128x128xf32>, vector<128x32xf32>, vector<128x32xf32> -> vector<128x32xf32>
    %65 = vector.extract_strided_slice %64 {offsets = [0, 0], sizes = [32, 32], strides = [1, 1]} : vector<128x32xf32> to vector<32x32xf32>
    %66 = vector.extract_strided_slice %64 {offsets = [32, 0], sizes = [32, 32], strides = [1, 1]} : vector<128x32xf32> to vector<32x32xf32>
    %67 = arith.addf %65, %66 : vector<32x32xf32>
    %68 = vector.extract_strided_slice %64 {offsets = [64, 0], sizes = [32, 32], strides = [1, 1]} : vector<128x32xf32> to vector<32x32xf32>
    %69 = arith.addf %67, %68 : vector<32x32xf32>
    %70 = vector.extract_strided_slice %64 {offsets = [96, 0], sizes = [32, 32], strides = [1, 1]} : vector<128x32xf32> to vector<32x32xf32>
    %71 = arith.addf %69, %70 : vector<32x32xf32>
    %72 = vector.broadcast %23 : vector<1x32xf32> to vector<32x32xf32>
    %73 = arith.addf %71, %72 : vector<32x32xf32>
    %74 = arith.addf %73, %8 : vector<32x32xf32>
    %c1_37 = arith.constant 1 : index
    %c0_38 = arith.constant 0 : index
    %c0_39 = arith.constant 0 : index
    %75 = vector.load %arg3[%c1_37, %c0_38, %c0_39] : memref<2x128x128xf32, #tpu.memory_space<vmem>>, vector<1x128x128xf32>
    %76 = vector.shape_cast %75 : vector<1x128x128xf32> to vector<128x128xf32>
    %c4 = arith.constant 4 : index
    %c0_40 = arith.constant 0 : index
    %c0_41 = arith.constant 0 : index
    %77 = vector.load %arg6[%c4, %c0_40, %c0_41] : memref<16x128x8xf32, #tpu.memory_space<vmem>>, vector<1x128x8xf32>
    %78 = vector.shape_cast %77 : vector<1x128x8xf32> to vector<128x8xf32>
    %c5 = arith.constant 5 : index
    %c0_42 = arith.constant 0 : index
    %c0_43 = arith.constant 0 : index
    %79 = vector.load %arg6[%c5, %c0_42, %c0_43] : memref<16x128x8xf32, #tpu.memory_space<vmem>>, vector<1x128x8xf32>
    %80 = vector.shape_cast %79 : vector<1x128x8xf32> to vector<128x8xf32>
    %c6 = arith.constant 6 : index
    %c0_44 = arith.constant 0 : index
    %c0_45 = arith.constant 0 : index
    %81 = vector.load %arg6[%c6, %c0_44, %c0_45] : memref<16x128x8xf32, #tpu.memory_space<vmem>>, vector<1x128x8xf32>
    %82 = vector.shape_cast %81 : vector<1x128x8xf32> to vector<128x8xf32>
    %c7 = arith.constant 7 : index
    %c0_46 = arith.constant 0 : index
    %c0_47 = arith.constant 0 : index
    %83 = vector.load %arg6[%c7, %c0_46, %c0_47] : memref<16x128x8xf32, #tpu.memory_space<vmem>>, vector<1x128x8xf32>
    %84 = vector.shape_cast %83 : vector<1x128x8xf32> to vector<128x8xf32>
    %c1_48 = arith.constant 1 : index
    %c0_49 = arith.constant 0 : index
    %c0_50 = arith.constant 0 : index
    %85 = vector.load %arg7[%c1_48, %c0_49, %c0_50] : memref<4x128x32xf32, #tpu.memory_space<vmem>>, vector<1x128x32xf32>
    %86 = vector.shape_cast %85 : vector<1x128x32xf32> to vector<128x32xf32>
    %87 = vector.extract_strided_slice %0 {offsets = [4, 0], sizes = [1, 32], strides = [1, 1]} : vector<17x32xf32> to vector<1x32xf32>
    %88 = vector.extract_strided_slice %0 {offsets = [5, 0], sizes = [1, 32], strides = [1, 1]} : vector<17x32xf32> to vector<1x32xf32>
    %89 = vector.extract_strided_slice %0 {offsets = [6, 0], sizes = [1, 32], strides = [1, 1]} : vector<17x32xf32> to vector<1x32xf32>
    %cst_51 = arith.constant dense<0.000000e+00> : vector<32xf32>
    %90 = vector.multi_reduction <add>, %74, %cst_51 [1] : vector<32x32xf32> to vector<32xf32>
    %91 = vector.shape_cast %90 : vector<32xf32> to vector<32x1xf32>
    %cst_52 = arith.constant 3.200000e+01 : f32
    %92 = vector.broadcast %cst_52 : f32 to vector<32x1xf32>
    %93 = arith.divf %91, %92 : vector<32x1xf32>
    %94 = vector.broadcast %93 : vector<32x1xf32> to vector<32x32xf32>
    %95 = arith.subf %74, %94 : vector<32x32xf32>
    %96 = arith.mulf %95, %95 : vector<32x32xf32>
    %cst_53 = arith.constant dense<0.000000e+00> : vector<32xf32>
    %97 = vector.multi_reduction <add>, %96, %cst_53 [1] : vector<32x32xf32> to vector<32xf32>
    %98 = vector.shape_cast %97 : vector<32xf32> to vector<32x1xf32>
    %cst_54 = arith.constant 3.200000e+01 : f32
    %99 = vector.broadcast %cst_54 : f32 to vector<32x1xf32>
    %100 = arith.divf %98, %99 : vector<32x1xf32>
    %cst_55 = arith.constant 9.99999974E-6 : f32
    %101 = vector.broadcast %cst_55 : f32 to vector<32x1xf32>
    %102 = arith.addf %100, %101 : vector<32x1xf32>
    %103 = math.rsqrt %102 : vector<32x1xf32>
    %104 = vector.broadcast %103 : vector<32x1xf32> to vector<32x32xf32>
    %105 = arith.mulf %95, %104 : vector<32x32xf32>
    %106 = vector.broadcast %87 : vector<1x32xf32> to vector<32x32xf32>
    %107 = arith.mulf %105, %106 : vector<32x32xf32>
    %108 = vector.broadcast %88 : vector<1x32xf32> to vector<32x32xf32>
    %109 = arith.addf %107, %108 : vector<32x32xf32>
    %cst_56 = arith.constant dense<0.000000e+00> : vector<32x128xf32>
    %110 = tpu.matmul %109, %1, %cst_56 {dimension_numbers = #tpu.dot_dimension_numbers<[1], [0], [0], [1], [0, 0, 1, 1], [], []>} : vector<32x32xf32>, vector<32x128xf32>, vector<32x128xf32> -> vector<32x128xf32>
    %111 = tpu.concatenate %110, %110, %110, %110 in 0 : vector<32x128xf32>, vector<32x128xf32>, vector<32x128xf32>, vector<32x128xf32> -> vector<128x128xf32>
    %112 = arith.mulf %111, %2 : vector<128x128xf32>
    %cst_57 = arith.constant dense<0.000000e+00> : vector<128x8xf32>
    %113 = tpu.matmul %112, %78, %cst_57 {dimension_numbers = #tpu.dot_dimension_numbers<[1], [0], [0], [1], [0, 0, 1, 1], [], []>} : vector<128x128xf32>, vector<128x8xf32>, vector<128x8xf32> -> vector<128x8xf32>
    %114 = arith.addf %113, %82 : vector<128x8xf32>
    %cst_58 = arith.constant dense<0.000000e+00> : vector<128x8xf32>
    %115 = tpu.matmul %112, %80, %cst_58 {dimension_numbers = #tpu.dot_dimension_numbers<[1], [0], [0], [1], [0, 0, 1, 1], [], []>} : vector<128x128xf32>, vector<128x8xf32>, vector<128x8xf32> -> vector<128x8xf32>
    %116 = arith.addf %115, %84 : vector<128x8xf32>
    %cst_59 = arith.constant dense<0.000000e+00> : vector<128x32xf32>
    %117 = tpu.matmul %112, %86, %cst_59 {dimension_numbers = #tpu.dot_dimension_numbers<[1], [0], [0], [1], [0, 0, 1, 1], [], []>} : vector<128x128xf32>, vector<128x32xf32>, vector<128x32xf32> -> vector<128x32xf32>
    %cst_60 = arith.constant dense<0.000000e+00> : vector<128x128xf32>
    %118 = tpu.matmul %114, %116, %cst_60 {dimension_numbers = #tpu.dot_dimension_numbers<[1], [1], [0], [0], [0, 0, 1, 0], [], []>} : vector<128x8xf32>, vector<128x8xf32>, vector<128x128xf32> -> vector<128x128xf32>
    %119 = arith.addf %118, %76 : vector<128x128xf32>
    %cst_61 = arith.constant dense<0xFF800000> : vector<128xf32>
    %120 = vector.multi_reduction <maximumf>, %119, %cst_61 [1] : vector<128x128xf32> to vector<128xf32>
    %121 = vector.shape_cast %120 : vector<128xf32> to vector<128x1xf32>
    %122 = vector.broadcast %121 : vector<128x1xf32> to vector<128x128xf32>
    %123 = arith.subf %119, %122 : vector<128x128xf32>
    %124 = math.exp %123 : vector<128x128xf32>
    %cst_62 = arith.constant dense<0.000000e+00> : vector<128xf32>
    %125 = vector.multi_reduction <add>, %124, %cst_62 [1] : vector<128x128xf32> to vector<128xf32>
    %126 = vector.shape_cast %125 : vector<128xf32> to vector<128x1xf32>
    %127 = tpu.reciprocal %126 {approx = true} : vector<128x1xf32> -> vector<128x1xf32>
    %128 = vector.broadcast %127 : vector<128x1xf32> to vector<128x128xf32>
    %129 = arith.mulf %124, %128 : vector<128x128xf32>
    %cst_63 = arith.constant dense<0.000000e+00> : vector<128x32xf32>
    %130 = tpu.matmul %129, %117, %cst_63 {dimension_numbers = #tpu.dot_dimension_numbers<[1], [0], [0], [1], [0, 0, 1, 1], [], []>} : vector<128x128xf32>, vector<128x32xf32>, vector<128x32xf32> -> vector<128x32xf32>
    %131 = vector.extract_strided_slice %130 {offsets = [0, 0], sizes = [32, 32], strides = [1, 1]} : vector<128x32xf32> to vector<32x32xf32>
    %132 = vector.extract_strided_slice %130 {offsets = [32, 0], sizes = [32, 32], strides = [1, 1]} : vector<128x32xf32> to vector<32x32xf32>
    %133 = arith.addf %131, %132 : vector<32x32xf32>
    %134 = vector.extract_strided_slice %130 {offsets = [64, 0], sizes = [32, 32], strides = [1, 1]} : vector<128x32xf32> to vector<32x32xf32>
    %135 = arith.addf %133, %134 : vector<32x32xf32>
    %136 = vector.extract_strided_slice %130 {offsets = [96, 0], sizes = [32, 32], strides = [1, 1]} : vector<128x32xf32> to vector<32x32xf32>
    %137 = arith.addf %135, %136 : vector<32x32xf32>
    %138 = vector.broadcast %89 : vector<1x32xf32> to vector<32x32xf32>
    %139 = arith.addf %137, %138 : vector<32x32xf32>
    %140 = arith.addf %139, %74 : vector<32x32xf32>
    %c0_64 = arith.constant 0 : index
    %c0_65 = arith.constant 0 : index
    %c0_66 = arith.constant 0 : index
    %141 = vector.load %arg8[%c0_64, %c0_65, %c0_66] : memref<2x33x256xf32, #tpu.memory_space<vmem>>, vector<1x33x256xf32>
    %142 = vector.shape_cast %141 : vector<1x33x256xf32> to vector<33x256xf32>
    %c0_67 = arith.constant 0 : index
    %c0_68 = arith.constant 0 : index
    %c0_69 = arith.constant 0 : index
    %143 = vector.load %arg9[%c0_67, %c0_68, %c0_69] : memref<2x129x32xf32, #tpu.memory_space<vmem>>, vector<1x129x32xf32>
    %144 = vector.shape_cast %143 : vector<1x129x32xf32> to vector<129x32xf32>
    %145 = vector.extract_strided_slice %0 {offsets = [13, 0], sizes = [1, 32], strides = [1, 1]} : vector<17x32xf32> to vector<1x32xf32>
    %146 = vector.extract_strided_slice %0 {offsets = [14, 0], sizes = [1, 32], strides = [1, 1]} : vector<17x32xf32> to vector<1x32xf32>
    %147 = vector.extract_strided_slice %142 {offsets = [0, 0], sizes = [32, 256], strides = [1, 1]} : vector<33x256xf32> to vector<32x256xf32>
    %148 = vector.extract_strided_slice %142 {offsets = [32, 0], sizes = [1, 256], strides = [1, 1]} : vector<33x256xf32> to vector<1x256xf32>
    %149 = vector.extract_strided_slice %144 {offsets = [0, 0], sizes = [128, 32], strides = [1, 1]} : vector<129x32xf32> to vector<128x32xf32>
    %150 = vector.extract_strided_slice %144 {offsets = [128, 0], sizes = [1, 32], strides = [1, 1]} : vector<129x32xf32> to vector<1x32xf32>
    %cst_70 = arith.constant dense<0.000000e+00> : vector<32xf32>
    %151 = vector.multi_reduction <add>, %140, %cst_70 [1] : vector<32x32xf32> to vector<32xf32>
    %152 = vector.shape_cast %151 : vector<32xf32> to vector<32x1xf32>
    %cst_71 = arith.constant 3.200000e+01 : f32
    %153 = vector.broadcast %cst_71 : f32 to vector<32x1xf32>
    %154 = arith.divf %152, %153 : vector<32x1xf32>
    %155 = vector.broadcast %154 : vector<32x1xf32> to vector<32x32xf32>
    %156 = arith.subf %140, %155 : vector<32x32xf32>
    %157 = arith.mulf %156, %156 : vector<32x32xf32>
    %cst_72 = arith.constant dense<0.000000e+00> : vector<32xf32>
    %158 = vector.multi_reduction <add>, %157, %cst_72 [1] : vector<32x32xf32> to vector<32xf32>
    %159 = vector.shape_cast %158 : vector<32xf32> to vector<32x1xf32>
    %cst_73 = arith.constant 3.200000e+01 : f32
    %160 = vector.broadcast %cst_73 : f32 to vector<32x1xf32>
    %161 = arith.divf %159, %160 : vector<32x1xf32>
    %cst_74 = arith.constant 9.99999974E-6 : f32
    %162 = vector.broadcast %cst_74 : f32 to vector<32x1xf32>
    %163 = arith.addf %161, %162 : vector<32x1xf32>
    %164 = math.rsqrt %163 : vector<32x1xf32>
    %165 = vector.broadcast %164 : vector<32x1xf32> to vector<32x32xf32>
    %166 = arith.mulf %156, %165 : vector<32x32xf32>
    %167 = vector.broadcast %145 : vector<1x32xf32> to vector<32x32xf32>
    %168 = arith.mulf %166, %167 : vector<32x32xf32>
    %169 = vector.broadcast %146 : vector<1x32xf32> to vector<32x32xf32>
    %170 = arith.addf %168, %169 : vector<32x32xf32>
    %cst_75 = arith.constant dense<0.000000e+00> : vector<32x256xf32>
    %171 = tpu.matmul %170, %147, %cst_75 {dimension_numbers = #tpu.dot_dimension_numbers<[1], [0], [0], [1], [0, 0, 1, 1], [], []>} : vector<32x32xf32>, vector<32x256xf32>, vector<32x256xf32> -> vector<32x256xf32>
    %172 = vector.broadcast %148 : vector<1x256xf32> to vector<32x256xf32>
    %173 = arith.addf %171, %172 : vector<32x256xf32>
    %174 = vector.extract_strided_slice %173 {offsets = [0, 0], sizes = [32, 128], strides = [1, 1]} : vector<32x256xf32> to vector<32x128xf32>
    %175 = vector.extract_strided_slice %173 {offsets = [0, 128], sizes = [32, 128], strides = [1, 1]} : vector<32x256xf32> to vector<32x128xf32>
    %cst_76 = arith.constant 5.000000e-01 : f32
    %176 = vector.broadcast %cst_76 : f32 to vector<32x128xf32>
    %177 = arith.mulf %176, %175 : vector<32x128xf32>
    %cst_77 = arith.constant 0.707106769 : f32
    %178 = vector.broadcast %cst_77 : f32 to vector<32x128xf32>
    %179 = arith.mulf %175, %178 : vector<32x128xf32>
    %180 = math.erf %179 : vector<32x128xf32>
    %cst_78 = arith.constant 1.000000e+00 : f32
    %181 = vector.broadcast %cst_78 : f32 to vector<32x128xf32>
    %182 = arith.addf %181, %180 : vector<32x128xf32>
    %183 = arith.mulf %177, %182 : vector<32x128xf32>
    %184 = arith.mulf %174, %183 : vector<32x128xf32>
    %cst_79 = arith.constant dense<0.000000e+00> : vector<32x32xf32>
    %185 = tpu.matmul %184, %149, %cst_79 {dimension_numbers = #tpu.dot_dimension_numbers<[1], [0], [0], [1], [0, 0, 1, 1], [], []>} : vector<32x128xf32>, vector<128x32xf32>, vector<32x32xf32> -> vector<32x32xf32>
    %186 = vector.broadcast %150 : vector<1x32xf32> to vector<32x32xf32>
    %187 = arith.addf %185, %186 : vector<32x32xf32>
    %188 = arith.addf %187, %140 : vector<32x32xf32>
    %c0_80 = arith.constant 0 : index
    %c0_81 = arith.constant 0 : index
    %c0_82 = arith.constant 0 : index
    %189 = vector.load %arg3[%c0_80, %c0_81, %c0_82] : memref<2x128x128xf32, #tpu.memory_space<vmem>>, vector<1x128x128xf32>
    %190 = vector.shape_cast %189 : vector<1x128x128xf32> to vector<128x128xf32>
    %c8 = arith.constant 8 : index
    %c0_83 = arith.constant 0 : index
    %c0_84 = arith.constant 0 : index
    %191 = vector.load %arg6[%c8, %c0_83, %c0_84] : memref<16x128x8xf32, #tpu.memory_space<vmem>>, vector<1x128x8xf32>
    %192 = vector.shape_cast %191 : vector<1x128x8xf32> to vector<128x8xf32>
    %c9 = arith.constant 9 : index
    %c0_85 = arith.constant 0 : index
    %c0_86 = arith.constant 0 : index
    %193 = vector.load %arg6[%c9, %c0_85, %c0_86] : memref<16x128x8xf32, #tpu.memory_space<vmem>>, vector<1x128x8xf32>
    %194 = vector.shape_cast %193 : vector<1x128x8xf32> to vector<128x8xf32>
    %c10 = arith.constant 10 : index
    %c0_87 = arith.constant 0 : index
    %c0_88 = arith.constant 0 : index
    %195 = vector.load %arg6[%c10, %c0_87, %c0_88] : memref<16x128x8xf32, #tpu.memory_space<vmem>>, vector<1x128x8xf32>
    %196 = vector.shape_cast %195 : vector<1x128x8xf32> to vector<128x8xf32>
    %c11 = arith.constant 11 : index
    %c0_89 = arith.constant 0 : index
    %c0_90 = arith.constant 0 : index
    %197 = vector.load %arg6[%c11, %c0_89, %c0_90] : memref<16x128x8xf32, #tpu.memory_space<vmem>>, vector<1x128x8xf32>
    %198 = vector.shape_cast %197 : vector<1x128x8xf32> to vector<128x8xf32>
    %c2_91 = arith.constant 2 : index
    %c0_92 = arith.constant 0 : index
    %c0_93 = arith.constant 0 : index
    %199 = vector.load %arg7[%c2_91, %c0_92, %c0_93] : memref<4x128x32xf32, #tpu.memory_space<vmem>>, vector<1x128x32xf32>
    %200 = vector.shape_cast %199 : vector<1x128x32xf32> to vector<128x32xf32>
    %201 = vector.extract_strided_slice %0 {offsets = [7, 0], sizes = [1, 32], strides = [1, 1]} : vector<17x32xf32> to vector<1x32xf32>
    %202 = vector.extract_strided_slice %0 {offsets = [8, 0], sizes = [1, 32], strides = [1, 1]} : vector<17x32xf32> to vector<1x32xf32>
    %203 = vector.extract_strided_slice %0 {offsets = [9, 0], sizes = [1, 32], strides = [1, 1]} : vector<17x32xf32> to vector<1x32xf32>
    %cst_94 = arith.constant dense<0.000000e+00> : vector<32xf32>
    %204 = vector.multi_reduction <add>, %188, %cst_94 [1] : vector<32x32xf32> to vector<32xf32>
    %205 = vector.shape_cast %204 : vector<32xf32> to vector<32x1xf32>
    %cst_95 = arith.constant 3.200000e+01 : f32
    %206 = vector.broadcast %cst_95 : f32 to vector<32x1xf32>
    %207 = arith.divf %205, %206 : vector<32x1xf32>
    %208 = vector.broadcast %207 : vector<32x1xf32> to vector<32x32xf32>
    %209 = arith.subf %188, %208 : vector<32x32xf32>
    %210 = arith.mulf %209, %209 : vector<32x32xf32>
    %cst_96 = arith.constant dense<0.000000e+00> : vector<32xf32>
    %211 = vector.multi_reduction <add>, %210, %cst_96 [1] : vector<32x32xf32> to vector<32xf32>
    %212 = vector.shape_cast %211 : vector<32xf32> to vector<32x1xf32>
    %cst_97 = arith.constant 3.200000e+01 : f32
    %213 = vector.broadcast %cst_97 : f32 to vector<32x1xf32>
    %214 = arith.divf %212, %213 : vector<32x1xf32>
    %cst_98 = arith.constant 9.99999974E-6 : f32
    %215 = vector.broadcast %cst_98 : f32 to vector<32x1xf32>
    %216 = arith.addf %214, %215 : vector<32x1xf32>
    %217 = math.rsqrt %216 : vector<32x1xf32>
    %218 = vector.broadcast %217 : vector<32x1xf32> to vector<32x32xf32>
    %219 = arith.mulf %209, %218 : vector<32x32xf32>
    %220 = vector.broadcast %201 : vector<1x32xf32> to vector<32x32xf32>
    %221 = arith.mulf %219, %220 : vector<32x32xf32>
    %222 = vector.broadcast %202 : vector<1x32xf32> to vector<32x32xf32>
    %223 = arith.addf %221, %222 : vector<32x32xf32>
    %cst_99 = arith.constant dense<0.000000e+00> : vector<32x128xf32>
    %224 = tpu.matmul %223, %1, %cst_99 {dimension_numbers = #tpu.dot_dimension_numbers<[1], [0], [0], [1], [0, 0, 1, 1], [], []>} : vector<32x32xf32>, vector<32x128xf32>, vector<32x128xf32> -> vector<32x128xf32>
    %225 = tpu.concatenate %224, %224, %224, %224 in 0 : vector<32x128xf32>, vector<32x128xf32>, vector<32x128xf32>, vector<32x128xf32> -> vector<128x128xf32>
    %226 = arith.mulf %225, %2 : vector<128x128xf32>
    %cst_100 = arith.constant dense<0.000000e+00> : vector<128x8xf32>
    %227 = tpu.matmul %226, %192, %cst_100 {dimension_numbers = #tpu.dot_dimension_numbers<[1], [0], [0], [1], [0, 0, 1, 1], [], []>} : vector<128x128xf32>, vector<128x8xf32>, vector<128x8xf32> -> vector<128x8xf32>
    %228 = arith.addf %227, %196 : vector<128x8xf32>
    %cst_101 = arith.constant dense<0.000000e+00> : vector<128x8xf32>
    %229 = tpu.matmul %226, %194, %cst_101 {dimension_numbers = #tpu.dot_dimension_numbers<[1], [0], [0], [1], [0, 0, 1, 1], [], []>} : vector<128x128xf32>, vector<128x8xf32>, vector<128x8xf32> -> vector<128x8xf32>
    %230 = arith.addf %229, %198 : vector<128x8xf32>
    %cst_102 = arith.constant dense<0.000000e+00> : vector<128x32xf32>
    %231 = tpu.matmul %226, %200, %cst_102 {dimension_numbers = #tpu.dot_dimension_numbers<[1], [0], [0], [1], [0, 0, 1, 1], [], []>} : vector<128x128xf32>, vector<128x32xf32>, vector<128x32xf32> -> vector<128x32xf32>
    %cst_103 = arith.constant dense<0.000000e+00> : vector<128x128xf32>
    %232 = tpu.matmul %228, %230, %cst_103 {dimension_numbers = #tpu.dot_dimension_numbers<[1], [1], [0], [0], [0, 0, 1, 0], [], []>} : vector<128x8xf32>, vector<128x8xf32>, vector<128x128xf32> -> vector<128x128xf32>
    %233 = arith.addf %232, %190 : vector<128x128xf32>
    %cst_104 = arith.constant dense<0xFF800000> : vector<128xf32>
    %234 = vector.multi_reduction <maximumf>, %233, %cst_104 [1] : vector<128x128xf32> to vector<128xf32>
    %235 = vector.shape_cast %234 : vector<128xf32> to vector<128x1xf32>
    %236 = vector.broadcast %235 : vector<128x1xf32> to vector<128x128xf32>
    %237 = arith.subf %233, %236 : vector<128x128xf32>
    %238 = math.exp %237 : vector<128x128xf32>
    %cst_105 = arith.constant dense<0.000000e+00> : vector<128xf32>
    %239 = vector.multi_reduction <add>, %238, %cst_105 [1] : vector<128x128xf32> to vector<128xf32>
    %240 = vector.shape_cast %239 : vector<128xf32> to vector<128x1xf32>
    %241 = tpu.reciprocal %240 {approx = true} : vector<128x1xf32> -> vector<128x1xf32>
    %242 = vector.broadcast %241 : vector<128x1xf32> to vector<128x128xf32>
    %243 = arith.mulf %238, %242 : vector<128x128xf32>
    %cst_106 = arith.constant dense<0.000000e+00> : vector<128x32xf32>
    %244 = tpu.matmul %243, %231, %cst_106 {dimension_numbers = #tpu.dot_dimension_numbers<[1], [0], [0], [1], [0, 0, 1, 1], [], []>} : vector<128x128xf32>, vector<128x32xf32>, vector<128x32xf32> -> vector<128x32xf32>
    %245 = vector.extract_strided_slice %244 {offsets = [0, 0], sizes = [32, 32], strides = [1, 1]} : vector<128x32xf32> to vector<32x32xf32>
    %246 = vector.extract_strided_slice %244 {offsets = [32, 0], sizes = [32, 32], strides = [1, 1]} : vector<128x32xf32> to vector<32x32xf32>
    %247 = arith.addf %245, %246 : vector<32x32xf32>
    %248 = vector.extract_strided_slice %244 {offsets = [64, 0], sizes = [32, 32], strides = [1, 1]} : vector<128x32xf32> to vector<32x32xf32>
    %249 = arith.addf %247, %248 : vector<32x32xf32>
    %250 = vector.extract_strided_slice %244 {offsets = [96, 0], sizes = [32, 32], strides = [1, 1]} : vector<128x32xf32> to vector<32x32xf32>
    %251 = arith.addf %249, %250 : vector<32x32xf32>
    %252 = vector.broadcast %203 : vector<1x32xf32> to vector<32x32xf32>
    %253 = arith.addf %251, %252 : vector<32x32xf32>
    %254 = arith.addf %253, %188 : vector<32x32xf32>
    %c1_107 = arith.constant 1 : index
    %c0_108 = arith.constant 0 : index
    %c0_109 = arith.constant 0 : index
    %255 = vector.load %arg3[%c1_107, %c0_108, %c0_109] : memref<2x128x128xf32, #tpu.memory_space<vmem>>, vector<1x128x128xf32>
    %256 = vector.shape_cast %255 : vector<1x128x128xf32> to vector<128x128xf32>
    %c12 = arith.constant 12 : index
    %c0_110 = arith.constant 0 : index
    %c0_111 = arith.constant 0 : index
    %257 = vector.load %arg6[%c12, %c0_110, %c0_111] : memref<16x128x8xf32, #tpu.memory_space<vmem>>, vector<1x128x8xf32>
    %258 = vector.shape_cast %257 : vector<1x128x8xf32> to vector<128x8xf32>
    %c13 = arith.constant 13 : index
    %c0_112 = arith.constant 0 : index
    %c0_113 = arith.constant 0 : index
    %259 = vector.load %arg6[%c13, %c0_112, %c0_113] : memref<16x128x8xf32, #tpu.memory_space<vmem>>, vector<1x128x8xf32>
    %260 = vector.shape_cast %259 : vector<1x128x8xf32> to vector<128x8xf32>
    %c14 = arith.constant 14 : index
    %c0_114 = arith.constant 0 : index
    %c0_115 = arith.constant 0 : index
    %261 = vector.load %arg6[%c14, %c0_114, %c0_115] : memref<16x128x8xf32, #tpu.memory_space<vmem>>, vector<1x128x8xf32>
    %262 = vector.shape_cast %261 : vector<1x128x8xf32> to vector<128x8xf32>
    %c15 = arith.constant 15 : index
    %c0_116 = arith.constant 0 : index
    %c0_117 = arith.constant 0 : index
    %263 = vector.load %arg6[%c15, %c0_116, %c0_117] : memref<16x128x8xf32, #tpu.memory_space<vmem>>, vector<1x128x8xf32>
    %264 = vector.shape_cast %263 : vector<1x128x8xf32> to vector<128x8xf32>
    %c3_118 = arith.constant 3 : index
    %c0_119 = arith.constant 0 : index
    %c0_120 = arith.constant 0 : index
    %265 = vector.load %arg7[%c3_118, %c0_119, %c0_120] : memref<4x128x32xf32, #tpu.memory_space<vmem>>, vector<1x128x32xf32>
    %266 = vector.shape_cast %265 : vector<1x128x32xf32> to vector<128x32xf32>
    %267 = vector.extract_strided_slice %0 {offsets = [10, 0], sizes = [1, 32], strides = [1, 1]} : vector<17x32xf32> to vector<1x32xf32>
    %268 = vector.extract_strided_slice %0 {offsets = [11, 0], sizes = [1, 32], strides = [1, 1]} : vector<17x32xf32> to vector<1x32xf32>
    %269 = vector.extract_strided_slice %0 {offsets = [12, 0], sizes = [1, 32], strides = [1, 1]} : vector<17x32xf32> to vector<1x32xf32>
    %cst_121 = arith.constant dense<0.000000e+00> : vector<32xf32>
    %270 = vector.multi_reduction <add>, %254, %cst_121 [1] : vector<32x32xf32> to vector<32xf32>
    %271 = vector.shape_cast %270 : vector<32xf32> to vector<32x1xf32>
    %cst_122 = arith.constant 3.200000e+01 : f32
    %272 = vector.broadcast %cst_122 : f32 to vector<32x1xf32>
    %273 = arith.divf %271, %272 : vector<32x1xf32>
    %274 = vector.broadcast %273 : vector<32x1xf32> to vector<32x32xf32>
    %275 = arith.subf %254, %274 : vector<32x32xf32>
    %276 = arith.mulf %275, %275 : vector<32x32xf32>
    %cst_123 = arith.constant dense<0.000000e+00> : vector<32xf32>
    %277 = vector.multi_reduction <add>, %276, %cst_123 [1] : vector<32x32xf32> to vector<32xf32>
    %278 = vector.shape_cast %277 : vector<32xf32> to vector<32x1xf32>
    %cst_124 = arith.constant 3.200000e+01 : f32
    %279 = vector.broadcast %cst_124 : f32 to vector<32x1xf32>
    %280 = arith.divf %278, %279 : vector<32x1xf32>
    %cst_125 = arith.constant 9.99999974E-6 : f32
    %281 = vector.broadcast %cst_125 : f32 to vector<32x1xf32>
    %282 = arith.addf %280, %281 : vector<32x1xf32>
    %283 = math.rsqrt %282 : vector<32x1xf32>
    %284 = vector.broadcast %283 : vector<32x1xf32> to vector<32x32xf32>
    %285 = arith.mulf %275, %284 : vector<32x32xf32>
    %286 = vector.broadcast %267 : vector<1x32xf32> to vector<32x32xf32>
    %287 = arith.mulf %285, %286 : vector<32x32xf32>
    %288 = vector.broadcast %268 : vector<1x32xf32> to vector<32x32xf32>
    %289 = arith.addf %287, %288 : vector<32x32xf32>
    %cst_126 = arith.constant dense<0.000000e+00> : vector<32x128xf32>
    %290 = tpu.matmul %289, %1, %cst_126 {dimension_numbers = #tpu.dot_dimension_numbers<[1], [0], [0], [1], [0, 0, 1, 1], [], []>} : vector<32x32xf32>, vector<32x128xf32>, vector<32x128xf32> -> vector<32x128xf32>
    %291 = tpu.concatenate %290, %290, %290, %290 in 0 : vector<32x128xf32>, vector<32x128xf32>, vector<32x128xf32>, vector<32x128xf32> -> vector<128x128xf32>
    %292 = arith.mulf %291, %2 : vector<128x128xf32>
    %cst_127 = arith.constant dense<0.000000e+00> : vector<128x8xf32>
    %293 = tpu.matmul %292, %258, %cst_127 {dimension_numbers = #tpu.dot_dimension_numbers<[1], [0], [0], [1], [0, 0, 1, 1], [], []>} : vector<128x128xf32>, vector<128x8xf32>, vector<128x8xf32> -> vector<128x8xf32>
    %294 = arith.addf %293, %262 : vector<128x8xf32>
    %cst_128 = arith.constant dense<0.000000e+00> : vector<128x8xf32>
    %295 = tpu.matmul %292, %260, %cst_128 {dimension_numbers = #tpu.dot_dimension_numbers<[1], [0], [0], [1], [0, 0, 1, 1], [], []>} : vector<128x128xf32>, vector<128x8xf32>, vector<128x8xf32> -> vector<128x8xf32>
    %296 = arith.addf %295, %264 : vector<128x8xf32>
    %cst_129 = arith.constant dense<0.000000e+00> : vector<128x32xf32>
    %297 = tpu.matmul %292, %266, %cst_129 {dimension_numbers = #tpu.dot_dimension_numbers<[1], [0], [0], [1], [0, 0, 1, 1], [], []>} : vector<128x128xf32>, vector<128x32xf32>, vector<128x32xf32> -> vector<128x32xf32>
    %cst_130 = arith.constant dense<0.000000e+00> : vector<128x128xf32>
    %298 = tpu.matmul %294, %296, %cst_130 {dimension_numbers = #tpu.dot_dimension_numbers<[1], [1], [0], [0], [0, 0, 1, 0], [], []>} : vector<128x8xf32>, vector<128x8xf32>, vector<128x128xf32> -> vector<128x128xf32>
    %299 = arith.addf %298, %256 : vector<128x128xf32>
    %cst_131 = arith.constant dense<0xFF800000> : vector<128xf32>
    %300 = vector.multi_reduction <maximumf>, %299, %cst_131 [1] : vector<128x128xf32> to vector<128xf32>
    %301 = vector.shape_cast %300 : vector<128xf32> to vector<128x1xf32>
    %302 = vector.broadcast %301 : vector<128x1xf32> to vector<128x128xf32>
    %303 = arith.subf %299, %302 : vector<128x128xf32>
    %304 = math.exp %303 : vector<128x128xf32>
    %cst_132 = arith.constant dense<0.000000e+00> : vector<128xf32>
    %305 = vector.multi_reduction <add>, %304, %cst_132 [1] : vector<128x128xf32> to vector<128xf32>
    %306 = vector.shape_cast %305 : vector<128xf32> to vector<128x1xf32>
    %307 = tpu.reciprocal %306 {approx = true} : vector<128x1xf32> -> vector<128x1xf32>
    %308 = vector.broadcast %307 : vector<128x1xf32> to vector<128x128xf32>
    %309 = arith.mulf %304, %308 : vector<128x128xf32>
    %cst_133 = arith.constant dense<0.000000e+00> : vector<128x32xf32>
    %310 = tpu.matmul %309, %297, %cst_133 {dimension_numbers = #tpu.dot_dimension_numbers<[1], [0], [0], [1], [0, 0, 1, 1], [], []>} : vector<128x128xf32>, vector<128x32xf32>, vector<128x32xf32> -> vector<128x32xf32>
    %311 = vector.extract_strided_slice %310 {offsets = [0, 0], sizes = [32, 32], strides = [1, 1]} : vector<128x32xf32> to vector<32x32xf32>
    %312 = vector.extract_strided_slice %310 {offsets = [32, 0], sizes = [32, 32], strides = [1, 1]} : vector<128x32xf32> to vector<32x32xf32>
    %313 = arith.addf %311, %312 : vector<32x32xf32>
    %314 = vector.extract_strided_slice %310 {offsets = [64, 0], sizes = [32, 32], strides = [1, 1]} : vector<128x32xf32> to vector<32x32xf32>
    %315 = arith.addf %313, %314 : vector<32x32xf32>
    %316 = vector.extract_strided_slice %310 {offsets = [96, 0], sizes = [32, 32], strides = [1, 1]} : vector<128x32xf32> to vector<32x32xf32>
    %317 = arith.addf %315, %316 : vector<32x32xf32>
    %318 = vector.broadcast %269 : vector<1x32xf32> to vector<32x32xf32>
    %319 = arith.addf %317, %318 : vector<32x32xf32>
    %320 = arith.addf %319, %254 : vector<32x32xf32>
    %c1_134 = arith.constant 1 : index
    %c0_135 = arith.constant 0 : index
    %c0_136 = arith.constant 0 : index
    %321 = vector.load %arg8[%c1_134, %c0_135, %c0_136] : memref<2x33x256xf32, #tpu.memory_space<vmem>>, vector<1x33x256xf32>
    %322 = vector.shape_cast %321 : vector<1x33x256xf32> to vector<33x256xf32>
    %c1_137 = arith.constant 1 : index
    %c0_138 = arith.constant 0 : index
    %c0_139 = arith.constant 0 : index
    %323 = vector.load %arg9[%c1_137, %c0_138, %c0_139] : memref<2x129x32xf32, #tpu.memory_space<vmem>>, vector<1x129x32xf32>
    %324 = vector.shape_cast %323 : vector<1x129x32xf32> to vector<129x32xf32>
    %325 = vector.extract_strided_slice %0 {offsets = [15, 0], sizes = [1, 32], strides = [1, 1]} : vector<17x32xf32> to vector<1x32xf32>
    %326 = vector.extract_strided_slice %0 {offsets = [16, 0], sizes = [1, 32], strides = [1, 1]} : vector<17x32xf32> to vector<1x32xf32>
    %327 = vector.extract_strided_slice %322 {offsets = [0, 0], sizes = [32, 256], strides = [1, 1]} : vector<33x256xf32> to vector<32x256xf32>
    %328 = vector.extract_strided_slice %322 {offsets = [32, 0], sizes = [1, 256], strides = [1, 1]} : vector<33x256xf32> to vector<1x256xf32>
    %329 = vector.extract_strided_slice %324 {offsets = [0, 0], sizes = [128, 32], strides = [1, 1]} : vector<129x32xf32> to vector<128x32xf32>
    %330 = vector.extract_strided_slice %324 {offsets = [128, 0], sizes = [1, 32], strides = [1, 1]} : vector<129x32xf32> to vector<1x32xf32>
    %cst_140 = arith.constant dense<0.000000e+00> : vector<32xf32>
    %331 = vector.multi_reduction <add>, %320, %cst_140 [1] : vector<32x32xf32> to vector<32xf32>
    %332 = vector.shape_cast %331 : vector<32xf32> to vector<32x1xf32>
    %cst_141 = arith.constant 3.200000e+01 : f32
    %333 = vector.broadcast %cst_141 : f32 to vector<32x1xf32>
    %334 = arith.divf %332, %333 : vector<32x1xf32>
    %335 = vector.broadcast %334 : vector<32x1xf32> to vector<32x32xf32>
    %336 = arith.subf %320, %335 : vector<32x32xf32>
    %337 = arith.mulf %336, %336 : vector<32x32xf32>
    %cst_142 = arith.constant dense<0.000000e+00> : vector<32xf32>
    %338 = vector.multi_reduction <add>, %337, %cst_142 [1] : vector<32x32xf32> to vector<32xf32>
    %339 = vector.shape_cast %338 : vector<32xf32> to vector<32x1xf32>
    %cst_143 = arith.constant 3.200000e+01 : f32
    %340 = vector.broadcast %cst_143 : f32 to vector<32x1xf32>
    %341 = arith.divf %339, %340 : vector<32x1xf32>
    %cst_144 = arith.constant 9.99999974E-6 : f32
    %342 = vector.broadcast %cst_144 : f32 to vector<32x1xf32>
    %343 = arith.addf %341, %342 : vector<32x1xf32>
    %344 = math.rsqrt %343 : vector<32x1xf32>
    %345 = vector.broadcast %344 : vector<32x1xf32> to vector<32x32xf32>
    %346 = arith.mulf %336, %345 : vector<32x32xf32>
    %347 = vector.broadcast %325 : vector<1x32xf32> to vector<32x32xf32>
    %348 = arith.mulf %346, %347 : vector<32x32xf32>
    %349 = vector.broadcast %326 : vector<1x32xf32> to vector<32x32xf32>
    %350 = arith.addf %348, %349 : vector<32x32xf32>
    %cst_145 = arith.constant dense<0.000000e+00> : vector<32x256xf32>
    %351 = tpu.matmul %350, %327, %cst_145 {dimension_numbers = #tpu.dot_dimension_numbers<[1], [0], [0], [1], [0, 0, 1, 1], [], []>} : vector<32x32xf32>, vector<32x256xf32>, vector<32x256xf32> -> vector<32x256xf32>
    %352 = vector.broadcast %328 : vector<1x256xf32> to vector<32x256xf32>
    %353 = arith.addf %351, %352 : vector<32x256xf32>
    %354 = vector.extract_strided_slice %353 {offsets = [0, 0], sizes = [32, 128], strides = [1, 1]} : vector<32x256xf32> to vector<32x128xf32>
    %355 = vector.extract_strided_slice %353 {offsets = [0, 128], sizes = [32, 128], strides = [1, 1]} : vector<32x256xf32> to vector<32x128xf32>
    %cst_146 = arith.constant 5.000000e-01 : f32
    %356 = vector.broadcast %cst_146 : f32 to vector<32x128xf32>
    %357 = arith.mulf %356, %355 : vector<32x128xf32>
    %cst_147 = arith.constant 0.707106769 : f32
    %358 = vector.broadcast %cst_147 : f32 to vector<32x128xf32>
    %359 = arith.mulf %355, %358 : vector<32x128xf32>
    %360 = math.erf %359 : vector<32x128xf32>
    %cst_148 = arith.constant 1.000000e+00 : f32
    %361 = vector.broadcast %cst_148 : f32 to vector<32x128xf32>
    %362 = arith.addf %361, %360 : vector<32x128xf32>
    %363 = arith.mulf %357, %362 : vector<32x128xf32>
    %364 = arith.mulf %354, %363 : vector<32x128xf32>
    %cst_149 = arith.constant dense<0.000000e+00> : vector<32x32xf32>
    %365 = tpu.matmul %364, %329, %cst_149 {dimension_numbers = #tpu.dot_dimension_numbers<[1], [0], [0], [1], [0, 0, 1, 1], [], []>} : vector<32x128xf32>, vector<128x32xf32>, vector<32x32xf32> -> vector<32x32xf32>
    %366 = vector.broadcast %330 : vector<1x32xf32> to vector<32x32xf32>
    %367 = arith.addf %365, %366 : vector<32x32xf32>
    %368 = arith.addf %367, %320 : vector<32x32xf32>
    %c0_150 = arith.constant 0 : index
    %c0_151 = arith.constant 0 : index
    %369 = vector.load %arg11[%c0_150, %c0_151] : memref<32x32xf32, #tpu.memory_space<vmem>>, vector<32x32xf32>
    tpu.vector_store %arg11[%c0_150, %c0_151], %368 {strides = array<i32>} : memref<32x32xf32, #tpu.memory_space<vmem>>, vector<32x32xf32>,
    return
  }
  func.func @transform_0(%arg0: i32) -> (i32, i32) {
    %c0_i32 = arith.constant 0 : i32
    %c0_i32_0 = arith.constant 0 : i32
    %c0_i32_1 = arith.constant 0 : i32
    return %c0_i32, %c0_i32_0 : i32, i32
  }
  func.func @transform_1(%arg0: i32) -> (i32, i32) {
    %c0_i32 = arith.constant 0 : i32
    %c0_i32_0 = arith.constant 0 : i32
    %c0_i32_1 = arith.constant 0 : i32
    return %c0_i32, %c0_i32_0 : i32, i32
  }
  func.func @transform_2(%arg0: i32) -> (i32, i32, i32) {
    %c0_i32 = arith.constant 0 : i32
    %c0_i32_0 = arith.constant 0 : i32
    %c0_i32_1 = arith.constant 0 : i32
    %c0_i32_2 = arith.constant 0 : i32
    return %c0_i32, %c0_i32_0, %c0_i32_1 : i32, i32, i32
  }
  func.func @transform_3(%arg0: i32) -> (i32, i32) {
    %c0_i32 = arith.constant 0 : i32
    %c0_i32_0 = arith.constant 0 : i32
    %c0_i32_1 = arith.constant 0 : i32
    return %c0_i32, %c0_i32_0 : i32, i32
  }
  func.func @transform_4(%arg0: i32) -> (i32, i32) {
    %c0_i32 = arith.constant 0 : i32
    %c0_i32_0 = arith.constant 0 : i32
    %c0_i32_1 = arith.constant 0 : i32
    return %c0_i32, %c0_i32_0 : i32, i32
  }
  func.func @transform_5(%arg0: i32) -> (i32, i32, i32) {
    %c0_i32 = arith.constant 0 : i32
    %c0_i32_0 = arith.constant 0 : i32
    %c0_i32_1 = arith.constant 0 : i32
    %c0_i32_2 = arith.constant 0 : i32
    return %c0_i32, %c0_i32_0, %c0_i32_1 : i32, i32, i32
  }
  func.func @transform_6(%arg0: i32) -> (i32, i32, i32) {
    %c0_i32 = arith.constant 0 : i32
    %c0_i32_0 = arith.constant 0 : i32
    %c0_i32_1 = arith.constant 0 : i32
    %c0_i32_2 = arith.constant 0 : i32
    return %c0_i32, %c0_i32_0, %c0_i32_1 : i32, i32, i32
  }
  func.func @transform_7(%arg0: i32) -> (i32, i32, i32) {
    %c0_i32 = arith.constant 0 : i32
    %c0_i32_0 = arith.constant 0 : i32
    %c0_i32_1 = arith.constant 0 : i32
    %c0_i32_2 = arith.constant 0 : i32
    return %c0_i32, %c0_i32_0, %c0_i32_1 : i32, i32, i32
  }
  func.func @transform_8(%arg0: i32) -> (i32, i32, i32) {
    %c0_i32 = arith.constant 0 : i32
    %c0_i32_0 = arith.constant 0 : i32
    %c0_i32_1 = arith.constant 0 : i32
    %c0_i32_2 = arith.constant 0 : i32
    return %c0_i32, %c0_i32_0, %c0_i32_1 : i32, i32, i32
  }
  func.func @transform_9(%arg0: i32) -> (i32, i32) {
    %c0_i32 = arith.constant 0 : i32
    %c0_i32_0 = arith.constant 0 : i32
    %c0_i32_1 = arith.constant 0 : i32
    return %c0_i32, %c0_i32_0 : i32, i32
  }
  func.func @transform_10(%arg0: i32) -> (i32, i32) {
    %c0_i32 = arith.constant 0 : i32
    %c0_i32_0 = arith.constant 0 : i32
    %c0_i32_1 = arith.constant 0 : i32
    return %c0_i32, %c0_i32_0 : i32, i32
  }
}

</mosaic_0001>

<bundles_post_ra>
// kernel: tpu_custom_call.1
= control target key start
LH: loop header
LB: loop body
LE: loop exit
PB: predicated region body
PF: predicated region fallthrough
CT: control target
= control target key end

     0   :  { %v8811_v1 = vmov 0.0   ;;  %vm95_vm0 = vcmask 523264   ;;  %s12305_s0 = inlined_call_operand.vmem [shape: f32[32,192], index: 0, kind: input, shape index: {}]   ;;  %s12306_s1 = inlined_call_operand.vmem [shape: f32[192,32], index: 1, kind: input, shape index: {}]   ;;  %s12307_s2 = inlined_call_operand.vmem [shape: f32[2,128,128], index: 2, kind: input, shape index: {}]   ;;  %s12308_s3 = inlined_call_operand.vmem [shape: f32[32,128], index: 3, kind: input, shape index: {}]   ;;  %s12309_s4 = inlined_call_operand.vmem [shape: f32[128,128], index: 4, kind: input, shape index: {}]   ;;  %s12310_s5 = inlined_call_operand.vmem [shape: f32[16,128,8], index: 5, kind: input, shape index: {}]   ;;  %s12311_s6 = inlined_call_operand.vmem [shape: f32[4,128,32], index: 6, kind: input, shape index: {}]   ;;  %s12312_s7 = inlined_call_operand.vmem [shape: f32[2,33,256], index: 7, kind: input, shape index: {}]   ;;  %s12313_s8 = inlined_call_operand.vmem [shape: f32[2,129,32], index: 8, kind: input, shape index: {}]   ;;  %s12314_s9 = inlined_call_operand.vmem [shape: f32[17,32], index: 9, kind: input, shape index: {}]   ;;  %s12315_s10 = inlined_call_operand.hbm [shape: f32[32,32], index: 10, kind: output, shape index: {}]  }
   0x1   :  { %v82_v0 = vld [vmem:[%s12306_s1 + $0x78] sm:$0xff]  ;;  %108 = vmatprep.subr.mxu0 %v8811_v1  ;;  %v81_v2 = vld [vmem:[%s12306_s1 + $0x70] sm:$0xff]  ;;  %v80_v3 = vld [vmem:[%s12306_s1 + $0x68] sm:$0xff] }
   0x2   :  { %109 = vmatpush1.msra.mxu0 %v82_v0  ;;  %v79_v4 = vld [vmem:[%s12306_s1 + $0x60] sm:$0xff]  ;;  %v78_v5 = vld [vmem:[%s12306_s1 + $0x58] sm:$0xff]  ;;  %v60_v6 = vld [vmem:[%s12305_s0 + $0x8] sm:$0xff] }
   0x3   :  { %110 = vmatprep.subr.mxu0 %v8811_v1  ;;  %v77_v7 = vld [vmem:[%s12306_s1 + $0x50] sm:$0xff]  ;;  %5911 = vmatprep.mubr.msk.f32.mxu0 %vm95_vm0, %v60_v6  ;;  %v76_v8 = vld [vmem:[%s12306_s1 + $0x48] sm:$0xff] }
   0x4   :  { %111 = vmatpush1.msra.mxu0 %v81_v2 }
   0x5   :  { %112 = vmatprep.subr.mxu0 %v8811_v1 }
   0x6   :  { %113 = vmatpush1.msra.mxu0 %v80_v3 }
   0x7   :  { %114 = vmatprep.subr.mxu0 %v8811_v1 }
   0x8   :  { %115 = vmatpush1.msra.mxu0 %v79_v4 }
   0x9   :  { %116 = vmatprep.subr.mxu0 %v8811_v1 }
   0xa   :  { %117 = vmatpush1.msra.mxu0 %v78_v5 }
   0xb   :  { %118 = vmatprep.subr.mxu0 %v8811_v1 }
   0xc   :  { %15 = vsyncpa [#allocation3], 0  ;;  %119 = vmatpush1.msra.mxu0 %v77_v7  ;;  %v75_v9 = vld [vmem:[%s12306_s1 + $0x40] sm:$0xff]  ;;  %v74_v10 = vld [vmem:[%s12306_s1 + $0x38] sm:$0xff]  ;;  %v91_v33 = vlaneseq  ;;  %vm292_vm1 = vcmask 261120   ;;  %vm910_vm2 = vcmask 64512  }
   0xd   :  { %120 = vmatprep.subr.mxu0 %v8811_v1  ;;  %v73_v11 = vld [vmem:[%s12306_s1 + $0x30] sm:$0xff]  ;;  %v72_v12 = vld [vmem:[%s12306_s1 + $0x28] sm:$0xff]  ;;  %v71_v13 = vld [vmem:[%s12306_s1 + $0x20] sm:$0xff]  ;;  %s8812_s19 = smov [#allocation2]  }
   0xe   :  { %121 = vmatpush1.msra.mxu0 %v76_v8  ;;  %v70_v14 = vld [vmem:[%s12306_s1 + $0x18] sm:$0xff]  ;;  %v69_v15 = vld [vmem:[%s12306_s1 + $0x10] sm:$0xff]  ;;  %v68_v16 = vld [vmem:[%s12306_s1 + $0x8] sm:$0xff]  ;;  %v8994_v34 = vshrl.u32 %v91_v33, 7  ;;  %s5900_s20 = sshll.u32 %s8812_s19, 4  ;;  %s5901_s20 = int_to_ptr.vmem [resolvable:$true] %s5900_s20 }
   0xf   :  { %122 = vmatprep.subr.mxu0 %v8811_v1  ;;  %v67_v17 = vld [vmem:[%s12306_s1] sm:$0xff]  ;;  %v90_v18 = vld [vmem:[%s12306_s1 + $0xb8] sm:$0xff]  ;;  %v89_v19 = vld [vmem:[%s12306_s1 + $0xb0] sm:$0xff]  ;;  %p8794_p1 = scmp.lt.s32.totalorder %s5901_s20, %s5901_s20 }
  0x10   :  { %123 = vmatpush1.msra.mxu0 %v75_v9  ;;  %v88_v20 = vld [vmem:[%s12306_s1 + $0xa8] sm:$0xff]  ;;  %v87_v21 = vld [vmem:[%s12306_s1 + $0xa0] sm:$0xff]  ;;  %v86_v22 = vld [vmem:[%s12306_s1 + $0x98] sm:$0xff]  ;;  %v93_v35 = vsub.s32 0, %v8994_v34 }
  0x11   :  { %124 = vmatprep.subr.mxu0 %v8811_v1  ;;  %v85_v23 = vld [vmem:[%s12306_s1 + $0x90] sm:$0xff]  ;;  %v84_v24 = vld [vmem:[%s12306_s1 + $0x88] sm:$0xff]  ;;  %v83_v25 = vld [vmem:[%s12306_s1 + $0x80] sm:$0xff] }
  0x12   :  { %125 = vmatpush1.msra.mxu0 %v74_v10  ;;  %v59_v26 = vld [vmem:[%s12305_s0] sm:$0xff]  ;;  %v62_v27 = vld [vmem:[%s12305_s0 + $0x18] sm:$0xff]  ;;  %v61_v28 = vld [vmem:[%s12305_s0 + $0x10] sm:$0xff] }
  0x13   :  { %126 = vmatprep.subr.mxu0 %v8811_v1  ;;  %v64_v29 = vld [vmem:[%s12305_s0 + $0x28] sm:$0xff]  ;;  %v63_v30 = vld [vmem:[%s12305_s0 + $0x20] sm:$0xff]  ;;  %v66_v31 = vld [vmem:[%s12305_s0 + $0x38] sm:$0xff] }
  0x14   :  { %127 = vmatpush1.msra.mxu0 %v73_v11  ;;  %v65_v32 = vld [vmem:[%s12305_s0 + $0x30] sm:$0xff]  ;;  %v9000_v36 = vld [vmem:[%s12314_s9] sm:$0xff]  ;;  %v9048_v11 = vld [vmem:[%s12308_s3 + $0x18] sm:$0xff] }
  0x15   :  { %128 = vmatprep.subr.mxu0 %v8811_v1  ;;  %v94_v37 = vrot.slane %v9000_v36, %v93_v35  ;;  %7117 = vmatprep.subr.mxu1 %v9048_v11 }
  0x16   :  { %129 = vmatpush1.msra.mxu0 %v72_v12  ;;  %v41_v12 = vld [vmem:[%s12308_s3 + $0x10] sm:$0xff]  ;;  %7118 = vmatpush3.msra.mxu1 %v9048_v11 }
  0x17   :  { %130 = vmatprep.subr.mxu0 %v8811_v1  ;;  %7119 = vmatprep.subr.mxu1 %v41_v12 }
  0x18   :  { %131 = vmatpush1.msra.mxu0 %v71_v13  ;;  %v40_v13 = vld [vmem:[%s12308_s3 + $0x8] sm:$0xff]  ;;  %7120 = vmatpush3.msra.mxu1 %v41_v12  ;;  %v216_v12 = vld [vmem:[%s12310_s5 + $0x38] sm:$0xff] }
  0x19   :  { %132 = vmatprep.subr.mxu0 %v8811_v1  ;;  %7121 = vmatprep.subr.mxu1 %v40_v13 }
  0x1a   :  { %133 = vmatpush1.msra.mxu0 %v70_v14  ;;  %7122 = vmatpush3.msra.mxu1 %v40_v13  ;;  %v39_v14 = vld [vmem:[%s12308_s3] sm:$0xff]  ;;  %v215_v13 = vld [vmem:[%s12310_s5 + $0x30] sm:$0xff] }
  0x1b   :  { %134 = vmatprep.subr.mxu0 %v8811_v1  ;;  %7123 = vmatprep.subr.mxu1 %v39_v14 }
  0x1c   :  { %135 = vmatpush1.msra.mxu0 %v69_v15  ;;  %7124 = vmatpush3.msra.mxu1 %v39_v14  ;;  %v9064_v15 = vld [vmem:[%s12310_s5 + $0x78] sm:$0xff]  ;;  %v214_v14 = vld [vmem:[%s12310_s5 + $0x28] sm:$0xff] }
  0x1d   :  { %136 = vmatprep.subr.mxu0 %v8811_v1  ;;  %7131 = vmatprep.subr.mxu1 %v9064_v15 }
  0x1e   :  { %137 = vmatpush1.msra.mxu0 %v68_v16  ;;  %v291_v16 = vld [vmem:[%s12311_s6 + $0x78] sm:$0xff] }
  0x1f   :  { %138 = vmatprep.subr.mxu0 %v8811_v1 }
  0x20   :  { %139 = vmatpush1.msra.mxu0 %v67_v17  ;;  %v290_v17 = vld [vmem:[%s12311_s6 + $0x70] sm:$0xff] }
  0x21   :  { %156 = vmatprep.subr.mxu0 %v8811_v1 }
  0x22   :  { %157 = vmatpush2.msra.mxu0 %v90_v18  ;;  %v289_v18 = vld [vmem:[%s12311_s6 + $0x68] sm:$0xff] }
  0x23   :  { %158 = vmatprep.subr.mxu0 %v8811_v1 }
  0x24   :  { %159 = vmatpush2.msra.mxu0 %v89_v19  ;;  %v288_v19 = vld [vmem:[%s12311_s6 + $0x60] sm:$0xff] }
  0x25   :  { %160 = vmatprep.subr.mxu0 %v8811_v1 }
  0x26   :  { %161 = vmatpush2.msra.mxu0 %v88_v20  ;;  %v287_v20 = vld [vmem:[%s12311_s6 + $0x58] sm:$0xff] }
  0x27   :  { %162 = vmatprep.subr.mxu0 %v8811_v1 }
  0x28   :  { %163 = vmatpush2.msra.mxu0 %v87_v21  ;;  %v286_v21 = vld [vmem:[%s12311_s6 + $0x50] sm:$0xff] }
  0x29   :  { %164 = vmatprep.subr.mxu0 %v8811_v1 }
  0x2a   :  { %165 = vmatpush2.msra.mxu0 %v86_v22  ;;  %v285_v22 = vld [vmem:[%s12311_s6 + $0x48] sm:$0xff] }
  0x2b   :  { %166 = vmatprep.subr.mxu0 %v8811_v1 }
  0x2c   :  { %167 = vmatpush2.msra.mxu0 %v85_v23  ;;  %v284_v23 = vld [vmem:[%s12311_s6 + $0x40] sm:$0xff] }
  0x2d   :  { %168 = vmatprep.subr.mxu0 %v8811_v1 }
  0x2e   :  { %169 = vmatpush2.msra.mxu0 %v84_v24  ;;  %v283_v24 = vld [vmem:[%s12311_s6 + $0x38] sm:$0xff] }
  0x2f   :  { %170 = vmatprep.subr.mxu0 %v8811_v1 }
  0x30   :  { %171 = vmatpush2.msra.mxu0 %v83_v25  ;;  %v282_v25 = vld [vmem:[%s12311_s6 + $0x30] sm:$0xff] }
  0x31   :  { %173 = vmatmul.mubr.f32.vlgmr.msra.gmra.mxu0 %v59_v26  ;;  %7243 = vmatprep.subr.mxu0 %v291_v16  ;;  %v281_v26 = vld [vmem:[%s12311_s6 + $0x28] sm:$0xff] }
  0x32   :  { %5912 = vmatprep.mubr.msk.f32.mxu0 %vm95_vm0, %v62_v27  ;;  %7244 = vmatpush3.msra.mxu0 %v291_v16  ;;  %v280_v27 = vld [vmem:[%s12311_s6 + $0x20] sm:$0xff]  ;;  %v212_v16 = vld [vmem:[%s12310_s5 + $0x18] sm:$0xff] }
  0x33   :  { %7245 = vmatprep.subr.mxu0 %v290_v17 }
  0x34   :  { %7246 = vmatpush3.msra.mxu0 %v290_v17  ;;  %v211_v17 = vld [vmem:[%s12310_s5 + $0x10] sm:$0xff] }
  0x35   :  { %178 = vmatmul.mubr.f32.gmra.mxu0 %v61_v28  ;;  %7247 = vmatprep.subr.mxu0 %v289_v18  ;;  %v279_v28 = vld [vmem:[%s12311_s6 + $0x18] sm:$0xff] }
  0x36   :  { %5913 = vmatprep.mubr.msk.f32.mxu0 %vm95_vm0, %v64_v29  ;;  %7248 = vmatpush3.msra.mxu0 %v289_v18  ;;  %v278_v18 = vld [vmem:[%s12311_s6 + $0x10] sm:$0xff] }
  0x37   :  { %7249 = vmatprep.subr.mxu0 %v288_v19 }
  0x38   :  { %7250 = vmatpush3.msra.mxu0 %v288_v19  ;;  %v210_v19 = vld [vmem:[%s12310_s5 + $0x8] sm:$0xff] }
  0x39   :  { %183 = vmatmul.mubr.f32.gmra.mxu0 %v63_v30  ;;  %7251 = vmatprep.subr.mxu0 %v287_v20 }
  0x3a   :  { %5914 = vmatprep.mubr.msk.f32.mxu0 %vm95_vm0, %v66_v31  ;;  %7252 = vmatpush3.msra.mxu0 %v287_v20  ;;  %v277_v20 = vld [vmem:[%s12311_s6 + $0x8] sm:$0xff] }
  0x3b   :  { %7253 = vmatprep.subr.mxu0 %v286_v21 }
  0x3c   :  { %7254 = vmatpush3.msra.mxu0 %v286_v21  ;;  %v209_v21 = vld [vmem:[%s12310_s5] sm:$0xff] }
  0x3d   :  { %188 = vmatmul.mubr.f32.gmra.mxu0 %v65_v32  ;;  %7255 = vmatprep.subr.mxu0 %v285_v22 }
  0x3e   :  { %7256 = vmatpush3.msra.mxu0 %v285_v22  ;;  %v276_v22 = vld [vmem:[%s12311_s6] sm:$0xff] }
  0x3f   :  { %7257 = vmatprep.subr.mxu0 %v284_v23 }
  0x40   :  { %7258 = vmatpush3.msra.mxu0 %v284_v23  ;;  %v5930_v23 = vld [vmem:[%s12310_s5 + $0xf8] sm:$0xff] }
  0x41   :  { %7259 = vmatprep.subr.mxu0 %v283_v24 }
  0x42   :  { %7260 = vmatpush3.msra.mxu0 %v283_v24 }
  0x43   :  { %7261 = vmatprep.subr.mxu0 %v282_v25 }
  0x44   :  { %7262 = vmatpush3.msra.mxu0 %v282_v25  ;;  %v43_v25 = vld [vmem:[%s12309_s4] sm:$0xff] }
  0x45   :  { %7263 = vmatprep.subr.mxu0 %v281_v26 }
  0x46   :  { %7264 = vmatpush3.msra.mxu0 %v281_v26  ;;  %v44_v26 = vld [vmem:[%s12309_s4 + $0x8] sm:$0xff] }
  0x47   :  { %7265 = vmatprep.subr.mxu0 %v280_v27 }
  0x48   :  { %7266 = vmatpush3.msra.mxu0 %v280_v27 }
  0x49   :  { %7267 = vmatprep.subr.mxu0 %v279_v28 }
  0x4a   :  { %7268 = vmatpush3.msra.mxu0 %v279_v28 }
  0x4b   :  { %7269 = vmatprep.subr.mxu0 %v278_v18 }
  0x4c   :  { %7270 = vmatpush3.msra.mxu0 %v278_v18  ;;  %v5916_v18 = vld [vmem:[%s12310_s5 + $0x88] sm:$0xff] }
  0x4d   :  { %7271 = vmatprep.subr.mxu0 %v277_v20 }
  0x4e   :  { %7272 = vmatpush3.msra.mxu0 %v277_v20  ;;  %v5915_v20 = vld [vmem:[%s12310_s5 + $0x80] sm:$0xff] }
  0x4f   :  { %7273 = vmatprep.subr.mxu0 %v276_v22 }
  0x50   :  { %7274 = vmatpush3.msra.mxu0 %v276_v22  ;;  %v5931_v22 = vld [vmem:[%s12310_s5 + $0x100] sm:$0xff] }
  0xf1   :  { %v174_v38 = vpop.f32.mrf.mxu0 }
  0xf2   :  { %v9005_v39 = vadd.f32 %v174_v38, %v94_v37 }
  0xf3   :  { %v176_v40 = vpop.f32.mrf.mxu0 }
  0xf4   :  { %v293_v41 = vsel %vm292_vm1, %v9005_v39, 0.0 }
  0xf5   :  { %v179_v42 = vpop.f32.mrf.mxu0  ;;  %294 = vadd.xlane.f32.xlu0 %v293_v41 }
  0xf6   :  { %v9009_v43 = vadd.f32 %v179_v42, %v94_v37 }
  0xf7   :  { %v181_v44 = vpop.f32.mrf.mxu0 }
  0xf8   :  { %v296_v45 = vsel %vm292_vm1, %v9009_v43, 0.0 }
  0xf9   :  { %v184_v46 = vpop.f32.mrf.mxu0  ;;  %297 = vadd.xlane.f32.xlu0 %v296_v45  ;;  %v348_v45 = vsub.s32 1, %v8994_v34 }
  0xfa   :  { %v9013_v47 = vadd.f32 %v184_v46, %v94_v37 }
  0xfb   :  { %v186_v48 = vpop.f32.mrf.mxu0 }
  0xfc   :  { %v299_v49 = vsel %vm292_vm1, %v9013_v47, 0.0  ;;  %v356_v48 = vsub.s32 2, %v8994_v34 }
  0xfd   :  { %v189_v50 = vpop.f32.mrf.mxu0  ;;  %300 = vadd.xlane.f32.xlu1 %v299_v49  ;;  %v349_v49 = vrot.slane %v9000_v36, %v348_v45 }
  0xfe   :  { %v9017_v51 = vadd.f32 %v189_v50, %v94_v37 }
  0xff   :  { %v191_v52 = vpop.f32.mrf.mxu0 }
 0x100   :  { %v302_v53 = vsel %vm292_vm1, %v9017_v51, 0.0 }
 0x101   :  { %303 = vadd.xlane.f32.xlu1 %v302_v53  ;;  %v357_v53 = vrot.slane %v9000_v36, %v356_v48 }
 0x17e   :  { %v295_v54 = vpop.xlane.xlu0 %294 }
 0x17f   :  { %v306_v55 = vmul.f32 0.03125, %v295_v54 }
 0x181   :  { %v9022_v56 = vsub.f32 %v9005_v39, %v306_v55 }
 0x182   :  { %v298_v57 = vpop.xlane.xlu0 %297 }
 0x183   :  { %v307_v58 = vmul.f32 0.03125, %v298_v57  ;;  %v314_v59 = vmul.f32 %v9022_v56, %v9022_v56 }
 0x185   :  { %v9027_v60 = vsub.f32 %v9009_v43, %v307_v58  ;;  %v318_v61 = vsel %vm292_vm1, %v314_v59, 0.0 }
 0x186   :  { %v301_v62 = vpop.xlane.xlu1 %300  ;;  %319 = vadd.xlane.f32.xlu0 %v318_v61 }
 0x187   :  { %v308_v63 = vmul.f32 0.03125, %v301_v62  ;;  %v315_v0 = vmul.f32 %v9027_v60, %v9027_v60 }
 0x189   :  { %v9033_v2 = vsub.f32 %v9013_v47, %v308_v63  ;;  %v321_v3 = vsel %vm292_vm1, %v315_v0, 0.0 }
 0x18a   :  { %v304_v4 = vpop.xlane.xlu1 %303  ;;  %322 = vadd.xlane.f32.xlu1 %v321_v3 }
 0x18b   :  { %v309_v5 = vmul.f32 0.03125, %v304_v4  ;;  %v316_v6 = vmul.f32 %v9033_v2, %v9033_v2 }
 0x18d   :  { %v9039_v7 = vsub.f32 %v9017_v51, %v309_v5  ;;  %v324_v8 = vsel %vm292_vm1, %v316_v6, 0.0  ;;  %v220_v6 = vld [vmem:[%s12310_s5 + $0x58] sm:$0xff] }
 0x18e   :  { %325 = vadd.xlane.f32.xlu0 %v324_v8 }
 0x18f   :  { %v317_v9 = vmul.f32 %v9039_v7, %v9039_v7 }
 0x191   :  { %v327_v10 = vsel %vm292_vm1, %v317_v9, 0.0  ;;  %v218_v9 = vld [vmem:[%s12310_s5 + $0x48] sm:$0xff] }
 0x192   :  { %328 = vadd.xlane.f32.xlu1 %v327_v10  ;;  %v217_v10 = vld [vmem:[%s12310_s5 + $0x40] sm:$0xff] }
 0x20f   :  { %v320_v29 = vpop.xlane.xlu0 %319 }
 0x210   :  { %v330_v30 = vmul.f32 0.03125, %v320_v29 }
 0x212   :  { %v334_v31 = vadd.f32 1e-05, %v330_v30  ;;  %v5929_v30 = vld [vmem:[%s12310_s5 + $0xf0] sm:$0xff] }
 0x213   :  { %v323_v32 = vpop.xlane.xlu1 %322 }
 0x214   :  { %8373 = vrsqrt.f32 %v334_v31  ;;  %v331_v33 = vmul.f32 0.03125, %v323_v32  ;;  %v5928_v31 = vld [vmem:[%s12310_s5 + $0xe8] sm:$0xff] }
 0x216   :  { %v335_v37 = vadd.f32 1e-05, %v331_v33  ;;  %v45_v33 = vld [vmem:[%s12309_s4 + $0x10] sm:$0xff] }
 0x217   :  { %v326_v38 = vpop.xlane.xlu0 %325 }
 0x218   :  { %8375 = vrsqrt.f32 %v335_v37  ;;  %v332_v40 = vmul.f32 0.03125, %v326_v38  ;;  %v46_v37 = vld [vmem:[%s12309_s4 + $0x18] sm:$0xff]  ;;  %v5927_v38 = vld [vmem:[%s12310_s5 + $0xe0] sm:$0xff] }
 0x21a   :  { %v336_v41 = vadd.f32 1e-05, %v332_v40 }
 0x21b   :  { %v329_v42 = vpop.xlane.xlu1 %328 }
 0x21c   :  { %8377 = vrsqrt.f32 %v336_v41  ;;  %v333_v44 = vmul.f32 0.03125, %v329_v42  ;;  %v47_v41 = vld [vmem:[%s12309_s4 + $0x20] sm:$0xff] }
 0x21e   :  { %v337_v46 = vadd.f32 1e-05, %v333_v44 }
 0x220   :  { %8379 = vrsqrt.f32 %v337_v46 }
 0x221   :  { %v8374_v50 = vpop.eup %8373 }
 0x222   :  { %v342_v52 = vmul.f32 %v8374_v50, %v9022_v56  ;;  %v223_v56 = vld [vmem:[%s12310_s5 + $0x70] sm:$0xff]  ;;  %v5926_v50 = vld [vmem:[%s12310_s5 + $0xd8] sm:$0xff] }
 0x224   :  { %v350_v54 = vmul.f32 %v349_v49, %v342_v52  ;;  %v49_v52 = vld [vmem:[%s12309_s4 + $0x30] sm:$0xff] }
 0x225   :  { %v8376_v55 = vpop.eup %8375 }
 0x226   :  { %v358_v57 = vadd.f32 %v357_v53, %v350_v54  ;;  %v343_v58 = vmul.f32 %v8376_v55, %v9027_v60  ;;  %v222_v60 = vld [vmem:[%s12310_s5 + $0x68] sm:$0xff]  ;;  %v5925_v55 = vld [vmem:[%s12310_s5 + $0xd0] sm:$0xff] }
 0x228   :  { %7125 = vmatprep.mubr.msk.f32.mxu1 %vm292_vm1, %v358_v57  ;;  %v351_v59 = vmul.f32 %v349_v49, %v343_v58  ;;  %v50_v57 = vld [vmem:[%s12309_s4 + $0x38] sm:$0xff]  ;;  %v5924_v58 = vld [vmem:[%s12310_s5 + $0xc8] sm:$0xff] }
 0x229   :  { %v8378_v61 = vpop.eup %8377 }
 0x22a   :  { %v359_v62 = vadd.f32 %v357_v53, %v351_v59  ;;  %v344_v63 = vmul.f32 %v8378_v61, %v9033_v2  ;;  %v221_v2 = vld [vmem:[%s12310_s5 + $0x60] sm:$0xff] }
 0x22b   :  { %v51_v59 = vld [vmem:[%s12309_s4 + $0x40] sm:$0xff] }
 0x22c   :  { %7126 = vmatmul.mubr.msk.f32.vlgmr.msra.gmra.mxu1 %vm292_vm1, %v359_v62  ;;  %v352_v0 = vmul.f32 %v349_v49, %v344_v63  ;;  %v5923_v62 = vld [vmem:[%s12310_s5 + $0xc0] sm:$0xff]  ;;  %v52_v63 = vld [vmem:[%s12309_s4 + $0x48] sm:$0xff] }
 0x22d   :  { %v8380_v36 = vpop.eup %8379  ;;  %7132 = vmatpush3.msra.mxu1 %v9064_v15  ;;  %v213_v15 = vld [vmem:[%s12310_s5 + $0x20] sm:$0xff] }
 0x22e   :  { %v360_v3 = vadd.f32 %v357_v53, %v352_v0  ;;  %v345_v4 = vmul.f32 %v8380_v36, %v9039_v7  ;;  %7133 = vmatprep.subr.mxu1 %v223_v56  ;;  %v219_v7 = vld [vmem:[%s12310_s5 + $0x50] sm:$0xff]  ;;  %v5922_v0 = vld [vmem:[%s12310_s5 + $0xb8] sm:$0xff] }
 0x22f   :  { %7134 = vmatpush3.msra.mxu1 %v223_v56  ;;  %v53_v36 = vld [vmem:[%s12309_s4 + $0x50] sm:$0xff] }
 0x230   :  { %7128 = vmatprep.mubr.msk.f32.mxu1 %vm292_vm1, %v360_v3  ;;  %v353_v5 = vmul.f32 %v349_v49, %v345_v4  ;;  %7135 = vmatprep.subr.mxu1 %v222_v60  ;;  %v48_v49 = vld [vmem:[%s12309_s4 + $0x28] sm:$0xff]  ;;  %v5921_v3 = vld [vmem:[%s12310_s5 + $0xb0] sm:$0xff]  ;;  %v54_v4 = vld [vmem:[%s12309_s4 + $0x58] sm:$0xff] }
 0x231   :  { %7136 = vmatpush3.msra.mxu1 %v222_v60 }
 0x232   :  { %v361_v8 = vadd.f32 %v357_v53, %v353_v5  ;;  %7137 = vmatprep.subr.mxu1 %v221_v2  ;;  %v5920_v5 = vld [vmem:[%s12310_s5 + $0xa8] sm:$0xff] }
 0x233   :  { %7138 = vmatpush3.msra.mxu1 %v221_v2 }
 0x234   :  { %7129 = vmatmul.mubr.msk.f32.gmra.mxu1 %vm292_vm1, %v361_v8  ;;  %7139 = vmatprep.subr.mxu1 %v220_v6 }
 0x235   :  { %7140 = vmatpush3.msra.mxu1 %v220_v6  ;;  %v55_v6 = vld [vmem:[%s12309_s4 + $0x60] sm:$0xff] }
 0x236   :  { %7141 = vmatprep.subr.mxu1 %v219_v7 }
 0x237   :  { %7142 = vmatpush3.msra.mxu1 %v219_v7  ;;  %v5919_v7 = vld [vmem:[%s12310_s5 + $0xa0] sm:$0xff] }
 0x238   :  { %7143 = vmatprep.subr.mxu1 %v218_v9 }
 0x239   :  { %7144 = vmatpush3.msra.mxu1 %v218_v9  ;;  %v56_v9 = vld [vmem:[%s12309_s4 + $0x68] sm:$0xff] }
 0x23a   :  { %7145 = vmatprep.subr.mxu1 %v217_v10 }
 0x23b   :  { %7146 = vmatpush3.msra.mxu1 %v217_v10 }
 0x23c   :  { %7147 = vmatprep.subr.mxu1 %v216_v12 }
 0x23d   :  { %7148 = vmatpush3.msra.mxu1 %v216_v12  ;;  %v5918_v12 = vld [vmem:[%s12310_s5 + $0x98] sm:$0xff] }
 0x23e   :  { %7149 = vmatprep.subr.mxu1 %v215_v13 }
 0x23f   :  { %7150 = vmatpush3.msra.mxu1 %v215_v13  ;;  %v57_v13 = vld [vmem:[%s12309_s4 + $0x70] sm:$0xff] }
 0x240   :  { %7151 = vmatprep.subr.mxu1 %v214_v14 }
 0x241   :  { %7152 = vmatpush3.msra.mxu1 %v214_v14 }
 0x242   :  { %7153 = vmatprep.subr.mxu1 %v213_v15 }
 0x243   :  { %7154 = vmatpush3.msra.mxu1 %v213_v15  ;;  %v5917_v15 = vld [vmem:[%s12310_s5 + $0x90] sm:$0xff] }
 0x244   :  { %7155 = vmatprep.subr.mxu1 %v212_v16 }
 0x245   :  { %7156 = vmatpush3.msra.mxu1 %v212_v16  ;;  %v58_v16 = vld [vmem:[%s12309_s4 + $0x78] sm:$0xff] }
 0x246   :  { %7157 = vmatprep.subr.mxu1 %v211_v17 }
 0x247   :  { %7158 = vmatpush3.msra.mxu1 %v211_v17 }
 0x248   :  { %7159 = vmatprep.subr.mxu1 %v210_v19 }
 0x249   :  { %7160 = vmatpush3.msra.mxu1 %v210_v19 }
 0x24a   :  { %7161 = vmatprep.subr.mxu1 %v209_v21 }
 0x24b   :  { %7162 = vmatpush3.msra.mxu1 %v209_v21 }
 0x24c   :  { %7187 = vmatprep.subr.mxu1 %v5930_v23 }
 0x2ec   :  { %v9180_v24 = vpop.f32.mrf.mxu1 }
 0x2ed   :  { %v9194_v29 = vmul.f32 %v9180_v24, %v44_v26  ;;  %v9247_v53 = vmul.f32 %v9180_v24, %v48_v49  ;;  %v468_v60 = vmul.f32 %v9180_v24, %v52_v63  ;;  %v472_v14 = vmul.f32 %v9180_v24, %v56_v9 }
 0x2ee   :  { %v9188_v27 = vpop.f32.mrf.mxu1 }
 0x2ef   :  { %v9191_v28 = vmul.f32 %v9188_v27, %v43_v25  ;;  %v9231_v46 = vmul.f32 %v9188_v27, %v47_v41  ;;  %v9279_v56 = vmul.f32 %v9188_v27, %v51_v59  ;;  %v471_v10 = vmul.f32 %v9188_v27, %v55_v6 }
 0x2f1   :  { %7163 = vmatprep.mubr.f32.mxu1 %v9191_v28  ;;  %7275 = vmatprep.mubr.f32.mxu0 %v9191_v28 }
 0x2f2   :  { %7164 = vmatmul.mubr.f32.vlgmr.msra.gmra.mxu1 %v9194_v29  ;;  %7276 = vmatmul.mubr.f32.vlgmr.msra.gmra.mxu0 %v9194_v29 }
 0x2f3   :  { %7188 = vmatpush3.msra.mxu1 %v5930_v23 }
 0x2f4   :  { %v9206_v32 = vpop.f32.mrf.mxu1  ;;  %7189 = vmatprep.subr.mxu1 %v5929_v30 }
 0x2f5   :  { %7190 = vmatpush3.msra.mxu1 %v5929_v30  ;;  %v9226_v44 = vmul.f32 %v9206_v32, %v46_v37  ;;  %v9269_v61 = vmul.f32 %v9206_v32, %v50_v57  ;;  %v470_v8 = vmul.f32 %v9206_v32, %v54_v4  ;;  %v474_v19 = vmul.f32 %v9206_v32, %v58_v16 }
 0x2f6   :  { %v9217_v40 = vpop.f32.mrf.mxu1  ;;  %7191 = vmatprep.subr.mxu1 %v5928_v31 }
 0x2f7   :  { %v9223_v42 = vmul.f32 %v9217_v40, %v45_v33  ;;  %7192 = vmatpush3.msra.mxu1 %v5928_v31  ;;  %v9250_v54 = vmul.f32 %v9217_v40, %v49_v52  ;;  %v469_v2 = vmul.f32 %v9217_v40, %v53_v36  ;;  %v473_v17 = vmul.f32 %v9217_v40, %v57_v13 }
 0x2f8   :  { %7193 = vmatprep.subr.mxu1 %v5927_v38 }
 0x2f9   :  { %7166 = vmatprep.mubr.f32.mxu1 %v9223_v42  ;;  %7278 = vmatprep.mubr.f32.mxu0 %v9223_v42 }
 0x2fa   :  { %7167 = vmatmul.mubr.f32.gmra.mxu1 %v9226_v44  ;;  %7279 = vmatmul.mubr.f32.gmra.mxu0 %v9226_v44 }
 0x2fb   :  { %7169 = vmatprep.mubr.f32.mxu1 %v9231_v46  ;;  %7281 = vmatprep.mubr.f32.mxu0 %v9231_v46 }
 0x2fc   :  { %7194 = vmatpush3.msra.mxu1 %v5927_v38 }
 0x2fd   :  { %7195 = vmatprep.subr.mxu1 %v5926_v50 }
 0x2fe   :  { %7170 = vmatmul.mubr.f32.gmra.mxu1 %v9247_v53  ;;  %7282 = vmatmul.mubr.f32.gmra.mxu0 %v9247_v53 }
 0x2ff   :  { %7196 = vmatpush3.msra.mxu1 %v5926_v50  ;;  %7172 = vmatprep.mubr.f32.mxu1 %v9250_v54 }
 0x300   :  { %7197 = vmatprep.subr.mxu1 %v5925_v55  ;;  %7284 = vmatprep.mubr.f32.mxu0 %v9250_v54 }
 0x301   :  { %7198 = vmatpush3.msra.mxu1 %v5925_v55 }
 0x302   :  { %7199 = vmatprep.subr.mxu1 %v5924_v58  ;;  %7173 = vmatmul.mubr.f32.gmra.mxu1 %v9269_v61 }
 0x303   :  { %7200 = vmatpush3.msra.mxu1 %v5924_v58  ;;  %7285 = vmatmul.mubr.f32.gmra.mxu0 %v9269_v61 }
 0x304   :  { %7175 = vmatprep.mubr.f32.mxu1 %v9279_v56  ;;  %7201 = vmatprep.subr.mxu1 %v5923_v62 }
 0x305   :  { %7287 = vmatprep.mubr.f32.mxu0 %v9279_v56  ;;  %7202 = vmatpush3.msra.mxu1 %v5923_v62 }
 0x306   :  { %7203 = vmatprep.subr.mxu1 %v5922_v0  ;;  %7176 = vmatmul.mubr.f32.gmra.mxu1 %v468_v60 }
 0x307   :  { %7204 = vmatpush3.msra.mxu1 %v5922_v0  ;;  %7288 = vmatmul.mubr.f32.gmra.mxu0 %v468_v60 }
 0x308   :  { %7178 = vmatprep.mubr.f32.mxu1 %v469_v2  ;;  %7205 = vmatprep.subr.mxu1 %v5921_v3 }
 0x309   :  { %7290 = vmatprep.mubr.f32.mxu0 %v469_v2  ;;  %7206 = vmatpush3.msra.mxu1 %v5921_v3 }
 0x30a   :  { %7207 = vmatprep.subr.mxu1 %v5920_v5  ;;  %7179 = vmatmul.mubr.f32.gmra.mxu1 %v470_v8 }
 0x30b   :  { %7208 = vmatpush3.msra.mxu1 %v5920_v5  ;;  %7291 = vmatmul.mubr.f32.gmra.mxu0 %v470_v8 }
 0x30c   :  { %7181 = vmatprep.mubr.f32.mxu1 %v471_v10  ;;  %7209 = vmatprep.subr.mxu1 %v5919_v7 }
 0x30d   :  { %7293 = vmatprep.mubr.f32.mxu0 %v471_v10  ;;  %7210 = vmatpush3.msra.mxu1 %v5919_v7 }
 0x30e   :  { %7211 = vmatprep.subr.mxu1 %v5918_v12  ;;  %7182 = vmatmul.mubr.f32.gmra.mxu1 %v472_v14 }
 0x30f   :  { %7212 = vmatpush3.msra.mxu1 %v5918_v12  ;;  %7294 = vmatmul.mubr.f32.gmra.mxu0 %v472_v14 }
 0x310   :  { %7184 = vmatprep.mubr.f32.mxu1 %v473_v17  ;;  %7213 = vmatprep.subr.mxu1 %v5917_v15 }
 0x311   :  { %7296 = vmatprep.mubr.f32.mxu0 %v473_v17  ;;  %7214 = vmatpush3.msra.mxu1 %v5917_v15  ;;  %v5962_v15 = vld [vmem:[%s12310_s5 + $0x1f8] sm:$0xff] }
 0x312   :  { %7215 = vmatprep.subr.mxu1 %v5916_v18  ;;  %7185 = vmatmul.mubr.f32.gmra.mxu1 %v474_v19 }
 0x313   :  { %7216 = vmatpush3.msra.mxu1 %v5916_v18  ;;  %7297 = vmatmul.mubr.f32.gmra.mxu0 %v474_v19 }
 0x314   :  { %7217 = vmatprep.subr.mxu1 %v5915_v20  ;;  %7219 = vmatprep.mubr.f32.mxu1 %v9191_v28 }
 0x315   :  { %7218 = vmatpush3.msra.mxu1 %v5915_v20 }
 0x316   :  { %7220 = vmatmul.mubr.f32.vlgmr.msra.gmra.mxu1 %v9194_v29 }
 0x317   :  { %7222 = vmatprep.mubr.f32.mxu1 %v9223_v42 }
 0x31a   :  { %7223 = vmatmul.mubr.f32.gmra.mxu1 %v9226_v44 }
 0x31b   :  { %7225 = vmatprep.mubr.f32.mxu1 %v9231_v46 }
 0x31e   :  { %7226 = vmatmul.mubr.f32.gmra.mxu1 %v9247_v53 }
 0x31f   :  { %7228 = vmatprep.mubr.f32.mxu1 %v9250_v54 }
 0x322   :  { %7229 = vmatmul.mubr.f32.gmra.mxu1 %v9269_v61 }
 0x323   :  { %7231 = vmatprep.mubr.f32.mxu1 %v9279_v56 }
 0x326   :  { %7232 = vmatmul.mubr.f32.gmra.mxu1 %v468_v60 }
 0x327   :  { %7234 = vmatprep.mubr.f32.mxu1 %v469_v2 }
 0x32a   :  { %7235 = vmatmul.mubr.f32.gmra.mxu1 %v470_v8 }
 0x32b   :  { %7237 = vmatprep.mubr.f32.mxu1 %v471_v10 }
 0x32e   :  { %7238 = vmatmul.mubr.f32.gmra.mxu1 %v472_v14 }
 0x32f   :  { %7240 = vmatprep.mubr.f32.mxu1 %v473_v17  ;;  %v5961_v17 = vld [vmem:[%s12310_s5 + $0x1f0] sm:$0xff] }
 0x332   :  { %7241 = vmatmul.mubr.f32.gmra.mxu1 %v474_v19 }
 0x3b2   :  { %v9342_v21 = vpop.f32.mrf.mxu1  ;;  %v9347_v23 = vpop.f32.mrf.mxu0 }
 0x3b4   :  { %v541_v24 = vpop.f32.mrf.mxu1  ;;  %v9350_v26 = vpop.f32.mrf.mxu0 }
 0x3b5   :  { %v542_v25 = vadd.f32 %v5931_v22, %v541_v24  ;;  %v5960_v22 = vld [vmem:[%s12310_s5 + $0x1e8] sm:$0xff]  ;;  %v5959_v24 = vld [vmem:[%s12310_s5 + $0x1e0] sm:$0xff] }
 0x3b7   :  { %7331 = vmatprep.mubr.msk.f32.mxu1 %vm910_vm2, %v542_v25  ;;  %v5958_v25 = vld [vmem:[%s12310_s5 + $0x1d8] sm:$0xff] }
 0x3ba   :  { %v9352_v27 = vpop.f32.mrf.mxu1  ;;  %v9354_v28 = vpop.f32.mrf.mxu0 }
 0x3bc   :  { %v9356_v29 = vpop.f32.mrf.mxu1  ;;  %v9358_v30 = vpop.f32.mrf.mxu0 }
 0x3be   :  { %v9360_v31 = vpop.f32.mrf.mxu1  ;;  %v7283_v32 = vpop.f32.mrf.mxu0 }
 0x3c0   :  { %v9362_v33 = vpop.f32.mrf.mxu1  ;;  %v851_v37 = vpop.f32.mrf.mxu0 }
 0x3c2   :  { %v9364_v38 = vpop.f32.mrf.mxu1 }
 0x3c3   :  { %v7286_v40 = vpop.f32.mrf.mxu0 }
 0x3c4   :  { %v9366_v41 = vpop.f32.mrf.mxu1 }
 0x3c5   :  { %v861_v42 = vpop.f32.mrf.mxu0 }
 0x3c6   :  { %v9368_v44 = vpop.f32.mrf.mxu1 }
 0x3c7   :  { %v7289_v46 = vpop.f32.mrf.mxu0 }
 0x3c8   :  { %v9370_v49 = vpop.f32.mrf.mxu1 }
 0x3c9   :  { %v871_v50 = vpop.f32.mrf.mxu0 }
 0x3ca   :  { %v9372_v52 = vpop.f32.mrf.mxu1 }
 0x3cb   :  { %v7292_v53 = vpop.f32.mrf.mxu0 }
 0x3cc   :  { %v9374_v54 = vpop.f32.mrf.mxu1 }
 0x3cd   :  { %v881_v55 = vpop.f32.mrf.mxu0 }
 0x3ce   :  { %v9376_v57 = vpop.f32.mrf.mxu1 }
 0x3cf   :  { %v7295_v58 = vpop.f32.mrf.mxu0 }
 0x3d0   :  { %v9378_v59 = vpop.f32.mrf.mxu1 }
 0x3d1   :  { %v891_v61 = vpop.f32.mrf.mxu0 }
 0x3d2   :  { %v9380_v62 = vpop.f32.mrf.mxu1 }
 0x3d3   :  { %v7298_v63 = vpop.f32.mrf.mxu0 }
 0x3d4   :  { %7355 = vmatprep.subr.mxu0 %v7298_v63  ;;  %v9382_v56 = vpop.f32.mrf.mxu1 }
 0x3d5   :  { %v901_v0 = vpop.f32.mrf.mxu0  ;;  %7356 = vmatpush3.msra.mxu0 %v7298_v63  ;;  %v5951_v63 = vld [vmem:[%s12310_s5 + $0x1a0] sm:$0xff] }
 0x3d6   :  { %7357 = vmatprep.subr.mxu0 %v901_v0  ;;  %v9384_v36 = vpop.f32.mrf.mxu1 }
 0x3d7   :  { %7358 = vmatpush3.msra.mxu0 %v901_v0 }
 0x3d8   :  { %7359 = vmatprep.subr.mxu0 %v7295_v58  ;;  %v9386_v60 = vpop.f32.mrf.mxu1 }
 0x3d9   :  { %7360 = vmatpush3.msra.mxu0 %v7295_v58  ;;  %v5952_v58 = vld [vmem:[%s12310_s5 + $0x1a8] sm:$0xff] }
 0x3da   :  { %7361 = vmatprep.subr.mxu0 %v891_v61  ;;  %v9388_v3 = vpop.f32.mrf.mxu1 }
 0x3db   :  { %7362 = vmatpush3.msra.mxu0 %v891_v61 }
 0x3dc   :  { %7363 = vmatprep.subr.mxu0 %v7292_v53  ;;  %v9390_v4 = vpop.f32.mrf.mxu1 }
 0x3dd   :  { %7364 = vmatpush3.msra.mxu0 %v7292_v53  ;;  %v5953_v53 = vld [vmem:[%s12310_s5 + $0x1b0] sm:$0xff] }
 0x3de   :  { %7365 = vmatprep.subr.mxu0 %v881_v55  ;;  %v9392_v2 = vpop.f32.mrf.mxu1 }
 0x3df   :  { %7366 = vmatpush3.msra.mxu0 %v881_v55  ;;  %v712_v61 = vadd.f32 %v9392_v2, %v5952_v58 }
 0x3e0   :  { %7367 = vmatprep.subr.mxu0 %v7289_v46  ;;  %v9394_v5 = vpop.f32.mrf.mxu1 }
 0x3e1   :  { %7368 = vmatpush3.msra.mxu0 %v7289_v46  ;;  %v5954_v46 = vld [vmem:[%s12310_s5 + $0x1b8] sm:$0xff]  ;;  %v707_v0 = vadd.f32 %v5951_v63, %v9394_v5 }
 0x3e2   :  { %7369 = vmatprep.subr.mxu0 %v871_v50  ;;  %v7230_v6 = vpop.f32.mrf.mxu1 }
 0x3e3   :  { %7370 = vmatpush3.msra.mxu0 %v871_v50  ;;  %v722_v50 = vadd.f32 %v7230_v6, %v5954_v46  ;;  %v5950_v6 = vld [vmem:[%s12310_s5 + $0x198] sm:$0xff] }
 0x3e4   :  { %7371 = vmatprep.subr.mxu0 %v7286_v40  ;;  %v716_v8 = vpop.f32.mrf.mxu1  ;;  %v702_v2 = vadd.f32 %v9388_v3, %v5950_v6  ;;  %v200_v6 = vld [vmem:[%s12307_s2 + $0x38] sm:$0xff] }
 0x3e5   :  { %7372 = vmatpush3.msra.mxu0 %v7286_v40  ;;  %v5955_v40 = vld [vmem:[%s12310_s5 + $0x1c0] sm:$0xff]  ;;  %v717_v55 = vadd.f32 %v5953_v53, %v716_v8  ;;  %v5949_v8 = vld [vmem:[%s12310_s5 + $0x190] sm:$0xff]  ;;  %v198_v53 = vld [vmem:[%s12307_s2 + $0x28] sm:$0xff] }
 0x3e6   :  { %7373 = vmatprep.subr.mxu0 %v861_v42  ;;  %v7233_v7 = vpop.f32.mrf.mxu1  ;;  %v697_v5 = vadd.f32 %v5949_v8, %v9390_v4 }
 0x3e7   :  { %7374 = vmatpush3.msra.mxu0 %v861_v42 }
 0x3e8   :  { %7375 = vmatprep.subr.mxu0 %v7283_v32  ;;  %v726_v9 = vpop.f32.mrf.mxu1 }
 0x3e9   :  { %7376 = vmatpush3.msra.mxu0 %v7283_v32  ;;  %v5956_v32 = vld [vmem:[%s12310_s5 + $0x1c8] sm:$0xff]  ;;  %v727_v42 = vadd.f32 %v5955_v40, %v726_v9  ;;  %v5947_v9 = vld [vmem:[%s12310_s5 + $0x180] sm:$0xff] }
 0x3ea   :  { %7377 = vmatprep.subr.mxu0 %v851_v37  ;;  %v7236_v10 = vpop.f32.mrf.mxu1  ;;  %v687_v4 = vadd.f32 %v5947_v9, %v9386_v60  ;;  %v5934_v60 = vld [vmem:[%s12310_s5 + $0x118] sm:$0xff]  ;;  %v202_v9 = vld [vmem:[%s12307_s2 + $0x48] sm:$0xff] }
 0x3eb   :  { %7378 = vmatpush3.msra.mxu0 %v851_v37  ;;  %v732_v37 = vadd.f32 %v7233_v7, %v5956_v32  ;;  %v5948_v7 = vld [vmem:[%s12310_s5 + $0x188] sm:$0xff] }
 0x3ec   :  { %7379 = vmatprep.subr.mxu0 %v9354_v28  ;;  %v736_v12 = vpop.f32.mrf.mxu1  ;;  %v692_v3 = vadd.f32 %v9384_v36, %v5948_v7  ;;  %v5933_v36 = vld [vmem:[%s12310_s5 + $0x110] sm:$0xff] }
 0x3ed   :  { %7380 = vmatpush3.msra.mxu0 %v9354_v28  ;;  %v5957_v28 = vld [vmem:[%s12310_s5 + $0x1d0] sm:$0xff] }
 0x3ee   :  { %7381 = vmatprep.subr.mxu0 %v9358_v30  ;;  %v7239_v13 = vpop.f32.mrf.mxu1 }
 0x3ef   :  { %7382 = vmatpush3.msra.mxu0 %v9358_v30  ;;  %v737_v30 = vadd.f32 %v5957_v28, %v736_v12  ;;  %v194_v28 = vld [vmem:[%s12307_s2 + $0x8] sm:$0xff] }
 0x3f0   :  { %7383 = vmatprep.subr.mxu0 %v9347_v23  ;;  %v746_v14 = vpop.f32.mrf.mxu1 }
 0x3f1   :  { %7384 = vmatpush3.msra.mxu0 %v9347_v23  ;;  %v752_v23 = vadd.f32 %v7239_v13, %v5960_v22  ;;  %v552_v13 = vadd.f32 %v5933_v36, %v9356_v29  ;;  %v5937_v29 = vld [vmem:[%s12310_s5 + $0x130] sm:$0xff]  ;;  %v201_v36 = vld [vmem:[%s12307_s2 + $0x40] sm:$0xff] }
 0x3f2   :  { %7385 = vmatprep.subr.mxu0 %v9350_v26  ;;  %v7242_v16 = vpop.f32.mrf.mxu1 }
 0x3f3   :  { %v762_v18 = vadd.f32 %v7242_v16, %v5962_v15  ;;  %7386 = vmatpush3.msra.mxu0 %v9350_v26  ;;  %v742_v26 = vadd.f32 %v7236_v10, %v5958_v25  ;;  %v5932_v10 = vld [vmem:[%s12310_s5 + $0x108] sm:$0xff]  ;;  %v557_v15 = vadd.f32 %v9352_v27, %v5934_v60  ;;  %v5938_v27 = vld [vmem:[%s12310_s5 + $0x138] sm:$0xff] }
 0x3f4   :  { %v756_v19 = vpop.f32.mrf.mxu1  ;;  %7411 = vmatprep.subr.mxu0 %v9048_v11  ;;  %v747_v11 = vadd.f32 %v5959_v24, %v746_v14  ;;  %v547_v12 = vadd.f32 %v9342_v21, %v5932_v10  ;;  %v5935_v14 = vld [vmem:[%s12310_s5 + $0x120] sm:$0xff]  ;;  %v5936_v21 = vld [vmem:[%s12310_s5 + $0x128] sm:$0xff] }
 0x3f5   :  { %v757_v20 = vadd.f32 %v5961_v17, %v756_v19  ;;  %7299 = vmatprep.subr.msk.mxu1 %vm910_vm2, %v762_v18  ;;  %v562_v16 = vadd.f32 %v5935_v14, %v9362_v33  ;;  %v567_v17 = vadd.f32 %v9360_v31, %v5936_v21  ;;  %v5939_v33 = vld [vmem:[%s12310_s5 + $0x140] sm:$0xff]  ;;  %v577_v19 = vadd.f32 %v9364_v38, %v5938_v27  ;;  %v5940_v31 = vld [vmem:[%s12310_s5 + $0x148] sm:$0xff]  ;;  %v5942_v38 = vld [vmem:[%s12310_s5 + $0x158] sm:$0xff] }
 0x3f6   :  { %7300 = vmatpush3.xpose.msk.msra.mxu1 %vm910_vm2, %v762_v18  ;;  %v572_v18 = vadd.f32 %v5937_v29, %v9366_v41  ;;  %v5941_v41 = vld [vmem:[%s12310_s5 + $0x150] sm:$0xff]  ;;  %v587_v22 = vadd.f32 %v9368_v44, %v5940_v31  ;;  %v597_v24 = vadd.f32 %v9372_v52, %v5942_v38  ;;  %v5944_v44 = vld [vmem:[%s12310_s5 + $0x168] sm:$0xff]  ;;  %v5946_v52 = vld [vmem:[%s12310_s5 + $0x178] sm:$0xff] }
 0x3f7   :  { %7301 = vmatprep.subr.msk.mxu1 %vm910_vm2, %v757_v20  ;;  %v607_v25 = vadd.f32 %v9376_v57, %v5944_v44  ;;  %v193_v57 = vld [vmem:[%s12307_s2] sm:$0xff]  ;;  %v203_v21 = vld [vmem:[%s12307_s2 + $0x50] sm:$0xff] }
 0x3f8   :  { %v207_v38 = vld [vmem:[%s12307_s2 + $0x70] sm:$0xff] }
 0x3fa   :  { %7302 = vmatpush3.xpose.msk.msra.mxu1 %vm910_vm2, %v757_v20  ;;  %v582_v20 = vadd.f32 %v5939_v33, %v9370_v49  ;;  %v5943_v49 = vld [vmem:[%s12310_s5 + $0x160] sm:$0xff] }
 0x3fb   :  { %7303 = vmatprep.subr.msk.mxu1 %vm910_vm2, %v752_v23  ;;  %v205_v33 = vld [vmem:[%s12307_s2 + $0x60] sm:$0xff] }
 0x3fe   :  { %7304 = vmatpush3.xpose.msk.msra.mxu1 %vm910_vm2, %v752_v23  ;;  %v592_v23 = vadd.f32 %v5941_v41, %v9374_v54  ;;  %v5945_v54 = vld [vmem:[%s12310_s5 + $0x170] sm:$0xff] }
 0x3ff   :  { %7305 = vmatprep.subr.msk.mxu1 %vm910_vm2, %v747_v11 }
 0x402   :  { %7306 = vmatpush3.xpose.msk.msra.mxu1 %vm910_vm2, %v747_v11  ;;  %v602_v11 = vadd.f32 %v5943_v49, %v9378_v59  ;;  %v617_v59 = vadd.f32 %v9380_v62, %v5946_v52 }
 0x403   :  { %7307 = vmatprep.subr.msk.mxu1 %vm910_vm2, %v742_v26 }
 0x406   :  { %7308 = vmatpush3.xpose.msk.msra.mxu1 %vm910_vm2, %v742_v26  ;;  %v612_v26 = vadd.f32 %v5945_v54, %v9382_v56 }
 0x407   :  { %7309 = vmatprep.subr.msk.mxu1 %vm910_vm2, %v737_v30 }
 0x40a   :  { %7310 = vmatpush3.xpose.msk.msra.mxu1 %vm910_vm2, %v737_v30 }
 0x40b   :  { %7311 = vmatprep.subr.msk.mxu1 %vm910_vm2, %v732_v37 }
 0x40e   :  { %7312 = vmatpush3.xpose.msk.msra.mxu1 %vm910_vm2, %v732_v37  ;;  %v196_v37 = vld [vmem:[%s12307_s2 + $0x18] sm:$0xff] }
 0x40f   :  { %7313 = vmatprep.subr.msk.mxu1 %vm910_vm2, %v727_v42 }
 0x412   :  { %7314 = vmatpush3.xpose.msk.msra.mxu1 %vm910_vm2, %v727_v42  ;;  %v195_v42 = vld [vmem:[%s12307_s2 + $0x10] sm:$0xff] }
 0x413   :  { %7315 = vmatprep.subr.msk.mxu1 %vm910_vm2, %v722_v50 }
 0x416   :  { %7316 = vmatpush3.xpose.msk.msra.mxu1 %vm910_vm2, %v722_v50 }
 0x417   :  { %7317 = vmatprep.subr.msk.mxu1 %vm910_vm2, %v717_v55 }
 0x41a   :  { %7318 = vmatpush3.xpose.msk.msra.mxu1 %vm910_vm2, %v717_v55 }
 0x41b   :  { %7319 = vmatprep.subr.msk.mxu1 %vm910_vm2, %v712_v61 }
 0x41e   :  { %7320 = vmatpush3.xpose.msk.msra.mxu1 %vm910_vm2, %v712_v61  ;;  %v197_v61 = vld [vmem:[%s12307_s2 + $0x20] sm:$0xff] }
 0x41f   :  { %7321 = vmatprep.subr.msk.mxu1 %vm910_vm2, %v707_v0 }
 0x422   :  { %7322 = vmatpush3.xpose.msk.msra.mxu1 %vm910_vm2, %v707_v0 }
 0x423   :  { %7323 = vmatprep.subr.msk.mxu1 %vm910_vm2, %v702_v2 }
 0x426   :  { %7324 = vmatpush3.xpose.msk.msra.mxu1 %vm910_vm2, %v702_v2 }
 0x427   :  { %7325 = vmatprep.subr.msk.mxu1 %vm910_vm2, %v697_v5 }
 0x42a   :  { %7326 = vmatpush3.xpose.msk.msra.mxu1 %vm910_vm2, %v697_v5  ;;  %v199_v5 = vld [vmem:[%s12307_s2 + $0x30] sm:$0xff] }
 0x42b   :  { %7327 = vmatprep.subr.msk.mxu1 %vm910_vm2, %v692_v3 }
 0x42e   :  { %7328 = vmatpush3.xpose.msk.msra.mxu1 %vm910_vm2, %v692_v3 }
 0x42f   :  { %7329 = vmatprep.subr.msk.mxu1 %vm910_vm2, %v687_v4 }
 0x432   :  { %7330 = vmatpush3.xpose.msk.msra.mxu1 %vm910_vm2, %v687_v4 }
 0x435   :  { %7332 = vmatmul.mubr.msk.f32.vlgmr.msra.gmra.mxu1 %vm910_vm2, %v547_v12 }
 0x436   :  { %7334 = vmatprep.mubr.msk.f32.mxu1 %vm910_vm2, %v552_v13  ;;  %v204_v13 = vld [vmem:[%s12307_s2 + $0x58] sm:$0xff] }
 0x439   :  { %7335 = vmatmul.mubr.msk.f32.gmra.mxu1 %vm910_vm2, %v557_v15 }
 0x43a   :  { %7337 = vmatprep.mubr.msk.f32.mxu1 %vm910_vm2, %v562_v16 }
 0x43d   :  { %7338 = vmatmul.mubr.msk.f32.gmra.mxu1 %vm910_vm2, %v567_v17  ;;  %v206_v17 = vld [vmem:[%s12307_s2 + $0x68] sm:$0xff] }
 0x43e   :  { %7340 = vmatprep.mubr.msk.f32.mxu1 %vm910_vm2, %v572_v18 }
 0x441   :  { %7341 = vmatmul.mubr.msk.f32.gmra.mxu1 %vm910_vm2, %v577_v19 }
 0x442   :  { %7343 = vmatprep.mubr.msk.f32.mxu1 %vm910_vm2, %v582_v20  ;;  %v208_v20 = vld [vmem:[%s12307_s2 + $0x78] sm:$0xff] }
 0x445   :  { %7344 = vmatmul.mubr.msk.f32.gmra.mxu1 %vm910_vm2, %v587_v22 }
 0x446   :  { %7346 = vmatprep.mubr.msk.f32.mxu1 %vm910_vm2, %v592_v23 }
 0x449   :  { %7347 = vmatmul.mubr.msk.f32.gmra.mxu1 %vm910_vm2, %v597_v24 }
 0x44a   :  { %7349 = vmatprep.mubr.msk.f32.mxu1 %vm910_vm2, %v602_v11 }
 0x44d   :  { %7350 = vmatmul.mubr.msk.f32.gmra.mxu1 %vm910_vm2, %v607_v25 }
 0x44e   :  { %7352 = vmatprep.mubr.msk.f32.mxu1 %vm910_vm2, %v612_v26 }
 0x451   :  { %7353 = vmatmul.mubr.msk.f32.gmra.mxu1 %vm910_vm2, %v617_v59 }
 0x4f5   :  { %v7333_v30 = vpop.f32.mrf.mxu1 }
 0x4f6   :  { %v9572_v32 = vadd.f32 %v7333_v30, %v194_v28 }
 0x4f7   :  { %v1073_v56 = vpop.f32.mrf.mxu1 }
 0x4f8   :  { %1154 = vmax.xlane.f32.xlu1 %v9572_v32  ;;  %v9578_v62 = vadd.f32 %v1073_v56, %v193_v57 }
 0x4f9   :  { %v7336_v40 = vpop.f32.mrf.mxu1 }
 0x4fa   :  { %v9583_v46 = vadd.f32 %v7336_v40, %v196_v37  ;;  %1152 = vmax.xlane.f32.xlu0 %v9578_v62 }
 0x4fb   :  { %v1083_v50 = vpop.f32.mrf.mxu1 }
 0x4fc   :  { %1158 = vmax.xlane.f32.xlu1 %v9583_v46  ;;  %v9590_v55 = vadd.f32 %v1083_v50, %v195_v42 }
 0x4fd   :  { %v7339_v58 = vpop.f32.mrf.mxu1 }
 0x4fe   :  { %v9595_v63 = vadd.f32 %v7339_v58, %v198_v53  ;;  %1156 = vmax.xlane.f32.xlu0 %v9590_v55 }
 0x4ff   :  { %v1093_v0 = vpop.f32.mrf.mxu1 }
 0x500   :  { %1162 = vmax.xlane.f32.xlu1 %v9595_v63  ;;  %v9602_v2 = vadd.f32 %v1093_v0, %v197_v61 }
 0x501   :  { %v7342_v8 = vpop.f32.mrf.mxu1 }
 0x502   :  { %v9607_v7 = vadd.f32 %v7342_v8, %v200_v6  ;;  %1160 = vmax.xlane.f32.xlu0 %v9602_v2 }
 0x503   :  { %v1103_v3 = vpop.f32.mrf.mxu1 }
 0x504   :  { %1166 = vmax.xlane.f32.xlu1 %v9607_v7  ;;  %v9614_v4 = vadd.f32 %v1103_v3, %v199_v5 }
 0x505   :  { %v7345_v10 = vpop.f32.mrf.mxu1 }
 0x506   :  { %v9619_v12 = vadd.f32 %v7345_v10, %v202_v9  ;;  %1164 = vmax.xlane.f32.xlu0 %v9614_v4 }
 0x507   :  { %v1113_v60 = vpop.f32.mrf.mxu1 }
 0x508   :  { %1170 = vmax.xlane.f32.xlu1 %v9619_v12  ;;  %v9626_v14 = vadd.f32 %v1113_v60, %v201_v36 }
 0x509   :  { %v7348_v15 = vpop.f32.mrf.mxu1 }
 0x50a   :  { %v9631_v16 = vadd.f32 %v7348_v15, %v204_v13  ;;  %1168 = vmax.xlane.f32.xlu0 %v9626_v14 }
 0x50b   :  { %v1123_v29 = vpop.f32.mrf.mxu1 }
 0x50c   :  { %1174 = vmax.xlane.f32.xlu1 %v9631_v16  ;;  %v9638_v27 = vadd.f32 %v1123_v29, %v203_v21 }
 0x50d   :  { %v7351_v18 = vpop.f32.mrf.mxu1 }
 0x50e   :  { %v9643_v19 = vadd.f32 %v7351_v18, %v206_v17  ;;  %1172 = vmax.xlane.f32.xlu0 %v9638_v27 }
 0x50f   :  { %v1133_v31 = vpop.f32.mrf.mxu1 }
 0x510   :  { %1178 = vmax.xlane.f32.xlu1 %v9643_v19  ;;  %v9650_v41 = vadd.f32 %v1133_v31, %v205_v33 }
 0x511   :  { %v7354_v22 = vpop.f32.mrf.mxu1 }
 0x512   :  { %v9655_v23 = vadd.f32 %v7354_v22, %v208_v20  ;;  %1176 = vmax.xlane.f32.xlu0 %v9650_v41 }
 0x513   :  { %v1143_v49 = vpop.f32.mrf.mxu1 }
 0x514   :  { %1182 = vmax.xlane.f32.xlu1 %v9655_v23  ;;  %v9659_v24 = vadd.f32 %v1143_v49, %v207_v38 }
 0x516   :  { %1180 = vmax.xlane.f32.xlu0 %v9659_v24 }
 0x581   :  { %v1155_v44 = vpop.xlane.xlu1 %1154 }
 0x582   :  { %v1185_v11 = vsub.f32 %v9572_v32, %v1155_v44 }
 0x583   :  { %v1153_v54 = vpop.xlane.xlu0 %1152 }
 0x584   :  { %v1202_v25 = vmul.f32 1.442695, %v1185_v11  ;;  %v1184_v52 = vsub.f32 %v9578_v62, %v1153_v54 }
 0x585   :  { %v1159_v26 = vpop.xlane.xlu1 %1158 }
 0x586   :  { %8381 = vpow2.f32 %v1202_v25  ;;  %v1200_v59 = vmul.f32 1.442695, %v1184_v52  ;;  %v1187_v28 = vsub.f32 %v9583_v46, %v1159_v26 }
 0x587   :  { %v1157_v30 = vpop.xlane.xlu0 %1156 }
 0x588   :  { %8383 = vpow2.f32 %v1200_v59  ;;  %v1206_v57 = vmul.f32 1.442695, %v1187_v28  ;;  %v1186_v56 = vsub.f32 %v9590_v55, %v1157_v30 }
 0x589   :  { %v1163_v37 = vpop.xlane.xlu1 %1162 }
 0x58a   :  { %8385 = vpow2.f32 %v1206_v57  ;;  %v1204_v40 = vmul.f32 1.442695, %v1186_v56  ;;  %v1189_v42 = vsub.f32 %v9595_v63, %v1163_v37 }
 0x58b   :  { %v1161_v32 = vpop.xlane.xlu0 %1160 }
 0x58c   :  { %8387 = vpow2.f32 %v1204_v40  ;;  %v1210_v50 = vmul.f32 1.442695, %v1189_v42  ;;  %v1188_v62 = vsub.f32 %v9602_v2, %v1161_v32 }
 0x58d   :  { %v1167_v53 = vpop.xlane.xlu1 %1166 }
 0x58e   :  { %8389 = vpow2.f32 %v1210_v50  ;;  %v1208_v58 = vmul.f32 1.442695, %v1188_v62  ;;  %v1191_v46 = vsub.f32 %v9607_v7, %v1167_v53 }
 0x58f   :  { %v1165_v61 = vpop.xlane.xlu0 %1164 }
 0x590   :  { %8391 = vpow2.f32 %v1208_v58  ;;  %v1214_v0 = vmul.f32 1.442695, %v1191_v46  ;;  %v1190_v55 = vsub.f32 %v9614_v4, %v1165_v61 }
 0x591   :  { %v1171_v6 = vpop.xlane.xlu1 %1170 }
 0x592   :  { %8393 = vpow2.f32 %v1214_v0  ;;  %v1212_v8 = vmul.f32 1.442695, %v1190_v55  ;;  %v1193_v63 = vsub.f32 %v9619_v12, %v1171_v6 }
 0x593   :  { %v9671_v5 = vpop.eup %8381  ;;  %v1169_v3 = vpop.xlane.xlu0 %1168 }
 0x594   :  { %8395 = vpow2.f32 %v1212_v8  ;;  %v1218_v2 = vmul.f32 1.442695, %v1193_v63  ;;  %v1192_v9 = vsub.f32 %v9626_v14, %v1169_v3  ;;  %1234 = vadd.xlane.f32.xlu1 %v9671_v5 }
 0x595   :  { %v9675_v7 = vpop.eup %8383  ;;  %v1175_v10 = vpop.xlane.xlu1 %1174 }
 0x596   :  { %8397 = vpow2.f32 %v1218_v2  ;;  %v1216_v36 = vmul.f32 1.442695, %v1192_v9  ;;  %v1195_v4 = vsub.f32 %v9631_v16, %v1175_v10  ;;  %1232 = vadd.xlane.f32.xlu0 %v9675_v7  ;;  %v8693_v2 = vld [vmem:[%s12308_s3 + $0x18] sm:$0xff] }
 0x597   :  { %v9679_v60 = vpop.eup %8385  ;;  %v1173_v12 = vpop.xlane.xlu0 %1172 }
 0x598   :  { %8399 = vpow2.f32 %v1216_v36  ;;  %v1222_v13 = vmul.f32 1.442695, %v1195_v4  ;;  %v1194_v15 = vsub.f32 %v9638_v27, %v1173_v12  ;;  %1238 = vadd.xlane.f32.xlu1 %v9679_v60  ;;  %v8695_v12 = vld [vmem:[%s12308_s3 + $0x8] sm:$0xff] }
 0x599   :  { %v9683_v14 = vpop.eup %8387  ;;  %v1179_v21 = vpop.xlane.xlu1 %1178 }
 0x59a   :  { %8401 = vpow2.f32 %v1222_v13  ;;  %v1220_v29 = vmul.f32 1.442695, %v1194_v15  ;;  %v1197_v17 = vsub.f32 %v9643_v19, %v1179_v21  ;;  %1236 = vadd.xlane.f32.xlu0 %v9683_v14 }
 0x59b   :  { %v9687_v16 = vpop.eup %8389  ;;  %v1177_v18 = vpop.xlane.xlu0 %1176 }
 0x59c   :  { %8403 = vpow2.f32 %v1220_v29  ;;  %v1226_v33 = vmul.f32 1.442695, %v1197_v17  ;;  %v1196_v31 = vsub.f32 %v9650_v41, %v1177_v18  ;;  %1242 = vadd.xlane.f32.xlu1 %v9687_v16 }
 0x59d   :  { %v9691_v27 = vpop.eup %8391  ;;  %v1183_v20 = vpop.xlane.xlu1 %1182 }
 0x59e   :  { %8405 = vpow2.f32 %v1226_v33  ;;  %v1224_v22 = vmul.f32 1.442695, %v1196_v31  ;;  %v1199_v38 = vsub.f32 %v9655_v23, %v1183_v20  ;;  %1240 = vadd.xlane.f32.xlu0 %v9691_v27 }
 0x59f   :  { %v9695_v19 = vpop.eup %8393  ;;  %v1181_v49 = vpop.xlane.xlu0 %1180 }
 0x5a0   :  { %8407 = vpow2.f32 %v1224_v22  ;;  %v1230_v44 = vmul.f32 1.442695, %v1199_v38  ;;  %v1198_v11 = vsub.f32 %v9659_v24, %v1181_v49  ;;  %1246 = vadd.xlane.f32.xlu1 %v9695_v19 }
 0x5a1   :  { %v9699_v41 = vpop.eup %8395 }
 0x5a2   :  { %8409 = vpow2.f32 %v1230_v44  ;;  %v1228_v54 = vmul.f32 1.442695, %v1198_v11  ;;  %1244 = vadd.xlane.f32.xlu0 %v9699_v41 }
 0x5a3   :  { %v9702_v25 = vpop.eup %8397 }
 0x5a4   :  { %8411 = vpow2.f32 %v1228_v54  ;;  %1250 = vadd.xlane.f32.xlu1 %v9702_v25 }
 0x5a5   :  { %v9705_v23 = vpop.eup %8399 }
 0x5a6   :  { %1248 = vadd.xlane.f32.xlu0 %v9705_v23 }
 0x5a7   :  { %v9708_v52 = vpop.eup %8401 }
 0x5a8   :  { %1254 = vadd.xlane.f32.xlu1 %v9708_v52 }
 0x5a9   :  { %v9711_v24 = vpop.eup %8403 }
 0x5aa   :  { %1252 = vadd.xlane.f32.xlu0 %v9711_v24 }
 0x5ab   :  { %v9714_v26 = vpop.eup %8405 }
 0x5ac   :  { %1258 = vadd.xlane.f32.xlu1 %v9714_v26 }
 0x5ad   :  { %v9717_v59 = vpop.eup %8407 }
 0x5ae   :  { %1256 = vadd.xlane.f32.xlu0 %v9717_v59 }
 0x5af   :  { %v9720_v28 = vpop.eup %8409 }
 0x5b0   :  { %1262 = vadd.xlane.f32.xlu1 %v9720_v28 }
 0x5b1   :  { %v9723_v30 = vpop.eup %8411 }
 0x5b2   :  { %1260 = vadd.xlane.f32.xlu0 %v9723_v30 }
 0x61d   :  { %v1235_v57 = vpop.xlane.xlu1 %1234 }
 0x61e   :  { %8413 = vrcp.f32 %v1235_v57 }
 0x61f   :  { %v1233_v56 = vpop.xlane.xlu0 %1232 }
 0x620   :  { %8415 = vrcp.f32 %v1233_v56 }
 0x621   :  { %v1239_v37 = vpop.xlane.xlu1 %1238 }
 0x622   :  { %8417 = vrcp.f32 %v1239_v37 }
 0x623   :  { %v1237_v40 = vpop.xlane.xlu0 %1236 }
 0x624   :  { %8419 = vrcp.f32 %v1237_v40 }
 0x625   :  { %v1243_v42 = vpop.xlane.xlu1 %1242 }
 0x626   :  { %8421 = vrcp.f32 %v1243_v42 }
 0x627   :  { %v1241_v32 = vpop.xlane.xlu0 %1240 }
 0x628   :  { %8423 = vrcp.f32 %v1241_v32 }
 0x629   :  { %v1247_v50 = vpop.xlane.xlu1 %1246 }
 0x62a   :  { %8425 = vrcp.f32 %v1247_v50 }
 0x62b   :  { %v1245_v62 = vpop.xlane.xlu0 %1244  ;;  %v8414_v53 = vpop.eup %8413 }
 0x62c   :  { %8427 = vrcp.f32 %v1245_v62  ;;  %v1281_v55 = vmul.f32 %v8414_v53, %v9671_v5  ;;  %v8694_v5 = vld [vmem:[%s12308_s3 + $0x10] sm:$0xff] }
 0x62d   :  { %v8416_v58 = vpop.eup %8415  ;;  %v1251_v46 = vpop.xlane.xlu1 %1250 }
 0x62e   :  { %v1280_v61 = vmul.f32 %v8416_v58, %v9675_v7  ;;  %8429 = vrcp.f32 %v1251_v46  ;;  %v1455_v58 = vsub.s32 3, %v8994_v34 }
 0x62f   :  { %v1249_v0 = vpop.xlane.xlu0 %1248  ;;  %v8418_v6 = vpop.eup %8417 }
 0x630   :  { %8431 = vrcp.f32 %v1249_v0  ;;  %7387 = vmatprep.mubr.f32.mxu0 %v1280_v61  ;;  %v1283_v7 = vmul.f32 %v8418_v6, %v9679_v60 }
 0x631   :  { %v8420_v8 = vpop.eup %8419  ;;  %v1255_v63 = vpop.xlane.xlu1 %1254  ;;  %7388 = vmatmul.mubr.f32.vlgmr.msra.gmra.mxu0 %v1281_v55 }
 0x632   :  { %v1282_v3 = vmul.f32 %v8420_v8, %v9683_v14  ;;  %7412 = vmatpush3.msra.mxu0 %v8693_v2  ;;  %8433 = vrcp.f32 %v1255_v63  ;;  %v8696_v14 = vld [vmem:[%s12308_s3] sm:$0xff] }
 0x633   :  { %v1253_v9 = vpop.xlane.xlu0 %1252  ;;  %7413 = vmatprep.subr.mxu0 %v8694_v5  ;;  %v8422_v10 = vpop.eup %8421 }
 0x634   :  { %8435 = vrcp.f32 %v1253_v9  ;;  %7390 = vmatprep.mubr.f32.mxu0 %v1282_v3  ;;  %7414 = vmatpush3.msra.mxu0 %v8694_v5  ;;  %v1285_v15 = vmul.f32 %v8422_v10, %v9687_v16 }
 0x635   :  { %v8424_v36 = vpop.eup %8423  ;;  %v1259_v4 = vpop.xlane.xlu1 %1258  ;;  %7391 = vmatmul.mubr.f32.gmra.mxu0 %v1283_v7  ;;  %7415 = vmatprep.subr.mxu0 %v8695_v12 }
 0x636   :  { %v1284_v13 = vmul.f32 %v8424_v36, %v9691_v27  ;;  %7416 = vmatpush3.msra.mxu0 %v8695_v12  ;;  %8437 = vrcp.f32 %v1259_v4 }
 0x637   :  { %v1257_v60 = vpop.xlane.xlu0 %1256  ;;  %7417 = vmatprep.subr.mxu0 %v8696_v14  ;;  %v8426_v21 = vpop.eup %8425 }
 0x638   :  { %8439 = vrcp.f32 %v1257_v60  ;;  %7393 = vmatprep.mubr.f32.mxu0 %v1284_v13  ;;  %7418 = vmatpush3.msra.mxu0 %v8696_v14  ;;  %v1287_v31 = vmul.f32 %v8426_v21, %v9695_v19 }
 0x639   :  { %v8428_v29 = vpop.eup %8427  ;;  %v1263_v17 = vpop.xlane.xlu1 %1262  ;;  %7394 = vmatmul.mubr.f32.gmra.mxu0 %v1285_v15 }
 0x63a   :  { %v1286_v18 = vmul.f32 %v8428_v29, %v9699_v41  ;;  %8441 = vrcp.f32 %v1263_v17 }
 0x63b   :  { %v1261_v33 = vpop.xlane.xlu0 %1260  ;;  %v8430_v27 = vpop.eup %8429 }
 0x63c   :  { %8443 = vrcp.f32 %v1261_v33  ;;  %7396 = vmatprep.mubr.f32.mxu0 %v1286_v18  ;;  %v1289_v22 = vmul.f32 %v8430_v27, %v9702_v25 }
 0x63d   :  { %v8432_v16 = vpop.eup %8431  ;;  %7397 = vmatmul.mubr.f32.gmra.mxu0 %v1287_v31 }
 0x63e   :  { %v1288_v20 = vmul.f32 %v8432_v16, %v9705_v23 }
 0x63f   :  { %v8434_v38 = vpop.eup %8433 }
 0x640   :  { %7399 = vmatprep.mubr.f32.mxu0 %v1288_v20  ;;  %v1291_v11 = vmul.f32 %v8434_v38, %v9708_v52 }
 0x641   :  { %v8436_v49 = vpop.eup %8435  ;;  %7400 = vmatmul.mubr.f32.gmra.mxu0 %v1289_v22 }
 0x642   :  { %v1290_v44 = vmul.f32 %v8436_v49, %v9711_v24 }
 0x643   :  { %v8438_v41 = vpop.eup %8437 }
 0x644   :  { %7402 = vmatprep.mubr.f32.mxu0 %v1290_v44  ;;  %v1293_v57 = vmul.f32 %v8438_v41, %v9714_v26 }
 0x645   :  { %v8440_v19 = vpop.eup %8439  ;;  %7403 = vmatmul.mubr.f32.gmra.mxu0 %v1291_v11 }
 0x646   :  { %v1292_v54 = vmul.f32 %v8440_v19, %v9717_v59 }
 0x647   :  { %v8442_v56 = vpop.eup %8441 }
 0x648   :  { %7405 = vmatprep.mubr.f32.mxu0 %v1292_v54  ;;  %v1295_v37 = vmul.f32 %v8442_v56, %v9720_v28  ;;  %v9758_v28 = vld [vmem:[%s12314_s9] sm:$0xff] }
 0x649   :  { %v8444_v23 = vpop.eup %8443  ;;  %7406 = vmatmul.mubr.f32.gmra.mxu0 %v1293_v57  ;;  %v1456_v6 = vrot.slane %v9758_v28, %v1455_v58 }
 0x64a   :  { %v1294_v25 = vmul.f32 %v8444_v23, %v9723_v30 }
 0x64c   :  { %7408 = vmatprep.mubr.f32.mxu0 %v1294_v25 }
 0x64d   :  { %7409 = vmatmul.mubr.f32.gmra.mxu0 %v1295_v37 }
 0x6f1   :  { %v7389_v24 = vpop.f32.mrf.mxu0 }
 0x6f3   :  { %v1362_v52 = vpop.f32.mrf.mxu0 }
 0x6f5   :  { %v7392_v40 = vpop.f32.mrf.mxu0 }
 0x6f7   :  { %v1372_v42 = vpop.f32.mrf.mxu0 }
 0x6f9   :  { %v7395_v32 = vpop.f32.mrf.mxu0 }
 0x6fa   :  { %v1442_v61 = vadd.f32 %v7395_v32, %v7389_v24  ;;  %v6030_v32 = vld [vmem:[%s12310_s5 + $0x278] sm:$0xff] }
 0x6fb   :  { %v1382_v50 = vpop.f32.mrf.mxu0  ;;  %7425 = vmatprep.subr.mxu1 %v6030_v32 }
 0x6fc   :  { %v1441_v30 = vadd.f32 %v1382_v50, %v1362_v52  ;;  %v9813_v50 = vld [vmem:[%s12310_s5 + $0x2f8] sm:$0xff]  ;;  %7426 = vmatpush3.msra.mxu1 %v6030_v32  ;;  %v6037_v32 = vld [vmem:[%s12310_s5 + $0x2b0] sm:$0xff] }
 0x6fd   :  { %v7398_v62 = vpop.f32.mrf.mxu0  ;;  %7481 = vmatprep.subr.mxu0 %v9813_v50 }
 0x6fe   :  { %v1444_v63 = vadd.f32 %v7398_v62, %v7392_v40  ;;  %v6029_v62 = vld [vmem:[%s12310_s5 + $0x270] sm:$0xff] }
 0x6ff   :  { %v1392_v59 = vpop.f32.mrf.mxu0  ;;  %7427 = vmatprep.subr.mxu1 %v6029_v62 }
 0x700   :  { %v1443_v7 = vadd.f32 %v1392_v59, %v1372_v42  ;;  %v6028_v59 = vld [vmem:[%s12310_s5 + $0x268] sm:$0xff]  ;;  %7428 = vmatpush3.msra.mxu1 %v6029_v62  ;;  %v6035_v62 = vld [vmem:[%s12310_s5 + $0x2a0] sm:$0xff] }
 0x701   :  { %v7401_v53 = vpop.f32.mrf.mxu0  ;;  %7429 = vmatprep.subr.mxu1 %v6028_v59 }
 0x702   :  { %v1446_v55 = vadd.f32 %v7401_v53, %v1442_v61  ;;  %v6027_v53 = vld [vmem:[%s12310_s5 + $0x260] sm:$0xff]  ;;  %7430 = vmatpush3.msra.mxu1 %v6028_v59  ;;  %v6024_v61 = vld [vmem:[%s12310_s5 + $0x248] sm:$0xff]  ;;  %v6034_v59 = vld [vmem:[%s12310_s5 + $0x298] sm:$0xff] }
 0x703   :  { %v1402_v26 = vpop.f32.mrf.mxu0  ;;  %7431 = vmatprep.subr.mxu1 %v6027_v53 }
 0x704   :  { %v1445_v3 = vadd.f32 %v1441_v30, %v1402_v26  ;;  %v6026_v26 = vld [vmem:[%s12310_s5 + $0x258] sm:$0xff]  ;;  %7432 = vmatpush3.msra.mxu1 %v6027_v53  ;;  %v6017_v53 = vld [vmem:[%s12310_s5 + $0x210] sm:$0xff] }
 0x705   :  { %v7404_v46 = vpop.f32.mrf.mxu0  ;;  %7433 = vmatprep.subr.mxu1 %v6026_v26  ;;  %v6022_v30 = vld [vmem:[%s12310_s5 + $0x238] sm:$0xff] }
 0x706   :  { %v1448_v5 = vadd.f32 %v7404_v46, %v1444_v63  ;;  %v6025_v46 = vld [vmem:[%s12310_s5 + $0x250] sm:$0xff]  ;;  %7434 = vmatpush3.msra.mxu1 %v6026_v26  ;;  %v6018_v63 = vld [vmem:[%s12310_s5 + $0x218] sm:$0xff] }
 0x707   :  { %v1412_v0 = vpop.f32.mrf.mxu0  ;;  %7435 = vmatprep.subr.mxu1 %v6025_v46  ;;  %v6033_v26 = vld [vmem:[%s12310_s5 + $0x290] sm:$0xff] }
 0x708   :  { %v1447_v12 = vadd.f32 %v1443_v7, %v1412_v0  ;;  %7436 = vmatpush3.msra.mxu1 %v6025_v46  ;;  %v6023_v0 = vld [vmem:[%s12310_s5 + $0x240] sm:$0xff]  ;;  %v6016_v46 = vld [vmem:[%s12310_s5 + $0x208] sm:$0xff] }
 0x709   :  { %v7407_v8 = vpop.f32.mrf.mxu0  ;;  %7437 = vmatprep.subr.mxu1 %v6024_v61 }
 0x70a   :  { %v1450_v2 = vadd.f32 %v7407_v8, %v1446_v55  ;;  %7438 = vmatpush3.msra.mxu1 %v6024_v61  ;;  %v6021_v55 = vld [vmem:[%s12310_s5 + $0x230] sm:$0xff]  ;;  %v6019_v8 = vld [vmem:[%s12310_s5 + $0x220] sm:$0xff]  ;;  %v6032_v61 = vld [vmem:[%s12310_s5 + $0x288] sm:$0xff] }
 0x70b   :  { %v1422_v9 = vpop.f32.mrf.mxu0  ;;  %7439 = vmatprep.subr.mxu1 %v6023_v0 }
 0x70c   :  { %v1458_v10 = vadd.f32 %v1456_v6, %v1450_v2  ;;  %v1449_v36 = vadd.f32 %v1445_v3, %v1422_v9  ;;  %7440 = vmatpush3.msra.mxu1 %v6023_v0  ;;  %v6015_v0 = vld [vmem:[%s12310_s5 + $0x200] sm:$0xff] }
 0x70d   :  { %v7410_v4 = vpop.f32.mrf.mxu0  ;;  %7441 = vmatprep.subr.mxu1 %v6022_v30 }
 0x70e   :  { %v9764_v13 = vadd.f32 %v1458_v10, %v9009_v43  ;;  %v1457_v60 = vadd.f32 %v1456_v6, %v1449_v36  ;;  %v1452_v15 = vadd.f32 %v7410_v4, %v1448_v5  ;;  %7442 = vmatpush3.msra.mxu1 %v6022_v30  ;;  %v6031_v30 = vld [vmem:[%s12310_s5 + $0x280] sm:$0xff] }
 0x70f   :  { %v1432_v14 = vpop.f32.mrf.mxu0  ;;  %7443 = vmatprep.subr.mxu1 %v6021_v55 }
 0x710   :  { %v1460_v21 = vadd.f32 %v1456_v6, %v1452_v15  ;;  %v1451_v29 = vadd.f32 %v1447_v12, %v1432_v14  ;;  %v1570_v17 = vsel %vm292_vm1, %v9764_v13, 0.0  ;;  %v9769_v18 = vadd.f32 %v1457_v60, %v9005_v39  ;;  %7444 = vmatpush3.msra.mxu1 %v6021_v55  ;;  %v6094_v55 = vld [vmem:[%s12311_s6 + $0xf8] sm:$0xff] }
 0x711   :  { %1571 = vadd.xlane.f32.xlu1 %v1570_v17 }
 0x712   :  { %v9772_v33 = vadd.f32 %v1460_v21, %v9017_v51  ;;  %v1459_v31 = vadd.f32 %v1456_v6, %v1451_v29  ;;  %v1567_v43 = vsel %vm292_vm1, %v9769_v18, 0.0  ;;  %v6020_v6 = vld [vmem:[%s12310_s5 + $0x228] sm:$0xff]  ;;  %v1621_v21 = vsub.s32 4, %v8994_v34 }
 0x713   :  { %1568 = vadd.xlane.f32.xlu0 %v1567_v43  ;;  %7445 = vmatprep.subr.mxu1 %v6020_v6 }
 0x714   :  { %v1576_v27 = vsel %vm292_vm1, %v9772_v33, 0.0  ;;  %v9779_v16 = vadd.f32 %v1459_v31, %v9013_v47  ;;  %7446 = vmatpush3.msra.mxu1 %v6020_v6  ;;  %v1622_v17 = vrot.slane %v9758_v28, %v1621_v21  ;;  %v1629_v31 = vsub.s32 5, %v8994_v34 }
 0x715   :  { %1577 = vadd.xlane.f32.xlu1 %v1576_v27  ;;  %7447 = vmatprep.subr.mxu1 %v6019_v8 }
 0x716   :  { %v1573_v39 = vsel %vm292_vm1, %v9779_v16, 0.0  ;;  %7448 = vmatpush3.msra.mxu1 %v6019_v8 }
 0x717   :  { %1574 = vadd.xlane.f32.xlu0 %v1573_v39  ;;  %7449 = vmatprep.subr.mxu1 %v6018_v63 }
 0x718   :  { %7450 = vmatpush3.msra.mxu1 %v6018_v63  ;;  %v8698_v63 = vld [vmem:[%s12309_s4] sm:$0xff] }
 0x719   :  { %7451 = vmatprep.subr.mxu1 %v6017_v53 }
 0x71a   :  { %7452 = vmatpush3.msra.mxu1 %v6017_v53 }
 0x71b   :  { %7453 = vmatprep.subr.mxu1 %v6016_v46 }
 0x71c   :  { %7454 = vmatpush3.msra.mxu1 %v6016_v46  ;;  %v8713_v46 = vld [vmem:[%s12309_s4 + $0x78] sm:$0xff] }
 0x71d   :  { %7455 = vmatprep.subr.mxu1 %v6015_v0 }
 0x71e   :  { %7456 = vmatpush3.msra.mxu1 %v6015_v0  ;;  %v6080_v0 = vld [vmem:[%s12311_s6 + $0x88] sm:$0xff] }
 0x71f   :  { %7537 = vmatprep.subr.mxu1 %v6094_v55 }
 0x79a   :  { %v1572_v20 = vpop.xlane.xlu1 %1571 }
 0x79b   :  { %v1580_v22 = vmul.f32 0.03125, %v1572_v20 }
 0x79c   :  { %v1569_v51 = vpop.xlane.xlu0 %1568 }
 0x79d   :  { %v9784_v38 = vsub.f32 %v9764_v13, %v1580_v22  ;;  %v1579_v49 = vmul.f32 0.03125, %v1569_v51  ;;  %v1630_v22 = vrot.slane %v9758_v28, %v1629_v31 }
 0x79e   :  { %v1578_v44 = vpop.xlane.xlu1 %1577 }
 0x79f   :  { %v9787_v11 = vsub.f32 %v9769_v18, %v1579_v49  ;;  %v1582_v41 = vmul.f32 0.03125, %v1578_v44  ;;  %v1588_v47 = vmul.f32 %v9784_v38, %v9784_v38 }
 0x7a0   :  { %v1575_v19 = vpop.xlane.xlu0 %1574 }
 0x7a1   :  { %v9792_v54 = vsub.f32 %v9772_v33, %v1582_v41  ;;  %v1581_v57 = vmul.f32 0.03125, %v1575_v19  ;;  %v1594_v56 = vsel %vm292_vm1, %v1588_v47, 0.0  ;;  %v1587_v23 = vmul.f32 %v9787_v11, %v9787_v11 }
 0x7a2   :  { %1595 = vadd.xlane.f32.xlu1 %v1594_v56 }
 0x7a3   :  { %v9798_v25 = vsub.f32 %v9779_v16, %v1581_v57  ;;  %v1591_v37 = vsel %vm292_vm1, %v1587_v23, 0.0  ;;  %v1590_v24 = vmul.f32 %v9792_v54, %v9792_v54 }
 0x7a4   :  { %1592 = vadd.xlane.f32.xlu0 %v1591_v37  ;;  %v6042_v37 = vld [vmem:[%s12310_s5 + $0x2d8] sm:$0xff] }
 0x7a5   :  { %v1600_v52 = vsel %vm292_vm1, %v1590_v24, 0.0  ;;  %v1589_v40 = vmul.f32 %v9798_v25, %v9798_v25  ;;  %v6041_v24 = vld [vmem:[%s12310_s5 + $0x2d0] sm:$0xff] }
 0x7a6   :  { %1601 = vadd.xlane.f32.xlu1 %v1600_v52  ;;  %v6040_v52 = vld [vmem:[%s12310_s5 + $0x2c8] sm:$0xff] }
 0x7a7   :  { %v1597_v42 = vsel %vm292_vm1, %v1589_v40, 0.0  ;;  %v6039_v40 = vld [vmem:[%s12310_s5 + $0x2c0] sm:$0xff] }
 0x7a8   :  { %1598 = vadd.xlane.f32.xlu0 %v1597_v42  ;;  %v6038_v42 = vld [vmem:[%s12310_s5 + $0x2b8] sm:$0xff] }
 0x82b   :  { %v1596_v3 = vpop.xlane.xlu1 %1595 }
 0x82c   :  { %v1604_v2 = vmul.f32 0.03125, %v1596_v3 }
 0x82d   :  { %v1593_v9 = vpop.xlane.xlu0 %1592 }
 0x82e   :  { %v1608_v7 = vadd.f32 1e-05, %v1604_v2  ;;  %v1603_v5 = vmul.f32 0.03125, %v1593_v9  ;;  %v8699_v2 = vld [vmem:[%s12309_s4 + $0x8] sm:$0xff] }
 0x82f   :  { %v1602_v10 = vpop.xlane.xlu1 %1601 }
 0x830   :  { %8445 = vrsqrt.f32 %v1608_v7  ;;  %v1607_v36 = vadd.f32 1e-05, %v1603_v5  ;;  %v1606_v4 = vmul.f32 0.03125, %v1602_v10  ;;  %v6093_v5 = vld [vmem:[%s12311_s6 + $0xf0] sm:$0xff] }
 0x831   :  { %v1599_v12 = vpop.xlane.xlu0 %1598 }
 0x832   :  { %8447 = vrsqrt.f32 %v1607_v36  ;;  %v1610_v60 = vadd.f32 1e-05, %v1606_v4  ;;  %v1605_v15 = vmul.f32 0.03125, %v1599_v12  ;;  %v8700_v36 = vld [vmem:[%s12309_s4 + $0x10] sm:$0xff]  ;;  %v8701_v12 = vld [vmem:[%s12309_s4 + $0x18] sm:$0xff] }
 0x834   :  { %8449 = vrsqrt.f32 %v1610_v60  ;;  %v1609_v14 = vadd.f32 1e-05, %v1605_v15  ;;  %v6092_v15 = vld [vmem:[%s12311_s6 + $0xe8] sm:$0xff] }
 0x836   :  { %8451 = vrsqrt.f32 %v1609_v14  ;;  %v8702_v14 = vld [vmem:[%s12309_s4 + $0x20] sm:$0xff] }
 0x83d   :  { %v8446_v29 = vpop.eup %8445 }
 0x83e   :  { %v1616_v43 = vmul.f32 %v8446_v29, %v9784_v38 }
 0x83f   :  { %v8448_v27 = vpop.eup %8447 }
 0x840   :  { %v1615_v39 = vmul.f32 %v8448_v27, %v9787_v11  ;;  %v1624_v51 = vmul.f32 %v1622_v17, %v1616_v43  ;;  %v6045_v11 = vld [vmem:[%s12310_s5 + $0x2f0] sm:$0xff]  ;;  %v8703_v43 = vld [vmem:[%s12309_s4 + $0x28] sm:$0xff] }
 0x841   :  { %v8450_v20 = vpop.eup %8449 }
 0x842   :  { %v1623_v49 = vmul.f32 %v1622_v17, %v1615_v39  ;;  %v1618_v44 = vmul.f32 %v8450_v20, %v9792_v54  ;;  %v1632_v57 = vadd.f32 %v1630_v22, %v1624_v51  ;;  %v6044_v54 = vld [vmem:[%s12310_s5 + $0x2e8] sm:$0xff]  ;;  %v6090_v39 = vld [vmem:[%s12311_s6 + $0xd8] sm:$0xff]  ;;  %v8704_v20 = vld [vmem:[%s12309_s4 + $0x30] sm:$0xff] }
 0x843   :  { %v8452_v41 = vpop.eup %8451  ;;  %v6089_v51 = vld [vmem:[%s12311_s6 + $0xd0] sm:$0xff] }
 0x844   :  { %v1631_v47 = vadd.f32 %v1630_v22, %v1623_v49  ;;  %v1617_v19 = vmul.f32 %v8452_v41, %v9798_v25  ;;  %v1626_v56 = vmul.f32 %v1622_v17, %v1618_v44  ;;  %v6043_v25 = vld [vmem:[%s12310_s5 + $0x2e0] sm:$0xff]  ;;  %v8705_v49 = vld [vmem:[%s12309_s4 + $0x38] sm:$0xff]  ;;  %v6088_v41 = vld [vmem:[%s12311_s6 + $0xc8] sm:$0xff] }
 0x846   :  { %7419 = vmatprep.mubr.msk.f32.mxu0 %vm292_vm1, %v1631_v47  ;;  %v1625_v38 = vmul.f32 %v1622_v17, %v1617_v19  ;;  %v1634_v23 = vadd.f32 %v1630_v22, %v1626_v56  ;;  %v6091_v17 = vld [vmem:[%s12311_s6 + $0xe0] sm:$0xff]  ;;  %v8707_v56 = vld [vmem:[%s12309_s4 + $0x48] sm:$0xff] }
 0x847   :  { %7420 = vmatmul.mubr.msk.f32.vlgmr.msra.gmra.mxu0 %vm292_vm1, %v1632_v57  ;;  %v8706_v47 = vld [vmem:[%s12309_s4 + $0x40] sm:$0xff] }
 0x848   :  { %v1633_v28 = vadd.f32 %v1630_v22, %v1625_v38  ;;  %7482 = vmatpush3.msra.mxu0 %v9813_v50  ;;  %v6036_v50 = vld [vmem:[%s12310_s5 + $0x2a8] sm:$0xff]  ;;  %v6087_v57 = vld [vmem:[%s12311_s6 + $0xc0] sm:$0xff] }
 0x849   :  { %7483 = vmatprep.subr.mxu0 %v6045_v11 }
 0x84a   :  { %7422 = vmatprep.mubr.msk.f32.mxu0 %vm292_vm1, %v1633_v28  ;;  %7484 = vmatpush3.msra.mxu0 %v6045_v11  ;;  %v6086_v11 = vld [vmem:[%s12311_s6 + $0xb8] sm:$0xff]  ;;  %v8708_v28 = vld [vmem:[%s12309_s4 + $0x50] sm:$0xff] }
 0x84b   :  { %7423 = vmatmul.mubr.msk.f32.gmra.mxu0 %vm292_vm1, %v1634_v23  ;;  %7485 = vmatprep.subr.mxu0 %v6044_v54  ;;  %v6085_v23 = vld [vmem:[%s12311_s6 + $0xb0] sm:$0xff] }
 0x84c   :  { %7486 = vmatpush3.msra.mxu0 %v6044_v54 }
 0x84d   :  { %7487 = vmatprep.subr.mxu0 %v6043_v25 }
 0x84e   :  { %7488 = vmatpush3.msra.mxu0 %v6043_v25  ;;  %v8709_v25 = vld [vmem:[%s12309_s4 + $0x58] sm:$0xff] }
 0x84f   :  { %7489 = vmatprep.subr.mxu0 %v6042_v37 }
 0x850   :  { %7490 = vmatpush3.msra.mxu0 %v6042_v37 }
 0x851   :  { %7491 = vmatprep.subr.mxu0 %v6041_v24 }
 0x852   :  { %7492 = vmatpush3.msra.mxu0 %v6041_v24  ;;  %v6084_v24 = vld [vmem:[%s12311_s6 + $0xa8] sm:$0xff] }
 0x853   :  { %7493 = vmatprep.subr.mxu0 %v6040_v52 }
 0x854   :  { %7494 = vmatpush3.msra.mxu0 %v6040_v52  ;;  %v8710_v52 = vld [vmem:[%s12309_s4 + $0x60] sm:$0xff] }
 0x855   :  { %7495 = vmatprep.subr.mxu0 %v6039_v40 }
 0x856   :  { %7496 = vmatpush3.msra.mxu0 %v6039_v40 }
 0x857   :  { %7497 = vmatprep.subr.mxu0 %v6038_v42 }
 0x858   :  { %7498 = vmatpush3.msra.mxu0 %v6038_v42  ;;  %v6083_v42 = vld [vmem:[%s12311_s6 + $0xa0] sm:$0xff] }
 0x859   :  { %7499 = vmatprep.subr.mxu0 %v6037_v32 }
 0x85a   :  { %7500 = vmatpush3.msra.mxu0 %v6037_v32  ;;  %v8711_v32 = vld [vmem:[%s12309_s4 + $0x68] sm:$0xff] }
 0x85b   :  { %7501 = vmatprep.subr.mxu0 %v6036_v50 }
 0x85c   :  { %7502 = vmatpush3.msra.mxu0 %v6036_v50 }
 0x85d   :  { %7503 = vmatprep.subr.mxu0 %v6035_v62 }
 0x85e   :  { %7504 = vmatpush3.msra.mxu0 %v6035_v62  ;;  %v6082_v62 = vld [vmem:[%s12311_s6 + $0x98] sm:$0xff] }
 0x85f   :  { %7505 = vmatprep.subr.mxu0 %v6034_v59 }
 0x860   :  { %7506 = vmatpush3.msra.mxu0 %v6034_v59  ;;  %v8712_v59 = vld [vmem:[%s12309_s4 + $0x70] sm:$0xff] }
 0x861   :  { %7507 = vmatprep.subr.mxu0 %v6033_v26 }
 0x862   :  { %7508 = vmatpush3.msra.mxu0 %v6033_v26  ;;  %v6081_v26 = vld [vmem:[%s12311_s6 + $0x90] sm:$0xff] }
 0x863   :  { %7509 = vmatprep.subr.mxu0 %v6032_v61 }
 0x864   :  { %7510 = vmatpush3.msra.mxu0 %v6032_v61 }
 0x865   :  { %7511 = vmatprep.subr.mxu0 %v6031_v30 }
 0x866   :  { %7512 = vmatpush3.msra.mxu0 %v6031_v30  ;;  %v6079_v30 = vld [vmem:[%s12311_s6 + $0x80] sm:$0xff] }
 0x907   :  { %v9926_v6 = vpop.f32.mrf.mxu0 }
 0x908   :  { %v9940_v9 = vmul.f32 %v8699_v2, %v9926_v6  ;;  %v9987_v27 = vmul.f32 %v8703_v43, %v9926_v6  ;;  %v10030_v38 = vmul.f32 %v8707_v56, %v9926_v6  ;;  %v1745_v50 = vmul.f32 %v8711_v32, %v9926_v6 }
 0x909   :  { %v9928_v8 = vpop.f32.mrf.mxu0 }
 0x90a   :  { %v9934_v3 = vmul.f32 %v8698_v63, %v9928_v8  ;;  %v9975_v29 = vmul.f32 %v8702_v14, %v9928_v8  ;;  %v10018_v19 = vmul.f32 %v8706_v47, %v9928_v8  ;;  %v1744_v40 = vmul.f32 %v8710_v52, %v9928_v8  ;;  %v6047_v8 = vld [vmem:[%s12310_s5 + $0x300] sm:$0xff] }
 0x90b   :  { %v9942_v7 = vpop.f32.mrf.mxu0 }
 0x90c   :  { %7457 = vmatprep.mubr.f32.mxu1 %v9934_v3  ;;  %7513 = vmatprep.mubr.f32.mxu0 %v9934_v3  ;;  %v9963_v60 = vmul.f32 %v8701_v12, %v9942_v7  ;;  %v10008_v44 = vmul.f32 %v8705_v49, %v9942_v7  ;;  %v1743_v37 = vmul.f32 %v8709_v25, %v9942_v7 }
 0x90d   :  { %v9949_v10 = vpop.f32.mrf.mxu0  ;;  %7458 = vmatmul.mubr.f32.vlgmr.msra.gmra.mxu1 %v9940_v9  ;;  %7514 = vmatmul.mubr.f32.vlgmr.msra.gmra.mxu0 %v9940_v9  ;;  %v1747_v61 = vmul.f32 %v8713_v46, %v9942_v7 }
 0x90e   :  { %7538 = vmatpush3.msra.mxu1 %v6094_v55  ;;  %v9957_v4 = vmul.f32 %v8700_v36, %v9949_v10  ;;  %v9996_v22 = vmul.f32 %v8704_v20, %v9949_v10  ;;  %v1742_v54 = vmul.f32 %v8708_v28, %v9949_v10  ;;  %v1746_v53 = vmul.f32 %v8712_v59, %v9949_v10  ;;  %v6074_v59 = vld [vmem:[%s12310_s5 + $0x3d8] sm:$0xff] }
 0x90f   :  { %7539 = vmatprep.subr.mxu1 %v6093_v5 }
 0x910   :  { %7460 = vmatprep.mubr.f32.mxu1 %v9957_v4  ;;  %7516 = vmatprep.mubr.f32.mxu0 %v9957_v4 }
 0x911   :  { %7540 = vmatpush3.msra.mxu1 %v6093_v5  ;;  %7517 = vmatmul.mubr.f32.gmra.mxu0 %v9963_v60 }
 0x912   :  { %7461 = vmatmul.mubr.f32.gmra.mxu1 %v9963_v60  ;;  %7541 = vmatprep.subr.mxu1 %v6092_v15 }
 0x913   :  { %7463 = vmatprep.mubr.f32.mxu1 %v9975_v29  ;;  %7519 = vmatprep.mubr.f32.mxu0 %v9975_v29 }
 0x914   :  { %7542 = vmatpush3.msra.mxu1 %v6092_v15 }
 0x915   :  { %7543 = vmatprep.subr.mxu1 %v6091_v17  ;;  %7520 = vmatmul.mubr.f32.gmra.mxu0 %v9987_v27 }
 0x916   :  { %7544 = vmatpush3.msra.mxu1 %v6091_v17  ;;  %7522 = vmatprep.mubr.f32.mxu0 %v9996_v22 }
 0x917   :  { %7464 = vmatmul.mubr.f32.gmra.mxu1 %v9987_v27  ;;  %7545 = vmatprep.subr.mxu1 %v6090_v39 }
 0x918   :  { %7466 = vmatprep.mubr.f32.mxu1 %v9996_v22  ;;  %7546 = vmatpush3.msra.mxu1 %v6090_v39 }
 0x919   :  { %7547 = vmatprep.subr.mxu1 %v6089_v51  ;;  %7523 = vmatmul.mubr.f32.gmra.mxu0 %v10008_v44 }
 0x91a   :  { %7548 = vmatpush3.msra.mxu1 %v6089_v51  ;;  %7525 = vmatprep.mubr.f32.mxu0 %v10018_v19 }
 0x91b   :  { %7467 = vmatmul.mubr.f32.gmra.mxu1 %v10008_v44  ;;  %7549 = vmatprep.subr.mxu1 %v6088_v41 }
 0x91c   :  { %7469 = vmatprep.mubr.f32.mxu1 %v10018_v19  ;;  %7550 = vmatpush3.msra.mxu1 %v6088_v41 }
 0x91d   :  { %7551 = vmatprep.subr.mxu1 %v6087_v57  ;;  %7526 = vmatmul.mubr.f32.gmra.mxu0 %v10030_v38 }
 0x91e   :  { %7552 = vmatpush3.msra.mxu1 %v6087_v57  ;;  %7528 = vmatprep.mubr.f32.mxu0 %v1742_v54  ;;  %v6078_v57 = vld [vmem:[%s12310_s5 + $0x3f8] sm:$0xff] }
 0x91f   :  { %7470 = vmatmul.mubr.f32.gmra.mxu1 %v10030_v38  ;;  %7553 = vmatprep.subr.mxu1 %v6086_v11 }
 0x920   :  { %7472 = vmatprep.mubr.f32.mxu1 %v1742_v54  ;;  %7554 = vmatpush3.msra.mxu1 %v6086_v11  ;;  %v6077_v11 = vld [vmem:[%s12310_s5 + $0x3f0] sm:$0xff] }
 0x921   :  { %7555 = vmatprep.subr.mxu1 %v6085_v23  ;;  %7529 = vmatmul.mubr.f32.gmra.mxu0 %v1743_v37 }
 0x922   :  { %7556 = vmatpush3.msra.mxu1 %v6085_v23  ;;  %7531 = vmatprep.mubr.f32.mxu0 %v1744_v40 }
 0x923   :  { %7473 = vmatmul.mubr.f32.gmra.mxu1 %v1743_v37  ;;  %7557 = vmatprep.subr.mxu1 %v6084_v24 }
 0x924   :  { %7475 = vmatprep.mubr.f32.mxu1 %v1744_v40  ;;  %7558 = vmatpush3.msra.mxu1 %v6084_v24 }
 0x925   :  { %7559 = vmatprep.subr.mxu1 %v6083_v42  ;;  %7532 = vmatmul.mubr.f32.gmra.mxu0 %v1745_v50 }
 0x926   :  { %7560 = vmatpush3.msra.mxu1 %v6083_v42  ;;  %7534 = vmatprep.mubr.f32.mxu0 %v1746_v53  ;;  %v6075_v42 = vld [vmem:[%s12310_s5 + $0x3e0] sm:$0xff] }
 0x927   :  { %7476 = vmatmul.mubr.f32.gmra.mxu1 %v1745_v50  ;;  %7561 = vmatprep.subr.mxu1 %v6082_v62 }
 0x928   :  { %7478 = vmatprep.mubr.f32.mxu1 %v1746_v53  ;;  %7562 = vmatpush3.msra.mxu1 %v6082_v62 }
 0x929   :  { %7563 = vmatprep.subr.mxu1 %v6081_v26  ;;  %7535 = vmatmul.mubr.f32.gmra.mxu0 %v1747_v61 }
 0x92a   :  { %7564 = vmatpush3.msra.mxu1 %v6081_v26 }
 0x92b   :  { %7479 = vmatmul.mubr.f32.gmra.mxu1 %v1747_v61  ;;  %7565 = vmatprep.subr.mxu1 %v6080_v0 }
 0x92c   :  { %7566 = vmatpush3.msra.mxu1 %v6080_v0  ;;  %7569 = vmatprep.mubr.f32.mxu1 %v9934_v3 }
 0x92d   :  { %7567 = vmatprep.subr.mxu1 %v6079_v30 }
 0x92e   :  { %7568 = vmatpush3.msra.mxu1 %v6079_v30 }
 0x92f   :  { %7570 = vmatmul.mubr.f32.vlgmr.msra.gmra.mxu1 %v9940_v9 }
 0x930   :  { %7572 = vmatprep.mubr.f32.mxu1 %v9957_v4 }
 0x933   :  { %7573 = vmatmul.mubr.f32.gmra.mxu1 %v9963_v60 }
 0x934   :  { %7575 = vmatprep.mubr.f32.mxu1 %v9975_v29 }
 0x937   :  { %7576 = vmatmul.mubr.f32.gmra.mxu1 %v9987_v27 }
 0x938   :  { %7578 = vmatprep.mubr.f32.mxu1 %v9996_v22 }
 0x93b   :  { %7579 = vmatmul.mubr.f32.gmra.mxu1 %v10008_v44 }
 0x93c   :  { %7581 = vmatprep.mubr.f32.mxu1 %v10018_v19 }
 0x93f   :  { %7582 = vmatmul.mubr.f32.gmra.mxu1 %v10030_v38 }
 0x940   :  { %7584 = vmatprep.mubr.f32.mxu1 %v1742_v54 }
 0x943   :  { %7585 = vmatmul.mubr.f32.gmra.mxu1 %v1743_v37  ;;  %v6076_v37 = vld [vmem:[%s12310_s5 + $0x3e8] sm:$0xff] }
 0x944   :  { %7587 = vmatprep.mubr.f32.mxu1 %v1744_v40 }
 0x947   :  { %7588 = vmatmul.mubr.f32.gmra.mxu1 %v1745_v50 }
 0x948   :  { %7590 = vmatprep.mubr.f32.mxu1 %v1746_v53 }
 0x94b   :  { %7591 = vmatmul.mubr.f32.gmra.mxu1 %v1747_v61  ;;  %v6073_v61 = vld [vmem:[%s12310_s5 + $0x3d0] sm:$0xff] }
 0x9cd   :  { %v10093_v55 = vpop.f32.mrf.mxu1  ;;  %v10095_v6 = vpop.f32.mrf.mxu0 }
 0x9cf   :  { %v1814_v63 = vpop.f32.mrf.mxu1  ;;  %v10100_v3 = vpop.f32.mrf.mxu0 }
 0x9d0   :  { %v1815_v2 = vadd.f32 %v6047_v8, %v1814_v63  ;;  %v6072_v63 = vld [vmem:[%s12310_s5 + $0x3c8] sm:$0xff] }
 0x9d1   :  { %v10102_v9 = vpop.f32.mrf.mxu0 }
 0x9d2   :  { %v10104_v7 = vpop.f32.mrf.mxu1  ;;  %7625 = vmatprep.mubr.msk.f32.mxu0 %vm910_vm2, %v1815_v2 }
 0x9d3   :  { %v10107_v5 = vpop.f32.mrf.mxu0 }
 0x9d4   :  { %v10109_v10 = vpop.f32.mrf.mxu1 }
 0x9d5   :  { %v10111_v36 = vpop.f32.mrf.mxu0 }
 0x9d7   :  { %v10113_v4 = vpop.f32.mrf.mxu1  ;;  %v10115_v12 = vpop.f32.mrf.mxu0 }
 0x9d9   :  { %v10117_v60 = vpop.f32.mrf.mxu1  ;;  %v10119_v15 = vpop.f32.mrf.mxu0 }
 0x9db   :  { %v10121_v14 = vpop.f32.mrf.mxu1  ;;  %v10123_v29 = vpop.f32.mrf.mxu0 }
 0x9dd   :  { %v10125_v17 = vpop.f32.mrf.mxu1  ;;  %v7527_v43 = vpop.f32.mrf.mxu0 }
 0x9df   :  { %v10127_v27 = vpop.f32.mrf.mxu1  ;;  %v1999_v39 = vpop.f32.mrf.mxu0 }
 0x9e1   :  { %v10129_v20 = vpop.f32.mrf.mxu1  ;;  %v7530_v22 = vpop.f32.mrf.mxu0 }
 0x9e2   :  { %v2015_v46 = vadd.f32 %v7530_v22, %v6074_v59 }
 0x9e3   :  { %v10131_v51 = vpop.f32.mrf.mxu1  ;;  %v2009_v49 = vpop.f32.mrf.mxu0 }
 0x9e4   :  { %v2010_v8 = vadd.f32 %v6073_v61, %v2009_v49  ;;  %v6065_v61 = vld [vmem:[%s12310_s5 + $0x390] sm:$0xff] }
 0x9e5   :  { %v10133_v44 = vpop.f32.mrf.mxu1  ;;  %v7533_v41 = vpop.f32.mrf.mxu0 }
 0x9e6   :  { %v2025_v40 = vadd.f32 %v7533_v41, %v6076_v37  ;;  %v2005_v41 = vadd.f32 %v7527_v43, %v6072_v63 }
 0x9e7   :  { %v10135_v47 = vpop.f32.mrf.mxu1  ;;  %v2019_v19 = vpop.f32.mrf.mxu0 }
 0x9e8   :  { %v2020_v62 = vadd.f32 %v6075_v42, %v2019_v19  ;;  %v6071_v19 = vld [vmem:[%s12310_s5 + $0x3c0] sm:$0xff]  ;;  %v6068_v42 = vld [vmem:[%s12310_s5 + $0x3a8] sm:$0xff] }
 0x9e9   :  { %v10140_v56 = vpop.f32.mrf.mxu1  ;;  %v7536_v38 = vpop.f32.mrf.mxu0 }
 0x9ea   :  { %v2035_v28 = vadd.f32 %v7536_v38, %v6078_v57  ;;  %v2000_v38 = vadd.f32 %v6071_v19, %v1999_v39 }
 0x9eb   :  { %v10145_v54 = vpop.f32.mrf.mxu1  ;;  %v2029_v23 = vpop.f32.mrf.mxu0 }
 0x9ec   :  { %v2030_v25 = vadd.f32 %v6077_v11, %v2029_v23  ;;  %7593 = vmatprep.subr.msk.mxu0 %vm910_vm2, %v2035_v28  ;;  %v6070_v11 = vld [vmem:[%s12310_s5 + $0x3b8] sm:$0xff] }
 0x9ed   :  { %v10151_v24 = vpop.f32.mrf.mxu1  ;;  %7594 = vmatpush3.xpose.msk.msra.mxu0 %vm910_vm2, %v2035_v28  ;;  %v1995_v23 = vadd.f32 %v10119_v15, %v6070_v11  ;;  %v1985_v15 = vadd.f32 %v10111_v36, %v6068_v42 }
 0x9ee   :  { %7595 = vmatprep.subr.msk.mxu0 %vm910_vm2, %v2030_v25 }
 0x9ef   :  { %v10155_v52 = vpop.f32.mrf.mxu1 }
 0x9f1   :  { %v10160_v32 = vpop.f32.mrf.mxu1  ;;  %7596 = vmatpush3.xpose.msk.msra.mxu0 %vm910_vm2, %v2030_v25  ;;  %v6069_v25 = vld [vmem:[%s12310_s5 + $0x3b0] sm:$0xff] }
 0x9f2   :  { %7597 = vmatprep.subr.msk.mxu0 %vm910_vm2, %v2025_v40 }
 0x9f3   :  { %v10164_v50 = vpop.f32.mrf.mxu1 }
 0x9f5   :  { %v10169_v53 = vpop.f32.mrf.mxu1  ;;  %7598 = vmatpush3.xpose.msk.msra.mxu0 %vm910_vm2, %v2025_v40  ;;  %v1990_v40 = vadd.f32 %v6069_v25, %v10123_v29  ;;  %v6067_v29 = vld [vmem:[%s12310_s5 + $0x3a0] sm:$0xff] }
 0x9f6   :  { %7599 = vmatprep.subr.msk.mxu0 %vm910_vm2, %v2020_v62  ;;  %v1980_v59 = vadd.f32 %v6067_v29, %v10115_v12  ;;  %v1970_v12 = vadd.f32 %v6065_v61, %v10107_v5  ;;  %v6063_v5 = vld [vmem:[%s12310_s5 + $0x380] sm:$0xff] }
 0x9f7   :  { %v10173_v26 = vpop.f32.mrf.mxu1 }
 0x9f9   :  { %v10178_v0 = vpop.f32.mrf.mxu1  ;;  %7600 = vmatpush3.xpose.msk.msra.mxu0 %vm910_vm2, %v2020_v62 }
 0x9fa   :  { %7601 = vmatprep.subr.msk.mxu0 %vm910_vm2, %v2015_v46 }
 0x9fb   :  { %v7580_v30 = vpop.f32.mrf.mxu1 }
 0x9fd   :  { %v2134_v2 = vpop.f32.mrf.mxu1  ;;  %7602 = vmatpush3.xpose.msk.msra.mxu0 %vm910_vm2, %v2015_v46  ;;  %v6066_v46 = vld [vmem:[%s12310_s5 + $0x398] sm:$0xff] }
 0x9fe   :  { %7603 = vmatprep.subr.msk.mxu0 %vm910_vm2, %v2010_v8  ;;  %v1975_v36 = vadd.f32 %v10102_v9, %v6066_v46  ;;  %v6003_v46 = vld [vmem:[%s12307_s2 + $0xa0] sm:$0xff] }
 0x9ff   :  { %v7583_v22 = vpop.f32.mrf.mxu1 }
 0xa01   :  { %v2144_v57 = vpop.f32.mrf.mxu1  ;;  %7604 = vmatpush3.xpose.msk.msra.mxu0 %vm910_vm2, %v2010_v8  ;;  %v6064_v8 = vld [vmem:[%s12310_s5 + $0x388] sm:$0xff] }
 0xa02   :  { %7605 = vmatprep.subr.msk.mxu0 %vm910_vm2, %v2005_v41  ;;  %v1965_v9 = vadd.f32 %v10095_v6, %v6064_v8  ;;  %v6048_v6 = vld [vmem:[%s12310_s5 + $0x308] sm:$0xff] }
 0xa03   :  { %v7586_v49 = vpop.f32.mrf.mxu1 }
 0xa05   :  { %v2154_v28 = vpop.f32.mrf.mxu1  ;;  %7606 = vmatpush3.xpose.msk.msra.mxu0 %vm910_vm2, %v2005_v41 }
 0xa06   :  { %7607 = vmatprep.subr.msk.mxu0 %vm910_vm2, %v2000_v38 }
 0xa07   :  { %v7589_v43 = vpop.f32.mrf.mxu1 }
 0xa09   :  { %v2164_v37 = vpop.f32.mrf.mxu1  ;;  %7608 = vmatpush3.xpose.msk.msra.mxu0 %vm910_vm2, %v2000_v38 }
 0xa0a   :  { %7609 = vmatprep.subr.msk.mxu0 %vm910_vm2, %v1995_v23 }
 0xa0b   :  { %v7592_v39 = vpop.f32.mrf.mxu1 }
 0xa0c   :  { %7649 = vmatprep.subr.mxu1 %v7592_v39 }
 0xa0d   :  { %v2174_v62 = vpop.f32.mrf.mxu1  ;;  %7650 = vmatpush3.msra.mxu1 %v7592_v39  ;;  %7610 = vmatpush3.xpose.msk.msra.mxu0 %vm910_vm2, %v1995_v23 }
 0xa0e   :  { %7651 = vmatprep.subr.mxu1 %v2174_v62  ;;  %7611 = vmatprep.subr.msk.mxu0 %vm910_vm2, %v1990_v40 }
 0xa0f   :  { %7652 = vmatpush3.msra.mxu1 %v2174_v62 }
 0xa10   :  { %7653 = vmatprep.subr.mxu1 %v7589_v43 }
 0xa11   :  { %7654 = vmatpush3.msra.mxu1 %v7589_v43  ;;  %7612 = vmatpush3.xpose.msk.msra.mxu0 %vm910_vm2, %v1990_v40  ;;  %v6000_v43 = vld [vmem:[%s12307_s2 + $0x88] sm:$0xff]  ;;  %v6001_v40 = vld [vmem:[%s12307_s2 + $0x90] sm:$0xff] }
 0xa12   :  { %7655 = vmatprep.subr.mxu1 %v2164_v37  ;;  %7613 = vmatprep.subr.msk.mxu0 %vm910_vm2, %v1985_v15 }
 0xa13   :  { %7656 = vmatpush3.msra.mxu1 %v2164_v37  ;;  %v6002_v37 = vld [vmem:[%s12307_s2 + $0x98] sm:$0xff] }
 0xa14   :  { %7657 = vmatprep.subr.mxu1 %v7586_v49 }
 0xa15   :  { %7658 = vmatpush3.msra.mxu1 %v7586_v49  ;;  %7614 = vmatpush3.xpose.msk.msra.mxu0 %vm910_vm2, %v1985_v15  ;;  %v6004_v15 = vld [vmem:[%s12307_s2 + $0xa8] sm:$0xff] }
 0xa16   :  { %7659 = vmatprep.subr.mxu1 %v2154_v28  ;;  %7615 = vmatprep.subr.msk.mxu0 %vm910_vm2, %v1980_v59 }
 0xa17   :  { %7660 = vmatpush3.msra.mxu1 %v2154_v28 }
 0xa18   :  { %7661 = vmatprep.subr.mxu1 %v7583_v22 }
 0xa19   :  { %7662 = vmatpush3.msra.mxu1 %v7583_v22  ;;  %7616 = vmatpush3.xpose.msk.msra.mxu0 %vm910_vm2, %v1980_v59 }
 0xa1a   :  { %7663 = vmatprep.subr.mxu1 %v2144_v57  ;;  %7617 = vmatprep.subr.msk.mxu0 %vm910_vm2, %v1975_v36 }
 0xa1b   :  { %7664 = vmatpush3.msra.mxu1 %v2144_v57 }
 0xa1c   :  { %7665 = vmatprep.subr.mxu1 %v7580_v30 }
 0xa1d   :  { %7666 = vmatpush3.msra.mxu1 %v7580_v30  ;;  %7618 = vmatpush3.xpose.msk.msra.mxu0 %vm910_vm2, %v1975_v36  ;;  %v1960_v30 = vadd.f32 %v6063_v5, %v10100_v3  ;;  %v6049_v3 = vld [vmem:[%s12310_s5 + $0x310] sm:$0xff] }
 0xa1e   :  { %7667 = vmatprep.subr.mxu1 %v2134_v2  ;;  %7619 = vmatprep.subr.msk.mxu0 %vm910_vm2, %v1970_v12  ;;  %v6005_v5 = vld [vmem:[%s12307_s2 + $0xb0] sm:$0xff] }
 0xa1f   :  { %7668 = vmatpush3.msra.mxu1 %v2134_v2 }
 0xa20   :  { %7669 = vmatprep.subr.mxu1 %v10173_v26 }
 0xa21   :  { %7670 = vmatpush3.msra.mxu1 %v10173_v26  ;;  %7620 = vmatpush3.xpose.msk.msra.mxu0 %vm910_vm2, %v1970_v12  ;;  %v6050_v26 = vld [vmem:[%s12310_s5 + $0x318] sm:$0xff] }
 0xa22   :  { %7671 = vmatprep.subr.mxu1 %v10178_v0  ;;  %7621 = vmatprep.subr.msk.mxu0 %vm910_vm2, %v1965_v9  ;;  %v6006_v12 = vld [vmem:[%s12307_s2 + $0xb8] sm:$0xff] }
 0xa23   :  { %7672 = vmatpush3.msra.mxu1 %v10178_v0  ;;  %v6051_v0 = vld [vmem:[%s12310_s5 + $0x320] sm:$0xff] }
 0xa24   :  { %7673 = vmatprep.subr.mxu1 %v10164_v50  ;;  %v1835_v63 = vadd.f32 %v6051_v0, %v10117_v60  ;;  %v6055_v60 = vld [vmem:[%s12310_s5 + $0x340] sm:$0xff] }
 0xa25   :  { %7674 = vmatpush3.msra.mxu1 %v10164_v50  ;;  %7622 = vmatpush3.xpose.msk.msra.mxu0 %vm910_vm2, %v1965_v9  ;;  %v1820_v50 = vadd.f32 %v10093_v55, %v6048_v6  ;;  %v1830_v55 = vadd.f32 %v10104_v7, %v6050_v26  ;;  %v6054_v7 = vld [vmem:[%s12310_s5 + $0x338] sm:$0xff]  ;;  %v1855_v41 = vadd.f32 %v6055_v60, %v10129_v20  ;;  %v6059_v20 = vld [vmem:[%s12310_s5 + $0x360] sm:$0xff]  ;;  %v6012_v60 = vld [vmem:[%s12307_s2 + $0xe8] sm:$0xff] }
 0xa26   :  { %7675 = vmatprep.subr.mxu1 %v10169_v53  ;;  %7623 = vmatprep.subr.msk.mxu0 %vm910_vm2, %v1960_v30  ;;  %v1850_v22 = vadd.f32 %v10121_v14, %v6054_v7  ;;  %v6058_v14 = vld [vmem:[%s12310_s5 + $0x358] sm:$0xff]  ;;  %v1875_v38 = vadd.f32 %v6059_v20, %v10140_v56 }
 0xa27   :  { %7676 = vmatpush3.msra.mxu1 %v10169_v53  ;;  %v1825_v53 = vadd.f32 %v6049_v3, %v10109_v10  ;;  %v6053_v10 = vld [vmem:[%s12310_s5 + $0x330] sm:$0xff]  ;;  %v1870_v49 = vadd.f32 %v10131_v51, %v6058_v14  ;;  %v6062_v51 = vld [vmem:[%s12310_s5 + $0x378] sm:$0xff]  ;;  %v6008_v3 = vld [vmem:[%s12307_s2 + $0xc8] sm:$0xff] }
 0xa28   :  { %7677 = vmatprep.subr.mxu1 %v10155_v52  ;;  %v1845_v2 = vadd.f32 %v6053_v10, %v10125_v17  ;;  %v6057_v17 = vld [vmem:[%s12310_s5 + $0x350] sm:$0xff]  ;;  %v1890_v56 = vadd.f32 %v10145_v54, %v6062_v51  ;;  %v6014_v14 = vld [vmem:[%s12307_s2 + $0xf8] sm:$0xff] }
 0xa29   :  { %7678 = vmatpush3.msra.mxu1 %v10155_v52  ;;  %7624 = vmatpush3.xpose.msk.msra.mxu0 %vm910_vm2, %v1960_v30  ;;  %v6052_v52 = vld [vmem:[%s12310_s5 + $0x328] sm:$0xff]  ;;  %v1865_v57 = vadd.f32 %v6057_v17, %v10133_v44  ;;  %v6061_v44 = vld [vmem:[%s12310_s5 + $0x370] sm:$0xff] }
 0xa2a   :  { %7679 = vmatprep.subr.mxu1 %v10160_v32  ;;  %v1885_v28 = vadd.f32 %v6061_v44, %v10151_v24 }
 0xa2b   :  { %7680 = vmatpush3.msra.mxu1 %v10160_v32  ;;  %v1840_v32 = vadd.f32 %v10113_v4, %v6052_v52  ;;  %v6056_v4 = vld [vmem:[%s12310_s5 + $0x348] sm:$0xff]  ;;  %v6010_v52 = vld [vmem:[%s12307_s2 + $0xd8] sm:$0xff] }
 0xa2c   :  { %7626 = vmatmul.mubr.msk.f32.vlgmr.msra.gmra.mxu0 %vm910_vm2, %v1820_v50  ;;  %v1860_v19 = vadd.f32 %v10127_v27, %v6056_v4  ;;  %v6060_v27 = vld [vmem:[%s12310_s5 + $0x368] sm:$0xff] }
 0xa2d   :  { %7628 = vmatprep.mubr.msk.f32.mxu0 %vm910_vm2, %v1825_v53  ;;  %v1880_v11 = vadd.f32 %v10135_v47, %v6060_v27  ;;  %v5999_v47 = vld [vmem:[%s12307_s2 + $0x80] sm:$0xff] }
 0xa2e   :  { %v6007_v53 = vld [vmem:[%s12307_s2 + $0xc0] sm:$0xff] }
 0xa30   :  { %7629 = vmatmul.mubr.msk.f32.gmra.mxu0 %vm910_vm2, %v1830_v55 }
 0xa31   :  { %7631 = vmatprep.mubr.msk.f32.mxu0 %vm910_vm2, %v1835_v63 }
 0xa34   :  { %7632 = vmatmul.mubr.msk.f32.gmra.mxu0 %vm910_vm2, %v1840_v32  ;;  %v6009_v32 = vld [vmem:[%s12307_s2 + $0xd0] sm:$0xff] }
 0xa35   :  { %7634 = vmatprep.mubr.msk.f32.mxu0 %vm910_vm2, %v1845_v2 }
 0xa38   :  { %7635 = vmatmul.mubr.msk.f32.gmra.mxu0 %vm910_vm2, %v1850_v22 }
 0xa39   :  { %7637 = vmatprep.mubr.msk.f32.mxu0 %vm910_vm2, %v1855_v41  ;;  %v6011_v41 = vld [vmem:[%s12307_s2 + $0xe0] sm:$0xff] }
 0xa3c   :  { %7638 = vmatmul.mubr.msk.f32.gmra.mxu0 %vm910_vm2, %v1860_v19 }
 0xa3d   :  { %7640 = vmatprep.mubr.msk.f32.mxu0 %vm910_vm2, %v1865_v57 }
 0xa40   :  { %7641 = vmatmul.mubr.msk.f32.gmra.mxu0 %vm910_vm2, %v1870_v49  ;;  %v6013_v49 = vld [vmem:[%s12307_s2 + $0xf0] sm:$0xff] }
 0xa41   :  { %7643 = vmatprep.mubr.msk.f32.mxu0 %vm910_vm2, %v1875_v38 }
 0xa44   :  { %7644 = vmatmul.mubr.msk.f32.gmra.mxu0 %vm910_vm2, %v1880_v11 }
 0xa45   :  { %7646 = vmatprep.mubr.msk.f32.mxu0 %vm910_vm2, %v1885_v28 }
 0xa48   :  { %7647 = vmatmul.mubr.msk.f32.gmra.mxu0 %vm910_vm2, %v1890_v56 }
 0xaec   :  { %v7627_v23 = vpop.f32.mrf.mxu0 }
 0xaed   :  { %v10336_v25 = vadd.f32 %v7627_v23, %v6000_v43 }
 0xaee   :  { %v2345_v24 = vpop.f32.mrf.mxu0 }
 0xaef   :  { %v10341_v39 = vadd.f32 %v5999_v47, %v2345_v24  ;;  %2426 = vmax.xlane.f32.xlu1 %v10336_v25 }
 0xaf0   :  { %v7630_v54 = vpop.f32.mrf.mxu0 }
 0xaf1   :  { %v10347_v42 = vadd.f32 %v7630_v54, %v6002_v37  ;;  %2424 = vmax.xlane.f32.xlu0 %v10341_v39 }
 0xaf2   :  { %v2355_v62 = vpop.f32.mrf.mxu0 }
 0xaf3   :  { %v10353_v29 = vadd.f32 %v6001_v40, %v2355_v62  ;;  %2430 = vmax.xlane.f32.xlu1 %v10347_v42 }
 0xaf4   :  { %v7633_v59 = vpop.f32.mrf.mxu0 }
 0xaf5   :  { %v10359_v36 = vadd.f32 %v7633_v59, %v6004_v15  ;;  %2428 = vmax.xlane.f32.xlu0 %v10353_v29 }
 0xaf6   :  { %v2365_v61 = vpop.f32.mrf.mxu0 }
 0xaf7   :  { %v10365_v8 = vadd.f32 %v6003_v46, %v2365_v61  ;;  %2434 = vmax.xlane.f32.xlu1 %v10359_v36 }
 0xaf8   :  { %v7636_v9 = vpop.f32.mrf.mxu0 }
 0xaf9   :  { %v10371_v30 = vadd.f32 %v7636_v9, %v6006_v12  ;;  %2432 = vmax.xlane.f32.xlu0 %v10365_v8 }
 0xafa   :  { %v2375_v6 = vpop.f32.mrf.mxu0 }
 0xafb   :  { %v10377_v50 = vadd.f32 %v6005_v5, %v2375_v6  ;;  %2438 = vmax.xlane.f32.xlu1 %v10371_v30 }
 0xafc   :  { %v7639_v26 = vpop.f32.mrf.mxu0 }
 0xafd   :  { %v10383_v0 = vadd.f32 %v7639_v26, %v6008_v3  ;;  %2436 = vmax.xlane.f32.xlu0 %v10377_v50 }
 0xafe   :  { %v2385_v55 = vpop.f32.mrf.mxu0 }
 0xaff   :  { %v10389_v63 = vadd.f32 %v6007_v53, %v2385_v55  ;;  %2442 = vmax.xlane.f32.xlu1 %v10383_v0 }
 0xb00   :  { %v7642_v10 = vpop.f32.mrf.mxu0 }
 0xb01   :  { %v10395_v7 = vadd.f32 %v7642_v10, %v6010_v52  ;;  %2440 = vmax.xlane.f32.xlu0 %v10389_v63 }
 0xb02   :  { %v2395_v2 = vpop.f32.mrf.mxu0 }
 0xb03   :  { %v10401_v22 = vadd.f32 %v6009_v32, %v2395_v2  ;;  %2446 = vmax.xlane.f32.xlu1 %v10395_v7 }
 0xb04   :  { %v7645_v4 = vpop.f32.mrf.mxu0 }
 0xb05   :  { %v10407_v17 = vadd.f32 %v7645_v4, %v6012_v60  ;;  %2444 = vmax.xlane.f32.xlu0 %v10401_v22 }
 0xb06   :  { %v2405_v19 = vpop.f32.mrf.mxu0 }
 0xb07   :  { %v10413_v57 = vadd.f32 %v6011_v41, %v2405_v19  ;;  %2450 = vmax.xlane.f32.xlu1 %v10407_v17 }
 0xb08   :  { %v7648_v20 = vpop.f32.mrf.mxu0 }
 0xb09   :  { %v10419_v27 = vadd.f32 %v7648_v20, %v6014_v14  ;;  %2448 = vmax.xlane.f32.xlu0 %v10413_v57 }
 0xb0a   :  { %v2415_v38 = vpop.f32.mrf.mxu0 }
 0xb0b   :  { %v10422_v44 = vadd.f32 %v6013_v49, %v2415_v38  ;;  %2454 = vmax.xlane.f32.xlu1 %v10419_v27 }
 0xb0d   :  { %2452 = vmax.xlane.f32.xlu0 %v10422_v44 }
 0xb78   :  { %v2427_v11 = vpop.xlane.xlu1 %2426 }
 0xb79   :  { %v2457_v51 = vsub.f32 %v10336_v25, %v2427_v11 }
 0xb7a   :  { %v2425_v28 = vpop.xlane.xlu0 %2424 }
 0xb7b   :  { %v2474_v56 = vmul.f32 1.442695, %v2457_v51  ;;  %v2456_v43 = vsub.f32 %v10341_v39, %v2425_v28 }
 0xb7c   :  { %v2431_v23 = vpop.xlane.xlu1 %2430 }
 0xb7d   :  { %8453 = vpow2.f32 %v2474_v56  ;;  %v2472_v47 = vmul.f32 1.442695, %v2456_v43  ;;  %v2459_v24 = vsub.f32 %v10347_v42, %v2431_v23 }
 0xb7e   :  { %v2429_v37 = vpop.xlane.xlu0 %2428 }
 0xb7f   :  { %8455 = vpow2.f32 %v2472_v47  ;;  %v2478_v54 = vmul.f32 1.442695, %v2459_v24  ;;  %v2458_v40 = vsub.f32 %v10353_v29, %v2429_v37 }
 0xb80   :  { %v2435_v62 = vpop.xlane.xlu1 %2434 }
 0xb81   :  { %8457 = vpow2.f32 %v2478_v54  ;;  %v2476_v15 = vmul.f32 1.442695, %v2458_v40  ;;  %v2461_v59 = vsub.f32 %v10359_v36, %v2435_v62 }
 0xb82   :  { %v2433_v25 = vpop.xlane.xlu0 %2432 }
 0xb83   :  { %8459 = vpow2.f32 %v2476_v15  ;;  %v2482_v46 = vmul.f32 1.442695, %v2461_v59  ;;  %v2460_v39 = vsub.f32 %v10365_v8, %v2433_v25 }
 0xb84   :  { %v2439_v61 = vpop.xlane.xlu1 %2438 }
 0xb85   :  { %8461 = vpow2.f32 %v2482_v46  ;;  %v2480_v12 = vmul.f32 1.442695, %v2460_v39  ;;  %v2463_v42 = vsub.f32 %v10371_v30, %v2439_v61 }
 0xb86   :  { %v2437_v9 = vpop.xlane.xlu0 %2436 }
 0xb87   :  { %8463 = vpow2.f32 %v2480_v12  ;;  %v2486_v5 = vmul.f32 1.442695, %v2463_v42  ;;  %v2462_v29 = vsub.f32 %v10377_v50, %v2437_v9 }
 0xb88   :  { %v2443_v6 = vpop.xlane.xlu1 %2442 }
 0xb89   :  { %8465 = vpow2.f32 %v2486_v5  ;;  %v2484_v3 = vmul.f32 1.442695, %v2462_v29  ;;  %v2465_v36 = vsub.f32 %v10383_v0, %v2443_v6 }
 0xb8a   :  { %v10435_v26 = vpop.eup %8453  ;;  %v2441_v53 = vpop.xlane.xlu0 %2440 }
 0xb8b   :  { %8467 = vpow2.f32 %v2484_v3  ;;  %v2490_v8 = vmul.f32 1.442695, %v2465_v36  ;;  %v2464_v55 = vsub.f32 %v10389_v63, %v2441_v53  ;;  %2506 = vadd.xlane.f32.xlu1 %v10435_v26 }
 0xb8c   :  { %v10439_v30 = vpop.eup %8455  ;;  %v2447_v52 = vpop.xlane.xlu1 %2446 }
 0xb8d   :  { %8469 = vpow2.f32 %v2490_v8  ;;  %v2488_v10 = vmul.f32 1.442695, %v2464_v55  ;;  %v2467_v50 = vsub.f32 %v10395_v7, %v2447_v52  ;;  %2504 = vadd.xlane.f32.xlu0 %v10439_v30 }
 0xb8e   :  { %v10443_v32 = vpop.eup %8457  ;;  %v2445_v0 = vpop.xlane.xlu0 %2444 }
 0xb8f   :  { %8471 = vpow2.f32 %v2488_v10  ;;  %v2494_v2 = vmul.f32 1.442695, %v2467_v50  ;;  %v2466_v60 = vsub.f32 %v10401_v22, %v2445_v0  ;;  %2510 = vadd.xlane.f32.xlu1 %v10443_v32 }
 0xb90   :  { %v10447_v63 = vpop.eup %8459  ;;  %v2451_v4 = vpop.xlane.xlu1 %2450 }
 0xb91   :  { %8473 = vpow2.f32 %v2494_v2  ;;  %v2492_v41 = vmul.f32 1.442695, %v2466_v60  ;;  %v2469_v19 = vsub.f32 %v10407_v17, %v2451_v4  ;;  %2508 = vadd.xlane.f32.xlu0 %v10447_v63 }
 0xb92   :  { %v10451_v7 = vpop.eup %8461  ;;  %v2449_v14 = vpop.xlane.xlu0 %2448 }
 0xb93   :  { %8475 = vpow2.f32 %v2492_v41  ;;  %v2498_v20 = vmul.f32 1.442695, %v2469_v19  ;;  %v2468_v49 = vsub.f32 %v10413_v57, %v2449_v14  ;;  %2514 = vadd.xlane.f32.xlu1 %v10451_v7 }
 0xb94   :  { %v10455_v22 = vpop.eup %8463  ;;  %v2455_v38 = vpop.xlane.xlu1 %2454 }
 0xb95   :  { %8477 = vpow2.f32 %v2498_v20  ;;  %v2496_v11 = vmul.f32 1.442695, %v2468_v49  ;;  %v2471_v51 = vsub.f32 %v10419_v27, %v2455_v38  ;;  %2512 = vadd.xlane.f32.xlu0 %v10455_v22 }
 0xb96   :  { %v10459_v17 = vpop.eup %8465  ;;  %v2453_v28 = vpop.xlane.xlu0 %2452 }
 0xb97   :  { %8479 = vpow2.f32 %v2496_v11  ;;  %v2502_v56 = vmul.f32 1.442695, %v2471_v51  ;;  %v2470_v43 = vsub.f32 %v10422_v44, %v2453_v28  ;;  %2518 = vadd.xlane.f32.xlu1 %v10459_v17 }
 0xb98   :  { %v10463_v57 = vpop.eup %8467 }
 0xb99   :  { %8481 = vpow2.f32 %v2502_v56  ;;  %v2500_v23 = vmul.f32 1.442695, %v2470_v43  ;;  %2516 = vadd.xlane.f32.xlu0 %v10463_v57 }
 0xb9a   :  { %v10466_v47 = vpop.eup %8469 }
 0xb9b   :  { %8483 = vpow2.f32 %v2500_v23  ;;  %2522 = vadd.xlane.f32.xlu1 %v10466_v47 }
 0xb9c   :  { %v10469_v27 = vpop.eup %8471 }
 0xb9d   :  { %2520 = vadd.xlane.f32.xlu0 %v10469_v27 }
 0xb9e   :  { %v10472_v24 = vpop.eup %8473 }
 0xb9f   :  { %2526 = vadd.xlane.f32.xlu1 %v10472_v24 }
 0xba0   :  { %v10475_v44 = vpop.eup %8475 }
 0xba1   :  { %2524 = vadd.xlane.f32.xlu0 %v10475_v44 }
 0xba2   :  { %v10478_v37 = vpop.eup %8477 }
 0xba3   :  { %2530 = vadd.xlane.f32.xlu1 %v10478_v37 }
 0xba4   :  { %v10481_v54 = vpop.eup %8479 }
 0xba5   :  { %2528 = vadd.xlane.f32.xlu0 %v10481_v54 }
 0xba6   :  { %v10484_v40 = vpop.eup %8481 }
 0xba7   :  { %2534 = vadd.xlane.f32.xlu1 %v10484_v40 }
 0xba8   :  { %v10487_v62 = vpop.eup %8483 }
 0xba9   :  { %2532 = vadd.xlane.f32.xlu0 %v10487_v62 }
 0xc14   :  { %v2507_v15 = vpop.xlane.xlu1 %2506 }
 0xc15   :  { %8485 = vrcp.f32 %v2507_v15 }
 0xc16   :  { %v2505_v59 = vpop.xlane.xlu0 %2504 }
 0xc17   :  { %8487 = vrcp.f32 %v2505_v59 }
 0xc18   :  { %v2511_v25 = vpop.xlane.xlu1 %2510 }
 0xc19   :  { %8489 = vrcp.f32 %v2511_v25 }
 0xc1a   :  { %v2509_v46 = vpop.xlane.xlu0 %2508 }
 0xc1b   :  { %8491 = vrcp.f32 %v2509_v46 }
 0xc1c   :  { %v2515_v39 = vpop.xlane.xlu1 %2514 }
 0xc1d   :  { %8493 = vrcp.f32 %v2515_v39 }
 0xc1e   :  { %v2513_v61 = vpop.xlane.xlu0 %2512 }
 0xc1f   :  { %8495 = vrcp.f32 %v2513_v61 }
 0xc20   :  { %v2519_v12 = vpop.xlane.xlu1 %2518 }
 0xc21   :  { %8497 = vrcp.f32 %v2519_v12 }
 0xc22   :  { %v2517_v42 = vpop.xlane.xlu0 %2516  ;;  %v8486_v9 = vpop.eup %8485 }
 0xc23   :  { %8499 = vrcp.f32 %v2517_v42  ;;  %v2553_v36 = vmul.f32 %v8486_v9, %v10435_v26  ;;  %v2727_v9 = vsub.s32 6, %v8994_v34 }
 0xc24   :  { %v8488_v5 = vpop.eup %8487  ;;  %v2523_v29 = vpop.xlane.xlu1 %2522 }
 0xc25   :  { %v2552_v6 = vmul.f32 %v8488_v5, %v10439_v30  ;;  %8501 = vrcp.f32 %v2523_v29 }
 0xc26   :  { %v2521_v3 = vpop.xlane.xlu0 %2520  ;;  %v8490_v53 = vpop.eup %8489 }
 0xc27   :  { %8503 = vrcp.f32 %v2521_v3  ;;  %7681 = vmatprep.mubr.f32.mxu1 %v2552_v6  ;;  %v2555_v50 = vmul.f32 %v8490_v53, %v10443_v32  ;;  %v10511_v3 = vld [vmem:[%s12314_s9] sm:$0xff] }
 0xc28   :  { %v8492_v8 = vpop.eup %8491  ;;  %v2527_v55 = vpop.xlane.xlu1 %2526  ;;  %7682 = vmatmul.mubr.f32.vlgmr.msra.gmra.mxu1 %v2553_v36  ;;  %v2728_v36 = vrot.slane %v10511_v3, %v2727_v9 }
 0xc29   :  { %v2554_v52 = vmul.f32 %v8492_v8, %v10447_v63  ;;  %8505 = vrcp.f32 %v2527_v55 }
 0xc2a   :  { %v2525_v10 = vpop.xlane.xlu0 %2524  ;;  %v8494_v0 = vpop.eup %8493 }
 0xc2b   :  { %8507 = vrcp.f32 %v2525_v10  ;;  %7684 = vmatprep.mubr.f32.mxu1 %v2554_v52  ;;  %v2557_v4 = vmul.f32 %v8494_v0, %v10451_v7 }
 0xc2c   :  { %v8496_v30 = vpop.eup %8495  ;;  %v2531_v2 = vpop.xlane.xlu1 %2530  ;;  %7685 = vmatmul.mubr.f32.gmra.mxu1 %v2555_v50 }
 0xc2d   :  { %v2556_v26 = vmul.f32 %v8496_v30, %v10455_v22  ;;  %8509 = vrcp.f32 %v2531_v2 }
 0xc2e   :  { %v2529_v60 = vpop.xlane.xlu0 %2528  ;;  %v8498_v41 = vpop.eup %8497 }
 0xc2f   :  { %8511 = vrcp.f32 %v2529_v60  ;;  %7687 = vmatprep.mubr.f32.mxu1 %v2556_v26  ;;  %v2559_v20 = vmul.f32 %v8498_v41, %v10459_v17 }
 0xc30   :  { %v8500_v63 = vpop.eup %8499  ;;  %v2535_v19 = vpop.xlane.xlu1 %2534  ;;  %7688 = vmatmul.mubr.f32.gmra.mxu1 %v2557_v4 }
 0xc31   :  { %v2558_v32 = vmul.f32 %v8500_v63, %v10463_v57  ;;  %8513 = vrcp.f32 %v2535_v19 }
 0xc32   :  { %v2533_v14 = vpop.xlane.xlu0 %2532  ;;  %v8502_v49 = vpop.eup %8501 }
 0xc33   :  { %8515 = vrcp.f32 %v2533_v14  ;;  %7690 = vmatprep.mubr.f32.mxu1 %v2558_v32  ;;  %v2561_v7 = vmul.f32 %v8502_v49, %v10466_v47 }
 0xc34   :  { %v8504_v22 = vpop.eup %8503  ;;  %7691 = vmatmul.mubr.f32.gmra.mxu1 %v2559_v20 }
 0xc35   :  { %v2560_v38 = vmul.f32 %v8504_v22, %v10469_v27 }
 0xc36   :  { %v8506_v11 = vpop.eup %8505 }
 0xc37   :  { %7693 = vmatprep.mubr.f32.mxu1 %v2560_v38  ;;  %v2563_v56 = vmul.f32 %v8506_v11, %v10472_v24 }
 0xc38   :  { %v8508_v51 = vpop.eup %8507  ;;  %7694 = vmatmul.mubr.f32.gmra.mxu1 %v2561_v7 }
 0xc39   :  { %v2562_v28 = vmul.f32 %v8508_v51, %v10475_v44  ;;  %v2743_v51 = vld [vmem:[%s12312_s7 + $0x30] sm:$0xff] }
 0xc3a   :  { %v8510_v43 = vpop.eup %8509 }
 0xc3b   :  { %7696 = vmatprep.mubr.f32.mxu1 %v2562_v28  ;;  %v2565_v23 = vmul.f32 %v8510_v43, %v10478_v37 }
 0xc3c   :  { %v8512_v17 = vpop.eup %8511  ;;  %7697 = vmatmul.mubr.f32.gmra.mxu1 %v2563_v56 }
 0xc3d   :  { %v2564_v57 = vmul.f32 %v8512_v17, %v10481_v54 }
 0xc3e   :  { %v8514_v15 = vpop.eup %8513 }
 0xc3f   :  { %7699 = vmatprep.mubr.f32.mxu1 %v2564_v57  ;;  %v2567_v59 = vmul.f32 %v8514_v15, %v10484_v40 }
 0xc40   :  { %v8516_v27 = vpop.eup %8515  ;;  %7700 = vmatmul.mubr.f32.gmra.mxu1 %v2565_v23 }
 0xc41   :  { %v2566_v47 = vmul.f32 %v8516_v27, %v10487_v62 }
 0xc43   :  { %7702 = vmatprep.mubr.f32.mxu1 %v2566_v47 }
 0xc44   :  { %7703 = vmatmul.mubr.f32.gmra.mxu1 %v2567_v59 }
 0xc45   :  { %2916 = vmatprep.mubr.f32.mxu1 %v8811_v1 }
 0xce8   :  { %v7683_v24 = vpop.f32.mrf.mxu1 }
 0xcea   :  { %v2634_v44 = vpop.f32.mrf.mxu1 }
 0xcec   :  { %v7686_v25 = vpop.f32.mrf.mxu1 }
 0xcee   :  { %v2644_v46 = vpop.f32.mrf.mxu1 }
 0xcf0   :  { %v7689_v39 = vpop.f32.mrf.mxu1 }
 0xcf1   :  { %v2714_v62 = vadd.f32 %v7689_v39, %v7683_v24 }
 0xcf2   :  { %v2654_v54 = vpop.f32.mrf.mxu1 }
 0xcf3   :  { %v2713_v40 = vadd.f32 %v2654_v54, %v2634_v44 }
 0xcf4   :  { %v7692_v61 = vpop.f32.mrf.mxu1 }
 0xcf5   :  { %v2716_v8 = vadd.f32 %v7692_v61, %v7686_v25 }
 0xcf6   :  { %v2664_v37 = vpop.f32.mrf.mxu1 }
 0xcf7   :  { %v2715_v50 = vadd.f32 %v2664_v37, %v2644_v46 }
 0xcf8   :  { %v7695_v12 = vpop.f32.mrf.mxu1 }
 0xcf9   :  { %v2718_v6 = vadd.f32 %v7695_v12, %v2714_v62  ;;  %v2740_v62 = vld [vmem:[%s12312_s7 + $0x18] sm:$0xff] }
 0xcfa   :  { %v2674_v42 = vpop.f32.mrf.mxu1 }
 0xcfb   :  { %v2717_v55 = vadd.f32 %v2713_v40, %v2674_v42  ;;  %v2742_v42 = vld [vmem:[%s12312_s7 + $0x28] sm:$0xff] }
 0xcfc   :  { %v7698_v5 = vpop.f32.mrf.mxu1  ;;  %v2738_v40 = vld [vmem:[%s12312_s7 + $0x8] sm:$0xff] }
 0xcfd   :  { %v2720_v0 = vadd.f32 %v7698_v5, %v2716_v8  ;;  %v2741_v5 = vld [vmem:[%s12312_s7 + $0x20] sm:$0xff] }
 0xcfe   :  { %v2684_v29 = vpop.f32.mrf.mxu1 }
 0xcff   :  { %v2719_v60 = vadd.f32 %v2715_v50, %v2684_v29  ;;  %v2739_v29 = vld [vmem:[%s12312_s7 + $0x10] sm:$0xff] }
 0xd00   :  { %v7701_v53 = vpop.f32.mrf.mxu1 }
 0xd01   :  { %v2722_v52 = vadd.f32 %v7701_v53, %v2718_v6  ;;  %v2737_v6 = vld [vmem:[%s12312_s7] sm:$0xff] }
 0xd02   :  { %v2694_v10 = vpop.f32.mrf.mxu1 }
 0xd03   :  { %v2730_v30 = vadd.f32 %v2728_v36, %v2722_v52  ;;  %v2721_v2 = vadd.f32 %v2717_v55, %v2694_v10 }
 0xd04   :  { %v7704_v26 = vpop.f32.mrf.mxu1 }
 0xd05   :  { %v10517_v4 = vadd.f32 %v2730_v30, %v9764_v13  ;;  %v2729_v41 = vadd.f32 %v2728_v36, %v2721_v2  ;;  %v2724_v63 = vadd.f32 %v7704_v26, %v2720_v0 }
 0xd06   :  { %v2704_v19 = vpop.f32.mrf.mxu1 }
 0xd07   :  { %v10520_v32 = vadd.f32 %v2729_v41, %v9769_v18  ;;  %v2732_v14 = vadd.f32 %v2728_v36, %v2724_v63  ;;  %v2723_v20 = vadd.f32 %v2719_v60, %v2704_v19  ;;  %v2767_v49 = vsel %vm292_vm1, %v10517_v4, 0.0  ;;  %v10574_v63 = vld [vmem:[%s12314_s9 + $0x8] sm:$0xff] }
 0xd08   :  { %2768 = vadd.xlane.f32.xlu1 %v2767_v49  ;;  %v2819_v19 = vrot.slane %v10574_v63, %v1629_v31 }
 0xd09   :  { %v10525_v22 = vadd.f32 %v2732_v14, %v9772_v33  ;;  %v2731_v38 = vadd.f32 %v2728_v36, %v2723_v20  ;;  %v2764_v13 = vsel %vm292_vm1, %v10520_v32, 0.0  ;;  %v2744_v33 = vld [vmem:[%s12312_s7 + $0x38] sm:$0xff]  ;;  %v2827_v20 = vrot.slane %v10574_v63, %v2727_v9  ;;  %v2761_v9 = vld [vmem:[%s12313_s8 + $0x70] sm:$0xff] }
 0xd0a   :  { %2765 = vadd.xlane.f32.xlu0 %v2764_v13  ;;  %2876 = vmatprep.subr.mxu1 %v2744_v33  ;;  %v2762_v36 = vld [vmem:[%s12313_s8 + $0x78] sm:$0xff] }
 0xd0b   :  { %v10530_v7 = vadd.f32 %v2731_v38, %v9779_v16  ;;  %v2773_v18 = vsel %vm292_vm1, %v10525_v22, 0.0  ;;  %2877 = vmatpush1.msra.mxu1 %v2743_v51  ;;  %7705 = vmatprep.subr.mxu0 %v2762_v36 }
 0xd0c   :  { %2774 = vadd.xlane.f32.xlu1 %v2773_v18  ;;  %2878 = vmatprep.subr.mxu1 %v2742_v42  ;;  %v2747_v42 = vld [vmem:[%s12313_s8] sm:$0xff] }
 0xd0d   :  { %v2770_v11 = vsel %vm292_vm1, %v10530_v7, 0.0  ;;  %2879 = vmatpush1.msra.mxu1 %v2741_v5  ;;  %7706 = vmatpush3.msra.mxu0 %v2762_v36  ;;  %v10637_v5 = vld [vmem:[%s12308_s3 + $0x18] sm:$0xff] }
 0xd0e   :  { %2771 = vadd.xlane.f32.xlu0 %v2770_v11  ;;  %2880 = vmatprep.subr.mxu1 %v2740_v62 }
 0xd0f   :  { %2881 = vmatpush1.msra.mxu1 %v2739_v29  ;;  %7707 = vmatprep.subr.mxu0 %v2761_v9  ;;  %v6132_v29 = vld [vmem:[%s12312_s7 + $0x48] ss:$0 sm:$0xff] }
 0xd10   :  { %2882 = vmatprep.subr.mxu1 %v2738_v40  ;;  %7708 = vmatpush3.msra.mxu0 %v2761_v9 }
 0xd11   :  { %2883 = vmatpush1.msra.mxu1 %v2737_v6 }
 0xd91   :  { %v2769_v16 = vpop.xlane.xlu1 %2768 }
 0xd92   :  { %v2777_v28 = vmul.f32 0.03125, %v2769_v16 }
 0xd93   :  { %v2766_v56 = vpop.xlane.xlu0 %2765 }
 0xd94   :  { %v2781_v43 = vsub.f32 %v10517_v4, %v2777_v28  ;;  %v2776_v17 = vmul.f32 0.03125, %v2766_v56 }
 0xd95   :  { %v2775_v57 = vpop.xlane.xlu1 %2774 }
 0xd96   :  { %v2780_v23 = vsub.f32 %v10520_v32, %v2776_v17  ;;  %v2779_v15 = vmul.f32 0.03125, %v2775_v57  ;;  %v2785_v27 = vmul.f32 %v2781_v43, %v2781_v43 }
 0xd97   :  { %v2772_v47 = vpop.xlane.xlu0 %2771 }
 0xd98   :  { %v2783_v59 = vsub.f32 %v10525_v22, %v2779_v15  ;;  %v2778_v24 = vmul.f32 0.03125, %v2772_v47  ;;  %v2791_v44 = vsel %vm292_vm1, %v2785_v27, 0.0  ;;  %v2784_v25 = vmul.f32 %v2780_v23, %v2780_v23  ;;  %v2758_v47 = vld [vmem:[%s12313_s8 + $0x58] sm:$0xff] }
 0xd99   :  { %2792 = vadd.xlane.f32.xlu1 %v2791_v44  ;;  %v2755_v44 = vld [vmem:[%s12313_s8 + $0x40] sm:$0xff] }
 0xd9a   :  { %v2782_v46 = vsub.f32 %v10530_v7, %v2778_v24  ;;  %v2788_v39 = vsel %vm292_vm1, %v2784_v25, 0.0  ;;  %v2787_v54 = vmul.f32 %v2783_v59, %v2783_v59  ;;  %v2756_v24 = vld [vmem:[%s12313_s8 + $0x48] sm:$0xff]  ;;  %v2754_v25 = vld [vmem:[%s12313_s8 + $0x38] sm:$0xff] }
 0xd9b   :  { %2789 = vadd.xlane.f32.xlu0 %v2788_v39  ;;  %v2752_v39 = vld [vmem:[%s12313_s8 + $0x28] sm:$0xff] }
 0xd9c   :  { %v2797_v61 = vsel %vm292_vm1, %v2787_v54, 0.0  ;;  %v2786_v37 = vmul.f32 %v2782_v46, %v2782_v46  ;;  %v2751_v54 = vld [vmem:[%s12313_s8 + $0x20] sm:$0xff] }
 0xd9d   :  { %2798 = vadd.xlane.f32.xlu1 %v2797_v61  ;;  %v2750_v61 = vld [vmem:[%s12313_s8 + $0x18] sm:$0xff] }
 0xd9e   :  { %v2794_v12 = vsel %vm292_vm1, %v2786_v37, 0.0  ;;  %v2749_v37 = vld [vmem:[%s12313_s8 + $0x10] sm:$0xff] }
 0xd9f   :  { %2795 = vadd.xlane.f32.xlu0 %v2794_v12  ;;  %v2748_v12 = vld [vmem:[%s12313_s8 + $0x8] sm:$0xff] }
 0xe22   :  { %v2793_v53 = vpop.xlane.xlu1 %2792 }
 0xe23   :  { %v2801_v8 = vmul.f32 0.03125, %v2793_v53 }
 0xe24   :  { %v2790_v55 = vpop.xlane.xlu0 %2789 }
 0xe25   :  { %v2805_v52 = vadd.f32 1e-05, %v2801_v8  ;;  %v2800_v10 = vmul.f32 0.03125, %v2790_v55 }
 0xe26   :  { %v2799_v50 = vpop.xlane.xlu1 %2798 }
 0xe27   :  { %8517 = vrsqrt.f32 %v2805_v52  ;;  %v2804_v0 = vadd.f32 1e-05, %v2800_v10  ;;  %v2803_v30 = vmul.f32 0.03125, %v2799_v50 }
 0xe28   :  { %v2796_v2 = vpop.xlane.xlu0 %2795 }
 0xe29   :  { %8519 = vrsqrt.f32 %v2804_v0  ;;  %v2807_v26 = vadd.f32 1e-05, %v2803_v30  ;;  %v2802_v60 = vmul.f32 0.03125, %v2796_v2 }
 0xe2b   :  { %8521 = vrsqrt.f32 %v2807_v26  ;;  %v2806_v41 = vadd.f32 1e-05, %v2802_v60 }
 0xe2d   :  { %8523 = vrsqrt.f32 %v2806_v41 }
 0xe34   :  { %v8518_v14 = vpop.eup %8517 }
 0xe35   :  { %v2813_v49 = vmul.f32 %v8518_v14, %v2781_v43  ;;  %v2760_v43 = vld [vmem:[%s12313_s8 + $0x68] sm:$0xff]  ;;  %v6131_v14 = vld [vmem:[%s12312_s7 + $0x40] ss:$0 sm:$0xff] }
 0xe36   :  { %v8520_v38 = vpop.eup %8519  ;;  %7709 = vmatprep.subr.mxu0 %v2760_v43 }
 0xe37   :  { %v2812_v13 = vmul.f32 %v8520_v38, %v2780_v23  ;;  %v2821_v18 = vmul.f32 %v2819_v19, %v2813_v49  ;;  %7710 = vmatpush3.msra.mxu0 %v2760_v43  ;;  %v2759_v23 = vld [vmem:[%s12313_s8 + $0x60] sm:$0xff] }
 0xe38   :  { %v8522_v11 = vpop.eup %8521  ;;  %7711 = vmatprep.subr.mxu0 %v2759_v23 }
 0xe39   :  { %v2820_v33 = vmul.f32 %v2819_v19, %v2812_v13  ;;  %v2829_v51 = vadd.f32 %v2827_v20, %v2821_v18  ;;  %v2815_v16 = vmul.f32 %v8522_v11, %v2783_v59  ;;  %7712 = vmatpush3.msra.mxu0 %v2759_v23  ;;  %v2757_v59 = vld [vmem:[%s12313_s8 + $0x50] sm:$0xff] }
 0xe3a   :  { %v8524_v28 = vpop.eup %8523  ;;  %7713 = vmatprep.subr.mxu0 %v2758_v47 }
 0xe3b   :  { %v2828_v56 = vadd.f32 %v2827_v20, %v2820_v33  ;;  %v2814_v17 = vmul.f32 %v8524_v28, %v2782_v46  ;;  %v2823_v57 = vmul.f32 %v2819_v19, %v2815_v16  ;;  %7714 = vmatpush3.msra.mxu0 %v2758_v47  ;;  %v2753_v46 = vld [vmem:[%s12313_s8 + $0x30] sm:$0xff] }
 0xe3c   :  { %7715 = vmatprep.subr.mxu0 %v2757_v59 }
 0xe3d   :  { %6133 = vmatmul.mubr.msk.f32.vlgmr.msra.gmra.mxu1 %vm292_vm1, %v2828_v56  ;;  %v2822_v31 = vmul.f32 %v2819_v19, %v2814_v17  ;;  %v2831_v15 = vadd.f32 %v2827_v20, %v2823_v57  ;;  %7716 = vmatpush3.msra.mxu0 %v2757_v59  ;;  %v8716_v59 = vld [vmem:[%s12308_s3 + $0x10] sm:$0xff] }
 0xe3e   :  { %2922 = vmatprep.mubr.f32.mxu1 %v8811_v1  ;;  %7717 = vmatprep.subr.mxu0 %v2756_v24 }
 0xe3f   :  { %v2830_v27 = vadd.f32 %v2827_v20, %v2822_v31  ;;  %7718 = vmatpush3.msra.mxu0 %v2756_v24 }
 0xe40   :  { %7719 = vmatprep.subr.mxu0 %v2755_v44 }
 0xe41   :  { %6134 = vmatmul.mubr.msk.f32.gmra.mxu1 %vm292_vm1, %v2829_v51  ;;  %7720 = vmatpush3.msra.mxu0 %v2755_v44 }
 0xe42   :  { %2928 = vmatprep.mubr.f32.mxu1 %v8811_v1  ;;  %7721 = vmatprep.subr.mxu0 %v2754_v25 }
 0xe43   :  { %7722 = vmatpush3.msra.mxu0 %v2754_v25  ;;  %v8717_v25 = vld [vmem:[%s12308_s3 + $0x8] sm:$0xff] }
 0xe44   :  { %7723 = vmatprep.subr.mxu0 %v2753_v46 }
 0xe45   :  { %6135 = vmatmul.mubr.msk.f32.gmra.mxu1 %vm292_vm1, %v2830_v27  ;;  %7724 = vmatpush3.msra.mxu0 %v2753_v46 }
 0xe46   :  { %2934 = vmatprep.mubr.f32.mxu1 %v8811_v1  ;;  %7725 = vmatprep.subr.mxu0 %v2752_v39 }
 0xe47   :  { %7726 = vmatpush3.msra.mxu0 %v2752_v39  ;;  %v8718_v39 = vld [vmem:[%s12308_s3] sm:$0xff] }
 0xe48   :  { %7727 = vmatprep.subr.mxu0 %v2751_v54 }
 0xe49   :  { %6136 = vmatmul.mubr.msk.f32.gmra.mxu1 %vm292_vm1, %v2831_v15  ;;  %7728 = vmatpush3.msra.mxu0 %v2751_v54  ;;  %v6137_v54 = vld [vmem:[%s12313_s8 + $0x80] ss:$0 sm:$0xff] }
 0xe4a   :  { %7729 = vmatprep.subr.mxu0 %v2750_v61 }
 0xe4b   :  { %7730 = vmatpush3.msra.mxu0 %v2750_v61 }
 0xe4c   :  { %7731 = vmatprep.subr.mxu0 %v2749_v37 }
 0xe4d   :  { %7732 = vmatpush3.msra.mxu0 %v2749_v37 }
 0xe4e   :  { %7733 = vmatprep.subr.mxu0 %v2748_v12 }
 0xe4f   :  { %7734 = vmatpush3.msra.mxu0 %v2748_v12 }
 0xe50   :  { %7735 = vmatprep.subr.mxu0 %v2747_v42 }
 0xe51   :  { %7736 = vmatpush3.msra.mxu0 %v2747_v42 }
 0xe52   :  { %7743 = vmatprep.subr.mxu0 %v10637_v5 }
 0xefd   :  { %v2918_v62 = vpop.f32.mrf.mxu1 }
 0xefe   :  { %v2919_v38 = vadd.f32 %v6131_v14, %v2918_v62 }
 0xeff   :  { %v2920_v40 = vpop.f32.mrf.mxu1 }
 0xf00   :  { %v2921_v6 = vadd.f32 %v6132_v29, %v2920_v40 }
 0xf01   :  { %v2924_v36 = vpop.f32.mrf.mxu1 }
 0xf02   :  { %v2945_v53 = vmul.f32 0.70710677, %v2921_v6  ;;  %v2941_v20 = vmul.f32 0.5, %v2921_v6  ;;  %v2925_v16 = vadd.f32 %v6131_v14, %v2924_v36 }
 0xf03   :  { %v2926_v8 = vpop.f32.mrf.mxu1 }
 0xf04   :  { %8525 = verf.f32 %v2945_v53  ;;  %v2927_v55 = vadd.f32 %v6132_v29, %v2926_v8 }
 0xf05   :  { %v2930_v52 = vpop.f32.mrf.mxu1 }
 0xf06   :  { %v2946_v10 = vmul.f32 0.70710677, %v2927_v55  ;;  %v2942_v11 = vmul.f32 0.5, %v2927_v55  ;;  %v2931_v15 = vadd.f32 %v6131_v14, %v2930_v52 }
 0xf07   :  { %v2932_v50 = vpop.f32.mrf.mxu1 }
 0xf08   :  { %8527 = verf.f32 %v2946_v10  ;;  %v2933_v0 = vadd.f32 %v6132_v29, %v2932_v50 }
 0xf09   :  { %v2936_v30 = vpop.f32.mrf.mxu1 }
 0xf0a   :  { %v2947_v2 = vmul.f32 0.70710677, %v2933_v0  ;;  %v2943_v57 = vmul.f32 0.5, %v2933_v0  ;;  %v2937_v24 = vadd.f32 %v6131_v14, %v2936_v30 }
 0xf0b   :  { %v2938_v26 = vpop.f32.mrf.mxu1 }
 0xf0c   :  { %8529 = verf.f32 %v2947_v2  ;;  %v2939_v60 = vadd.f32 %v6132_v29, %v2938_v26 }
 0xf0e   :  { %v2948_v41 = vmul.f32 0.70710677, %v2939_v60  ;;  %v2944_v43 = vmul.f32 0.5, %v2939_v60 }
 0xf10   :  { %8531 = verf.f32 %v2948_v41 }
 0xf11   :  { %v8526_v19 = vpop.eup %8525 }
 0xf12   :  { %v2953_v49 = vadd.f32 1.0, %v8526_v19 }
 0xf14   :  { %v2957_v13 = vmul.f32 %v2953_v49, %v2941_v20 }
 0xf15   :  { %v8528_v18 = vpop.eup %8527 }
 0xf16   :  { %v2954_v33 = vadd.f32 1.0, %v8528_v18  ;;  %v2961_v51 = vmul.f32 %v2957_v13, %v2919_v38 }
 0xf18   :  { %v2958_v28 = vmul.f32 %v2954_v33, %v2942_v11  ;;  %7737 = vmatprep.mubr.f32.mxu0 %v2961_v51 }
 0xf19   :  { %v8530_v56 = vpop.eup %8529 }
 0xf1a   :  { %v2962_v17 = vmul.f32 %v2958_v28, %v2925_v16  ;;  %v2955_v31 = vadd.f32 1.0, %v8530_v56  ;;  %v6153_v28 = vld [vmem:[%s12310_s5 + $0x478] sm:$0xff] }
 0xf1b   :  { %v10709_v56 = vld [vmem:[%s12310_s5 + $0x4f8] sm:$0xff]  ;;  %7757 = vmatprep.subr.mxu1 %v6153_v28 }
 0xf1c   :  { %v2959_v27 = vmul.f32 %v2955_v31, %v2943_v57  ;;  %7738 = vmatmul.mubr.f32.vlgmr.msra.gmra.mxu0 %v2962_v17  ;;  %v6152_v17 = vld [vmem:[%s12310_s5 + $0x470] sm:$0xff]  ;;  %7758 = vmatpush3.msra.mxu1 %v6153_v28  ;;  %v6151_v57 = vld [vmem:[%s12310_s5 + $0x468] sm:$0xff]  ;;  %v6150_v31 = vld [vmem:[%s12310_s5 + $0x460] sm:$0xff] }
 0xf1d   :  { %v8532_v9 = vpop.eup %8531  ;;  %7744 = vmatpush3.msra.mxu0 %v10637_v5  ;;  %7759 = vmatprep.subr.mxu1 %v6152_v17  ;;  %v6160_v28 = vld [vmem:[%s12310_s5 + $0x4b0] sm:$0xff] }
 0xf1e   :  { %v2956_v23 = vadd.f32 1.0, %v8532_v9  ;;  %v2963_v47 = vmul.f32 %v2959_v27, %v2931_v15  ;;  %7745 = vmatprep.subr.mxu0 %v8716_v59  ;;  %7760 = vmatpush3.msra.mxu1 %v6152_v17  ;;  %v6149_v15 = vld [vmem:[%s12310_s5 + $0x458] sm:$0xff]  ;;  %v6148_v27 = vld [vmem:[%s12310_s5 + $0x450] sm:$0xff]  ;;  %v6147_v9 = vld [vmem:[%s12310_s5 + $0x448] sm:$0xff] }
 0xf1f   :  { %7746 = vmatpush3.msra.mxu0 %v8716_v59  ;;  %7761 = vmatprep.subr.mxu1 %v6151_v57  ;;  %v6143_v59 = vld [vmem:[%s12310_s5 + $0x428] sm:$0xff]  ;;  %v6158_v17 = vld [vmem:[%s12310_s5 + $0x4a0] sm:$0xff] }
 0xf20   :  { %v2960_v44 = vmul.f32 %v2956_v23, %v2944_v43  ;;  %7740 = vmatprep.mubr.f32.mxu0 %v2963_v47  ;;  %7747 = vmatprep.subr.mxu0 %v8717_v25  ;;  %v6146_v43 = vld [vmem:[%s12310_s5 + $0x440] sm:$0xff]  ;;  %v6145_v23 = vld [vmem:[%s12310_s5 + $0x438] sm:$0xff]  ;;  %v6144_v47 = vld [vmem:[%s12310_s5 + $0x430] sm:$0xff] }
 0xf21   :  { %7748 = vmatpush3.msra.mxu0 %v8717_v25  ;;  %7762 = vmatpush3.msra.mxu1 %v6151_v57  ;;  %v6157_v57 = vld [vmem:[%s12310_s5 + $0x498] sm:$0xff] }
 0xf22   :  { %v2964_v46 = vmul.f32 %v2960_v44, %v2937_v24  ;;  %7749 = vmatprep.subr.mxu0 %v8718_v39  ;;  %7763 = vmatprep.subr.mxu1 %v6150_v31  ;;  %v6142_v24 = vld [vmem:[%s12310_s5 + $0x420] sm:$0xff]  ;;  %v6141_v44 = vld [vmem:[%s12310_s5 + $0x418] sm:$0xff] }
 0xf23   :  { %7750 = vmatpush3.msra.mxu0 %v8718_v39  ;;  %7764 = vmatpush3.msra.mxu1 %v6150_v31  ;;  %v6140_v31 = vld [vmem:[%s12310_s5 + $0x410] sm:$0xff] }
 0xf24   :  { %7741 = vmatmul.mubr.f32.gmra.mxu0 %v2964_v46  ;;  %7813 = vmatprep.subr.mxu0 %v10709_v56 }
 0xf25   :  { %7765 = vmatprep.subr.mxu1 %v6149_v15 }
 0xf26   :  { %7766 = vmatpush3.msra.mxu1 %v6149_v15  ;;  %v6156_v15 = vld [vmem:[%s12310_s5 + $0x490] sm:$0xff] }
 0xf27   :  { %7767 = vmatprep.subr.mxu1 %v6148_v27 }
 0xf28   :  { %7768 = vmatpush3.msra.mxu1 %v6148_v27  ;;  %v6139_v27 = vld [vmem:[%s12310_s5 + $0x408] sm:$0xff] }
 0xf29   :  { %7769 = vmatprep.subr.mxu1 %v6147_v9 }
 0xf2a   :  { %7770 = vmatpush3.msra.mxu1 %v6147_v9  ;;  %v6155_v9 = vld [vmem:[%s12310_s5 + $0x488] sm:$0xff] }
 0xf2b   :  { %7771 = vmatprep.subr.mxu1 %v6146_v43 }
 0xf2c   :  { %7772 = vmatpush3.msra.mxu1 %v6146_v43  ;;  %v6138_v43 = vld [vmem:[%s12310_s5 + $0x400] sm:$0xff] }
 0xf2d   :  { %7773 = vmatprep.subr.mxu1 %v6145_v23 }
 0xf2e   :  { %7774 = vmatpush3.msra.mxu1 %v6145_v23  ;;  %v6154_v23 = vld [vmem:[%s12310_s5 + $0x480] sm:$0xff] }
 0xf2f   :  { %7775 = vmatprep.subr.mxu1 %v6144_v47 }
 0xf30   :  { %7776 = vmatpush3.msra.mxu1 %v6144_v47  ;;  %v6217_v47 = vld [vmem:[%s12311_s6 + $0x178] sm:$0xff] }
 0xf31   :  { %7777 = vmatprep.subr.mxu1 %v6143_v59 }
 0xf32   :  { %7778 = vmatpush3.msra.mxu1 %v6143_v59 }
 0xf33   :  { %7779 = vmatprep.subr.mxu1 %v6142_v24 }
 0xf34   :  { %7780 = vmatpush3.msra.mxu1 %v6142_v24 }
 0xf35   :  { %7781 = vmatprep.subr.mxu1 %v6141_v44 }
 0xf36   :  { %7782 = vmatpush3.msra.mxu1 %v6141_v44  ;;  %v8719_v44 = vld [vmem:[%s12309_s4] sm:$0xff] }
 0xf37   :  { %7783 = vmatprep.subr.mxu1 %v6140_v31 }
 0xf38   :  { %7784 = vmatpush3.msra.mxu1 %v6140_v31 }
 0xf39   :  { %7785 = vmatprep.subr.mxu1 %v6139_v27 }
 0xf3a   :  { %7786 = vmatpush3.msra.mxu1 %v6139_v27  ;;  %v8734_v27 = vld [vmem:[%s12309_s4 + $0x78] sm:$0xff] }
 0xf3b   :  { %7787 = vmatprep.subr.mxu1 %v6138_v43 }
 0xf3c   :  { %7788 = vmatpush3.msra.mxu1 %v6138_v43  ;;  %v6203_v43 = vld [vmem:[%s12311_s6 + $0x108] sm:$0xff] }
 0xf3d   :  { %7869 = vmatprep.subr.mxu1 %v6217_v47 }
 0xfdc   :  { %v7739_v61 = vpop.f32.mrf.mxu0 }
 0xfdd   :  { %v3041_v37 = vadd.f32 %v7739_v61, %v6137_v54 }
 0xfde   :  { %v3035_v12 = vpop.f32.mrf.mxu0 }
 0xfdf   :  { %v10660_v42 = vadd.f32 %v3041_v37, %v10517_v4  ;;  %v3036_v62 = vadd.f32 %v6137_v54, %v3035_v12 }
 0xfe1   :  { %v10663_v29 = vadd.f32 %v3036_v62, %v10520_v32  ;;  %v3146_v40 = vsel %vm292_vm1, %v10660_v42, 0.0 }
 0xfe2   :  { %3147 = vadd.xlane.f32.xlu1 %v3146_v40 }
 0xfe3   :  { %v3143_v6 = vsel %vm292_vm1, %v10663_v29, 0.0 }
 0xfe4   :  { %3144 = vadd.xlane.f32.xlu0 %v3143_v6  ;;  %v7742_v36 = vpop.f32.mrf.mxu0 }
 0xfe5   :  { %v3051_v53 = vadd.f32 %v7742_v36, %v6137_v54 }
 0xfe6   :  { %v3045_v8 = vpop.f32.mrf.mxu0 }
 0xfe7   :  { %v10670_v55 = vadd.f32 %v3051_v53, %v10525_v22  ;;  %v3046_v4 = vadd.f32 %v6137_v54, %v3045_v8  ;;  %v3197_v8 = vsub.s32 7, %v8994_v34 }
 0xfe9   :  { %v10673_v52 = vadd.f32 %v3046_v4, %v10530_v7  ;;  %v3152_v32 = vsel %vm292_vm1, %v10670_v55, 0.0 }
 0xfea   :  { %3153 = vadd.xlane.f32.xlu1 %v3152_v32  ;;  %v3198_v32 = vrot.slane %v10511_v3, %v3197_v8  ;;  %v6168_v3 = vld [vmem:[%s12310_s5 + $0x4f0] sm:$0xff] }
 0xfeb   :  { %v3149_v10 = vsel %vm292_vm1, %v10673_v52, 0.0 }
 0xfec   :  { %3150 = vadd.xlane.f32.xlu0 %v3149_v10 }
0x106b   :  { %v3148_v50 = vpop.xlane.xlu1 %3147 }
0x106c   :  { %v3156_v0 = vmul.f32 0.03125, %v3148_v50 }
0x106d   :  { %v3145_v30 = vpop.xlane.xlu0 %3144 }
0x106e   :  { %v10680_v2 = vsub.f32 %v10660_v42, %v3156_v0  ;;  %v3155_v22 = vmul.f32 0.03125, %v3145_v30  ;;  %v3206_v30 = vrot.slane %v10574_v63, %v93_v35  ;;  %v6167_v35 = vld [vmem:[%s12310_s5 + $0x4e8] sm:$0xff] }
0x1070   :  { %v10683_v26 = vsub.f32 %v10663_v29, %v3155_v22  ;;  %v3164_v7 = vmul.f32 %v10680_v2, %v10680_v2 }
0x1072   :  { %v3170_v60 = vsel %vm292_vm1, %v3164_v7, 0.0  ;;  %v3163_v41 = vmul.f32 %v10683_v26, %v10683_v26 }
0x1073   :  { %3171 = vadd.xlane.f32.xlu1 %v3170_v60  ;;  %v3154_v19 = vpop.xlane.xlu1 %3153 }
0x1074   :  { %v3158_v14 = vmul.f32 0.03125, %v3154_v19  ;;  %v3167_v20 = vsel %vm292_vm1, %v3163_v41, 0.0 }
0x1075   :  { %3168 = vadd.xlane.f32.xlu0 %v3167_v20  ;;  %v3151_v49 = vpop.xlane.xlu0 %3150 }
0x1076   :  { %v10692_v38 = vsub.f32 %v10670_v55, %v3158_v14  ;;  %v3157_v13 = vmul.f32 0.03125, %v3151_v49  ;;  %v6166_v49 = vld [vmem:[%s12310_s5 + $0x4e0] sm:$0xff] }
0x1078   :  { %v10695_v18 = vsub.f32 %v10673_v52, %v3157_v13  ;;  %v3166_v11 = vmul.f32 %v10692_v38, %v10692_v38  ;;  %v6165_v13 = vld [vmem:[%s12310_s5 + $0x4d8] sm:$0xff] }
0x107a   :  { %v3176_v33 = vsel %vm292_vm1, %v3166_v11, 0.0  ;;  %v3165_v51 = vmul.f32 %v10695_v18, %v10695_v18  ;;  %v6164_v11 = vld [vmem:[%s12310_s5 + $0x4d0] sm:$0xff] }
0x107b   :  { %3177 = vadd.xlane.f32.xlu1 %v3176_v33  ;;  %v6163_v33 = vld [vmem:[%s12310_s5 + $0x4c8] sm:$0xff] }
0x107c   :  { %v3173_v16 = vsel %vm292_vm1, %v3165_v51, 0.0  ;;  %v6162_v51 = vld [vmem:[%s12310_s5 + $0x4c0] sm:$0xff] }
0x107d   :  { %3174 = vadd.xlane.f32.xlu0 %v3173_v16  ;;  %v6161_v16 = vld [vmem:[%s12310_s5 + $0x4b8] sm:$0xff] }
0x10fc   :  { %v3172_v25 = vpop.xlane.xlu1 %3171 }
0x10fd   :  { %v3180_v46 = vmul.f32 0.03125, %v3172_v25 }
0x10fe   :  { %v3169_v39 = vpop.xlane.xlu0 %3168 }
0x10ff   :  { %v3184_v54 = vadd.f32 1e-05, %v3180_v46  ;;  %v3179_v61 = vmul.f32 0.03125, %v3169_v39  ;;  %v8720_v46 = vld [vmem:[%s12309_s4 + $0x8] sm:$0xff] }
0x1101   :  { %8533 = vrsqrt.f32 %v3184_v54  ;;  %v3183_v37 = vadd.f32 1e-05, %v3179_v61  ;;  %v6216_v54 = vld [vmem:[%s12311_s6 + $0x170] sm:$0xff]  ;;  %v6215_v61 = vld [vmem:[%s12311_s6 + $0x168] sm:$0xff] }
0x1103   :  { %8535 = vrsqrt.f32 %v3183_v37 }
0x1104   :  { %v3178_v12 = vpop.xlane.xlu1 %3177 }
0x1105   :  { %v3182_v62 = vmul.f32 0.03125, %v3178_v12  ;;  %v6214_v12 = vld [vmem:[%s12311_s6 + $0x160] sm:$0xff] }
0x1106   :  { %v3175_v40 = vpop.xlane.xlu0 %3174 }
0x1107   :  { %v3186_v6 = vadd.f32 1e-05, %v3182_v62  ;;  %v3181_v36 = vmul.f32 0.03125, %v3175_v40  ;;  %v8721_v40 = vld [vmem:[%s12309_s4 + $0x10] sm:$0xff] }
0x1109   :  { %8537 = vrsqrt.f32 %v3186_v6  ;;  %v3185_v53 = vadd.f32 1e-05, %v3181_v36  ;;  %v8722_v36 = vld [vmem:[%s12309_s4 + $0x18] sm:$0xff] }
0x110b   :  { %8539 = vrsqrt.f32 %v3185_v53 }
0x110e   :  { %v8534_v4 = vpop.eup %8533 }
0x110f   :  { %v3192_v10 = vmul.f32 %v8534_v4, %v10680_v2  ;;  %v8723_v4 = vld [vmem:[%s12309_s4 + $0x20] sm:$0xff] }
0x1110   :  { %v8536_v50 = vpop.eup %8535 }
0x1111   :  { %v3191_v0 = vmul.f32 %v8536_v50, %v10683_v26  ;;  %v3200_v22 = vmul.f32 %v3198_v32, %v3192_v10  ;;  %v6213_v10 = vld [vmem:[%s12311_s6 + $0x158] sm:$0xff]  ;;  %v8724_v50 = vld [vmem:[%s12309_s4 + $0x28] sm:$0xff] }
0x1113   :  { %v3199_v7 = vmul.f32 %v3198_v32, %v3191_v0  ;;  %v3208_v19 = vadd.f32 %v3206_v30, %v3200_v22 }
0x1115   :  { %v3207_v60 = vadd.f32 %v3206_v30, %v3199_v7  ;;  %v6212_v7 = vld [vmem:[%s12311_s6 + $0x150] sm:$0xff] }
0x1116   :  { %v8538_v41 = vpop.eup %8537 }
0x1117   :  { %7751 = vmatprep.mubr.msk.f32.mxu0 %vm292_vm1, %v3207_v60  ;;  %v3194_v14 = vmul.f32 %v8538_v41, %v10692_v38  ;;  %v8726_v60 = vld [vmem:[%s12309_s4 + $0x38] sm:$0xff] }
0x1118   :  { %v8540_v2 = vpop.eup %8539  ;;  %7752 = vmatmul.mubr.msk.f32.vlgmr.msra.gmra.mxu0 %vm292_vm1, %v3208_v19  ;;  %v6211_v19 = vld [vmem:[%s12311_s6 + $0x148] sm:$0xff] }
0x1119   :  { %v3193_v26 = vmul.f32 %v8540_v2, %v10695_v18  ;;  %7814 = vmatpush3.msra.mxu0 %v10709_v56  ;;  %v3202_v63 = vmul.f32 %v3198_v32, %v3194_v14  ;;  %v6159_v56 = vld [vmem:[%s12310_s5 + $0x4a8] sm:$0xff]  ;;  %v8727_v14 = vld [vmem:[%s12309_s4 + $0x40] sm:$0xff] }
0x111a   :  { %7815 = vmatprep.subr.mxu0 %v6168_v3  ;;  %v6210_v2 = vld [vmem:[%s12311_s6 + $0x140] sm:$0xff] }
0x111b   :  { %v3201_v20 = vmul.f32 %v3198_v32, %v3193_v26  ;;  %7816 = vmatpush3.msra.mxu0 %v6168_v3  ;;  %v3210_v18 = vadd.f32 %v3206_v30, %v3202_v63  ;;  %v8728_v26 = vld [vmem:[%s12309_s4 + $0x48] sm:$0xff]  ;;  %v6209_v63 = vld [vmem:[%s12311_s6 + $0x138] sm:$0xff] }
0x111c   :  { %7817 = vmatprep.subr.mxu0 %v6167_v35 }
0x111d   :  { %v3209_v38 = vadd.f32 %v3206_v30, %v3201_v20  ;;  %7818 = vmatpush3.msra.mxu0 %v6167_v35  ;;  %v8725_v30 = vld [vmem:[%s12309_s4 + $0x30] sm:$0xff] }
0x111e   :  { %7819 = vmatprep.subr.mxu0 %v6166_v49  ;;  %v8729_v20 = vld [vmem:[%s12309_s4 + $0x50] sm:$0xff] }
0x111f   :  { %7754 = vmatprep.mubr.msk.f32.mxu0 %vm292_vm1, %v3209_v38  ;;  %7820 = vmatpush3.msra.mxu0 %v6166_v49  ;;  %v6208_v38 = vld [vmem:[%s12311_s6 + $0x130] sm:$0xff] }
0x1120   :  { %7755 = vmatmul.mubr.msk.f32.gmra.mxu0 %vm292_vm1, %v3210_v18  ;;  %7821 = vmatprep.subr.mxu0 %v6165_v13 }
0x1121   :  { %7822 = vmatpush3.msra.mxu0 %v6165_v13  ;;  %v8730_v13 = vld [vmem:[%s12309_s4 + $0x58] sm:$0xff] }
0x1122   :  { %7823 = vmatprep.subr.mxu0 %v6164_v11 }
0x1123   :  { %7824 = vmatpush3.msra.mxu0 %v6164_v11  ;;  %v6207_v11 = vld [vmem:[%s12311_s6 + $0x128] sm:$0xff] }
0x1124   :  { %7825 = vmatprep.subr.mxu0 %v6163_v33 }
0x1125   :  { %7826 = vmatpush3.msra.mxu0 %v6163_v33  ;;  %v8731_v33 = vld [vmem:[%s12309_s4 + $0x60] sm:$0xff] }
0x1126   :  { %7827 = vmatprep.subr.mxu0 %v6162_v51 }
0x1127   :  { %7828 = vmatpush3.msra.mxu0 %v6162_v51 }
0x1128   :  { %7829 = vmatprep.subr.mxu0 %v6161_v16 }
0x1129   :  { %7830 = vmatpush3.msra.mxu0 %v6161_v16  ;;  %v6206_v16 = vld [vmem:[%s12311_s6 + $0x120] sm:$0xff] }
0x112a   :  { %7831 = vmatprep.subr.mxu0 %v6160_v28 }
0x112b   :  { %7832 = vmatpush3.msra.mxu0 %v6160_v28  ;;  %v8732_v28 = vld [vmem:[%s12309_s4 + $0x68] sm:$0xff] }
0x112c   :  { %7833 = vmatprep.subr.mxu0 %v6159_v56 }
0x112d   :  { %7834 = vmatpush3.msra.mxu0 %v6159_v56 }
0x112e   :  { %7835 = vmatprep.subr.mxu0 %v6158_v17 }
0x112f   :  { %7836 = vmatpush3.msra.mxu0 %v6158_v17  ;;  %v6205_v17 = vld [vmem:[%s12311_s6 + $0x118] sm:$0xff] }
0x1130   :  { %7837 = vmatprep.subr.mxu0 %v6157_v57 }
0x1131   :  { %7838 = vmatpush3.msra.mxu0 %v6157_v57  ;;  %v8733_v57 = vld [vmem:[%s12309_s4 + $0x70] sm:$0xff] }
0x1132   :  { %7839 = vmatprep.subr.mxu0 %v6156_v15 }
0x1133   :  { %7840 = vmatpush3.msra.mxu0 %v6156_v15  ;;  %v6204_v15 = vld [vmem:[%s12311_s6 + $0x110] sm:$0xff] }
0x1134   :  { %7841 = vmatprep.subr.mxu0 %v6155_v9 }
0x1135   :  { %7842 = vmatpush3.msra.mxu0 %v6155_v9 }
0x1136   :  { %7843 = vmatprep.subr.mxu0 %v6154_v23 }
0x1137   :  { %7844 = vmatpush3.msra.mxu0 %v6154_v23  ;;  %v6202_v23 = vld [vmem:[%s12311_s6 + $0x100] sm:$0xff] }
0x11d8   :  { %v10821_v59 = vpop.f32.mrf.mxu0 }
0x11d9   :  { %v10835_v39 = vmul.f32 %v8720_v46, %v10821_v59  ;;  %v10885_v0 = vmul.f32 %v8724_v50, %v10821_v59  ;;  %v10924_v35 = vmul.f32 %v8728_v26, %v10821_v59  ;;  %v3321_v56 = vmul.f32 %v8732_v28, %v10821_v59  ;;  %v6170_v59 = vld [vmem:[%s12310_s5 + $0x500] sm:$0xff] }
0x11da   :  { %v10823_v24 = vpop.f32.mrf.mxu0 }
0x11db   :  { %v10829_v25 = vmul.f32 %v8719_v44, %v10823_v24  ;;  %v10872_v32 = vmul.f32 %v8723_v4, %v10823_v24  ;;  %v10914_v3 = vmul.f32 %v8727_v14, %v10823_v24  ;;  %v3320_v51 = vmul.f32 %v8731_v33, %v10823_v24 }
0x11dd   :  { %7789 = vmatprep.mubr.f32.mxu1 %v10829_v25  ;;  %7845 = vmatprep.mubr.f32.mxu0 %v10829_v25 }
0x11de   :  { %7790 = vmatmul.mubr.f32.vlgmr.msra.gmra.mxu1 %v10835_v39  ;;  %7846 = vmatmul.mubr.f32.vlgmr.msra.gmra.mxu0 %v10835_v39 }
0x11df   :  { %7870 = vmatpush3.msra.mxu1 %v6217_v47 }
0x11e0   :  { %v10847_v37 = vpop.f32.mrf.mxu0  ;;  %7871 = vmatprep.subr.mxu1 %v6216_v54 }
0x11e1   :  { %7872 = vmatpush3.msra.mxu1 %v6216_v54  ;;  %v10864_v53 = vmul.f32 %v8722_v36, %v10847_v37  ;;  %v10904_v41 = vmul.f32 %v8726_v60, %v10847_v37  ;;  %v3319_v18 = vmul.f32 %v8730_v13, %v10847_v37  ;;  %v3323_v9 = vmul.f32 %v8734_v27, %v10847_v37 }
0x11e2   :  { %v10852_v62 = vpop.f32.mrf.mxu0  ;;  %7873 = vmatprep.subr.mxu1 %v6215_v61 }
0x11e3   :  { %v10858_v6 = vmul.f32 %v8721_v40, %v10852_v62  ;;  %7874 = vmatpush3.msra.mxu1 %v6215_v61  ;;  %v10891_v22 = vmul.f32 %v8725_v30, %v10852_v62  ;;  %v3318_v49 = vmul.f32 %v8729_v20, %v10852_v62  ;;  %v3322_v31 = vmul.f32 %v8733_v57, %v10852_v62  ;;  %v6197_v57 = vld [vmem:[%s12310_s5 + $0x5d8] sm:$0xff] }
0x11e4   :  { %7875 = vmatprep.subr.mxu1 %v6214_v12 }
0x11e5   :  { %7792 = vmatprep.mubr.f32.mxu1 %v10858_v6  ;;  %7848 = vmatprep.mubr.f32.mxu0 %v10858_v6 }
0x11e6   :  { %7793 = vmatmul.mubr.f32.gmra.mxu1 %v10864_v53  ;;  %7849 = vmatmul.mubr.f32.gmra.mxu0 %v10864_v53 }
0x11e7   :  { %7795 = vmatprep.mubr.f32.mxu1 %v10872_v32  ;;  %7851 = vmatprep.mubr.f32.mxu0 %v10872_v32 }
0x11e8   :  { %7876 = vmatpush3.msra.mxu1 %v6214_v12 }
0x11e9   :  { %7877 = vmatprep.subr.mxu1 %v6213_v10 }
0x11ea   :  { %7796 = vmatmul.mubr.f32.gmra.mxu1 %v10885_v0  ;;  %7852 = vmatmul.mubr.f32.gmra.mxu0 %v10885_v0 }
0x11eb   :  { %7798 = vmatprep.mubr.f32.mxu1 %v10891_v22  ;;  %7854 = vmatprep.mubr.f32.mxu0 %v10891_v22 }
0x11ec   :  { %7878 = vmatpush3.msra.mxu1 %v6213_v10 }
0x11ed   :  { %7879 = vmatprep.subr.mxu1 %v6212_v7 }
0x11ee   :  { %7880 = vmatpush3.msra.mxu1 %v6212_v7  ;;  %7855 = vmatmul.mubr.f32.gmra.mxu0 %v10904_v41 }
0x11ef   :  { %7799 = vmatmul.mubr.f32.gmra.mxu1 %v10904_v41  ;;  %7881 = vmatprep.subr.mxu1 %v6211_v19 }
0x11f0   :  { %7801 = vmatprep.mubr.f32.mxu1 %v10914_v3  ;;  %7857 = vmatprep.mubr.f32.mxu0 %v10914_v3 }
0x11f1   :  { %7882 = vmatpush3.msra.mxu1 %v6211_v19 }
0x11f2   :  { %7883 = vmatprep.subr.mxu1 %v6210_v2  ;;  %7858 = vmatmul.mubr.f32.gmra.mxu0 %v10924_v35 }
0x11f3   :  { %7884 = vmatpush3.msra.mxu1 %v6210_v2  ;;  %7860 = vmatprep.mubr.f32.mxu0 %v3318_v49  ;;  %v6201_v2 = vld [vmem:[%s12310_s5 + $0x5f8] sm:$0xff] }
0x11f4   :  { %7802 = vmatmul.mubr.f32.gmra.mxu1 %v10924_v35  ;;  %7885 = vmatprep.subr.mxu1 %v6209_v63 }
0x11f5   :  { %7804 = vmatprep.mubr.f32.mxu1 %v3318_v49  ;;  %7886 = vmatpush3.msra.mxu1 %v6209_v63  ;;  %v6200_v63 = vld [vmem:[%s12310_s5 + $0x5f0] sm:$0xff] }
0x11f6   :  { %7887 = vmatprep.subr.mxu1 %v6208_v38  ;;  %7861 = vmatmul.mubr.f32.gmra.mxu0 %v3319_v18 }
0x11f7   :  { %7888 = vmatpush3.msra.mxu1 %v6208_v38  ;;  %7863 = vmatprep.mubr.f32.mxu0 %v3320_v51 }
0x11f8   :  { %7805 = vmatmul.mubr.f32.gmra.mxu1 %v3319_v18  ;;  %7889 = vmatprep.subr.mxu1 %v6207_v11 }
0x11f9   :  { %7807 = vmatprep.mubr.f32.mxu1 %v3320_v51  ;;  %7890 = vmatpush3.msra.mxu1 %v6207_v11 }
0x11fa   :  { %7891 = vmatprep.subr.mxu1 %v6206_v16  ;;  %7864 = vmatmul.mubr.f32.gmra.mxu0 %v3321_v56 }
0x11fb   :  { %7892 = vmatpush3.msra.mxu1 %v6206_v16  ;;  %7866 = vmatprep.mubr.f32.mxu0 %v3322_v31  ;;  %v6198_v16 = vld [vmem:[%s12310_s5 + $0x5e0] sm:$0xff] }
0x11fc   :  { %7808 = vmatmul.mubr.f32.gmra.mxu1 %v3321_v56  ;;  %7893 = vmatprep.subr.mxu1 %v6205_v17 }
0x11fd   :  { %7810 = vmatprep.mubr.f32.mxu1 %v3322_v31  ;;  %7894 = vmatpush3.msra.mxu1 %v6205_v17 }
0x11fe   :  { %7895 = vmatprep.subr.mxu1 %v6204_v15  ;;  %7867 = vmatmul.mubr.f32.gmra.mxu0 %v3323_v9 }
0x11ff   :  { %7896 = vmatpush3.msra.mxu1 %v6204_v15 }
0x1200   :  { %7811 = vmatmul.mubr.f32.gmra.mxu1 %v3323_v9  ;;  %7897 = vmatprep.subr.mxu1 %v6203_v43 }
0x1201   :  { %7898 = vmatpush3.msra.mxu1 %v6203_v43  ;;  %7901 = vmatprep.mubr.f32.mxu1 %v10829_v25 }
0x1202   :  { %7899 = vmatprep.subr.mxu1 %v6202_v23 }
0x1203   :  { %7900 = vmatpush3.msra.mxu1 %v6202_v23 }
0x1204   :  { %7902 = vmatmul.mubr.f32.vlgmr.msra.gmra.mxu1 %v10835_v39 }
0x1205   :  { %7904 = vmatprep.mubr.f32.mxu1 %v10858_v6 }
0x1208   :  { %7905 = vmatmul.mubr.f32.gmra.mxu1 %v10864_v53 }
0x1209   :  { %7907 = vmatprep.mubr.f32.mxu1 %v10872_v32 }
0x120c   :  { %7908 = vmatmul.mubr.f32.gmra.mxu1 %v10885_v0 }
0x120d   :  { %7910 = vmatprep.mubr.f32.mxu1 %v10891_v22 }
0x1210   :  { %7911 = vmatmul.mubr.f32.gmra.mxu1 %v10904_v41 }
0x1211   :  { %7913 = vmatprep.mubr.f32.mxu1 %v10914_v3 }
0x1214   :  { %7914 = vmatmul.mubr.f32.gmra.mxu1 %v10924_v35 }
0x1215   :  { %7916 = vmatprep.mubr.f32.mxu1 %v3318_v49 }
0x1218   :  { %7917 = vmatmul.mubr.f32.gmra.mxu1 %v3319_v18  ;;  %v6199_v18 = vld [vmem:[%s12310_s5 + $0x5e8] sm:$0xff] }
0x1219   :  { %7919 = vmatprep.mubr.f32.mxu1 %v3320_v51 }
0x121c   :  { %7920 = vmatmul.mubr.f32.gmra.mxu1 %v3321_v56 }
0x121d   :  { %7922 = vmatprep.mubr.f32.mxu1 %v3322_v31 }
0x1220   :  { %7923 = vmatmul.mubr.f32.gmra.mxu1 %v3323_v9  ;;  %v6196_v9 = vld [vmem:[%s12310_s5 + $0x5d0] sm:$0xff] }
0x129e   :  { %v10988_v47 = vpop.f32.mrf.mxu1  ;;  %v10993_v24 = vpop.f32.mrf.mxu0 }
0x12a0   :  { %v3390_v44 = vpop.f32.mrf.mxu1  ;;  %v10996_v46 = vpop.f32.mrf.mxu0 }
0x12a1   :  { %v3391_v25 = vadd.f32 %v6170_v59, %v3390_v44  ;;  %v6195_v44 = vld [vmem:[%s12310_s5 + $0x5c8] sm:$0xff] }
0x12a3   :  { %7957 = vmatprep.mubr.msk.f32.mxu0 %vm910_vm2, %v3391_v25 }
0x12a6   :  { %v10998_v39 = vpop.f32.mrf.mxu1  ;;  %v11000_v54 = vpop.f32.mrf.mxu0 }
0x12a8   :  { %v11002_v61 = vpop.f32.mrf.mxu1  ;;  %v11004_v37 = vpop.f32.mrf.mxu0 }
0x12aa   :  { %v11006_v12 = vpop.f32.mrf.mxu1  ;;  %v11008_v62 = vpop.f32.mrf.mxu0 }
0x12ac   :  { %v11010_v40 = vpop.f32.mrf.mxu1  ;;  %v11012_v6 = vpop.f32.mrf.mxu0 }
0x12ae   :  { %v11014_v36 = vpop.f32.mrf.mxu0 }
0x12af   :  { %v11016_v53 = vpop.f32.mrf.mxu1 }
0x12b0   :  { %v11018_v4 = vpop.f32.mrf.mxu0 }
0x12b1   :  { %v11020_v32 = vpop.f32.mrf.mxu1 }
0x12b2   :  { %v7859_v10 = vpop.f32.mrf.mxu0 }
0x12b4   :  { %v11022_v50 = vpop.f32.mrf.mxu1  ;;  %v3575_v0 = vpop.f32.mrf.mxu0 }
0x12b6   :  { %v11024_v30 = vpop.f32.mrf.mxu1  ;;  %v7862_v22 = vpop.f32.mrf.mxu0 }
0x12b7   :  { %v3591_v27 = vadd.f32 %v7862_v22, %v6197_v57 }
0x12b8   :  { %v11026_v7 = vpop.f32.mrf.mxu1  ;;  %v3585_v60 = vpop.f32.mrf.mxu0 }
0x12b9   :  { %v3586_v59 = vadd.f32 %v6196_v9, %v3585_v60  ;;  %v6188_v9 = vld [vmem:[%s12310_s5 + $0x590] sm:$0xff] }
0x12ba   :  { %v11028_v41 = vpop.f32.mrf.mxu1  ;;  %v7865_v19 = vpop.f32.mrf.mxu0 }
0x12bb   :  { %v3601_v51 = vadd.f32 %v7865_v19, %v6199_v18  ;;  %v3581_v19 = vadd.f32 %v7859_v10, %v6195_v44 }
0x12bc   :  { %v11030_v14 = vpop.f32.mrf.mxu1  ;;  %v3595_v3 = vpop.f32.mrf.mxu0 }
0x12bd   :  { %v3596_v17 = vadd.f32 %v6198_v16, %v3595_v3  ;;  %v6194_v3 = vld [vmem:[%s12310_s5 + $0x5c0] sm:$0xff]  ;;  %v6191_v16 = vld [vmem:[%s12310_s5 + $0x5a8] sm:$0xff] }
0x12be   :  { %v11035_v26 = vpop.f32.mrf.mxu1  ;;  %v7868_v35 = vpop.f32.mrf.mxu0 }
0x12bf   :  { %v3611_v20 = vadd.f32 %v7868_v35, %v6201_v2  ;;  %v3576_v35 = vadd.f32 %v6194_v3, %v3575_v0 }
0x12c0   :  { %v11040_v49 = vpop.f32.mrf.mxu1  ;;  %v3605_v38 = vpop.f32.mrf.mxu0 }
0x12c1   :  { %v3606_v13 = vadd.f32 %v6200_v63, %v3605_v38  ;;  %7925 = vmatprep.subr.msk.mxu0 %vm910_vm2, %v3611_v20  ;;  %v6193_v63 = vld [vmem:[%s12310_s5 + $0x5b8] sm:$0xff] }
0x12c2   :  { %v11046_v11 = vpop.f32.mrf.mxu1  ;;  %7926 = vmatpush3.xpose.msk.msra.mxu0 %vm910_vm2, %v3611_v20  ;;  %v3571_v38 = vadd.f32 %v11014_v36, %v6193_v63  ;;  %v3561_v36 = vadd.f32 %v11008_v62, %v6191_v16  ;;  %v8738_v16 = vld [vmem:[%s12307_s2 + $0x10] sm:$0xff] }
0x12c3   :  { %7927 = vmatprep.subr.msk.mxu0 %vm910_vm2, %v3606_v13 }
0x12c4   :  { %v11050_v33 = vpop.f32.mrf.mxu1 }
0x12c6   :  { %v11055_v28 = vpop.f32.mrf.mxu1  ;;  %7928 = vmatpush3.xpose.msk.msra.mxu0 %vm910_vm2, %v3606_v13  ;;  %v6192_v13 = vld [vmem:[%s12310_s5 + $0x5b0] sm:$0xff] }
0x12c7   :  { %7929 = vmatprep.subr.msk.mxu0 %vm910_vm2, %v3601_v51 }
0x12c8   :  { %v11059_v56 = vpop.f32.mrf.mxu1 }
0x12ca   :  { %v11064_v31 = vpop.f32.mrf.mxu1  ;;  %7930 = vmatpush3.xpose.msk.msra.mxu0 %vm910_vm2, %v3601_v51  ;;  %v3566_v51 = vadd.f32 %v6192_v13, %v11018_v4  ;;  %v6190_v4 = vld [vmem:[%s12310_s5 + $0x5a0] sm:$0xff] }
0x12cb   :  { %7931 = vmatprep.subr.msk.mxu0 %vm910_vm2, %v3596_v17  ;;  %v3556_v57 = vadd.f32 %v6190_v4, %v11012_v6  ;;  %v3546_v6 = vadd.f32 %v6188_v9, %v11004_v37  ;;  %v6186_v37 = vld [vmem:[%s12310_s5 + $0x580] sm:$0xff]  ;;  %v8739_v4 = vld [vmem:[%s12307_s2 + $0x28] sm:$0xff] }
0x12cc   :  { %v11068_v15 = vpop.f32.mrf.mxu1 }
0x12ce   :  { %v11073_v43 = vpop.f32.mrf.mxu1  ;;  %7932 = vmatpush3.xpose.msk.msra.mxu0 %vm910_vm2, %v3596_v17 }
0x12cf   :  { %7933 = vmatprep.subr.msk.mxu0 %vm910_vm2, %v3591_v27 }
0x12d0   :  { %v7912_v23 = vpop.f32.mrf.mxu1 }
0x12d2   :  { %v3710_v25 = vpop.f32.mrf.mxu1  ;;  %7934 = vmatpush3.xpose.msk.msra.mxu0 %vm910_vm2, %v3591_v27  ;;  %v6189_v27 = vld [vmem:[%s12310_s5 + $0x598] sm:$0xff] }
0x12d3   :  { %7935 = vmatprep.subr.msk.mxu0 %vm910_vm2, %v3586_v59  ;;  %v3551_v62 = vadd.f32 %v11000_v54, %v6189_v27 }
0x12d4   :  { %v7915_v22 = vpop.f32.mrf.mxu1 }
0x12d6   :  { %v3720_v2 = vpop.f32.mrf.mxu1  ;;  %7936 = vmatpush3.xpose.msk.msra.mxu0 %vm910_vm2, %v3586_v59  ;;  %v6187_v59 = vld [vmem:[%s12310_s5 + $0x588] sm:$0xff] }
0x12d7   :  { %7937 = vmatprep.subr.msk.mxu0 %vm910_vm2, %v3581_v19  ;;  %v3541_v54 = vadd.f32 %v10993_v24, %v6187_v59  ;;  %v6171_v24 = vld [vmem:[%s12310_s5 + $0x508] sm:$0xff]  ;;  %v8741_v59 = vld [vmem:[%s12307_s2 + $0x38] sm:$0xff] }
0x12d8   :  { %v7918_v60 = vpop.f32.mrf.mxu1 }
0x12da   :  { %v3730_v20 = vpop.f32.mrf.mxu1  ;;  %7938 = vmatpush3.xpose.msk.msra.mxu0 %vm910_vm2, %v3581_v19 }
0x12db   :  { %7939 = vmatprep.subr.msk.mxu0 %vm910_vm2, %v3576_v35 }
0x12dc   :  { %v7921_v10 = vpop.f32.mrf.mxu1 }
0x12de   :  { %v3740_v18 = vpop.f32.mrf.mxu1  ;;  %7940 = vmatpush3.xpose.msk.msra.mxu0 %vm910_vm2, %v3576_v35 }
0x12df   :  { %7941 = vmatprep.subr.msk.mxu0 %vm910_vm2, %v3571_v38 }
0x12e0   :  { %v7924_v0 = vpop.f32.mrf.mxu1 }
0x12e1   :  { %7981 = vmatprep.subr.mxu1 %v7924_v0 }
0x12e2   :  { %v3750_v17 = vpop.f32.mrf.mxu1  ;;  %7982 = vmatpush3.msra.mxu1 %v7924_v0  ;;  %7942 = vmatpush3.xpose.msk.msra.mxu0 %vm910_vm2, %v3571_v38 }
0x12e3   :  { %7983 = vmatprep.subr.mxu1 %v3750_v17  ;;  %7943 = vmatprep.subr.msk.mxu0 %vm910_vm2, %v3566_v51 }
0x12e4   :  { %7984 = vmatpush3.msra.mxu1 %v3750_v17 }
0x12e5   :  { %7985 = vmatprep.subr.mxu1 %v7921_v10 }
0x12e6   :  { %7986 = vmatpush3.msra.mxu1 %v7921_v10  ;;  %7944 = vmatpush3.xpose.msk.msra.mxu0 %vm910_vm2, %v3566_v51  ;;  %v8735_v10 = vld [vmem:[%s12307_s2 + $0x8] sm:$0xff] }
0x12e7   :  { %7987 = vmatprep.subr.mxu1 %v3740_v18  ;;  %7945 = vmatprep.subr.msk.mxu0 %vm910_vm2, %v3561_v36 }
0x12e8   :  { %7988 = vmatpush3.msra.mxu1 %v3740_v18 }
0x12e9   :  { %7989 = vmatprep.subr.mxu1 %v7918_v60 }
0x12ea   :  { %7990 = vmatpush3.msra.mxu1 %v7918_v60  ;;  %7946 = vmatpush3.xpose.msk.msra.mxu0 %vm910_vm2, %v3561_v36 }
0x12eb   :  { %7991 = vmatprep.subr.mxu1 %v3730_v20  ;;  %7947 = vmatprep.subr.msk.mxu0 %vm910_vm2, %v3556_v57 }
0x12ec   :  { %7992 = vmatpush3.msra.mxu1 %v3730_v20 }
0x12ed   :  { %7993 = vmatprep.subr.mxu1 %v7915_v22 }
0x12ee   :  { %7994 = vmatpush3.msra.mxu1 %v7915_v22  ;;  %7948 = vmatpush3.xpose.msk.msra.mxu0 %vm910_vm2, %v3556_v57 }
0x12ef   :  { %7995 = vmatprep.subr.mxu1 %v3720_v2  ;;  %7949 = vmatprep.subr.msk.mxu0 %vm910_vm2, %v3551_v62 }
0x12f0   :  { %7996 = vmatpush3.msra.mxu1 %v3720_v2 }
0x12f1   :  { %7997 = vmatprep.subr.mxu1 %v7912_v23 }
0x12f2   :  { %7998 = vmatpush3.msra.mxu1 %v7912_v23  ;;  %7950 = vmatpush3.xpose.msk.msra.mxu0 %vm910_vm2, %v3551_v62  ;;  %v3536_v23 = vadd.f32 %v6186_v37, %v10996_v46  ;;  %v6172_v46 = vld [vmem:[%s12310_s5 + $0x510] sm:$0xff]  ;;  %v8740_v62 = vld [vmem:[%s12307_s2 + $0x20] sm:$0xff] }
0x12f3   :  { %7999 = vmatprep.subr.mxu1 %v3710_v25  ;;  %7951 = vmatprep.subr.msk.mxu0 %vm910_vm2, %v3546_v6 }
0x12f4   :  { %8000 = vmatpush3.msra.mxu1 %v3710_v25 }
0x12f5   :  { %8001 = vmatprep.subr.mxu1 %v11068_v15 }
0x12f6   :  { %8002 = vmatpush3.msra.mxu1 %v11068_v15  ;;  %7952 = vmatpush3.xpose.msk.msra.mxu0 %vm910_vm2, %v3546_v6  ;;  %v6173_v15 = vld [vmem:[%s12310_s5 + $0x518] sm:$0xff] }
0x12f7   :  { %8003 = vmatprep.subr.mxu1 %v11073_v43  ;;  %7953 = vmatprep.subr.msk.mxu0 %vm910_vm2, %v3541_v54 }
0x12f8   :  { %8004 = vmatpush3.msra.mxu1 %v11073_v43  ;;  %v6174_v43 = vld [vmem:[%s12310_s5 + $0x520] sm:$0xff] }
0x12f9   :  { %8005 = vmatprep.subr.mxu1 %v11059_v56 }
0x12fa   :  { %8006 = vmatpush3.msra.mxu1 %v11059_v56  ;;  %7954 = vmatpush3.xpose.msk.msra.mxu0 %vm910_vm2, %v3541_v54  ;;  %v3396_v56 = vadd.f32 %v10988_v47, %v6171_v24  ;;  %v3406_v47 = vadd.f32 %v10998_v39, %v6173_v15  ;;  %v6177_v39 = vld [vmem:[%s12310_s5 + $0x538] sm:$0xff] }
0x12fb   :  { %8007 = vmatprep.subr.mxu1 %v11064_v31  ;;  %7955 = vmatprep.subr.msk.mxu0 %vm910_vm2, %v3536_v23  ;;  %v3426_v25 = vadd.f32 %v11016_v53, %v6177_v39  ;;  %v6181_v53 = vld [vmem:[%s12310_s5 + $0x558] sm:$0xff]  ;;  %v8746_v39 = vld [vmem:[%s12307_s2 + $0x50] sm:$0xff] }
0x12fc   :  { %8008 = vmatpush3.msra.mxu1 %v11064_v31  ;;  %v3401_v31 = vadd.f32 %v6172_v46, %v11002_v61  ;;  %v3411_v61 = vadd.f32 %v6174_v43, %v11010_v40  ;;  %v6178_v40 = vld [vmem:[%s12310_s5 + $0x540] sm:$0xff]  ;;  %v3446_v2 = vadd.f32 %v11026_v7, %v6181_v53  ;;  %v6185_v7 = vld [vmem:[%s12310_s5 + $0x578] sm:$0xff] }
0x12fd   :  { %8009 = vmatprep.subr.mxu1 %v11050_v33  ;;  %v3431_v22 = vadd.f32 %v6178_v40, %v11024_v30  ;;  %v6182_v30 = vld [vmem:[%s12310_s5 + $0x560] sm:$0xff] }
0x12fe   :  { %8010 = vmatpush3.msra.mxu1 %v11050_v33  ;;  %7956 = vmatpush3.xpose.msk.msra.mxu0 %vm910_vm2, %v3536_v23  ;;  %v6175_v33 = vld [vmem:[%s12310_s5 + $0x528] sm:$0xff]  ;;  %v3451_v60 = vadd.f32 %v6182_v30, %v11035_v26  ;;  %v3466_v26 = vadd.f32 %v11040_v49, %v6185_v7  ;;  %v8737_v49 = vld [vmem:[%s12307_s2 + $0x18] sm:$0xff]  ;;  %v8742_v23 = vld [vmem:[%s12307_s2 + $0x30] sm:$0xff] }
0x12ff   :  { %8011 = vmatprep.subr.mxu1 %v11055_v28  ;;  %v8744_v43 = vld [vmem:[%s12307_s2 + $0x40] sm:$0xff] }
0x1300   :  { %8012 = vmatpush3.msra.mxu1 %v11055_v28  ;;  %v6176_v28 = vld [vmem:[%s12310_s5 + $0x530] sm:$0xff] }
0x1301   :  { %7958 = vmatmul.mubr.msk.f32.vlgmr.msra.gmra.mxu0 %vm910_vm2, %v3396_v56  ;;  %8037 = vmatprep.subr.mxu1 %v10637_v5  ;;  %v3416_v5 = vadd.f32 %v11006_v12, %v6175_v33  ;;  %v3421_v44 = vadd.f32 %v6176_v28, %v11020_v32  ;;  %v6179_v12 = vld [vmem:[%s12310_s5 + $0x548] sm:$0xff]  ;;  %v6180_v32 = vld [vmem:[%s12310_s5 + $0x550] sm:$0xff] }
0x1302   :  { %7960 = vmatprep.mubr.msk.f32.mxu0 %vm910_vm2, %v3401_v31  ;;  %v3436_v19 = vadd.f32 %v11022_v50, %v6179_v12  ;;  %v3441_v3 = vadd.f32 %v6180_v32, %v11028_v41  ;;  %v6183_v50 = vld [vmem:[%s12310_s5 + $0x568] sm:$0xff]  ;;  %v6184_v41 = vld [vmem:[%s12310_s5 + $0x570] sm:$0xff]  ;;  %v8748_v32 = vld [vmem:[%s12307_s2 + $0x60] sm:$0xff] }
0x1303   :  { %v3456_v35 = vadd.f32 %v11030_v14, %v6183_v50  ;;  %v3461_v63 = vadd.f32 %v6184_v41, %v11046_v11  ;;  %v8736_v11 = vld [vmem:[%s12307_s2] sm:$0xff]  ;;  %v8743_v56 = vld [vmem:[%s12307_s2 + $0x48] sm:$0xff]  ;;  %v8750_v50 = vld [vmem:[%s12307_s2 + $0x70] sm:$0xff] }
0x1305   :  { %7961 = vmatmul.mubr.msk.f32.gmra.mxu0 %vm910_vm2, %v3406_v47 }
0x1306   :  { %7963 = vmatprep.mubr.msk.f32.mxu0 %vm910_vm2, %v3411_v61  ;;  %v8745_v61 = vld [vmem:[%s12307_s2 + $0x58] sm:$0xff] }
0x1309   :  { %7964 = vmatmul.mubr.msk.f32.gmra.mxu0 %vm910_vm2, %v3416_v5 }
0x130a   :  { %7966 = vmatprep.mubr.msk.f32.mxu0 %vm910_vm2, %v3421_v44 }
0x130d   :  { %7967 = vmatmul.mubr.msk.f32.gmra.mxu0 %vm910_vm2, %v3426_v25  ;;  %v8747_v25 = vld [vmem:[%s12307_s2 + $0x68] sm:$0xff] }
0x130e   :  { %7969 = vmatprep.mubr.msk.f32.mxu0 %vm910_vm2, %v3431_v22 }
0x1311   :  { %7970 = vmatmul.mubr.msk.f32.gmra.mxu0 %vm910_vm2, %v3436_v19 }
0x1312   :  { %7972 = vmatprep.mubr.msk.f32.mxu0 %vm910_vm2, %v3441_v3  ;;  %v8749_v3 = vld [vmem:[%s12307_s2 + $0x78] sm:$0xff] }
0x1315   :  { %7973 = vmatmul.mubr.msk.f32.gmra.mxu0 %vm910_vm2, %v3446_v2 }
0x1316   :  { %7975 = vmatprep.mubr.msk.f32.mxu0 %vm910_vm2, %v3451_v60 }
0x1319   :  { %7976 = vmatmul.mubr.msk.f32.gmra.mxu0 %vm910_vm2, %v3456_v35 }
0x131a   :  { %7978 = vmatprep.mubr.msk.f32.mxu0 %vm910_vm2, %v3461_v63 }
0x131d   :  { %7979 = vmatmul.mubr.msk.f32.gmra.mxu0 %vm910_vm2, %v3466_v26 }
0x13c1   :  { %v7959_v20 = vpop.f32.mrf.mxu0 }
0x13c2   :  { %v11229_v14 = vadd.f32 %v8735_v10, %v7959_v20 }
0x13c3   :  { %v3921_v38 = vpop.f32.mrf.mxu0 }
0x13c4   :  { %v11234_v13 = vadd.f32 %v8736_v11, %v3921_v38  ;;  %4002 = vmax.xlane.f32.xlu1 %v11229_v14 }
0x13c5   :  { %v7962_v18 = vpop.f32.mrf.mxu0 }
0x13c6   :  { %v11240_v0 = vadd.f32 %v8737_v49, %v7962_v18  ;;  %4000 = vmax.xlane.f32.xlu0 %v11234_v13 }
0x13c7   :  { %v3931_v51 = vpop.f32.mrf.mxu0 }
0x13c8   :  { %v11246_v17 = vadd.f32 %v8738_v16, %v3931_v51  ;;  %4006 = vmax.xlane.f32.xlu1 %v11240_v0 }
0x13c9   :  { %v7965_v36 = vpop.f32.mrf.mxu0 }
0x13ca   :  { %v11252_v57 = vadd.f32 %v8739_v4, %v7965_v36  ;;  %4004 = vmax.xlane.f32.xlu0 %v11246_v17 }
0x13cb   :  { %v3941_v27 = vpop.f32.mrf.mxu0 }
0x13cc   :  { %v11258_v9 = vadd.f32 %v8740_v62, %v3941_v27  ;;  %4010 = vmax.xlane.f32.xlu1 %v11252_v57 }
0x13cd   :  { %v7968_v6 = vpop.f32.mrf.mxu0 }
0x13ce   :  { %v11264_v54 = vadd.f32 %v8741_v59, %v7968_v6  ;;  %4008 = vmax.xlane.f32.xlu0 %v11258_v9 }
0x13cf   :  { %v3951_v37 = vpop.f32.mrf.mxu0 }
0x13d0   :  { %v11270_v24 = vadd.f32 %v8742_v23, %v3951_v37  ;;  %4014 = vmax.xlane.f32.xlu1 %v11264_v54 }
0x13d1   :  { %v7971_v46 = vpop.f32.mrf.mxu0 }
0x13d2   :  { %v11276_v15 = vadd.f32 %v8743_v56, %v7971_v46  ;;  %4012 = vmax.xlane.f32.xlu0 %v11270_v24 }
0x13d3   :  { %v3961_v31 = vpop.f32.mrf.mxu0 }
0x13d4   :  { %v11282_v47 = vadd.f32 %v8744_v43, %v3961_v31  ;;  %4018 = vmax.xlane.f32.xlu1 %v11276_v15 }
0x13d5   :  { %v7974_v33 = vpop.f32.mrf.mxu0 }
0x13d6   :  { %v11288_v28 = vadd.f32 %v8745_v61, %v7974_v33  ;;  %4016 = vmax.xlane.f32.xlu0 %v11282_v47 }
0x13d7   :  { %v3971_v5 = vpop.f32.mrf.mxu0 }
0x13d8   :  { %v11294_v44 = vadd.f32 %v8746_v39, %v3971_v5  ;;  %4022 = vmax.xlane.f32.xlu1 %v11288_v28 }
0x13d9   :  { %v7977_v40 = vpop.f32.mrf.mxu0 }
0x13da   :  { %v11300_v12 = vadd.f32 %v8747_v25, %v7977_v40  ;;  %4020 = vmax.xlane.f32.xlu0 %v11294_v44 }
0x13db   :  { %v3981_v22 = vpop.f32.mrf.mxu0 }
0x13dc   :  { %v11306_v19 = vadd.f32 %v8748_v32, %v3981_v22  ;;  %4026 = vmax.xlane.f32.xlu1 %v11300_v12 }
0x13dd   :  { %v7980_v53 = vpop.f32.mrf.mxu0 }
0x13de   :  { %v11312_v30 = vadd.f32 %v8749_v3, %v7980_v53  ;;  %4024 = vmax.xlane.f32.xlu0 %v11306_v19 }
0x13df   :  { %v3991_v2 = vpop.f32.mrf.mxu0 }
0x13e0   :  { %v11318_v60 = vadd.f32 %v8750_v50, %v3991_v2  ;;  %4030 = vmax.xlane.f32.xlu1 %v11312_v30 }
0x13e2   :  { %4028 = vmax.xlane.f32.xlu0 %v11318_v60 }
0x144d   :  { %v4003_v41 = vpop.xlane.xlu1 %4002 }
0x144e   :  { %v4033_v35 = vsub.f32 %v11229_v14, %v4003_v41 }
0x144f   :  { %v4001_v7 = vpop.xlane.xlu0 %4000 }
0x1450   :  { %v4050_v63 = vmul.f32 1.442695, %v4033_v35  ;;  %v4032_v26 = vsub.f32 %v11234_v13, %v4001_v7 }
0x1451   :  { %v4007_v20 = vpop.xlane.xlu1 %4006 }
0x1452   :  { %8541 = vpow2.f32 %v4050_v63  ;;  %v4048_v10 = vmul.f32 1.442695, %v4032_v26  ;;  %v4035_v38 = vsub.f32 %v11240_v0, %v4007_v20 }
0x1453   :  { %v4005_v11 = vpop.xlane.xlu0 %4004 }
0x1454   :  { %8543 = vpow2.f32 %v4048_v10  ;;  %v4054_v18 = vmul.f32 1.442695, %v4035_v38  ;;  %v4034_v49 = vsub.f32 %v11246_v17, %v4005_v11 }
0x1455   :  { %v4011_v51 = vpop.xlane.xlu1 %4010 }
0x1456   :  { %8545 = vpow2.f32 %v4054_v18  ;;  %v4052_v16 = vmul.f32 1.442695, %v4034_v49  ;;  %v4037_v36 = vsub.f32 %v11252_v57, %v4011_v51 }
0x1457   :  { %v4009_v14 = vpop.xlane.xlu0 %4008 }
0x1458   :  { %8547 = vpow2.f32 %v4052_v16  ;;  %v4058_v4 = vmul.f32 1.442695, %v4037_v36  ;;  %v4036_v13 = vsub.f32 %v11258_v9, %v4009_v14 }
0x1459   :  { %v4015_v27 = vpop.xlane.xlu1 %4014 }
0x145a   :  { %8549 = vpow2.f32 %v4058_v4  ;;  %v4056_v62 = vmul.f32 1.442695, %v4036_v13  ;;  %v4039_v0 = vsub.f32 %v11264_v54, %v4015_v27 }
0x145b   :  { %v4013_v6 = vpop.xlane.xlu0 %4012 }
0x145c   :  { %8551 = vpow2.f32 %v4056_v62  ;;  %v4062_v59 = vmul.f32 1.442695, %v4039_v0  ;;  %v4038_v17 = vsub.f32 %v11270_v24, %v4013_v6 }
0x145d   :  { %v4019_v37 = vpop.xlane.xlu1 %4018 }
0x145e   :  { %8553 = vpow2.f32 %v4062_v59  ;;  %v4060_v23 = vmul.f32 1.442695, %v4038_v17  ;;  %v4041_v57 = vsub.f32 %v11276_v15, %v4019_v37 }
0x145f   :  { %v11331_v46 = vpop.eup %8541  ;;  %v4017_v56 = vpop.xlane.xlu0 %4016 }
0x1460   :  { %8555 = vpow2.f32 %v4060_v23  ;;  %v4066_v9 = vmul.f32 1.442695, %v4041_v57  ;;  %v4040_v31 = vsub.f32 %v11282_v47, %v4017_v56  ;;  %4082 = vadd.xlane.f32.xlu1 %v11331_v46 }
0x1461   :  { %v11335_v54 = vpop.eup %8543  ;;  %v4023_v43 = vpop.xlane.xlu1 %4022 }
0x1462   :  { %8557 = vpow2.f32 %v4066_v9  ;;  %v4064_v33 = vmul.f32 1.442695, %v4040_v31  ;;  %v4043_v24 = vsub.f32 %v11288_v28, %v4023_v43  ;;  %4080 = vadd.xlane.f32.xlu0 %v11335_v54  ;;  %v8751_v43 = vld [vmem:[%s12308_s3 + $0x18] sm:$0xff] }
0x1463   :  { %v11339_v61 = vpop.eup %8545  ;;  %v4021_v15 = vpop.xlane.xlu0 %4020 }
0x1464   :  { %8559 = vpow2.f32 %v4064_v33  ;;  %v4070_v5 = vmul.f32 1.442695, %v4043_v24  ;;  %v4042_v39 = vsub.f32 %v11294_v44, %v4021_v15  ;;  %4086 = vadd.xlane.f32.xlu1 %v11339_v61 }
0x1465   :  { %v11343_v47 = vpop.eup %8547  ;;  %v4027_v40 = vpop.xlane.xlu1 %4026 }
0x1466   :  { %8561 = vpow2.f32 %v4070_v5  ;;  %v4068_v25 = vmul.f32 1.442695, %v4042_v39  ;;  %v4045_v22 = vsub.f32 %v11300_v12, %v4027_v40  ;;  %4084 = vadd.xlane.f32.xlu0 %v11343_v47  ;;  %v8753_v39 = vld [vmem:[%s12308_s3 + $0x8] sm:$0xff] }
0x1467   :  { %v11347_v28 = vpop.eup %8549  ;;  %v4025_v32 = vpop.xlane.xlu0 %4024 }
0x1468   :  { %8563 = vpow2.f32 %v4068_v25  ;;  %v4074_v53 = vmul.f32 1.442695, %v4045_v22  ;;  %v4044_v3 = vsub.f32 %v11306_v19, %v4025_v32  ;;  %4090 = vadd.xlane.f32.xlu1 %v11347_v28  ;;  %v8754_v25 = vld [vmem:[%s12308_s3] sm:$0xff] }
0x1469   :  { %v11351_v44 = vpop.eup %8551  ;;  %v4031_v2 = vpop.xlane.xlu1 %4030 }
0x146a   :  { %8565 = vpow2.f32 %v4074_v53  ;;  %v4072_v50 = vmul.f32 1.442695, %v4044_v3  ;;  %v4047_v41 = vsub.f32 %v11312_v30, %v4031_v2  ;;  %4088 = vadd.xlane.f32.xlu0 %v11351_v44 }
0x146b   :  { %v11355_v12 = vpop.eup %8553  ;;  %v4029_v35 = vpop.xlane.xlu0 %4028 }
0x146c   :  { %8567 = vpow2.f32 %v4072_v50  ;;  %v4078_v7 = vmul.f32 1.442695, %v4047_v41  ;;  %v4046_v63 = vsub.f32 %v11318_v60, %v4029_v35  ;;  %4094 = vadd.xlane.f32.xlu1 %v11355_v12 }
0x146d   :  { %v11359_v19 = vpop.eup %8555 }
0x146e   :  { %8569 = vpow2.f32 %v4078_v7  ;;  %v4076_v26 = vmul.f32 1.442695, %v4046_v63  ;;  %4092 = vadd.xlane.f32.xlu0 %v11359_v19 }
0x146f   :  { %v11362_v20 = vpop.eup %8557 }
0x1470   :  { %8571 = vpow2.f32 %v4076_v26  ;;  %4098 = vadd.xlane.f32.xlu1 %v11362_v20 }
0x1471   :  { %v11365_v30 = vpop.eup %8559 }
0x1472   :  { %4096 = vadd.xlane.f32.xlu0 %v11365_v30 }
0x1473   :  { %v11368_v10 = vpop.eup %8561 }
0x1474   :  { %4102 = vadd.xlane.f32.xlu1 %v11368_v10 }
0x1475   :  { %v11371_v60 = vpop.eup %8563 }
0x1476   :  { %4100 = vadd.xlane.f32.xlu0 %v11371_v60 }
0x1477   :  { %v11374_v38 = vpop.eup %8565 }
0x1478   :  { %4106 = vadd.xlane.f32.xlu1 %v11374_v38 }
0x1479   :  { %v11377_v11 = vpop.eup %8567 }
0x147a   :  { %4104 = vadd.xlane.f32.xlu0 %v11377_v11 }
0x147b   :  { %v11380_v18 = vpop.eup %8569 }
0x147c   :  { %4110 = vadd.xlane.f32.xlu1 %v11380_v18 }
0x147d   :  { %v11383_v49 = vpop.eup %8571 }
0x147e   :  { %4108 = vadd.xlane.f32.xlu0 %v11383_v49 }
0x14e9   :  { %v4083_v51 = vpop.xlane.xlu1 %4082 }
0x14ea   :  { %8573 = vrcp.f32 %v4083_v51 }
0x14eb   :  { %v4081_v16 = vpop.xlane.xlu0 %4080 }
0x14ec   :  { %8575 = vrcp.f32 %v4081_v16 }
0x14ed   :  { %v4087_v36 = vpop.xlane.xlu1 %4086 }
0x14ee   :  { %8577 = vrcp.f32 %v4087_v36 }
0x14ef   :  { %v4085_v14 = vpop.xlane.xlu0 %4084 }
0x14f0   :  { %8579 = vrcp.f32 %v4085_v14 }
0x14f1   :  { %v4091_v4 = vpop.xlane.xlu1 %4090 }
0x14f2   :  { %8581 = vrcp.f32 %v4091_v4 }
0x14f3   :  { %v4089_v13 = vpop.xlane.xlu0 %4088 }
0x14f4   :  { %8583 = vrcp.f32 %v4089_v13 }
0x14f5   :  { %v4095_v27 = vpop.xlane.xlu1 %4094 }
0x14f6   :  { %8585 = vrcp.f32 %v4095_v27 }
0x14f7   :  { %v4093_v62 = vpop.xlane.xlu0 %4092  ;;  %v8574_v0 = vpop.eup %8573 }
0x14f8   :  { %8587 = vrcp.f32 %v4093_v62  ;;  %v4129_v37 = vmul.f32 %v8574_v0, %v11331_v46  ;;  %v8752_v46 = vld [vmem:[%s12308_s3 + $0x10] sm:$0xff] }
0x14f9   :  { %v8576_v6 = vpop.eup %8575  ;;  %v4099_v59 = vpop.xlane.xlu1 %4098 }
0x14fa   :  { %v4128_v17 = vmul.f32 %v8576_v6, %v11335_v54  ;;  %8589 = vrcp.f32 %v4099_v59 }
0x14fb   :  { %v4097_v23 = vpop.xlane.xlu0 %4096  ;;  %v8578_v57 = vpop.eup %8577 }
0x14fc   :  { %8591 = vrcp.f32 %v4097_v23  ;;  %8013 = vmatprep.mubr.f32.mxu1 %v4128_v17  ;;  %v4131_v54 = vmul.f32 %v8578_v57, %v11339_v61 }
0x14fd   :  { %v8580_v56 = vpop.eup %8579  ;;  %v4103_v9 = vpop.xlane.xlu1 %4102  ;;  %8014 = vmatmul.mubr.f32.vlgmr.msra.gmra.mxu1 %v4129_v37 }
0x14fe   :  { %v4130_v31 = vmul.f32 %v8580_v56, %v11343_v47  ;;  %8038 = vmatpush3.msra.mxu1 %v8751_v43  ;;  %8593 = vrcp.f32 %v4103_v9 }
0x14ff   :  { %v4101_v33 = vpop.xlane.xlu0 %4100  ;;  %8039 = vmatprep.subr.mxu1 %v8752_v46  ;;  %v8582_v24 = vpop.eup %8581 }
0x1500   :  { %8595 = vrcp.f32 %v4101_v33  ;;  %8016 = vmatprep.mubr.f32.mxu1 %v4130_v31  ;;  %8040 = vmatpush3.msra.mxu1 %v8752_v46  ;;  %v4133_v40 = vmul.f32 %v8582_v24, %v11347_v28 }
0x1501   :  { %v8584_v15 = vpop.eup %8583  ;;  %v4107_v5 = vpop.xlane.xlu1 %4106  ;;  %8017 = vmatmul.mubr.f32.gmra.mxu1 %v4131_v54  ;;  %8041 = vmatprep.subr.mxu1 %v8753_v39 }
0x1502   :  { %v4132_v47 = vmul.f32 %v8584_v15, %v11351_v44  ;;  %8042 = vmatpush3.msra.mxu1 %v8753_v39  ;;  %8597 = vrcp.f32 %v4107_v5 }
0x1503   :  { %v4105_v61 = vpop.xlane.xlu0 %4104  ;;  %8043 = vmatprep.subr.mxu1 %v8754_v25  ;;  %v8586_v22 = vpop.eup %8585 }
0x1504   :  { %8599 = vrcp.f32 %v4105_v61  ;;  %8019 = vmatprep.mubr.f32.mxu1 %v4132_v47  ;;  %8044 = vmatpush3.msra.mxu1 %v8754_v25  ;;  %v4135_v2 = vmul.f32 %v8586_v22, %v11355_v12 }
0x1505   :  { %v8588_v32 = vpop.eup %8587  ;;  %v4111_v53 = vpop.xlane.xlu1 %4110  ;;  %8020 = vmatmul.mubr.f32.gmra.mxu1 %v4133_v40 }
0x1506   :  { %v4134_v3 = vmul.f32 %v8588_v32, %v11359_v19  ;;  %8601 = vrcp.f32 %v4111_v53 }
0x1507   :  { %v4109_v44 = vpop.xlane.xlu0 %4108  ;;  %v8590_v50 = vpop.eup %8589 }
0x1508   :  { %8603 = vrcp.f32 %v4109_v44  ;;  %8022 = vmatprep.mubr.f32.mxu1 %v4134_v3  ;;  %v4137_v35 = vmul.f32 %v8590_v50, %v11362_v20 }
0x1509   :  { %v8592_v28 = vpop.eup %8591  ;;  %8023 = vmatmul.mubr.f32.gmra.mxu1 %v4135_v2 }
0x150a   :  { %v4136_v41 = vmul.f32 %v8592_v28, %v11365_v30 }
0x150b   :  { %v8594_v7 = vpop.eup %8593 }
0x150c   :  { %8025 = vmatprep.mubr.f32.mxu1 %v4136_v41  ;;  %v4139_v19 = vmul.f32 %v8594_v7, %v11368_v10 }
0x150d   :  { %v8596_v63 = vpop.eup %8595  ;;  %8026 = vmatmul.mubr.f32.gmra.mxu1 %v4137_v35 }
0x150e   :  { %v4138_v26 = vmul.f32 %v8596_v63, %v11371_v60 }
0x150f   :  { %v8598_v51 = vpop.eup %8597 }
0x1510   :  { %8028 = vmatprep.mubr.f32.mxu1 %v4138_v26  ;;  %v4141_v36 = vmul.f32 %v8598_v51, %v11374_v38 }
0x1511   :  { %v8600_v12 = vpop.eup %8599  ;;  %8029 = vmatmul.mubr.f32.gmra.mxu1 %v4139_v19 }
0x1512   :  { %v4140_v16 = vmul.f32 %v8600_v12, %v11377_v11 }
0x1513   :  { %v8602_v14 = vpop.eup %8601 }
0x1514   :  { %8031 = vmatprep.mubr.f32.mxu1 %v4140_v16  ;;  %v4143_v4 = vmul.f32 %v8602_v14, %v11380_v18  ;;  %v11417_v18 = vld [vmem:[%s12314_s9 + $0x8] sm:$0xff] }
0x1515   :  { %v8604_v30 = vpop.eup %8603  ;;  %8032 = vmatmul.mubr.f32.gmra.mxu1 %v4141_v36 }
0x1516   :  { %v4142_v20 = vmul.f32 %v8604_v30, %v11383_v49  ;;  %v4304_v49 = vrot.slane %v11417_v18, %v348_v45 }
0x1518   :  { %8034 = vmatprep.mubr.f32.mxu1 %v4142_v20 }
0x1519   :  { %8035 = vmatmul.mubr.f32.gmra.mxu1 %v4143_v4 }
0x15bd   :  { %v8015_v60 = vpop.f32.mrf.mxu1 }
0x15bf   :  { %v4210_v10 = vpop.f32.mrf.mxu1 }
0x15c1   :  { %v8018_v13 = vpop.f32.mrf.mxu1 }
0x15c3   :  { %v4220_v27 = vpop.f32.mrf.mxu1 }
0x15c5   :  { %v8021_v62 = vpop.f32.mrf.mxu1 }
0x15c6   :  { %v4290_v37 = vadd.f32 %v8021_v62, %v8015_v60  ;;  %v6269_v62 = vld [vmem:[%s12310_s5 + $0x678] sm:$0xff] }
0x15c7   :  { %v4230_v0 = vpop.f32.mrf.mxu1  ;;  %8051 = vmatprep.subr.mxu0 %v6269_v62 }
0x15c8   :  { %v4289_v57 = vadd.f32 %v4230_v0, %v4210_v10  ;;  %v11472_v0 = vld [vmem:[%s12310_s5 + $0x6f8] sm:$0xff]  ;;  %8052 = vmatpush3.msra.mxu0 %v6269_v62  ;;  %v6256_v62 = vld [vmem:[%s12310_s5 + $0x610] sm:$0xff] }
0x15c9   :  { %v8024_v6 = vpop.f32.mrf.mxu1  ;;  %8107 = vmatprep.subr.mxu1 %v11472_v0 }
0x15ca   :  { %v4292_v31 = vadd.f32 %v8024_v6, %v8018_v13  ;;  %v6268_v6 = vld [vmem:[%s12310_s5 + $0x670] sm:$0xff] }
0x15cb   :  { %v4240_v11 = vpop.f32.mrf.mxu1  ;;  %8053 = vmatprep.subr.mxu0 %v6268_v6 }
0x15cc   :  { %v4291_v46 = vadd.f32 %v4240_v11, %v4220_v27  ;;  %v6267_v11 = vld [vmem:[%s12310_s5 + $0x668] sm:$0xff]  ;;  %8054 = vmatpush3.msra.mxu0 %v6268_v6 }
0x15cd   :  { %v8027_v59 = vpop.f32.mrf.mxu1  ;;  %8055 = vmatprep.subr.mxu0 %v6267_v11  ;;  %v6255_v6 = vld [vmem:[%s12310_s5 + $0x608] sm:$0xff] }
0x15ce   :  { %v4294_v56 = vadd.f32 %v8027_v59, %v4290_v37  ;;  %v6266_v59 = vld [vmem:[%s12310_s5 + $0x660] sm:$0xff]  ;;  %8056 = vmatpush3.msra.mxu0 %v6267_v11  ;;  %v6263_v37 = vld [vmem:[%s12310_s5 + $0x648] sm:$0xff] }
0x15cf   :  { %v4250_v38 = vpop.f32.mrf.mxu1  ;;  %8057 = vmatprep.subr.mxu0 %v6266_v59  ;;  %v6271_v11 = vld [vmem:[%s12310_s5 + $0x688] sm:$0xff] }
0x15d0   :  { %v4293_v43 = vadd.f32 %v4289_v57, %v4250_v38  ;;  %v6265_v38 = vld [vmem:[%s12310_s5 + $0x658] sm:$0xff]  ;;  %8058 = vmatpush3.msra.mxu0 %v6266_v59  ;;  %v6254_v59 = vld [vmem:[%s12310_s5 + $0x600] sm:$0xff] }
0x15d1   :  { %v8030_v17 = vpop.f32.mrf.mxu1  ;;  %8059 = vmatprep.subr.mxu0 %v6265_v38  ;;  %v6261_v57 = vld [vmem:[%s12310_s5 + $0x638] sm:$0xff] }
0x15d2   :  { %v4296_v24 = vadd.f32 %v8030_v17, %v4292_v31  ;;  %v6264_v17 = vld [vmem:[%s12310_s5 + $0x650] sm:$0xff]  ;;  %8060 = vmatpush3.msra.mxu0 %v6265_v38  ;;  %v6257_v31 = vld [vmem:[%s12310_s5 + $0x618] sm:$0xff]  ;;  %v6270_v38 = vld [vmem:[%s12310_s5 + $0x680] sm:$0xff] }
0x15d3   :  { %v4260_v23 = vpop.f32.mrf.mxu1  ;;  %8061 = vmatprep.subr.mxu0 %v6264_v17 }
0x15d4   :  { %v4295_v47 = vadd.f32 %v4291_v46, %v4260_v23  ;;  %8062 = vmatpush3.msra.mxu0 %v6264_v17  ;;  %v6262_v23 = vld [vmem:[%s12310_s5 + $0x640] sm:$0xff]  ;;  %v6333_v17 = vld [vmem:[%s12311_s6 + $0x1f8] sm:$0xff] }
0x15d5   :  { %v8033_v9 = vpop.f32.mrf.mxu1  ;;  %8063 = vmatprep.subr.mxu0 %v6263_v37 }
0x15d6   :  { %v4298_v33 = vadd.f32 %v8033_v9, %v4294_v56  ;;  %8064 = vmatpush3.msra.mxu0 %v6263_v37  ;;  %v6260_v56 = vld [vmem:[%s12310_s5 + $0x630] sm:$0xff]  ;;  %v6258_v9 = vld [vmem:[%s12310_s5 + $0x620] sm:$0xff] }
0x15d7   :  { %v4270_v54 = vpop.f32.mrf.mxu1  ;;  %8065 = vmatprep.subr.mxu0 %v6262_v23 }
0x15d8   :  { %v4306_v15 = vadd.f32 %v4304_v49, %v4298_v33  ;;  %v4297_v5 = vadd.f32 %v4293_v43, %v4270_v54  ;;  %8066 = vmatpush3.msra.mxu0 %v6262_v23 }
0x15d9   :  { %v8036_v39 = vpop.f32.mrf.mxu1  ;;  %8067 = vmatprep.subr.mxu0 %v6261_v57 }
0x15da   :  { %v11423_v61 = vadd.f32 %v4306_v15, %v10660_v42  ;;  %v4305_v40 = vadd.f32 %v4304_v49, %v4297_v5  ;;  %v4300_v25 = vadd.f32 %v8036_v39, %v4296_v24  ;;  %8068 = vmatpush3.msra.mxu0 %v6261_v57  ;;  %v8756_v57 = vld [vmem:[%s12309_s4] sm:$0xff] }
0x15db   :  { %v4280_v22 = vpop.f32.mrf.mxu1  ;;  %8069 = vmatprep.subr.mxu0 %v6260_v56 }
0x15dc   :  { %v11426_v32 = vadd.f32 %v4305_v40, %v10663_v29  ;;  %v4308_v45 = vadd.f32 %v4304_v49, %v4300_v25  ;;  %v4299_v53 = vadd.f32 %v4295_v47, %v4280_v22  ;;  %v4401_v3 = vsel %vm292_vm1, %v11423_v61, 0.0  ;;  %8070 = vmatpush3.msra.mxu0 %v6260_v56 }
0x15dd   :  { %4402 = vadd.xlane.f32.xlu1 %v4401_v3  ;;  %v4461_v3 = vrot.slane %v11417_v18, %v1455_v58 }
0x15de   :  { %v11431_v44 = vadd.f32 %v4308_v45, %v10670_v55  ;;  %v4307_v2 = vadd.f32 %v4304_v49, %v4299_v53  ;;  %v4398_v42 = vsel %vm292_vm1, %v11426_v32, 0.0  ;;  %v6259_v49 = vld [vmem:[%s12310_s5 + $0x628] sm:$0xff]  ;;  %v4453_v45 = vrot.slane %v11417_v18, %v356_v48  ;;  %v6284_v18 = vld [vmem:[%s12310_s5 + $0x6f0] sm:$0xff] }
0x15df   :  { %4399 = vadd.xlane.f32.xlu0 %v4398_v42  ;;  %8071 = vmatprep.subr.mxu0 %v6259_v49 }
0x15e0   :  { %v11436_v50 = vadd.f32 %v4307_v2, %v10673_v52  ;;  %v4407_v29 = vsel %vm292_vm1, %v11431_v44, 0.0  ;;  %8072 = vmatpush3.msra.mxu0 %v6259_v49  ;;  %v8757_v49 = vld [vmem:[%s12309_s4 + $0x8] sm:$0xff] }
0x15e1   :  { %4408 = vadd.xlane.f32.xlu1 %v4407_v29  ;;  %8073 = vmatprep.subr.mxu0 %v6258_v9 }
0x15e2   :  { %v4404_v28 = vsel %vm292_vm1, %v11436_v50, 0.0  ;;  %8074 = vmatpush3.msra.mxu0 %v6258_v9 }
0x15e3   :  { %4405 = vadd.xlane.f32.xlu0 %v4404_v28  ;;  %8075 = vmatprep.subr.mxu0 %v6257_v31 }
0x15e4   :  { %8076 = vmatpush3.msra.mxu0 %v6257_v31 }
0x15e5   :  { %8077 = vmatprep.subr.mxu0 %v6256_v62 }
0x15e6   :  { %8078 = vmatpush3.msra.mxu0 %v6256_v62  ;;  %v6319_v62 = vld [vmem:[%s12311_s6 + $0x188] sm:$0xff] }
0x15e7   :  { %8079 = vmatprep.subr.mxu0 %v6255_v6 }
0x15e8   :  { %8080 = vmatpush3.msra.mxu0 %v6255_v6 }
0x15e9   :  { %8081 = vmatprep.subr.mxu0 %v6254_v59 }
0x15ea   :  { %8082 = vmatpush3.msra.mxu0 %v6254_v59 }
0x15eb   :  { %8163 = vmatprep.subr.mxu0 %v6333_v17 }
0x1666   :  { %v4403_v41 = vpop.xlane.xlu1 %4402 }
0x1667   :  { %v4411_v35 = vmul.f32 0.03125, %v4403_v41 }
0x1668   :  { %v4400_v55 = vpop.xlane.xlu0 %4399 }
0x1669   :  { %v11443_v7 = vsub.f32 %v11423_v61, %v4411_v35  ;;  %v4410_v63 = vmul.f32 0.03125, %v4400_v55 }
0x166a   :  { %v4409_v26 = vpop.xlane.xlu1 %4408 }
0x166b   :  { %v11446_v19 = vsub.f32 %v11426_v32, %v4410_v63  ;;  %v4413_v52 = vmul.f32 0.03125, %v4409_v26  ;;  %v4419_v51 = vmul.f32 %v11443_v7, %v11443_v7 }
0x166c   :  { %v4406_v12 = vpop.xlane.xlu0 %4405 }
0x166d   :  { %v11451_v16 = vsub.f32 %v11431_v44, %v4413_v52  ;;  %v4412_v36 = vmul.f32 0.03125, %v4406_v12  ;;  %v4425_v14 = vsel %vm292_vm1, %v4419_v51, 0.0  ;;  %v4418_v30 = vmul.f32 %v11446_v19, %v11446_v19 }
0x166e   :  { %4426 = vadd.xlane.f32.xlu1 %v4425_v14  ;;  %v6280_v14 = vld [vmem:[%s12310_s5 + $0x6d0] sm:$0xff] }
0x166f   :  { %v11457_v20 = vsub.f32 %v11436_v50, %v4412_v36  ;;  %v4422_v4 = vsel %vm292_vm1, %v4418_v30, 0.0  ;;  %v4421_v60 = vmul.f32 %v11451_v16, %v11451_v16  ;;  %v6281_v36 = vld [vmem:[%s12310_s5 + $0x6d8] sm:$0xff]  ;;  %v6279_v30 = vld [vmem:[%s12310_s5 + $0x6c8] sm:$0xff] }
0x1670   :  { %4423 = vadd.xlane.f32.xlu0 %v4422_v4  ;;  %v6277_v4 = vld [vmem:[%s12310_s5 + $0x6b8] sm:$0xff] }
0x1671   :  { %v4431_v10 = vsel %vm292_vm1, %v4421_v60, 0.0  ;;  %v4420_v13 = vmul.f32 %v11457_v20, %v11457_v20  ;;  %v6276_v60 = vld [vmem:[%s12310_s5 + $0x6b0] sm:$0xff] }
0x1672   :  { %4432 = vadd.xlane.f32.xlu1 %v4431_v10  ;;  %v6275_v10 = vld [vmem:[%s12310_s5 + $0x6a8] sm:$0xff] }
0x1673   :  { %v4428_v27 = vsel %vm292_vm1, %v4420_v13, 0.0  ;;  %v6274_v13 = vld [vmem:[%s12310_s5 + $0x6a0] sm:$0xff] }
0x1674   :  { %4429 = vadd.xlane.f32.xlu0 %v4428_v27  ;;  %v6273_v27 = vld [vmem:[%s12310_s5 + $0x698] sm:$0xff] }
0x16f7   :  { %v4427_v43 = vpop.xlane.xlu1 %4426 }
0x16f8   :  { %v4435_v33 = vmul.f32 0.03125, %v4427_v43  ;;  %v6332_v43 = vld [vmem:[%s12311_s6 + $0x1f0] sm:$0xff] }
0x16f9   :  { %v4424_v54 = vpop.xlane.xlu0 %4423 }
0x16fa   :  { %v4439_v46 = vadd.f32 1e-05, %v4435_v33  ;;  %v4434_v24 = vmul.f32 0.03125, %v4424_v54  ;;  %v8758_v54 = vld [vmem:[%s12309_s4 + $0x10] sm:$0xff] }
0x16fb   :  { %v4433_v15 = vpop.xlane.xlu1 %4432 }
0x16fc   :  { %8605 = vrsqrt.f32 %v4439_v46  ;;  %v4438_v5 = vadd.f32 1e-05, %v4434_v24  ;;  %v4437_v39 = vmul.f32 0.03125, %v4433_v15  ;;  %v8759_v24 = vld [vmem:[%s12309_s4 + $0x18] sm:$0xff] }
0x16fd   :  { %v4430_v47 = vpop.xlane.xlu0 %4429 }
0x16fe   :  { %8607 = vrsqrt.f32 %v4438_v5  ;;  %v4441_v40 = vadd.f32 1e-05, %v4437_v39  ;;  %v4436_v25 = vmul.f32 0.03125, %v4430_v47  ;;  %v6331_v5 = vld [vmem:[%s12311_s6 + $0x1e8] sm:$0xff]  ;;  %v8760_v39 = vld [vmem:[%s12309_s4 + $0x20] sm:$0xff] }
0x1700   :  { %8609 = vrsqrt.f32 %v4441_v40  ;;  %v4440_v22 = vadd.f32 1e-05, %v4436_v25  ;;  %v6330_v40 = vld [vmem:[%s12311_s6 + $0x1e0] sm:$0xff]  ;;  %v8761_v25 = vld [vmem:[%s12309_s4 + $0x28] sm:$0xff] }
0x1702   :  { %8611 = vrsqrt.f32 %v4440_v22 }
0x1709   :  { %v8606_v53 = vpop.eup %8605 }
0x170a   :  { %v4447_v2 = vmul.f32 %v8606_v53, %v11443_v7  ;;  %v8762_v53 = vld [vmem:[%s12309_s4 + $0x30] sm:$0xff] }
0x170b   :  { %v8608_v42 = vpop.eup %8607 }
0x170c   :  { %v4455_v29 = vmul.f32 %v4453_v45, %v4447_v2  ;;  %v4446_v28 = vmul.f32 %v8608_v42, %v11446_v19  ;;  %v6283_v19 = vld [vmem:[%s12310_s5 + $0x6e8] sm:$0xff]  ;;  %v6328_v2 = vld [vmem:[%s12311_s6 + $0x1d0] sm:$0xff]  ;;  %v8763_v42 = vld [vmem:[%s12309_s4 + $0x38] sm:$0xff] }
0x170d   :  { %v8610_v41 = vpop.eup %8609 }
0x170e   :  { %v4463_v35 = vadd.f32 %v4461_v3, %v4455_v29  ;;  %v4449_v55 = vmul.f32 %v8610_v41, %v11451_v16  ;;  %v4454_v63 = vmul.f32 %v4453_v45, %v4446_v28  ;;  %v6282_v16 = vld [vmem:[%s12310_s5 + $0x6e0] sm:$0xff]  ;;  %v6327_v28 = vld [vmem:[%s12311_s6 + $0x1c8] sm:$0xff] }
0x170f   :  { %v8612_v26 = vpop.eup %8611  ;;  %v8764_v41 = vld [vmem:[%s12309_s4 + $0x40] sm:$0xff] }
0x1710   :  { %v4462_v52 = vadd.f32 %v4461_v3, %v4454_v63  ;;  %v4448_v48 = vmul.f32 %v8612_v26, %v11457_v20  ;;  %v4457_v51 = vmul.f32 %v4453_v45, %v4449_v55  ;;  %v6278_v20 = vld [vmem:[%s12310_s5 + $0x6c0] sm:$0xff]  ;;  %v8765_v63 = vld [vmem:[%s12309_s4 + $0x48] sm:$0xff] }
0x1711   :  { %v6326_v55 = vld [vmem:[%s12311_s6 + $0x1c0] sm:$0xff] }
0x1712   :  { %8045 = vmatprep.mubr.msk.f32.mxu1 %vm292_vm1, %v4462_v52  ;;  %v4456_v12 = vmul.f32 %v4453_v45, %v4448_v48  ;;  %v4465_v58 = vadd.f32 %v4461_v3, %v4457_v51  ;;  %v6329_v45 = vld [vmem:[%s12311_s6 + $0x1d8] sm:$0xff]  ;;  %v8766_v48 = vld [vmem:[%s12309_s4 + $0x50] sm:$0xff] }
0x1713   :  { %8046 = vmatmul.mubr.msk.f32.vlgmr.msra.gmra.mxu1 %vm292_vm1, %v4463_v35  ;;  %v6325_v52 = vld [vmem:[%s12311_s6 + $0x1b8] sm:$0xff] }
0x1714   :  { %v4464_v7 = vadd.f32 %v4461_v3, %v4456_v12  ;;  %8108 = vmatpush3.msra.mxu1 %v11472_v0  ;;  %v6272_v0 = vld [vmem:[%s12310_s5 + $0x690] sm:$0xff] }
0x1715   :  { %8109 = vmatprep.subr.mxu1 %v6284_v18  ;;  %v6324_v12 = vld [vmem:[%s12311_s6 + $0x1b0] sm:$0xff] }
0x1716   :  { %8048 = vmatprep.mubr.msk.f32.mxu1 %vm292_vm1, %v4464_v7  ;;  %8110 = vmatpush3.msra.mxu1 %v6284_v18  ;;  %v6323_v7 = vld [vmem:[%s12311_s6 + $0x1a8] sm:$0xff] }
0x1717   :  { %8049 = vmatmul.mubr.msk.f32.gmra.mxu1 %vm292_vm1, %v4465_v58  ;;  %8111 = vmatprep.subr.mxu1 %v6283_v19  ;;  %v8767_v58 = vld [vmem:[%s12309_s4 + $0x58] sm:$0xff] }
0x1718   :  { %8112 = vmatpush3.msra.mxu1 %v6283_v19  ;;  %v8768_v19 = vld [vmem:[%s12309_s4 + $0x60] sm:$0xff] }
0x1719   :  { %8113 = vmatprep.subr.mxu1 %v6282_v16 }
0x171a   :  { %8114 = vmatpush3.msra.mxu1 %v6282_v16 }
0x171b   :  { %8115 = vmatprep.subr.mxu1 %v6281_v36 }
0x171c   :  { %8116 = vmatpush3.msra.mxu1 %v6281_v36  ;;  %v6322_v36 = vld [vmem:[%s12311_s6 + $0x1a0] sm:$0xff] }
0x171d   :  { %8117 = vmatprep.subr.mxu1 %v6280_v14 }
0x171e   :  { %8118 = vmatpush3.msra.mxu1 %v6280_v14  ;;  %v8769_v14 = vld [vmem:[%s12309_s4 + $0x68] sm:$0xff] }
0x171f   :  { %8119 = vmatprep.subr.mxu1 %v6279_v30 }
0x1720   :  { %8120 = vmatpush3.msra.mxu1 %v6279_v30 }
0x1721   :  { %8121 = vmatprep.subr.mxu1 %v6278_v20 }
0x1722   :  { %8122 = vmatpush3.msra.mxu1 %v6278_v20  ;;  %v6321_v20 = vld [vmem:[%s12311_s6 + $0x198] sm:$0xff] }
0x1723   :  { %8123 = vmatprep.subr.mxu1 %v6277_v4 }
0x1724   :  { %8124 = vmatpush3.msra.mxu1 %v6277_v4  ;;  %v8770_v4 = vld [vmem:[%s12309_s4 + $0x70] sm:$0xff] }
0x1725   :  { %8125 = vmatprep.subr.mxu1 %v6276_v60 }
0x1726   :  { %8126 = vmatpush3.msra.mxu1 %v6276_v60 }
0x1727   :  { %8127 = vmatprep.subr.mxu1 %v6275_v10 }
0x1728   :  { %8128 = vmatpush3.msra.mxu1 %v6275_v10  ;;  %v6320_v10 = vld [vmem:[%s12311_s6 + $0x190] sm:$0xff] }
0x1729   :  { %8129 = vmatprep.subr.mxu1 %v6274_v13 }
0x172a   :  { %8130 = vmatpush3.msra.mxu1 %v6274_v13  ;;  %v8771_v13 = vld [vmem:[%s12309_s4 + $0x78] sm:$0xff] }
0x172b   :  { %8131 = vmatprep.subr.mxu1 %v6273_v27 }
0x172c   :  { %8132 = vmatpush3.msra.mxu1 %v6273_v27 }
0x172d   :  { %8133 = vmatprep.subr.mxu1 %v6272_v0 }
0x172e   :  { %8134 = vmatpush3.msra.mxu1 %v6272_v0  ;;  %v6318_v0 = vld [vmem:[%s12311_s6 + $0x180] sm:$0xff] }
0x172f   :  { %8135 = vmatprep.subr.mxu1 %v6271_v11 }
0x1730   :  { %8136 = vmatpush3.msra.mxu1 %v6271_v11  ;;  %v6286_v11 = vld [vmem:[%s12310_s5 + $0x700] sm:$0xff] }
0x1731   :  { %8137 = vmatprep.subr.mxu1 %v6270_v38 }
0x1732   :  { %8138 = vmatpush3.msra.mxu1 %v6270_v38 }
0x17d3   :  { %v11583_v37 = vpop.f32.mrf.mxu1 }
0x17d4   :  { %v11597_v9 = vmul.f32 %v8757_v49, %v11583_v37  ;;  %v11643_v22 = vmul.f32 %v8761_v25, %v11583_v37  ;;  %v11686_v26 = vmul.f32 %v8765_v63, %v11583_v37  ;;  %v4576_v30 = vmul.f32 %v8769_v14, %v11583_v37 }
0x17d5   :  { %v11585_v23 = vpop.f32.mrf.mxu1 }
0x17d6   :  { %v11591_v56 = vmul.f32 %v8756_v57, %v11585_v23  ;;  %v11631_v47 = vmul.f32 %v8760_v39, %v11585_v23  ;;  %v11675_v35 = vmul.f32 %v8764_v41, %v11585_v23  ;;  %v4575_v16 = vmul.f32 %v8768_v19, %v11585_v23 }
0x17d7   :  { %v11599_v31 = vpop.f32.mrf.mxu1 }
0x17d8   :  { %8083 = vmatprep.mubr.f32.mxu0 %v11591_v56  ;;  %8139 = vmatprep.mubr.f32.mxu1 %v11591_v56  ;;  %v11620_v15 = vmul.f32 %v8759_v24, %v11599_v31  ;;  %v11664_v29 = vmul.f32 %v8763_v42, %v11599_v31  ;;  %v4574_v18 = vmul.f32 %v8767_v58, %v11599_v31 }
0x17d9   :  { %v11606_v33 = vpop.f32.mrf.mxu1  ;;  %8084 = vmatmul.mubr.f32.vlgmr.msra.gmra.mxu0 %v11597_v9  ;;  %8140 = vmatmul.mubr.f32.vlgmr.msra.gmra.mxu1 %v11597_v9  ;;  %v4578_v27 = vmul.f32 %v8771_v13, %v11599_v31 }
0x17da   :  { %8164 = vmatpush3.msra.mxu0 %v6333_v17  ;;  %v11614_v46 = vmul.f32 %v8758_v54, %v11606_v33  ;;  %v11654_v3 = vmul.f32 %v8762_v53, %v11606_v33  ;;  %v4573_v51 = vmul.f32 %v8766_v48, %v11606_v33  ;;  %v4577_v60 = vmul.f32 %v8770_v4, %v11606_v33  ;;  %v6315_v48 = vld [vmem:[%s12310_s5 + $0x7e8] sm:$0xff]  ;;  %v6312_v4 = vld [vmem:[%s12310_s5 + $0x7d0] sm:$0xff] }
0x17db   :  { %8165 = vmatprep.subr.mxu0 %v6332_v43 }
0x17dc   :  { %8086 = vmatprep.mubr.f32.mxu0 %v11614_v46  ;;  %8142 = vmatprep.mubr.f32.mxu1 %v11614_v46 }
0x17dd   :  { %8166 = vmatpush3.msra.mxu0 %v6332_v43  ;;  %8143 = vmatmul.mubr.f32.gmra.mxu1 %v11620_v15 }
0x17de   :  { %8087 = vmatmul.mubr.f32.gmra.mxu0 %v11620_v15  ;;  %8167 = vmatprep.subr.mxu0 %v6331_v5 }
0x17df   :  { %8089 = vmatprep.mubr.f32.mxu0 %v11631_v47  ;;  %8145 = vmatprep.mubr.f32.mxu1 %v11631_v47 }
0x17e0   :  { %8168 = vmatpush3.msra.mxu0 %v6331_v5 }
0x17e1   :  { %8169 = vmatprep.subr.mxu0 %v6330_v40  ;;  %8146 = vmatmul.mubr.f32.gmra.mxu1 %v11643_v22 }
0x17e2   :  { %8170 = vmatpush3.msra.mxu0 %v6330_v40  ;;  %8148 = vmatprep.mubr.f32.mxu1 %v11654_v3 }
0x17e3   :  { %8090 = vmatmul.mubr.f32.gmra.mxu0 %v11643_v22  ;;  %8171 = vmatprep.subr.mxu0 %v6329_v45 }
0x17e4   :  { %8092 = vmatprep.mubr.f32.mxu0 %v11654_v3  ;;  %8172 = vmatpush3.msra.mxu0 %v6329_v45 }
0x17e5   :  { %8173 = vmatprep.subr.mxu0 %v6328_v2  ;;  %8149 = vmatmul.mubr.f32.gmra.mxu1 %v11664_v29 }
0x17e6   :  { %8174 = vmatpush3.msra.mxu0 %v6328_v2  ;;  %8151 = vmatprep.mubr.f32.mxu1 %v11675_v35 }
0x17e7   :  { %8093 = vmatmul.mubr.f32.gmra.mxu0 %v11664_v29  ;;  %8175 = vmatprep.subr.mxu0 %v6327_v28 }
0x17e8   :  { %8095 = vmatprep.mubr.f32.mxu0 %v11675_v35  ;;  %8176 = vmatpush3.msra.mxu0 %v6327_v28 }
0x17e9   :  { %8177 = vmatprep.subr.mxu0 %v6326_v55  ;;  %8152 = vmatmul.mubr.f32.gmra.mxu1 %v11686_v26 }
0x17ea   :  { %8178 = vmatpush3.msra.mxu0 %v6326_v55  ;;  %8154 = vmatprep.mubr.f32.mxu1 %v4573_v51 }
0x17eb   :  { %8096 = vmatmul.mubr.f32.gmra.mxu0 %v11686_v26  ;;  %8179 = vmatprep.subr.mxu0 %v6325_v52 }
0x17ec   :  { %8098 = vmatprep.mubr.f32.mxu0 %v4573_v51  ;;  %8180 = vmatpush3.msra.mxu0 %v6325_v52 }
0x17ed   :  { %8181 = vmatprep.subr.mxu0 %v6324_v12  ;;  %8155 = vmatmul.mubr.f32.gmra.mxu1 %v4574_v18 }
0x17ee   :  { %8182 = vmatpush3.msra.mxu0 %v6324_v12  ;;  %8157 = vmatprep.mubr.f32.mxu1 %v4575_v16 }
0x17ef   :  { %8099 = vmatmul.mubr.f32.gmra.mxu0 %v4574_v18  ;;  %8183 = vmatprep.subr.mxu0 %v6323_v7 }
0x17f0   :  { %8101 = vmatprep.mubr.f32.mxu0 %v4575_v16  ;;  %8184 = vmatpush3.msra.mxu0 %v6323_v7 }
0x17f1   :  { %8185 = vmatprep.subr.mxu0 %v6322_v36  ;;  %8158 = vmatmul.mubr.f32.gmra.mxu1 %v4576_v30 }
0x17f2   :  { %8186 = vmatpush3.msra.mxu0 %v6322_v36  ;;  %8160 = vmatprep.mubr.f32.mxu1 %v4577_v60  ;;  %v6313_v36 = vld [vmem:[%s12310_s5 + $0x7d8] sm:$0xff] }
0x17f3   :  { %8102 = vmatmul.mubr.f32.gmra.mxu0 %v4576_v30  ;;  %8187 = vmatprep.subr.mxu0 %v6321_v20 }
0x17f4   :  { %8104 = vmatprep.mubr.f32.mxu0 %v4577_v60  ;;  %8188 = vmatpush3.msra.mxu0 %v6321_v20 }
0x17f5   :  { %8189 = vmatprep.subr.mxu0 %v6320_v10  ;;  %8161 = vmatmul.mubr.f32.gmra.mxu1 %v4578_v27 }
0x17f6   :  { %8190 = vmatpush3.msra.mxu0 %v6320_v10 }
0x17f7   :  { %8105 = vmatmul.mubr.f32.gmra.mxu0 %v4578_v27  ;;  %8191 = vmatprep.subr.mxu0 %v6319_v62 }
0x17f8   :  { %8192 = vmatpush3.msra.mxu0 %v6319_v62  ;;  %8195 = vmatprep.mubr.f32.mxu0 %v11591_v56 }
0x17f9   :  { %8193 = vmatprep.subr.mxu0 %v6318_v0 }
0x17fa   :  { %8194 = vmatpush3.msra.mxu0 %v6318_v0 }
0x17fb   :  { %8196 = vmatmul.mubr.f32.vlgmr.msra.gmra.mxu0 %v11597_v9 }
0x17fc   :  { %8198 = vmatprep.mubr.f32.mxu0 %v11614_v46 }
0x17ff   :  { %8199 = vmatmul.mubr.f32.gmra.mxu0 %v11620_v15 }
0x1800   :  { %8201 = vmatprep.mubr.f32.mxu0 %v11631_v47 }
0x1803   :  { %8202 = vmatmul.mubr.f32.gmra.mxu0 %v11643_v22 }
0x1804   :  { %8204 = vmatprep.mubr.f32.mxu0 %v11654_v3 }
0x1807   :  { %8205 = vmatmul.mubr.f32.gmra.mxu0 %v11664_v29  ;;  %v6317_v29 = vld [vmem:[%s12310_s5 + $0x7f8] sm:$0xff] }
0x1808   :  { %8207 = vmatprep.mubr.f32.mxu0 %v11675_v35  ;;  %v6316_v35 = vld [vmem:[%s12310_s5 + $0x7f0] sm:$0xff] }
0x180b   :  { %8208 = vmatmul.mubr.f32.gmra.mxu0 %v11686_v26 }
0x180c   :  { %8210 = vmatprep.mubr.f32.mxu0 %v4573_v51 }
0x180f   :  { %8211 = vmatmul.mubr.f32.gmra.mxu0 %v4574_v18  ;;  %v6314_v18 = vld [vmem:[%s12310_s5 + $0x7e0] sm:$0xff] }
0x1810   :  { %8213 = vmatprep.mubr.f32.mxu0 %v4575_v16 }
0x1813   :  { %8214 = vmatmul.mubr.f32.gmra.mxu0 %v4576_v30 }
0x1814   :  { %8216 = vmatprep.mubr.f32.mxu0 %v4577_v60 }
0x1817   :  { %8217 = vmatmul.mubr.f32.gmra.mxu0 %v4578_v27  ;;  %v6311_v27 = vld [vmem:[%s12310_s5 + $0x7c8] sm:$0xff] }
0x1899   :  { %v11750_v6 = vpop.f32.mrf.mxu0  ;;  %v11755_v59 = vpop.f32.mrf.mxu1 }
0x189b   :  { %v4645_v38 = vpop.f32.mrf.mxu0  ;;  %v11757_v37 = vpop.f32.mrf.mxu1 }
0x189c   :  { %v4646_v17 = vadd.f32 %v6286_v11, %v4645_v38  ;;  %v6310_v38 = vld [vmem:[%s12310_s5 + $0x7c0] sm:$0xff] }
0x189d   :  { %v11761_v57 = vpop.f32.mrf.mxu1 }
0x189e   :  { %v11759_v23 = vpop.f32.mrf.mxu0  ;;  %8251 = vmatprep.mubr.msk.f32.mxu1 %vm910_vm2, %v4646_v17 }
0x189f   :  { %v11766_v49 = vpop.f32.mrf.mxu1 }
0x18a0   :  { %v11764_v56 = vpop.f32.mrf.mxu0 }
0x18a1   :  { %v11768_v9 = vpop.f32.mrf.mxu1 }
0x18a3   :  { %v11770_v31 = vpop.f32.mrf.mxu0  ;;  %v11772_v43 = vpop.f32.mrf.mxu1 }
0x18a5   :  { %v11774_v33 = vpop.f32.mrf.mxu0  ;;  %v11776_v54 = vpop.f32.mrf.mxu1 }
0x18a7   :  { %v11778_v46 = vpop.f32.mrf.mxu0  ;;  %v11780_v24 = vpop.f32.mrf.mxu1 }
0x18a9   :  { %v11782_v15 = vpop.f32.mrf.mxu0  ;;  %v8153_v5 = vpop.f32.mrf.mxu1 }
0x18aa   :  { %v4836_v11 = vadd.f32 %v8153_v5, %v6311_v27 }
0x18ab   :  { %v11784_v39 = vpop.f32.mrf.mxu0  ;;  %v4830_v47 = vpop.f32.mrf.mxu1 }
0x18ad   :  { %v11786_v40 = vpop.f32.mrf.mxu0  ;;  %v8156_v25 = vpop.f32.mrf.mxu1 }
0x18ae   :  { %v4846_v20 = vadd.f32 %v8156_v25, %v6313_v36 }
0x18af   :  { %v11788_v22 = vpop.f32.mrf.mxu0  ;;  %v4840_v45 = vpop.f32.mrf.mxu1 }
0x18b0   :  { %v4841_v13 = vadd.f32 %v6312_v4, %v4840_v45  ;;  %v4831_v45 = vadd.f32 %v6310_v38, %v4830_v47 }
0x18b1   :  { %v11790_v53 = vpop.f32.mrf.mxu0  ;;  %v8159_v3 = vpop.f32.mrf.mxu1 }
0x18b2   :  { %v4856_v58 = vadd.f32 %v8159_v3, %v6315_v48  ;;  %v6309_v3 = vld [vmem:[%s12310_s5 + $0x7b8] sm:$0xff] }
0x18b3   :  { %v11792_v2 = vpop.f32.mrf.mxu0  ;;  %v4850_v42 = vpop.f32.mrf.mxu1 }
0x18b4   :  { %v4851_v16 = vadd.f32 %v6314_v18, %v4850_v42  ;;  %v6304_v18 = vld [vmem:[%s12310_s5 + $0x790] sm:$0xff] }
0x18b5   :  { %v11797_v28 = vpop.f32.mrf.mxu0  ;;  %v8162_v41 = vpop.f32.mrf.mxu1 }
0x18b6   :  { %v4866_v55 = vadd.f32 %v8162_v41, %v6317_v29  ;;  %v4826_v29 = vadd.f32 %v11776_v54, %v6309_v3  ;;  %v6308_v41 = vld [vmem:[%s12310_s5 + $0x7b0] sm:$0xff] }
0x18b7   :  { %v11802_v63 = vpop.f32.mrf.mxu0  ;;  %v4860_v26 = vpop.f32.mrf.mxu1 }
0x18b8   :  { %v4861_v52 = vadd.f32 %v6316_v35, %v4860_v26  ;;  %8219 = vmatprep.subr.msk.mxu1 %vm910_vm2, %v4866_v55  ;;  %v6307_v26 = vld [vmem:[%s12310_s5 + $0x7a8] sm:$0xff] }
0x18b9   :  { %v11808_v51 = vpop.f32.mrf.mxu0  ;;  %8220 = vmatpush3.xpose.msk.msra.mxu1 %vm910_vm2, %v4866_v55  ;;  %v4821_v55 = vadd.f32 %v6308_v41, %v11780_v24  ;;  %v4816_v54 = vadd.f32 %v11768_v9, %v6307_v26  ;;  %v6306_v24 = vld [vmem:[%s12310_s5 + $0x7a0] sm:$0xff]  ;;  %v8776_v26 = vld [vmem:[%s12307_s2 + $0xa8] sm:$0xff] }
0x18ba   :  { %8221 = vmatprep.subr.msk.mxu1 %vm910_vm2, %v4861_v52  ;;  %v4811_v48 = vadd.f32 %v6306_v24, %v11772_v43  ;;  %v4801_v43 = vadd.f32 %v6304_v18, %v11766_v49  ;;  %v6302_v49 = vld [vmem:[%s12310_s5 + $0x780] sm:$0xff] }
0x18bb   :  { %v11812_v12 = vpop.f32.mrf.mxu0  ;;  %v4791_v36 = vadd.f32 %v6302_v49, %v11757_v37  ;;  %v6288_v37 = vld [vmem:[%s12310_s5 + $0x710] sm:$0xff]  ;;  %v8777_v24 = vld [vmem:[%s12307_s2 + $0xa0] sm:$0xff] }
0x18bd   :  { %v11817_v7 = vpop.f32.mrf.mxu0  ;;  %8222 = vmatpush3.xpose.msk.msra.mxu1 %vm910_vm2, %v4861_v52 }
0x18be   :  { %8223 = vmatprep.subr.msk.mxu1 %vm910_vm2, %v4856_v58 }
0x18bf   :  { %v11821_v19 = vpop.f32.mrf.mxu0 }
0x18c1   :  { %v11826_v14 = vpop.f32.mrf.mxu0  ;;  %8224 = vmatpush3.xpose.msk.msra.mxu1 %vm910_vm2, %v4856_v58  ;;  %v6305_v58 = vld [vmem:[%s12310_s5 + $0x798] sm:$0xff] }
0x18c2   :  { %8225 = vmatprep.subr.msk.mxu1 %vm910_vm2, %v4851_v16  ;;  %v4806_v9 = vadd.f32 %v11761_v57, %v6305_v58 }
0x18c3   :  { %v11830_v30 = vpop.f32.mrf.mxu0 }
0x18c5   :  { %v11835_v60 = vpop.f32.mrf.mxu0  ;;  %8226 = vmatpush3.xpose.msk.msra.mxu1 %vm910_vm2, %v4851_v16  ;;  %v6303_v16 = vld [vmem:[%s12310_s5 + $0x788] sm:$0xff] }
0x18c6   :  { %8227 = vmatprep.subr.msk.mxu1 %vm910_vm2, %v4846_v20  ;;  %v4796_v57 = vadd.f32 %v11755_v59, %v6303_v16  ;;  %v6287_v59 = vld [vmem:[%s12310_s5 + $0x708] sm:$0xff]  ;;  %v8779_v16 = vld [vmem:[%s12307_s2 + $0xb0] sm:$0xff] }
0x18c7   :  { %v8206_v10 = vpop.f32.mrf.mxu0 }
0x18c9   :  { %v4965_v62 = vpop.f32.mrf.mxu0  ;;  %8228 = vmatpush3.xpose.msk.msra.mxu1 %vm910_vm2, %v4846_v20  ;;  %v6290_v20 = vld [vmem:[%s12310_s5 + $0x720] sm:$0xff] }
0x18ca   :  { %8229 = vmatprep.subr.msk.mxu1 %vm910_vm2, %v4841_v13  ;;  %v4666_v4 = vadd.f32 %v6290_v20, %v11774_v33  ;;  %v6294_v33 = vld [vmem:[%s12310_s5 + $0x740] sm:$0xff]  ;;  %v8782_v20 = vld [vmem:[%s12307_s2 + $0xd8] sm:$0xff] }
0x18cb   :  { %v8209_v0 = vpop.f32.mrf.mxu0 }
0x18cd   :  { %v4975_v17 = vpop.f32.mrf.mxu0  ;;  %8230 = vmatpush3.xpose.msk.msra.mxu1 %vm910_vm2, %v4841_v13  ;;  %v4686_v13 = vadd.f32 %v6294_v33, %v11786_v40  ;;  %v6298_v40 = vld [vmem:[%s12310_s5 + $0x760] sm:$0xff] }
0x18ce   :  { %8231 = vmatprep.subr.msk.mxu1 %vm910_vm2, %v4836_v11 }
0x18cf   :  { %v8212_v25 = vpop.f32.mrf.mxu0 }
0x18d1   :  { %v4985_v42 = vpop.f32.mrf.mxu0  ;;  %8232 = vmatpush3.xpose.msk.msra.mxu1 %vm910_vm2, %v4836_v11  ;;  %v4706_v11 = vadd.f32 %v6298_v40, %v11797_v28 }
0x18d2   :  { %8233 = vmatprep.subr.msk.mxu1 %vm910_vm2, %v4831_v45 }
0x18d3   :  { %v8215_v5 = vpop.f32.mrf.mxu0 }
0x18d5   :  { %v4995_v35 = vpop.f32.mrf.mxu0  ;;  %8234 = vmatpush3.xpose.msk.msra.mxu1 %vm910_vm2, %v4831_v45  ;;  %v8772_v45 = vld [vmem:[%s12307_s2 + $0x88] sm:$0xff] }
0x18d6   :  { %8235 = vmatprep.subr.msk.mxu1 %vm910_vm2, %v4826_v29 }
0x18d7   :  { %v8218_v47 = vpop.f32.mrf.mxu0 }
0x18d8   :  { %8275 = vmatprep.subr.mxu0 %v8218_v47 }
0x18d9   :  { %v5005_v52 = vpop.f32.mrf.mxu0  ;;  %8276 = vmatpush3.msra.mxu0 %v8218_v47  ;;  %8236 = vmatpush3.xpose.msk.msra.mxu1 %vm910_vm2, %v4826_v29 }
0x18da   :  { %8277 = vmatprep.subr.mxu0 %v5005_v52  ;;  %8237 = vmatprep.subr.msk.mxu1 %vm910_vm2, %v4821_v55 }
0x18db   :  { %8278 = vmatpush3.msra.mxu0 %v5005_v52 }
0x18dc   :  { %8279 = vmatprep.subr.mxu0 %v8215_v5 }
0x18dd   :  { %8280 = vmatpush3.msra.mxu0 %v8215_v5  ;;  %8238 = vmatpush3.xpose.msk.msra.mxu1 %vm910_vm2, %v4821_v55 }
0x18de   :  { %8281 = vmatprep.subr.mxu0 %v4995_v35  ;;  %8239 = vmatprep.subr.msk.mxu1 %vm910_vm2, %v4816_v54 }
0x18df   :  { %8282 = vmatpush3.msra.mxu0 %v4995_v35  ;;  %v8775_v35 = vld [vmem:[%s12307_s2 + $0x90] sm:$0xff] }
0x18e0   :  { %8283 = vmatprep.subr.mxu0 %v8212_v25 }
0x18e1   :  { %8284 = vmatpush3.msra.mxu0 %v8212_v25  ;;  %8240 = vmatpush3.xpose.msk.msra.mxu1 %vm910_vm2, %v4816_v54 }
0x18e2   :  { %8285 = vmatprep.subr.mxu0 %v4985_v42  ;;  %8241 = vmatprep.subr.msk.mxu1 %vm910_vm2, %v4811_v48 }
0x18e3   :  { %8286 = vmatpush3.msra.mxu0 %v4985_v42 }
0x18e4   :  { %8287 = vmatprep.subr.mxu0 %v8209_v0 }
0x18e5   :  { %8288 = vmatpush3.msra.mxu0 %v8209_v0  ;;  %8242 = vmatpush3.xpose.msk.msra.mxu1 %vm910_vm2, %v4811_v48 }
0x18e6   :  { %8289 = vmatprep.subr.mxu0 %v4975_v17  ;;  %8243 = vmatprep.subr.msk.mxu1 %vm910_vm2, %v4806_v9 }
0x18e7   :  { %8290 = vmatpush3.msra.mxu0 %v4975_v17 }
0x18e8   :  { %8291 = vmatprep.subr.mxu0 %v8206_v10 }
0x18e9   :  { %8292 = vmatpush3.msra.mxu0 %v8206_v10  ;;  %8244 = vmatpush3.xpose.msk.msra.mxu1 %vm910_vm2, %v4806_v9  ;;  %v8778_v9 = vld [vmem:[%s12307_s2 + $0xb8] sm:$0xff] }
0x18ea   :  { %8293 = vmatprep.subr.mxu0 %v4965_v62  ;;  %8245 = vmatprep.subr.msk.mxu1 %vm910_vm2, %v4801_v43 }
0x18eb   :  { %8294 = vmatpush3.msra.mxu0 %v4965_v62 }
0x18ec   :  { %8295 = vmatprep.subr.mxu0 %v11830_v30 }
0x18ed   :  { %8296 = vmatpush3.msra.mxu0 %v11830_v30  ;;  %8246 = vmatpush3.xpose.msk.msra.mxu1 %vm910_vm2, %v4801_v43  ;;  %v6289_v30 = vld [vmem:[%s12310_s5 + $0x718] sm:$0xff] }
0x18ee   :  { %8297 = vmatprep.subr.mxu0 %v11835_v60  ;;  %8247 = vmatprep.subr.msk.mxu1 %vm910_vm2, %v4796_v57 }
0x18ef   :  { %8298 = vmatpush3.msra.mxu0 %v11835_v60 }
0x18f0   :  { %8299 = vmatprep.subr.mxu0 %v11821_v19 }
0x18f1   :  { %8300 = vmatpush3.msra.mxu0 %v11821_v19  ;;  %8248 = vmatpush3.xpose.msk.msra.mxu1 %vm910_vm2, %v4796_v57  ;;  %v4651_v19 = vadd.f32 %v11750_v6, %v6287_v59  ;;  %v4661_v6 = vadd.f32 %v11759_v23, %v6289_v30  ;;  %v6293_v23 = vld [vmem:[%s12310_s5 + $0x738] sm:$0xff] }
0x18f2   :  { %8301 = vmatprep.subr.mxu0 %v11826_v14  ;;  %8249 = vmatprep.subr.msk.mxu1 %vm910_vm2, %v4791_v36  ;;  %v4681_v10 = vadd.f32 %v11778_v46, %v6293_v23  ;;  %v6297_v46 = vld [vmem:[%s12310_s5 + $0x758] sm:$0xff]  ;;  %v8784_v23 = vld [vmem:[%s12307_s2 + $0xe8] sm:$0xff] }
0x18f3   :  { %8302 = vmatpush3.msra.mxu0 %v11826_v14  ;;  %v4656_v14 = vadd.f32 %v6288_v37, %v11764_v56  ;;  %v6292_v56 = vld [vmem:[%s12310_s5 + $0x730] sm:$0xff]  ;;  %v4701_v0 = vadd.f32 %v11788_v22, %v6297_v46  ;;  %v6301_v22 = vld [vmem:[%s12310_s5 + $0x778] sm:$0xff] }
0x18f4   :  { %8303 = vmatprep.subr.mxu0 %v11812_v12  ;;  %v4676_v60 = vadd.f32 %v6292_v56, %v11782_v15  ;;  %v6296_v15 = vld [vmem:[%s12310_s5 + $0x750] sm:$0xff]  ;;  %v4721_v28 = vadd.f32 %v11802_v63, %v6301_v22  ;;  %v8774_v63 = vld [vmem:[%s12307_s2 + $0x98] sm:$0xff] }
0x18f5   :  { %8304 = vmatpush3.msra.mxu0 %v11812_v12  ;;  %8250 = vmatpush3.xpose.msk.msra.mxu1 %vm910_vm2, %v4791_v36  ;;  %v6291_v12 = vld [vmem:[%s12310_s5 + $0x728] sm:$0xff]  ;;  %v4696_v62 = vadd.f32 %v6296_v15, %v11790_v53  ;;  %v6300_v53 = vld [vmem:[%s12310_s5 + $0x770] sm:$0xff]  ;;  %v8786_v15 = vld [vmem:[%s12307_s2 + $0xf8] sm:$0xff] }
0x18f6   :  { %8305 = vmatprep.subr.mxu0 %v11817_v7  ;;  %v4716_v17 = vadd.f32 %v6300_v53, %v11808_v51  ;;  %v8773_v51 = vld [vmem:[%s12307_s2 + $0x80] sm:$0xff]  ;;  %v8780_v36 = vld [vmem:[%s12307_s2 + $0xc8] sm:$0xff] }
0x18f7   :  { %8306 = vmatpush3.msra.mxu0 %v11817_v7  ;;  %v4671_v7 = vadd.f32 %v11770_v31, %v6291_v12  ;;  %v6295_v31 = vld [vmem:[%s12310_s5 + $0x748] sm:$0xff] }
0x18f8   :  { %8252 = vmatmul.mubr.msk.f32.vlgmr.msra.gmra.mxu1 %vm910_vm2, %v4651_v19  ;;  %v4691_v27 = vadd.f32 %v11784_v39, %v6295_v31  ;;  %v6299_v39 = vld [vmem:[%s12310_s5 + $0x768] sm:$0xff]  ;;  %v8781_v19 = vld [vmem:[%s12307_s2 + $0xc0] sm:$0xff] }
0x18f9   :  { %8254 = vmatprep.mubr.msk.f32.mxu1 %vm910_vm2, %v4656_v14  ;;  %v4711_v38 = vadd.f32 %v11792_v2, %v6299_v39 }
0x18fc   :  { %8255 = vmatmul.mubr.msk.f32.gmra.mxu1 %vm910_vm2, %v4661_v6 }
0x18fd   :  { %8257 = vmatprep.mubr.msk.f32.mxu1 %vm910_vm2, %v4666_v4  ;;  %v8783_v4 = vld [vmem:[%s12307_s2 + $0xd0] sm:$0xff] }
0x1900   :  { %8258 = vmatmul.mubr.msk.f32.gmra.mxu1 %vm910_vm2, %v4671_v7 }
0x1901   :  { %8260 = vmatprep.mubr.msk.f32.mxu1 %vm910_vm2, %v4676_v60 }
0x1904   :  { %8261 = vmatmul.mubr.msk.f32.gmra.mxu1 %vm910_vm2, %v4681_v10  ;;  %v8785_v10 = vld [vmem:[%s12307_s2 + $0xe0] sm:$0xff] }
0x1905   :  { %8263 = vmatprep.mubr.msk.f32.mxu1 %vm910_vm2, %v4686_v13 }
0x1908   :  { %8264 = vmatmul.mubr.msk.f32.gmra.mxu1 %vm910_vm2, %v4691_v27 }
0x1909   :  { %8266 = vmatprep.mubr.msk.f32.mxu1 %vm910_vm2, %v4696_v62  ;;  %v8787_v62 = vld [vmem:[%s12307_s2 + $0xf0] sm:$0xff] }
0x190c   :  { %8267 = vmatmul.mubr.msk.f32.gmra.mxu1 %vm910_vm2, %v4701_v0 }
0x190d   :  { %8269 = vmatprep.mubr.msk.f32.mxu1 %vm910_vm2, %v4706_v11 }
0x1910   :  { %8270 = vmatmul.mubr.msk.f32.gmra.mxu1 %vm910_vm2, %v4711_v38 }
0x1911   :  { %8272 = vmatprep.mubr.msk.f32.mxu1 %vm910_vm2, %v4716_v17 }
0x1914   :  { %8273 = vmatmul.mubr.msk.f32.gmra.mxu1 %vm910_vm2, %v4721_v28 }
0x19b8   :  { %v8253_v25 = vpop.f32.mrf.mxu1 }
0x19b9   :  { %v11990_v2 = vadd.f32 %v8772_v45, %v8253_v25 }
0x19ba   :  { %v5176_v3 = vpop.f32.mrf.mxu1 }
0x19bb   :  { %v11995_v42 = vadd.f32 %v8773_v51, %v5176_v3  ;;  %5257 = vmax.xlane.f32.xlu1 %v11990_v2 }
0x19bc   :  { %v8256_v5 = vpop.f32.mrf.mxu1 }
0x19bd   :  { %v12001_v29 = vadd.f32 %v8774_v63, %v8256_v5  ;;  %5255 = vmax.xlane.f32.xlu0 %v11995_v42 }
0x19be   :  { %v5186_v41 = vpop.f32.mrf.mxu1 }
0x19bf   :  { %v12007_v47 = vadd.f32 %v8775_v35, %v5186_v41  ;;  %5261 = vmax.xlane.f32.xlu1 %v12001_v29 }
0x19c0   :  { %v8259_v55 = vpop.f32.mrf.mxu1 }
0x19c1   :  { %v12013_v52 = vadd.f32 %v8776_v26, %v8259_v55  ;;  %5259 = vmax.xlane.f32.xlu0 %v12007_v47 }
0x19c2   :  { %v5196_v54 = vpop.f32.mrf.mxu1 }
0x19c3   :  { %v12019_v48 = vadd.f32 %v8777_v24, %v5196_v54  ;;  %5265 = vmax.xlane.f32.xlu1 %v12013_v52 }
0x19c4   :  { %v8262_v58 = vpop.f32.mrf.mxu1 }
0x19c5   :  { %v12025_v18 = vadd.f32 %v8778_v9, %v8262_v58  ;;  %5263 = vmax.xlane.f32.xlu0 %v12019_v48 }
0x19c6   :  { %v5206_v43 = vpop.f32.mrf.mxu1 }
0x19c7   :  { %v12031_v57 = vadd.f32 %v8779_v16, %v5206_v43  ;;  %5269 = vmax.xlane.f32.xlu1 %v12025_v18 }
0x19c8   :  { %v8265_v49 = vpop.f32.mrf.mxu1 }
0x19c9   :  { %v12037_v59 = vadd.f32 %v8780_v36, %v8265_v49  ;;  %5267 = vmax.xlane.f32.xlu0 %v12031_v57 }
0x19ca   :  { %v5216_v37 = vpop.f32.mrf.mxu1 }
0x19cb   :  { %v12043_v30 = vadd.f32 %v8781_v19, %v5216_v37  ;;  %5273 = vmax.xlane.f32.xlu1 %v12037_v59 }
0x19cc   :  { %v8268_v14 = vpop.f32.mrf.mxu1 }
0x19cd   :  { %v12049_v6 = vadd.f32 %v8782_v20, %v8268_v14  ;;  %5271 = vmax.xlane.f32.xlu0 %v12043_v30 }
0x19ce   :  { %v5226_v12 = vpop.f32.mrf.mxu1 }
0x19cf   :  { %v12055_v56 = vadd.f32 %v8783_v4, %v5226_v12  ;;  %5277 = vmax.xlane.f32.xlu1 %v12049_v6 }
0x19d0   :  { %v8271_v7 = vpop.f32.mrf.mxu1 }
0x19d1   :  { %v12061_v60 = vadd.f32 %v8784_v23, %v8271_v7  ;;  %5275 = vmax.xlane.f32.xlu0 %v12055_v56 }
0x19d2   :  { %v5236_v33 = vpop.f32.mrf.mxu1 }
0x19d3   :  { %v12067_v31 = vadd.f32 %v8785_v10, %v5236_v33  ;;  %5281 = vmax.xlane.f32.xlu1 %v12061_v60 }
0x19d4   :  { %v8274_v13 = vpop.f32.mrf.mxu1 }
0x19d5   :  { %v12073_v27 = vadd.f32 %v8786_v15, %v8274_v13  ;;  %5279 = vmax.xlane.f32.xlu0 %v12067_v31 }
0x19d6   :  { %v5246_v46 = vpop.f32.mrf.mxu1 }
0x19d7   :  { %v12079_v40 = vadd.f32 %v8787_v62, %v5246_v46  ;;  %5285 = vmax.xlane.f32.xlu1 %v12073_v27 }
0x19d9   :  { %5283 = vmax.xlane.f32.xlu0 %v12079_v40 }
0x1a44   :  { %v5258_v0 = vpop.xlane.xlu1 %5257 }
0x1a45   :  { %v5288_v39 = vsub.f32 %v11990_v2, %v5258_v0 }
0x1a46   :  { %v5256_v11 = vpop.xlane.xlu0 %5255 }
0x1a47   :  { %v5305_v53 = vmul.f32 1.442695, %v5288_v39  ;;  %v5287_v38 = vsub.f32 %v11995_v42, %v5256_v11 }
0x1a48   :  { %v5262_v22 = vpop.xlane.xlu1 %5261 }
0x1a49   :  { %8613 = vpow2.f32 %v5305_v53  ;;  %v5303_v17 = vmul.f32 1.442695, %v5287_v38  ;;  %v5290_v28 = vsub.f32 %v12001_v29, %v5262_v22 }
0x1a4a   :  { %v5260_v25 = vpop.xlane.xlu0 %5259 }
0x1a4b   :  { %8615 = vpow2.f32 %v5303_v17  ;;  %v5309_v45 = vmul.f32 1.442695, %v5290_v28  ;;  %v5289_v3 = vsub.f32 %v12007_v47, %v5260_v25 }
0x1a4c   :  { %v5266_v51 = vpop.xlane.xlu1 %5265 }
0x1a4d   :  { %8617 = vpow2.f32 %v5309_v45  ;;  %v5307_v5 = vmul.f32 1.442695, %v5289_v3  ;;  %v5292_v63 = vsub.f32 %v12013_v52, %v5266_v51 }
0x1a4e   :  { %v5264_v2 = vpop.xlane.xlu0 %5263 }
0x1a4f   :  { %8619 = vpow2.f32 %v5307_v5  ;;  %v5313_v41 = vmul.f32 1.442695, %v5292_v63  ;;  %v5291_v42 = vsub.f32 %v12019_v48, %v5264_v2 }
0x1a50   :  { %v5270_v35 = vpop.xlane.xlu1 %5269 }
0x1a51   :  { %8621 = vpow2.f32 %v5313_v41  ;;  %v5311_v55 = vmul.f32 1.442695, %v5291_v42  ;;  %v5294_v29 = vsub.f32 %v12025_v18, %v5270_v35 }
0x1a52   :  { %v5268_v26 = vpop.xlane.xlu0 %5267 }
0x1a53   :  { %8623 = vpow2.f32 %v5311_v55  ;;  %v5317_v54 = vmul.f32 1.442695, %v5294_v29  ;;  %v5293_v47 = vsub.f32 %v12031_v57, %v5268_v26 }
0x1a54   :  { %v5274_v24 = vpop.xlane.xlu1 %5273 }
0x1a55   :  { %8625 = vpow2.f32 %v5317_v54  ;;  %v5315_v58 = vmul.f32 1.442695, %v5293_v47  ;;  %v5296_v52 = vsub.f32 %v12037_v59, %v5274_v24 }
0x1a56   :  { %v12092_v9 = vpop.eup %8613  ;;  %v5272_v43 = vpop.xlane.xlu0 %5271 }
0x1a57   :  { %8627 = vpow2.f32 %v5315_v58  ;;  %v5321_v48 = vmul.f32 1.442695, %v5296_v52  ;;  %v5295_v16 = vsub.f32 %v12043_v30, %v5272_v43  ;;  %5337 = vadd.xlane.f32.xlu1 %v12092_v9 }
0x1a58   :  { %v12096_v18 = vpop.eup %8615  ;;  %v5278_v49 = vpop.xlane.xlu1 %5277 }
0x1a59   :  { %8629 = vpow2.f32 %v5321_v48  ;;  %v5319_v36 = vmul.f32 1.442695, %v5295_v16  ;;  %v5298_v57 = vsub.f32 %v12049_v6, %v5278_v49  ;;  %5335 = vadd.xlane.f32.xlu0 %v12096_v18 }
0x1a5a   :  { %v12100_v37 = vpop.eup %8617  ;;  %v5276_v59 = vpop.xlane.xlu0 %5275 }
0x1a5b   :  { %8631 = vpow2.f32 %v5319_v36  ;;  %v5325_v19 = vmul.f32 1.442695, %v5298_v57  ;;  %v5297_v14 = vsub.f32 %v12055_v56, %v5276_v59  ;;  %5341 = vadd.xlane.f32.xlu1 %v12100_v37 }
0x1a5c   :  { %v12104_v30 = vpop.eup %8619  ;;  %v5282_v20 = vpop.xlane.xlu1 %5281 }
0x1a5d   :  { %8633 = vpow2.f32 %v5325_v19  ;;  %v5323_v12 = vmul.f32 1.442695, %v5297_v14  ;;  %v5300_v4 = vsub.f32 %v12061_v60, %v5282_v20  ;;  %5339 = vadd.xlane.f32.xlu0 %v12104_v30 }
0x1a5e   :  { %v12108_v6 = vpop.eup %8621  ;;  %v5280_v7 = vpop.xlane.xlu0 %5279 }
0x1a5f   :  { %8635 = vpow2.f32 %v5323_v12  ;;  %v5329_v23 = vmul.f32 1.442695, %v5300_v4  ;;  %v5299_v33 = vsub.f32 %v12067_v31, %v5280_v7  ;;  %5345 = vadd.xlane.f32.xlu1 %v12108_v6 }
0x1a60   :  { %v12112_v56 = vpop.eup %8623  ;;  %v5286_v10 = vpop.xlane.xlu1 %5285 }
0x1a61   :  { %8637 = vpow2.f32 %v5329_v23  ;;  %v5327_v13 = vmul.f32 1.442695, %v5299_v33  ;;  %v5302_v15 = vsub.f32 %v12073_v27, %v5286_v10  ;;  %5343 = vadd.xlane.f32.xlu0 %v12112_v56 }
0x1a62   :  { %v12116_v60 = vpop.eup %8625  ;;  %v5284_v46 = vpop.xlane.xlu0 %5283 }
0x1a63   :  { %8639 = vpow2.f32 %v5327_v13  ;;  %v5333_v62 = vmul.f32 1.442695, %v5302_v15  ;;  %v5301_v0 = vsub.f32 %v12079_v40, %v5284_v46  ;;  %5349 = vadd.xlane.f32.xlu1 %v12116_v60 }
0x1a64   :  { %v12120_v31 = vpop.eup %8627 }
0x1a65   :  { %8641 = vpow2.f32 %v5333_v62  ;;  %v5331_v39 = vmul.f32 1.442695, %v5301_v0  ;;  %5347 = vadd.xlane.f32.xlu0 %v12120_v31 }
0x1a66   :  { %v12123_v11 = vpop.eup %8629 }
0x1a67   :  { %8643 = vpow2.f32 %v5331_v39  ;;  %5353 = vadd.xlane.f32.xlu1 %v12123_v11 }
0x1a68   :  { %v12126_v27 = vpop.eup %8631 }
0x1a69   :  { %5351 = vadd.xlane.f32.xlu0 %v12126_v27 }
0x1a6a   :  { %v12129_v53 = vpop.eup %8633 }
0x1a6b   :  { %5357 = vadd.xlane.f32.xlu1 %v12129_v53 }
0x1a6c   :  { %v12132_v40 = vpop.eup %8635 }
0x1a6d   :  { %5355 = vadd.xlane.f32.xlu0 %v12132_v40 }
0x1a6e   :  { %v12135_v38 = vpop.eup %8637 }
0x1a6f   :  { %5361 = vadd.xlane.f32.xlu1 %v12135_v38 }
0x1a70   :  { %v12138_v22 = vpop.eup %8639 }
0x1a71   :  { %5359 = vadd.xlane.f32.xlu0 %v12138_v22 }
0x1a72   :  { %v12141_v17 = vpop.eup %8641 }
0x1a73   :  { %5365 = vadd.xlane.f32.xlu1 %v12141_v17 }
0x1a74   :  { %v12144_v28 = vpop.eup %8643 }
0x1a75   :  { %5363 = vadd.xlane.f32.xlu0 %v12144_v28 }
0x1ae0   :  { %v5338_v25 = vpop.xlane.xlu1 %5337 }
0x1ae1   :  { %8645 = vrcp.f32 %v5338_v25 }
0x1ae2   :  { %v5336_v45 = vpop.xlane.xlu0 %5335 }
0x1ae3   :  { %8647 = vrcp.f32 %v5336_v45 }
0x1ae4   :  { %v5342_v3 = vpop.xlane.xlu1 %5341 }
0x1ae5   :  { %8649 = vrcp.f32 %v5342_v3 }
0x1ae6   :  { %v5340_v51 = vpop.xlane.xlu0 %5339 }
0x1ae7   :  { %8651 = vrcp.f32 %v5340_v51 }
0x1ae8   :  { %v5346_v5 = vpop.xlane.xlu1 %5345 }
0x1ae9   :  { %8653 = vrcp.f32 %v5346_v5 }
0x1aea   :  { %v5344_v63 = vpop.xlane.xlu0 %5343 }
0x1aeb   :  { %8655 = vrcp.f32 %v5344_v63 }
0x1aec   :  { %v5350_v2 = vpop.xlane.xlu1 %5349 }
0x1aed   :  { %8657 = vrcp.f32 %v5350_v2 }
0x1aee   :  { %v5348_v41 = vpop.xlane.xlu0 %5347  ;;  %v8646_v42 = vpop.eup %8645 }
0x1aef   :  { %8659 = vrcp.f32 %v5348_v41  ;;  %v5384_v26 = vmul.f32 %v8646_v42, %v12092_v9 }
0x1af0   :  { %v8648_v35 = vpop.eup %8647  ;;  %v5354_v55 = vpop.xlane.xlu1 %5353 }
0x1af1   :  { %v5383_v29 = vmul.f32 %v8648_v35, %v12096_v18  ;;  %8661 = vrcp.f32 %v5354_v55 }
0x1af2   :  { %v5352_v54 = vpop.xlane.xlu0 %5351  ;;  %v8650_v47 = vpop.eup %8649 }
0x1af3   :  { %8663 = vrcp.f32 %v5352_v54  ;;  %8307 = vmatprep.mubr.f32.mxu0 %v5383_v29  ;;  %v5386_v48 = vmul.f32 %v8650_v47, %v12100_v37 }
0x1af4   :  { %v8652_v24 = vpop.eup %8651  ;;  %v5358_v58 = vpop.xlane.xlu1 %5357  ;;  %8308 = vmatmul.mubr.f32.vlgmr.msra.gmra.mxu0 %v5384_v26 }
0x1af5   :  { %v5385_v52 = vmul.f32 %v8652_v24, %v12104_v30  ;;  %8665 = vrcp.f32 %v5358_v58 }
0x1af6   :  { %v5356_v43 = vpop.xlane.xlu0 %5355  ;;  %v8654_v16 = vpop.eup %8653 }
0x1af7   :  { %8667 = vrcp.f32 %v5356_v43  ;;  %8310 = vmatprep.mubr.f32.mxu0 %v5385_v52  ;;  %v5388_v57 = vmul.f32 %v8654_v16, %v12108_v6 }
0x1af8   :  { %v8656_v18 = vpop.eup %8655  ;;  %v5362_v49 = vpop.xlane.xlu1 %5361  ;;  %8311 = vmatmul.mubr.f32.gmra.mxu0 %v5386_v48 }
0x1af9   :  { %v5387_v9 = vmul.f32 %v8656_v18, %v12112_v56  ;;  %8669 = vrcp.f32 %v5362_v49 }
0x1afa   :  { %v5360_v36 = vpop.xlane.xlu0 %5359  ;;  %v8658_v59 = vpop.eup %8657 }
0x1afb   :  { %8671 = vrcp.f32 %v5360_v36  ;;  %8313 = vmatprep.mubr.f32.mxu0 %v5387_v9  ;;  %v5390_v20 = vmul.f32 %v8658_v59, %v12116_v60 }
0x1afc   :  { %v8660_v19 = vpop.eup %8659  ;;  %v5366_v14 = vpop.xlane.xlu1 %5365  ;;  %8314 = vmatmul.mubr.f32.gmra.mxu0 %v5388_v57 }
0x1afd   :  { %v5389_v37 = vmul.f32 %v8660_v19, %v12120_v31  ;;  %8673 = vrcp.f32 %v5366_v14 }
0x1afe   :  { %v5364_v30 = vpop.xlane.xlu0 %5363  ;;  %v8662_v12 = vpop.eup %8661 }
0x1aff   :  { %8675 = vrcp.f32 %v5364_v30  ;;  %8316 = vmatprep.mubr.f32.mxu0 %v5389_v37  ;;  %v5392_v6 = vmul.f32 %v8662_v12, %v12123_v11 }
0x1b00   :  { %v8664_v4 = vpop.eup %8663  ;;  %8317 = vmatmul.mubr.f32.gmra.mxu0 %v5390_v20  ;;  %v6376_v20 = vld [vmem:[%s12312_s7 + $0x80] sm:$0xff] }
0x1b01   :  { %v5391_v7 = vmul.f32 %v8664_v4, %v12126_v27 }
0x1b02   :  { %v8666_v23 = vpop.eup %8665 }
0x1b03   :  { %8319 = vmatprep.mubr.f32.mxu0 %v5391_v7  ;;  %v5394_v10 = vmul.f32 %v8666_v23, %v12129_v53 }
0x1b04   :  { %v8668_v33 = vpop.eup %8667  ;;  %8320 = vmatmul.mubr.f32.gmra.mxu0 %v5392_v6 }
0x1b05   :  { %v5393_v56 = vmul.f32 %v8668_v33, %v12132_v40 }
0x1b06   :  { %v8670_v13 = vpop.eup %8669 }
0x1b07   :  { %8322 = vmatprep.mubr.f32.mxu0 %v5393_v56  ;;  %v5396_v46 = vmul.f32 %v8670_v13, %v12135_v38 }
0x1b08   :  { %v8672_v15 = vpop.eup %8671  ;;  %8323 = vmatmul.mubr.f32.gmra.mxu0 %v5394_v10 }
0x1b09   :  { %v5395_v60 = vmul.f32 %v8672_v15, %v12138_v22 }
0x1b0a   :  { %v8674_v62 = vpop.eup %8673 }
0x1b0b   :  { %8325 = vmatprep.mubr.f32.mxu0 %v5395_v60  ;;  %v5398_v39 = vmul.f32 %v8674_v62, %v12141_v17  ;;  %v12167_v17 = vld [vmem:[%s12314_s9 + $0x8] sm:$0xff] }
0x1b0c   :  { %v8676_v0 = vpop.eup %8675  ;;  %8326 = vmatmul.mubr.f32.gmra.mxu0 %v5396_v46  ;;  %v5559_v42 = vrot.slane %v12167_v17, %v1621_v21 }
0x1b0d   :  { %v5397_v31 = vmul.f32 %v8676_v0, %v12144_v28 }
0x1b0f   :  { %8328 = vmatprep.mubr.f32.mxu0 %v5397_v31 }
0x1b10   :  { %8329 = vmatmul.mubr.f32.gmra.mxu0 %v5398_v39 }
0x1b11   :  { %5749 = vmatprep.mubr.f32.mxu0 %v8811_v1 }
0x1bb4   :  { %v8309_v11 = vpop.f32.mrf.mxu0 }
0x1bb6   :  { %v5465_v27 = vpop.f32.mrf.mxu0 }
0x1bb8   :  { %v8312_v53 = vpop.f32.mrf.mxu0 }
0x1bba   :  { %v5475_v40 = vpop.f32.mrf.mxu0 }
0x1bbc   :  { %v8315_v25 = vpop.f32.mrf.mxu0 }
0x1bbd   :  { %v5545_v63 = vadd.f32 %v8315_v25, %v8309_v11  ;;  %v6374_v25 = vld [vmem:[%s12312_s7 + $0x70] sm:$0xff] }
0x1bbe   :  { %v5485_v22 = vpop.f32.mrf.mxu0 }
0x1bbf   :  { %v5544_v28 = vadd.f32 %v5485_v22, %v5465_v27  ;;  %v6373_v22 = vld [vmem:[%s12312_s7 + $0x68] sm:$0xff] }
0x1bc0   :  { %v8318_v45 = vpop.f32.mrf.mxu0 }
0x1bc1   :  { %v5547_v55 = vadd.f32 %v8318_v45, %v8312_v53  ;;  %v6372_v45 = vld [vmem:[%s12312_s7 + $0x60] sm:$0xff] }
0x1bc2   :  { %v5495_v38 = vpop.f32.mrf.mxu0 }
0x1bc3   :  { %v5546_v47 = vadd.f32 %v5495_v38, %v5475_v40  ;;  %v6375_v40 = vld [vmem:[%s12312_s7 + $0x78] sm:$0xff] }
0x1bc4   :  { %v8321_v3 = vpop.f32.mrf.mxu0  ;;  %v6371_v38 = vld [vmem:[%s12312_s7 + $0x58] sm:$0xff] }
0x1bc5   :  { %v5549_v41 = vadd.f32 %v8321_v3, %v5545_v63  ;;  %v6370_v3 = vld [vmem:[%s12312_s7 + $0x50] sm:$0xff] }
0x1bc6   :  { %v5505_v51 = vpop.f32.mrf.mxu0 }
0x1bc7   :  { %v5548_v29 = vadd.f32 %v5544_v28, %v5505_v51  ;;  %v6395_v51 = vld [vmem:[%s12313_s8 + $0x100] sm:$0xff] }
0x1bc8   :  { %v8324_v5 = vpop.f32.mrf.mxu0  ;;  %8331 = vmatprep.subr.mxu1 %v6395_v51 }
0x1bc9   :  { %v5551_v24 = vadd.f32 %v8324_v5, %v5547_v55  ;;  %8332 = vmatpush3.msra.mxu1 %v6395_v51 }
0x1bca   :  { %v5515_v2 = vpop.f32.mrf.mxu0 }
0x1bcb   :  { %v5550_v48 = vadd.f32 %v5546_v47, %v5515_v2 }
0x1bcc   :  { %v8327_v35 = vpop.f32.mrf.mxu0 }
0x1bcd   :  { %v5553_v26 = vadd.f32 %v8327_v35, %v5549_v41 }
0x1bce   :  { %v5525_v54 = vpop.f32.mrf.mxu0 }
0x1bcf   :  { %v5561_v58 = vadd.f32 %v5559_v42, %v5553_v26  ;;  %v5552_v52 = vadd.f32 %v5548_v29, %v5525_v54 }
0x1bd0   :  { %v8330_v43 = vpop.f32.mrf.mxu0 }
0x1bd1   :  { %v12173_v16 = vadd.f32 %v5561_v58, %v11423_v61  ;;  %v5560_v18 = vadd.f32 %v5559_v42, %v5552_v52  ;;  %v5555_v49 = vadd.f32 %v8330_v43, %v5551_v24  ;;  %v5652_v43 = vrot.slane %v12167_v17, %v3197_v8 }
0x1bd2   :  { %v5535_v9 = vpop.f32.mrf.mxu0 }
0x1bd3   :  { %v12176_v36 = vadd.f32 %v5560_v18, %v11426_v32  ;;  %v5563_v21 = vadd.f32 %v5559_v42, %v5555_v49  ;;  %v5554_v57 = vadd.f32 %v5550_v48, %v5535_v9  ;;  %v5600_v59 = vsel %vm292_vm1, %v12173_v16, 0.0  ;;  %v6397_v9 = vld [vmem:[%s12314_s9 + $0x10] ss:$0 sm:$0xff] }
0x1bd4   :  { %5601 = vadd.xlane.f32.xlu1 %v5600_v59 }
0x1bd5   :  { %v12181_v19 = vadd.f32 %v5563_v21, %v11431_v44  ;;  %v5562_v14 = vadd.f32 %v5559_v42, %v5554_v57  ;;  %v5597_v61 = vsel %vm292_vm1, %v12176_v36, 0.0  ;;  %v6377_v44 = vld [vmem:[%s12312_s7 + $0x88] sm:$0xff] }
0x1bd6   :  { %5598 = vadd.xlane.f32.xlu0 %v5597_v61  ;;  %5709 = vmatprep.subr.mxu0 %v6377_v44  ;;  %v6394_v44 = vld [vmem:[%s12313_s8 + $0xf8] sm:$0xff] }
0x1bd7   :  { %v12186_v37 = vadd.f32 %v5562_v14, %v11436_v50  ;;  %v5606_v32 = vsel %vm292_vm1, %v12181_v19, 0.0  ;;  %5710 = vmatpush1.msra.mxu0 %v6376_v20  ;;  %8333 = vmatprep.subr.mxu1 %v6394_v44  ;;  %v6393_v20 = vld [vmem:[%s12313_s8 + $0xf0] sm:$0xff] }
0x1bd8   :  { %5607 = vadd.xlane.f32.xlu1 %v5606_v32  ;;  %5711 = vmatprep.subr.mxu0 %v6375_v40 }
0x1bd9   :  { %v5603_v30 = vsel %vm292_vm1, %v12186_v37, 0.0  ;;  %5712 = vmatpush1.msra.mxu0 %v6374_v25  ;;  %8334 = vmatpush3.msra.mxu1 %v6394_v44 }
0x1bda   :  { %5604 = vadd.xlane.f32.xlu0 %v5603_v30  ;;  %5713 = vmatprep.subr.mxu0 %v6373_v22 }
0x1bdb   :  { %5714 = vmatpush1.msra.mxu0 %v6372_v45  ;;  %8335 = vmatprep.subr.mxu1 %v6393_v20 }
0x1bdc   :  { %5715 = vmatprep.subr.mxu0 %v6371_v38  ;;  %8336 = vmatpush3.msra.mxu1 %v6393_v20 }
0x1bdd   :  { %5716 = vmatpush1.msra.mxu0 %v6370_v3 }
0x1c5d   :  { %v5602_v50 = vpop.xlane.xlu1 %5601 }
0x1c5e   :  { %v5610_v12 = vmul.f32 0.03125, %v5602_v50  ;;  %v6392_v50 = vld [vmem:[%s12313_s8 + $0xe8] sm:$0xff] }
0x1c5f   :  { %v5599_v4 = vpop.xlane.xlu0 %5598  ;;  %8337 = vmatprep.subr.mxu1 %v6392_v50 }
0x1c60   :  { %v5614_v7 = vsub.f32 %v12173_v16, %v5610_v12  ;;  %v5609_v6 = vmul.f32 0.03125, %v5599_v4  ;;  %8338 = vmatpush3.msra.mxu1 %v6392_v50  ;;  %v6390_v12 = vld [vmem:[%s12313_s8 + $0xd8] sm:$0xff]  ;;  %v6389_v4 = vld [vmem:[%s12313_s8 + $0xd0] sm:$0xff] }
0x1c61   :  { %v5608_v23 = vpop.xlane.xlu1 %5607 }
0x1c62   :  { %v5613_v33 = vsub.f32 %v12176_v36, %v5609_v6  ;;  %v5612_v56 = vmul.f32 0.03125, %v5608_v23  ;;  %v5618_v10 = vmul.f32 %v5614_v7, %v5614_v7  ;;  %v6387_v6 = vld [vmem:[%s12313_s8 + $0xc0] sm:$0xff]  ;;  %v6386_v23 = vld [vmem:[%s12313_s8 + $0xb8] sm:$0xff] }
0x1c63   :  { %v5605_v13 = vpop.xlane.xlu0 %5604 }
0x1c64   :  { %v5616_v15 = vsub.f32 %v12181_v19, %v5612_v56  ;;  %v5611_v60 = vmul.f32 0.03125, %v5605_v13  ;;  %v5624_v46 = vsel %vm292_vm1, %v5618_v10, 0.0  ;;  %v5617_v62 = vmul.f32 %v5613_v33, %v5613_v33  ;;  %v6384_v56 = vld [vmem:[%s12313_s8 + $0xa8] sm:$0xff]  ;;  %v6383_v10 = vld [vmem:[%s12313_s8 + $0xa0] sm:$0xff]  ;;  %v6382_v13 = vld [vmem:[%s12313_s8 + $0x98] sm:$0xff] }
0x1c65   :  { %5625 = vadd.xlane.f32.xlu1 %v5624_v46 }
0x1c66   :  { %v5615_v0 = vsub.f32 %v12186_v37, %v5611_v60  ;;  %v5621_v31 = vsel %vm292_vm1, %v5617_v62, 0.0  ;;  %v5620_v39 = vmul.f32 %v5616_v15, %v5616_v15  ;;  %v6380_v60 = vld [vmem:[%s12313_s8 + $0x88] sm:$0xff]  ;;  %v6399_v62 = vld [vmem:[%s12312_s7 + $0x98] ss:$0 sm:$0xff] }
0x1c67   :  { %5622 = vadd.xlane.f32.xlu0 %v5621_v31 }
0x1c68   :  { %v5630_v11 = vsel %vm292_vm1, %v5620_v39, 0.0  ;;  %v5619_v27 = vmul.f32 %v5615_v0, %v5615_v0 }
0x1c69   :  { %5631 = vadd.xlane.f32.xlu1 %v5630_v11 }
0x1c6a   :  { %v5627_v53 = vsel %vm292_vm1, %v5619_v27, 0.0 }
0x1c6b   :  { %5628 = vadd.xlane.f32.xlu0 %v5627_v53 }
0x1cee   :  { %v5626_v5 = vpop.xlane.xlu1 %5625 }
0x1cef   :  { %v5634_v63 = vmul.f32 0.03125, %v5626_v5 }
0x1cf0   :  { %v5623_v2 = vpop.xlane.xlu0 %5622 }
0x1cf1   :  { %v5638_v28 = vadd.f32 1e-05, %v5634_v63  ;;  %v5633_v41 = vmul.f32 0.03125, %v5623_v2 }
0x1cf2   :  { %v5632_v42 = vpop.xlane.xlu1 %5631 }
0x1cf3   :  { %8677 = vrsqrt.f32 %v5638_v28  ;;  %v5637_v35 = vadd.f32 1e-05, %v5633_v41  ;;  %v5636_v55 = vmul.f32 0.03125, %v5632_v42  ;;  %v6398_v28 = vld [vmem:[%s12312_s7 + $0x90] ss:$0 sm:$0xff] }
0x1cf4   :  { %v5629_v29 = vpop.xlane.xlu0 %5628 }
0x1cf5   :  { %8679 = vrsqrt.f32 %v5637_v35  ;;  %v5635_v26 = vmul.f32 0.03125, %v5629_v29  ;;  %v5640_v54 = vadd.f32 1e-05, %v5636_v55 }
0x1cf7   :  { %v5639_v47 = vadd.f32 1e-05, %v5635_v26 }
0x1cf9   :  { %8681 = vrsqrt.f32 %v5639_v47 }
0x1cfa   :  { %8683 = vrsqrt.f32 %v5640_v54 }
0x1d00   :  { %v8678_v24 = vpop.eup %8677 }
0x1d01   :  { %v5646_v52 = vmul.f32 %v8678_v24, %v5614_v7  ;;  %v6388_v7 = vld [vmem:[%s12313_s8 + $0xc8] sm:$0xff] }
0x1d02   :  { %v8680_v58 = vpop.eup %8679 }
0x1d03   :  { %v5645_v48 = vmul.f32 %v8680_v58, %v5613_v33  ;;  %v5654_v59 = vmul.f32 %v5652_v43, %v5646_v52  ;;  %v6385_v33 = vld [vmem:[%s12313_s8 + $0xb0] sm:$0xff] }
0x1d05   :  { %v5653_v18 = vmul.f32 %v5652_v43, %v5645_v48  ;;  %v5662_v32 = vadd.f32 %v6397_v9, %v5654_v59 }
0x1d06   :  { %v8682_v49 = vpop.eup %8681 }
0x1d07   :  { %v5661_v21 = vadd.f32 %v6397_v9, %v5653_v18  ;;  %v5647_v57 = vmul.f32 %v8682_v49, %v5615_v0  ;;  %v8684_v14 = vpop.eup %8683 }
0x1d08   :  { %v5648_v61 = vmul.f32 %v8684_v14, %v5616_v15  ;;  %v6381_v15 = vld [vmem:[%s12313_s8 + $0x90] sm:$0xff] }
0x1d09   :  { %6400 = vmatmul.mubr.msk.f32.vlgmr.msra.gmra.mxu0 %vm292_vm1, %v5661_v21  ;;  %v5655_v34 = vmul.f32 %v5652_v43, %v5647_v57 }
0x1d0a   :  { %5755 = vmatprep.mubr.f32.mxu0 %v8811_v1  ;;  %v5656_v17 = vmul.f32 %v5652_v43, %v5648_v61 }
0x1d0b   :  { %v5663_v8 = vadd.f32 %v6397_v9, %v5655_v34 }
0x1d0c   :  { %v5664_v30 = vadd.f32 %v6397_v9, %v5656_v17 }
0x1d0d   :  { %6401 = vmatmul.mubr.msk.f32.gmra.mxu0 %vm292_vm1, %v5662_v32 }
0x1d0e   :  { %5761 = vmatprep.mubr.f32.mxu0 %v8811_v1 }
0x1d11   :  { %6402 = vmatmul.mubr.msk.f32.gmra.mxu0 %vm292_vm1, %v5663_v8  ;;  %v6404_v8 = vld [vmem:[%s12313_s8 + $0x108] ss:$0 sm:$0xff] }
0x1d12   :  { %5767 = vmatprep.mubr.f32.mxu0 %v8811_v1  ;;  %v6391_v1 = vld [vmem:[%s12313_s8 + $0xe0] sm:$0xff]  ;;  %s8789_s8 = scalar_lea.vmem %s5901_s20, 512 }
0x1d13   :  { %8339 = vmatprep.subr.mxu1 %v6391_v1  ;;  %p8790_p0 = scmp.ne.s32.totalorder %s5901_s20, %s8789_s8  ;;  %p8795_p2 = scmp.lt.s32.totalorder %s8789_s8, %s8789_s8 }
0x1d14   :  { %8340 = vmatpush3.msra.mxu1 %v6391_v1 }
0x1d15   :  { %6403 = vmatmul.mubr.msk.f32.gmra.mxu0 %vm292_vm1, %v5664_v30  ;;  %8341 = vmatprep.subr.mxu1 %v6390_v12  ;;  %p8796_p3 = por %p8795_p2, %p8794_p1 }
0x1d16   :  { %8342 = vmatpush3.msra.mxu1 %v6390_v12 }
0x1d17   :  { %8343 = vmatprep.subr.mxu1 %v6389_v4  ;;  %p8797_p4 = pnand %p8796_p3, %p8790_p0 }
0x1d18   :  { %8344 = vmatpush3.msra.mxu1 %v6389_v4 }
0x1d19   :  { %8345 = vmatprep.subr.mxu1 %v6388_v7 }
0x1d1a   :  { %8346 = vmatpush3.msra.mxu1 %v6388_v7 }
0x1d1b   :  { %8347 = vmatprep.subr.mxu1 %v6387_v6 }
0x1d1c   :  { %8348 = vmatpush3.msra.mxu1 %v6387_v6 }
0x1d1d   :  { %8349 = vmatprep.subr.mxu1 %v6386_v23 }
0x1d1e   :  { %8350 = vmatpush3.msra.mxu1 %v6386_v23 }
0x1d1f   :  { %8351 = vmatprep.subr.mxu1 %v6385_v33 }
0x1d20   :  { %8352 = vmatpush3.msra.mxu1 %v6385_v33 }
0x1d21   :  { %8353 = vmatprep.subr.mxu1 %v6384_v56 }
0x1d22   :  { %8354 = vmatpush3.msra.mxu1 %v6384_v56 }
0x1d23   :  { %8355 = vmatprep.subr.mxu1 %v6383_v10 }
0x1d24   :  { %8356 = vmatpush3.msra.mxu1 %v6383_v10 }
0x1d25   :  { %8357 = vmatprep.subr.mxu1 %v6382_v13 }
0x1d26   :  { %8358 = vmatpush3.msra.mxu1 %v6382_v13 }
0x1d27   :  { %8359 = vmatprep.subr.mxu1 %v6381_v15 }
0x1d28   :  { %8360 = vmatpush3.msra.mxu1 %v6381_v15 }
0x1d29   :  { %8361 = vmatprep.subr.mxu1 %v6380_v60 }
0x1d2a   :  { %8362 = vmatpush3.msra.mxu1 %v6380_v60 }
0x1dc9   :  { %v5751_v46 = vpop.f32.mrf.mxu0 }
0x1dca   :  { %v5752_v35 = vadd.f32 %v6398_v28, %v5751_v46 }
0x1dcb   :  { %v5753_v0 = vpop.f32.mrf.mxu0 }
0x1dcc   :  { %v5754_v31 = vadd.f32 %v6399_v62, %v5753_v0 }
0x1dcd   :  { %v5757_v39 = vpop.f32.mrf.mxu0 }
0x1dce   :  { %v5778_v11 = vmul.f32 0.70710677, %v5754_v31  ;;  %v5774_v41 = vmul.f32 0.5, %v5754_v31  ;;  %v5758_v24 = vadd.f32 %v6398_v28, %v5757_v39 }
0x1dcf   :  { %v5759_v27 = vpop.f32.mrf.mxu0 }
0x1dd0   :  { %8685 = verf.f32 %v5778_v11  ;;  %v5760_v53 = vadd.f32 %v6399_v62, %v5759_v27 }
0x1dd1   :  { %v5763_v40 = vpop.f32.mrf.mxu0 }
0x1dd2   :  { %v5779_v25 = vmul.f32 0.70710677, %v5760_v53  ;;  %v5775_v26 = vmul.f32 0.5, %v5760_v53  ;;  %v5764_v49 = vadd.f32 %v6398_v28, %v5763_v40 }
0x1dd3   :  { %v5765_v22 = vpop.f32.mrf.mxu0 }
0x1dd4   :  { %8687 = verf.f32 %v5779_v25  ;;  %v5766_v45 = vadd.f32 %v6399_v62, %v5765_v22 }
0x1dd5   :  { %v5769_v38 = vpop.f32.mrf.mxu0 }
0x1dd6   :  { %v5780_v3 = vmul.f32 0.70710677, %v5766_v45  ;;  %v5776_v48 = vmul.f32 0.5, %v5766_v45  ;;  %v5770_v61 = vadd.f32 %v6398_v28, %v5769_v38 }
0x1dd7   :  { %v5771_v51 = vpop.f32.mrf.mxu0 }
0x1dd8   :  { %8689 = verf.f32 %v5780_v3  ;;  %v5772_v5 = vadd.f32 %v6399_v62, %v5771_v51 }
0x1dda   :  { %v5781_v63 = vmul.f32 0.70710677, %v5772_v5  ;;  %v5777_v57 = vmul.f32 0.5, %v5772_v5 }
0x1ddc   :  { %8691 = verf.f32 %v5781_v63 }
0x1ddd   :  { %v8686_v2 = vpop.eup %8685 }
0x1dde   :  { %v5786_v42 = vadd.f32 1.0, %v8686_v2 }
0x1de0   :  { %v5790_v55 = vmul.f32 %v5786_v42, %v5774_v41 }
0x1de1   :  { %v8688_v29 = vpop.eup %8687 }
0x1de2   :  { %v5787_v54 = vadd.f32 1.0, %v8688_v29  ;;  %v5794_v47 = vmul.f32 %v5790_v55, %v5752_v35 }
0x1de4   :  { %v5791_v58 = vmul.f32 %v5787_v54, %v5775_v26  ;;  %8363 = vmatprep.mubr.f32.mxu1 %v5794_v47 }
0x1de5   :  { %v8690_v52 = vpop.eup %8689 }
0x1de6   :  { %v5795_v43 = vmul.f32 %v5791_v58, %v5758_v24  ;;  %v5788_v18 = vadd.f32 1.0, %v8690_v52 }
0x1de8   :  { %v5792_v9 = vmul.f32 %v5788_v18, %v5776_v48  ;;  %8364 = vmatmul.mubr.f32.vlgmr.msra.gmra.mxu1 %v5795_v43 }
0x1de9   :  { %v8692_v21 = vpop.eup %8691 }
0x1dea   :  { %v5789_v59 = vadd.f32 1.0, %v8692_v21  ;;  %v5796_v14 = vmul.f32 %v5792_v9, %v5764_v49 }
0x1dec   :  { %v5793_v32 = vmul.f32 %v5789_v59, %v5777_v57  ;;  %8366 = vmatprep.mubr.f32.mxu1 %v5796_v14 }
0x1dee   :  { %v5797_v34 = vmul.f32 %v5793_v32, %v5770_v61 }
0x1df0   :  { %8367 = vmatmul.mubr.f32.gmra.mxu1 %v5797_v34 }
0x1ea8   :  { %v8365_v17 = vpop.f32.mrf.mxu1 }
0x1ea9   :  { %v5874_v30 = vadd.f32 %v8365_v17, %v6404_v8 }
0x1eaa   :  { %v5868_v44 = vpop.f32.mrf.mxu1 }
0x1eab   :  { %v5888_v20 = vadd.f32 %v5874_v30, %v12173_v16  ;;  %v5869_v50 = vadd.f32 %v6404_v8, %v5868_v44 }
0x1ead   :  { %5892 = vst.msk [vmem:[#allocation2 + $0x8] sm:$0xff] %vm292_vm1, %v5888_v20  ;;  %v5887_v1 = vadd.f32 %v5869_v50, %v12176_v36 }
0x1eaf   :  { %5891 = vst.msk [vmem:[#allocation2] sm:$0xff] %vm292_vm1, %v5887_v1 }
0x1eb0   :  { %v8368_v12 = vpop.f32.mrf.mxu1 }
0x1eb1   :  { %v5884_v4 = vadd.f32 %v8368_v12, %v6404_v8 }
0x1eb2   :  { %v5878_v7 = vpop.f32.mrf.mxu1 }
0x1eb3   :  { %v5890_v6 = vadd.f32 %v5884_v4, %v12181_v19  ;;  %v5879_v23 = vadd.f32 %v6404_v8, %v5878_v7 }
0x1eb5   :  { %5894 = vst.msk [vmem:[#allocation2 + $0x18] sm:$0xff] %vm292_vm1, %v5890_v6  ;;  %v5889_v33 = vadd.f32 %v5879_v23, %v12186_v37 }
0x1eb7   :  { %5893 = vst.msk [vmem:[#allocation2 + $0x10] sm:$0xff] %vm292_vm1, %v5889_v33 }
0x1eb8   :  { %8800 = shalt.err (!%p8797_p4)
}
0x1eb9   :  { %s8813_s21 = smov 128   ;;  %s8814_s22 = smov 8  }
0x1eba   :  { %5906 = dma.vmem_to_hbm [thread:$0]  %s5901_s20, 512, %s12315_s10, [#allocation3], %s8813_s21, %s8813_s21, %s8814_s22  }
0x1ebb   :  { %8809 = dma.done.wait [#allocation3], 512  }
0x1ebc   :  { %8810 = vsyncadd [#allocation3], 4294966784 }
0x1ebd   :  { %5910 = vsyncpa [#allocation3], 1 }

</bundles_post_ra>
